<compile_context>
chip_gen: v5e
topology: v5e:2x2
jax: 0.10.0
libtpu: 0.0.40
codegen_flags: <defaults>
</compile_context>

<pallas_src>
import functools

import jax
import jax.numpy as jnp
from jax.experimental import pallas as pl
from jax.experimental.pallas import tpu as pltpu

# Safe on v5e/v6e (128 MiB physical) and v7x (64 MiB physical), above the
# 32 MiB default scoped limit.
VMEM_LIMIT_BYTES = 48 * 1024 * 1024
MAX_TILE_M = 1024  # ~512-1024 rows per review; full-dim block when smaller.


def _pick_tile(m, cap=MAX_TILE_M):
    # Full-dim block when small (always legal); otherwise a multiple of 8.
    return m if m <= cap else cap


def _mosaic_params(n_grid_dims):
    return pltpu.CompilerParams(
        dimension_semantics=("parallel",) * n_grid_dims,
        vmem_limit_bytes=VMEM_LIMIT_BYTES,
    )


# ----------------------------------------------------------------------------
# Kernel 1: fused linear  (x @ W + b [+ add] [+ activation]), tiled over rows.
# Used for patch down-scale (256 -> Cctx, fused with + motion_embedding) and
# up-scale (Cch -> 3*16*16, fused sigmoid).
# ----------------------------------------------------------------------------
def _linear_kernel(x_ref, w_ref, b_ref, *rest, act, has_add):
    if has_add:
        add_ref, o_ref = rest
    else:
        (o_ref,) = rest
    x = x_ref[...].astype(jnp.bfloat16)          # bf16 MXU operands
    w = w_ref[...].astype(jnp.bfloat16)
    y = jnp.dot(x, w, preferred_element_type=jnp.float32)   # fp32 accumulate
    y = y + b_ref[...].astype(jnp.float32)
    if has_add:
        y = y + add_ref[...].astype(jnp.float32)             # fused epilogue add
    if act == "sigmoid":
        y = jax.nn.sigmoid(y)
    elif act == "gelu":
        y = jax.nn.gelu(y, approximate=True)
    o_ref[...] = y.astype(o_ref.dtype)


def linear_pallas(x, w, b, act="none", add=None):
    M, K = x.shape
    _, N = w.shape
    tm = _pick_tile(M)
    grid = (pl.cdiv(M, tm),)
    in_specs = [
        pl.BlockSpec((tm, K), lambda i: (i, 0)),
        pl.BlockSpec((K, N), lambda i: (0, 0)),   # weights stay resident
        pl.BlockSpec((1, N), lambda i: (0, 0)),
    ]
    args = [x, w, b]
    if add is not None:
        in_specs.append(pl.BlockSpec((tm, N), lambda i: (i, 0)))
        args.append(add)
    return pl.pallas_call(
        functools.partial(_linear_kernel, act=act, has_add=add is not None),
        out_shape=jax.ShapeDtypeStruct((M, N), x.dtype),
        grid=grid,
        in_specs=in_specs,
        out_specs=pl.BlockSpec((tm, N), lambda i: (i, 0)),
        compiler_params=_mosaic_params(1),
    )(*args)


# ----------------------------------------------------------------------------
# Kernel 2: 7x7 depthwise convolution (ConvNeXt spatial mixing), NHWC layout.
# Grid over batch; halo padding done in-kernel into a VMEM scratch (no jnp.pad
# HBM pass). One row-shifted slab load per ky, reused across the 7 kx taps.
# ----------------------------------------------------------------------------
def _dwconv_kernel(x_ref, w_ref, b_ref, o_ref, pad_ref, *, h, w, ksize):
    pad = ksize // 2
    x = x_ref[0].astype(jnp.float32)                  # (h, w, c)
    # Zero halo scratch and place the tile in its interior.
    pad_ref[...] = jnp.zeros_like(pad_ref)
    pad_ref[pad:pad + h, pad:pad + w, :] = x
    wgt = w_ref[...].astype(jnp.float32)              # (49, c)
    acc = jnp.zeros_like(x)
    for ky in range(ksize):
        row = pad_ref[ky:ky + h, :, :].astype(jnp.float32)   # (h, w+6, c) reused view
        for kx in range(ksize):
            tap = ky * ksize + kx
            acc = acc + row[:, kx:kx + w, :] * wgt[tap:tap + 1, :]
    acc = acc + b_ref[...].astype(jnp.float32)        # (1, c) broadcast
    o_ref[0] = acc.astype(o_ref.dtype)


def dwconv_pallas(x_nhwc, wgt, b):
    B, h, wdt, c = x_nhwc.shape
    k = 7
    return pl.pallas_call(
        functools.partial(_dwconv_kernel, h=h, w=wdt, ksize=k),
        out_shape=jax.ShapeDtypeStruct((B, h, wdt, c), x_nhwc.dtype),
        grid=(B,),
        in_specs=[
            pl.BlockSpec((1, h, wdt, c), lambda i: (i, 0, 0, 0)),
            pl.BlockSpec((k * k, c), lambda i: (0, 0)),
            pl.BlockSpec((1, c), lambda i: (0, 0)),
        ],
        out_specs=pl.BlockSpec((1, h, wdt, c), lambda i: (i, 0, 0, 0)),
        scratch_shapes=[pltpu.VMEM((h + k - 1, wdt + k - 1, c), jnp.float32)],
        compiler_params=_mosaic_params(1),
    )(x_nhwc, wgt, b)


# ----------------------------------------------------------------------------
# Kernel 3: ConvNeXt channel MLP: LN(1e-6) -> Linear(4x) -> GELU -> Linear
# (+ residual, gated statically -- no zeros DMA). Tiled over tokens.
# ----------------------------------------------------------------------------
def _convnext_mlp_kernel(x_ref, *rest, residual):
    if residual:
        res_ref, g_ref, be_ref, w1_ref, b1_ref, w2_ref, b2_ref, o_ref = rest
    else:
        g_ref, be_ref, w1_ref, b1_ref, w2_ref, b2_ref, o_ref = rest
    x = x_ref[...].astype(jnp.float32)
    mu = jnp.mean(x, axis=-1, keepdims=True)
    var = jnp.mean((x - mu) ** 2, axis=-1, keepdims=True)
    xn = (x - mu) * jax.lax.rsqrt(var + 1e-6)
    xn = xn * g_ref[...].astype(jnp.float32) + be_ref[...].astype(jnp.float32)
    h1 = jnp.dot(xn.astype(jnp.bfloat16), w1_ref[...].astype(jnp.bfloat16),
                 preferred_element_type=jnp.float32) + b1_ref[...].astype(jnp.float32)
    h1 = jax.nn.gelu(h1, approximate=True)
    y = jnp.dot(h1.astype(jnp.bfloat16), w2_ref[...].astype(jnp.bfloat16),
                preferred_element_type=jnp.float32) + b2_ref[...].astype(jnp.float32)
    if residual:
        y = y + res_ref[...].astype(jnp.float32)
    o_ref[...] = y.astype(o_ref.dtype)


def convnext_mlp_pallas(tok, res, p, residual):
    M, cin = tok.shape
    hid = p["w1"].shape[1]
    cout = p["w2"].shape[1]
    tm = _pick_tile(M)
    grid = (pl.cdiv(M, tm),)
    in_specs = [pl.BlockSpec((tm, cin), lambda i: (i, 0))]
    args = [tok]
    if residual:
        in_specs.append(pl.BlockSpec((tm, cin), lambda i: (i, 0)))
        args.append(res)
    in_specs += [
        pl.BlockSpec((1, cin), lambda i: (0, 0)),
        pl.BlockSpec((1, cin), lambda i: (0, 0)),
        pl.BlockSpec((cin, hid), lambda i: (0, 0)),
        pl.BlockSpec((1, hid), lambda i: (0, 0)),
        pl.BlockSpec((hid, cout), lambda i: (0, 0)),
        pl.BlockSpec((1, cout), lambda i: (0, 0)),
    ]
    args += [p["ln_g"], p["ln_b"], p["w1"], p["b1"], p["w2"], p["b2"]]
    return pl.pallas_call(
        functools.partial(_convnext_mlp_kernel, residual=residual),
        out_shape=jax.ShapeDtypeStruct((M, cout), tok.dtype),
        grid=grid,
        in_specs=in_specs,
        out_specs=pl.BlockSpec((tm, cout), lambda i: (i, 0)),
        compiler_params=_mosaic_params(1),
    )(*args)


def convnext_block(x_nhwc, p, residual):
    B, h, w, cin = x_nhwc.shape
    y = dwconv_pallas(x_nhwc, p["dw_w"], p["dw_b"])
    tok = y.reshape(B * h * w, cin)
    res = x_nhwc.reshape(B * h * w, cin) if residual else None
    out = convnext_mlp_pallas(tok, res, p, residual)
    return out.reshape(B, h, w, p["w2"].shape[1])


# ----------------------------------------------------------------------------
# Kernel 4: fused cross-attention layer (pre-LN, single head) + MLP.
# Grid over (batch, query tiles); keys/values (m x c) and all weights stay
# resident via constant index maps. Softmax scale pre-folded into wq/bq,
# softmax divide via approx reciprocal (EUP).
# ----------------------------------------------------------------------------
def _xattn_kernel(x_ref, ctx_ref,
                  ln1g, ln1b, wq, bq, wk, bk, wv, bv, wo, bo,
                  ln2g, ln2b, w1, b1, w2, b2, o_ref):
    x = x_ref[0].astype(jnp.float32)        # (tn, c) query tile
    ctx = ctx_ref[0].astype(jnp.float32)    # (m, c)  rgb patch tokens

    def ln(t, g, b):
        mu = jnp.mean(t, axis=-1, keepdims=True)
        var = jnp.mean((t - mu) ** 2, axis=-1, keepdims=True)
        # eps=1e-5: PyTorch nn.LayerNorm default for the attention LNs.
        return ((t - mu) * jax.lax.rsqrt(var + 1e-5)
                * g[...].astype(jnp.float32) + b[...].astype(jnp.float32))

    def mm(a, w_ref_):
        return jnp.dot(a.astype(jnp.bfloat16), w_ref_[...].astype(jnp.bfloat16),
                       preferred_element_type=jnp.float32)

    q = mm(ln(x, ln1g, ln1b), wq) + bq[...]      # 1/sqrt(c) already folded in
    k = mm(ctx, wk) + bk[...]
    v = mm(ctx, wv) + bv[...]

    s = jnp.dot(q.astype(jnp.bfloat16), k.T.astype(jnp.bfloat16),
                preferred_element_type=jnp.float32)            # (tn, m)
    s = s - jnp.max(s, axis=-1, keepdims=True)
    p = jnp.exp(s)
    p = p * pl.reciprocal(jnp.sum(p, axis=-1, keepdims=True), approx=True)
    a = jnp.dot(p.astype(jnp.bfloat16), v.astype(jnp.bfloat16),
                preferred_element_type=jnp.float32)

    x = x + mm(a, wo) + bo[...]
    h1 = mm(ln(x, ln2g, ln2b), w1) + b1[...]
    h1 = jax.nn.gelu(h1, approximate=True)
    x = x + mm(h1, w2) + b2[...]
    o_ref[0] = x.astype(o_ref.dtype)


def cross_attention_pallas(x, ctx, p):
    B, n, c = x.shape
    _, m, _ = ctx.shape
    scale = 1.0 / (c ** 0.5)
    # TODO(synk): modeled as single-head attention with scale 1/sqrt(C_total).
    wq = p["wq"] * scale      # fold attention scale at trace time
    bq = p["bq"] * scale
    params = [p["ln1_g"], p["ln1_b"], wq, bq, p["wk"], p["bk"],
              p["wv"], p["bv"], p["wo"], p["bo"], p["ln2_g"], p["ln2_b"],
              p["w1"], p["b1"], p["w2"], p["b2"]]
    tn = _pick_tile(n)
    grid = (B, pl.cdiv(n, tn))
    in_specs = [
        pl.BlockSpec((1, tn, c), lambda b, t: (b, t, 0)),
        pl.BlockSpec((1, m, c), lambda b, t: (b, 0, 0)),
    ]
    # All params are 2-D; explicit constant index maps keep them VMEM-resident.
    for q in params:
        in_specs.append(pl.BlockSpec(q.shape, lambda b, t: (0, 0)))
    return pl.pallas_call(
        _xattn_kernel,
        out_shape=jax.ShapeDtypeStruct((B, n, c), x.dtype),
        grid=grid,
        in_specs=in_specs,
        out_specs=pl.BlockSpec((1, tn, c), lambda b, t: (b, t, 0)),
        compiler_params=_mosaic_params(2),
    )(x, ctx, *params)


# ----------------------------------------------------------------------------
# Deterministic parameter construction (synthetic, no checkpoint loading).
# ----------------------------------------------------------------------------
def init_params(key, context_size, channels, n_xattn, n_convnext):
    keys = iter(jax.random.split(key, 256))

    def nrm(shape, s=0.02):
        return s * jax.random.normal(next(keys), shape, jnp.float32)

    def convnext_params(cin, cout):
        return {
            "dw_w": nrm((49, cin)),
            "dw_b": jnp.zeros((1, cin), jnp.float32),
            "ln_g": jnp.ones((1, cin), jnp.float32),
            "ln_b": jnp.zeros((1, cin), jnp.float32),
            "w1": nrm((cin, 4 * cin)),
            "b1": jnp.zeros((1, 4 * cin), jnp.float32),
            "w2": nrm((4 * cin, cout)),
            "b2": jnp.zeros((1, cout), jnp.float32),
        }

    def xattn_params(c):
        return {
            "ln1_g": jnp.ones((1, c), jnp.float32), "ln1_b": jnp.zeros((1, c), jnp.float32),
            "wq": nrm((c, c)), "bq": jnp.zeros((1, c), jnp.float32),
            "wk": nrm((c, c)), "bk": jnp.zeros((1, c), jnp.float32),
            "wv": nrm((c, c)), "bv": jnp.zeros((1, c), jnp.float32),
            "wo": nrm((c, c)), "bo": jnp.zeros((1, c), jnp.float32),
            "ln2_g": jnp.ones((1, c), jnp.float32), "ln2_b": jnp.zeros((1, c), jnp.float32),
            "w1": nrm((c, 4 * c)), "b1": jnp.zeros((1, 4 * c), jnp.float32),
            "w2": nrm((4 * c, c)), "b2": jnp.zeros((1, c), jnp.float32),
        }

    return {
        "down_w": nrm((16 * 16, context_size)),          # pixel_unshuffle(16) proj
        "down_b": jnp.zeros((1, context_size), jnp.float32),
        "pre": convnext_params(context_size, channels),  # ConvNeXtBlock(ctx -> ch)
        "xattn": [xattn_params(channels) for _ in range(n_xattn)],
        "convnext": [convnext_params(channels, channels) for _ in range(n_convnext)],
        "up_w": nrm((channels, 3 * 16 * 16)),            # MemoryEfficientUpscaling proj
        "up_b": jnp.zeros((1, 3 * 16 * 16), jnp.float32),
    }


# ----------------------------------------------------------------------------
# Full forward pass (glue reshapes in plain JAX, hot paths in Pallas kernels).
# ----------------------------------------------------------------------------
def rgb_context_decoder_forward(P, rgb_patches, depth, motion_embedding):
    B, _, H, W = depth.shape
    r = 16
    h, w = H // r, W // r
    cs = motion_embedding.shape[1]

    # depth_embedding: GradientScaler (identity fwd) -> pixel_unshuffle(16)
    # -> 1x1 conv, with the "+ motion_embedding" add fused into the kernel.
    d = jnp.transpose(depth, (0, 2, 3, 1))                                  # (B,H,W,1)
    d = d.reshape(B, h, r, w, r, 1).transpose(0, 1, 3, 5, 2, 4).reshape(B * h * w, r * r)
    motion = jnp.transpose(motion_embedding, (0, 2, 3, 1)).reshape(B * h * w, cs)
    x = linear_pallas(d, P["down_w"], P["down_b"], add=motion)
    x = x.reshape(B, h, w, cs)

    # preprocess: ConvNeXtBlock(context_size -> channels) + 'b c h w -> b (h w) c'
    x = convnext_block(x, P["pre"], residual=False)                         # (B,h,w,ch)
    ch = x.shape[-1]
    x_tok = x.reshape(B, h * w, ch)

    for p in P["xattn"]:
        x_tok = cross_attention_pallas(x_tok, rgb_patches, p)

    # 'b (h w) c -> b c h w' (kept NHWC internally)
    x = x_tok.reshape(B, h, w, ch)
    for p in P["convnext"]:
        x = convnext_block(x, p, residual=True)

    # to_patches: 1x1 conv (ch -> 3*r*r) + sigmoid (fused), then pixel_shuffle(16).
    up = linear_pallas(x.reshape(B * h * w, ch), P["up_w"], P["up_b"], act="sigmoid")
    up = up.reshape(B, h, w, 3, r, r).transpose(0, 3, 1, 4, 2, 5).reshape(B, 3, H, W)
    return up


if __name__ == "__main__":
    B = 2
    context_size = 32
    channels = 32
    H = W = 64                     # depth resolution; latent grid = 4x4 after /16
    n_patches = 16                 # rgb patch tokens

    key = jax.random.PRNGKey(0)
    k1, k2, k3, kp = jax.random.split(key, 4)
    depth = jax.random.normal(k1, (B, 1, H, W), jnp.float32)
    motion_embedding = jax.random.normal(
        k2, (B, context_size, H // 16, W // 16), jnp.float32)
    rgb_patches = jax.random.normal(k3, (B, n_patches, channels), jnp.float32)

    P = init_params(kp, context_size, channels, n_xattn=2, n_convnext=2)

    fwd = jax.jit(rgb_context_decoder_forward)
    out = fwd(P, rgb_patches, depth, motion_embedding)
    out = jax.block_until_ready(out)

    assert out.shape == (B, 3, H, W), out.shape
    assert bool(jnp.all(jnp.isfinite(out)))
    assert bool(jnp.all((out >= 0.0) & (out <= 1.0)))   # sigmoid output range
    print("KERNEL_OK")
</pallas_src>

<mosaic_0001>
module attributes {stable_mosaic.version = 11 : i64} {
  func.func @_linear_kernel(%arg0: i32, %arg1: memref<32x256xf32, #tpu.memory_space<vmem>>, %arg2: memref<256x32xf32, #tpu.memory_space<vmem>>, %arg3: memref<1x32xf32, #tpu.memory_space<vmem>>, %arg4: memref<32x32xf32, #tpu.memory_space<vmem>>, %arg5: memref<32x32xf32, #tpu.memory_space<vmem>>) attributes {dimension_semantics = [#tpu.dimension_semantics<parallel>], iteration_bounds = array<i64: 1>, scalar_prefetch = 0 : i64, scratch_operands = 0 : i64, tpu.core_type = #tpu.core_type<tc>, window_params = [{transform_indices = @transform_0, window_bounds = array<i64: 32, 256>}, {pipeline_mode = #tpu.pipeline_mode<synchronous>, transform_indices = @transform_1, window_bounds = array<i64: 256, 32>}, {pipeline_mode = #tpu.pipeline_mode<synchronous>, transform_indices = @transform_2, window_bounds = array<i64: 1, 32>}, {transform_indices = @transform_3, window_bounds = array<i64: 32, 32>}, {transform_indices = @transform_4, window_bounds = array<i64: 32, 32>}]} {
    %c0 = arith.constant 0 : index
    %c0_0 = arith.constant 0 : index
    %0 = vector.load %arg1[%c0, %c0_0] : memref<32x256xf32, #tpu.memory_space<vmem>>, vector<32x256xf32>
    %1 = arith.truncf %0 : vector<32x256xf32> to vector<32x256xbf16>
    %c0_1 = arith.constant 0 : index
    %c0_2 = arith.constant 0 : index
    %2 = vector.load %arg2[%c0_1, %c0_2] : memref<256x32xf32, #tpu.memory_space<vmem>>, vector<256x32xf32>
    %3 = arith.truncf %2 : vector<256x32xf32> to vector<256x32xbf16>
    %cst = arith.constant dense<0.000000e+00> : vector<32x32xf32>
    %4 = tpu.matmul %1, %3, %cst {dimension_numbers = #tpu.dot_dimension_numbers<[1], [0], [0], [1], [0, 0, 1, 1], [], []>} : vector<32x256xbf16>, vector<256x32xbf16>, vector<32x32xf32> -> vector<32x32xf32>
    %c0_3 = arith.constant 0 : index
    %c0_4 = arith.constant 0 : index
    %5 = vector.load %arg3[%c0_3, %c0_4] : memref<1x32xf32, #tpu.memory_space<vmem>>, vector<1x32xf32>
    %6 = vector.broadcast %5 : vector<1x32xf32> to vector<32x32xf32>
    %7 = arith.addf %4, %6 : vector<32x32xf32>
    %c0_5 = arith.constant 0 : index
    %c0_6 = arith.constant 0 : index
    %8 = vector.load %arg4[%c0_5, %c0_6] : memref<32x32xf32, #tpu.memory_space<vmem>>, vector<32x32xf32>
    %9 = arith.addf %7, %8 : vector<32x32xf32>
    %c0_7 = arith.constant 0 : index
    %c0_8 = arith.constant 0 : index
    %10 = vector.load %arg5[%c0_7, %c0_8] : memref<32x32xf32, #tpu.memory_space<vmem>>, vector<32x32xf32>
    tpu.vector_store %arg5[%c0_7, %c0_8], %9 {strides = array<i32>} : memref<32x32xf32, #tpu.memory_space<vmem>>, vector<32x32xf32>,
    return
  }
  func.func @transform_0(%arg0: i32) -> (i32, i32) {
    %c0_i32 = arith.constant 0 : i32
    %c0_i32_0 = arith.constant 0 : i32
    return %arg0, %c0_i32 : i32, i32
  }
  func.func @transform_1(%arg0: i32) -> (i32, i32) {
    %c0_i32 = arith.constant 0 : i32
    %c0_i32_0 = arith.constant 0 : i32
    %c0_i32_1 = arith.constant 0 : i32
    return %c0_i32, %c0_i32_0 : i32, i32
  }
  func.func @transform_2(%arg0: i32) -> (i32, i32) {
    %c0_i32 = arith.constant 0 : i32
    %c0_i32_0 = arith.constant 0 : i32
    %c0_i32_1 = arith.constant 0 : i32
    return %c0_i32, %c0_i32_0 : i32, i32
  }
  func.func @transform_3(%arg0: i32) -> (i32, i32) {
    %c0_i32 = arith.constant 0 : i32
    %c0_i32_0 = arith.constant 0 : i32
    return %arg0, %c0_i32 : i32, i32
  }
  func.func @transform_4(%arg0: i32) -> (i32, i32) {
    %c0_i32 = arith.constant 0 : i32
    %c0_i32_0 = arith.constant 0 : i32
    return %arg0, %c0_i32 : i32, i32
  }
}

module attributes {stable_mosaic.version = 11 : i64} {
  func.func @_convnext_mlp_kernel(%arg0: i32, %arg1: memref<32x32xf32, #tpu.memory_space<vmem>>, %arg2: memref<1x32xf32, #tpu.memory_space<vmem>>, %arg3: memref<1x32xf32, #tpu.memory_space<vmem>>, %arg4: memref<32x128xf32, #tpu.memory_space<vmem>>, %arg5: memref<1x128xf32, #tpu.memory_space<vmem>>, %arg6: memref<128x32xf32, #tpu.memory_space<vmem>>, %arg7: memref<1x32xf32, #tpu.memory_space<vmem>>, %arg8: memref<32x32xf32, #tpu.memory_space<vmem>>) attributes {dimension_semantics = [#tpu.dimension_semantics<parallel>], iteration_bounds = array<i64: 1>, scalar_prefetch = 0 : i64, scratch_operands = 0 : i64, tpu.core_type = #tpu.core_type<tc>, window_params = [{transform_indices = @transform_0, window_bounds = array<i64: 32, 32>}, {pipeline_mode = #tpu.pipeline_mode<synchronous>, transform_indices = @transform_1, window_bounds = array<i64: 1, 32>}, {pipeline_mode = #tpu.pipeline_mode<synchronous>, transform_indices = @transform_2, window_bounds = array<i64: 1, 32>}, {pipeline_mode = #tpu.pipeline_mode<synchronous>, transform_indices = @transform_3, window_bounds = array<i64: 32, 128>}, {pipeline_mode = #tpu.pipeline_mode<synchronous>, transform_indices = @transform_4, window_bounds = array<i64: 1, 128>}, {pipeline_mode = #tpu.pipeline_mode<synchronous>, transform_indices = @transform_5, window_bounds = array<i64: 128, 32>}, {pipeline_mode = #tpu.pipeline_mode<synchronous>, transform_indices = @transform_6, window_bounds = array<i64: 1, 32>}, {transform_indices = @transform_7, window_bounds = array<i64: 32, 32>}]} {
    %c0 = arith.constant 0 : index
    %c0_0 = arith.constant 0 : index
    %0 = vector.load %arg1[%c0, %c0_0] : memref<32x32xf32, #tpu.memory_space<vmem>>, vector<32x32xf32>
    %cst = arith.constant dense<0.000000e+00> : vector<32xf32>
    %1 = vector.multi_reduction <add>, %0, %cst [1] : vector<32x32xf32> to vector<32xf32>
    %2 = vector.shape_cast %1 : vector<32xf32> to vector<32x1xf32>
    %cst_1 = arith.constant 3.200000e+01 : f32
    %3 = vector.broadcast %cst_1 : f32 to vector<32x1xf32>
    %4 = arith.divf %2, %3 : vector<32x1xf32>
    %5 = vector.broadcast %4 : vector<32x1xf32> to vector<32x32xf32>
    %6 = arith.subf %0, %5 : vector<32x32xf32>
    %7 = arith.mulf %6, %6 : vector<32x32xf32>
    %cst_2 = arith.constant dense<0.000000e+00> : vector<32xf32>
    %8 = vector.multi_reduction <add>, %7, %cst_2 [1] : vector<32x32xf32> to vector<32xf32>
    %9 = vector.shape_cast %8 : vector<32xf32> to vector<32x1xf32>
    %cst_3 = arith.constant 3.200000e+01 : f32
    %10 = vector.broadcast %cst_3 : f32 to vector<32x1xf32>
    %11 = arith.divf %9, %10 : vector<32x1xf32>
    %12 = vector.broadcast %4 : vector<32x1xf32> to vector<32x32xf32>
    %13 = arith.subf %0, %12 : vector<32x32xf32>
    %cst_4 = arith.constant 9.99999997E-7 : f32
    %14 = vector.broadcast %cst_4 : f32 to vector<32x1xf32>
    %15 = arith.addf %11, %14 : vector<32x1xf32>
    %16 = math.rsqrt %15 : vector<32x1xf32>
    %17 = vector.broadcast %16 : vector<32x1xf32> to vector<32x32xf32>
    %18 = arith.mulf %13, %17 : vector<32x32xf32>
    %c0_5 = arith.constant 0 : index
    %c0_6 = arith.constant 0 : index
    %19 = vector.load %arg2[%c0_5, %c0_6] : memref<1x32xf32, #tpu.memory_space<vmem>>, vector<1x32xf32>
    %20 = vector.broadcast %19 : vector<1x32xf32> to vector<32x32xf32>
    %21 = arith.mulf %18, %20 : vector<32x32xf32>
    %c0_7 = arith.constant 0 : index
    %c0_8 = arith.constant 0 : index
    %22 = vector.load %arg3[%c0_7, %c0_8] : memref<1x32xf32, #tpu.memory_space<vmem>>, vector<1x32xf32>
    %23 = vector.broadcast %22 : vector<1x32xf32> to vector<32x32xf32>
    %24 = arith.addf %21, %23 : vector<32x32xf32>
    %25 = arith.truncf %24 : vector<32x32xf32> to vector<32x32xbf16>
    %c0_9 = arith.constant 0 : index
    %c0_10 = arith.constant 0 : index
    %26 = vector.load %arg4[%c0_9, %c0_10] : memref<32x128xf32, #tpu.memory_space<vmem>>, vector<32x128xf32>
    %27 = arith.truncf %26 : vector<32x128xf32> to vector<32x128xbf16>
    %cst_11 = arith.constant dense<0.000000e+00> : vector<32x128xf32>
    %28 = tpu.matmul %25, %27, %cst_11 {dimension_numbers = #tpu.dot_dimension_numbers<[1], [0], [0], [1], [0, 0, 1, 1], [], []>} : vector<32x32xbf16>, vector<32x128xbf16>, vector<32x128xf32> -> vector<32x128xf32>
    %c0_12 = arith.constant 0 : index
    %c0_13 = arith.constant 0 : index
    %29 = vector.load %arg5[%c0_12, %c0_13] : memref<1x128xf32, #tpu.memory_space<vmem>>, vector<1x128xf32>
    %30 = vector.broadcast %29 : vector<1x128xf32> to vector<32x128xf32>
    %31 = arith.addf %28, %30 : vector<32x128xf32>
    %32 = arith.mulf %31, %31 : vector<32x128xf32>
    %33 = arith.mulf %31, %32 : vector<32x128xf32>
    %cst_14 = arith.constant 4.471500e-02 : f32
    %34 = vector.broadcast %cst_14 : f32 to vector<32x128xf32>
    %35 = arith.mulf %34, %33 : vector<32x128xf32>
    %36 = arith.addf %31, %35 : vector<32x128xf32>
    %cst_15 = arith.constant 0.797884583 : f32
    %37 = vector.broadcast %cst_15 : f32 to vector<32x128xf32>
    %38 = arith.mulf %37, %36 : vector<32x128xf32>
    %39 = math.tanh %38 : vector<32x128xf32>
    %cst_16 = arith.constant 1.000000e+00 : f32
    %40 = vector.broadcast %cst_16 : f32 to vector<32x128xf32>
    %41 = arith.addf %40, %39 : vector<32x128xf32>
    %cst_17 = arith.constant 5.000000e-01 : f32
    %42 = vector.broadcast %cst_17 : f32 to vector<32x128xf32>
    %43 = arith.mulf %42, %41 : vector<32x128xf32>
    %44 = arith.mulf %31, %43 : vector<32x128xf32>
    %45 = arith.truncf %44 : vector<32x128xf32> to vector<32x128xbf16>
    %c0_18 = arith.constant 0 : index
    %c0_19 = arith.constant 0 : index
    %46 = vector.load %arg6[%c0_18, %c0_19] : memref<128x32xf32, #tpu.memory_space<vmem>>, vector<128x32xf32>
    %47 = arith.truncf %46 : vector<128x32xf32> to vector<128x32xbf16>
    %cst_20 = arith.constant dense<0.000000e+00> : vector<32x32xf32>
    %48 = tpu.matmul %45, %47, %cst_20 {dimension_numbers = #tpu.dot_dimension_numbers<[1], [0], [0], [1], [0, 0, 1, 1], [], []>} : vector<32x128xbf16>, vector<128x32xbf16>, vector<32x32xf32> -> vector<32x32xf32>
    %c0_21 = arith.constant 0 : index
    %c0_22 = arith.constant 0 : index
    %49 = vector.load %arg7[%c0_21, %c0_22] : memref<1x32xf32, #tpu.memory_space<vmem>>, vector<1x32xf32>
    %50 = vector.broadcast %49 : vector<1x32xf32> to vector<32x32xf32>
    %51 = arith.addf %48, %50 : vector<32x32xf32>
    %c0_23 = arith.constant 0 : index
    %c0_24 = arith.constant 0 : index
    %52 = vector.load %arg8[%c0_23, %c0_24] : memref<32x32xf32, #tpu.memory_space<vmem>>, vector<32x32xf32>
    tpu.vector_store %arg8[%c0_23, %c0_24], %51 {strides = array<i32>} : memref<32x32xf32, #tpu.memory_space<vmem>>, vector<32x32xf32>,
    return
  }
  func.func @transform_0(%arg0: i32) -> (i32, i32) {
    %c0_i32 = arith.constant 0 : i32
    %c0_i32_0 = arith.constant 0 : i32
    return %arg0, %c0_i32 : i32, i32
  }
  func.func @transform_1(%arg0: i32) -> (i32, i32) {
    %c0_i32 = arith.constant 0 : i32
    %c0_i32_0 = arith.constant 0 : i32
    %c0_i32_1 = arith.constant 0 : i32
    return %c0_i32, %c0_i32_0 : i32, i32
  }
  func.func @transform_2(%arg0: i32) -> (i32, i32) {
    %c0_i32 = arith.constant 0 : i32
    %c0_i32_0 = arith.constant 0 : i32
    %c0_i32_1 = arith.constant 0 : i32
    return %c0_i32, %c0_i32_0 : i32, i32
  }
  func.func @transform_3(%arg0: i32) -> (i32, i32) {
    %c0_i32 = arith.constant 0 : i32
    %c0_i32_0 = arith.constant 0 : i32
    %c0_i32_1 = arith.constant 0 : i32
    return %c0_i32, %c0_i32_0 : i32, i32
  }
  func.func @transform_4(%arg0: i32) -> (i32, i32) {
    %c0_i32 = arith.constant 0 : i32
    %c0_i32_0 = arith.constant 0 : i32
    %c0_i32_1 = arith.constant 0 : i32
    return %c0_i32, %c0_i32_0 : i32, i32
  }
  func.func @transform_5(%arg0: i32) -> (i32, i32) {
    %c0_i32 = arith.constant 0 : i32
    %c0_i32_0 = arith.constant 0 : i32
    %c0_i32_1 = arith.constant 0 : i32
    return %c0_i32, %c0_i32_0 : i32, i32
  }
  func.func @transform_6(%arg0: i32) -> (i32, i32) {
    %c0_i32 = arith.constant 0 : i32
    %c0_i32_0 = arith.constant 0 : i32
    %c0_i32_1 = arith.constant 0 : i32
    return %c0_i32, %c0_i32_0 : i32, i32
  }
  func.func @transform_7(%arg0: i32) -> (i32, i32) {
    %c0_i32 = arith.constant 0 : i32
    %c0_i32_0 = arith.constant 0 : i32
    return %arg0, %c0_i32 : i32, i32
  }
}

module attributes {stable_mosaic.version = 11 : i64} {
  func.func @_dwconv_kernel(%arg0: i32, %arg1: memref<1x4x4x32xf32, #tpu.memory_space<vmem>>, %arg2: memref<49x32xf32, #tpu.memory_space<vmem>>, %arg3: memref<1x32xf32, #tpu.memory_space<vmem>>, %arg4: memref<1x4x4x32xf32, #tpu.memory_space<vmem>>, %arg5: memref<10x10x32xf32, #tpu.memory_space<vmem>>) attributes {dimension_semantics = [#tpu.dimension_semantics<parallel>], iteration_bounds = array<i64: 2>, scalar_prefetch = 0 : i64, scratch_operands = 1 : i64, tpu.core_type = #tpu.core_type<tc>, window_params = [{transform_indices = @transform_0, window_bounds = array<i64: 1, 4, 4, 32>}, {pipeline_mode = #tpu.pipeline_mode<synchronous>, transform_indices = @transform_1, window_bounds = array<i64: 49, 32>}, {pipeline_mode = #tpu.pipeline_mode<synchronous>, transform_indices = @transform_2, window_bounds = array<i64: 1, 32>}, {transform_indices = @transform_3, window_bounds = array<i64: 1, 4, 4, 32>}]} {
    %c0 = arith.constant 0 : index
    %c0_0 = arith.constant 0 : index
    %c0_1 = arith.constant 0 : index
    %c0_2 = arith.constant 0 : index
    %0 = vector.load %arg1[%c0, %c0_0, %c0_1, %c0_2] : memref<1x4x4x32xf32, #tpu.memory_space<vmem>>, vector<1x4x4x32xf32>
    %1 = vector.shape_cast %0 : vector<1x4x4x32xf32> to vector<4x4x32xf32>
    %cst = arith.constant 0.000000e+00 : f32
    %2 = vector.broadcast %cst : f32 to vector<10x10x32xf32>
    %c0_3 = arith.constant 0 : index
    %c0_4 = arith.constant 0 : index
    %c0_5 = arith.constant 0 : index
    %3 = vector.load %arg5[%c0_3, %c0_4, %c0_5] : memref<10x10x32xf32, #tpu.memory_space<vmem>>, vector<10x10x32xf32>
    tpu.vector_store %arg5[%c0_3, %c0_4, %c0_5], %2 {strides = array<i32>} : memref<10x10x32xf32, #tpu.memory_space<vmem>>, vector<10x10x32xf32>,
    %c3 = arith.constant 3 : index
    %c3_6 = arith.constant 3 : index
    %c0_7 = arith.constant 0 : index
    %4 = vector.load %arg5[%c3, %c3_6, %c0_7] : memref<10x10x32xf32, #tpu.memory_space<vmem>>, vector<4x4x32xf32>
    tpu.vector_store %arg5[%c3, %c3_6, %c0_7], %1 {strides = array<i32>} : memref<10x10x32xf32, #tpu.memory_space<vmem>>, vector<4x4x32xf32>,
    %c0_8 = arith.constant 0 : index
    %c0_9 = arith.constant 0 : index
    %5 = vector.load %arg2[%c0_8, %c0_9] : memref<49x32xf32, #tpu.memory_space<vmem>>, vector<49x32xf32>
    %cst_10 = arith.constant 0.000000e+00 : f32
    %6 = vector.broadcast %cst_10 : f32 to vector<4x4x32xf32>
    %c0_11 = arith.constant 0 : index
    %c0_12 = arith.constant 0 : index
    %c0_13 = arith.constant 0 : index
    %7 = vector.load %arg5[%c0_11, %c0_12, %c0_13] : memref<10x10x32xf32, #tpu.memory_space<vmem>>, vector<4x10x32xf32>
    %8 = vector.extract_strided_slice %7 {offsets = [0, 0, 0], sizes = [4, 4, 32], strides = [1, 1, 1]} : vector<4x10x32xf32> to vector<4x4x32xf32>
    %9 = vector.extract_strided_slice %5 {offsets = [0, 0], sizes = [1, 32], strides = [1, 1]} : vector<49x32xf32> to vector<1x32xf32>
    %10 = vector.shape_cast %9 : vector<1x32xf32> to vector<1x1x32xf32>
    %11 = vector.broadcast %10 : vector<1x1x32xf32> to vector<4x4x32xf32>
    %12 = arith.mulf %8, %11 : vector<4x4x32xf32>
    %13 = arith.addf %6, %12 : vector<4x4x32xf32>
    %14 = vector.extract_strided_slice %7 {offsets = [0, 1, 0], sizes = [4, 4, 32], strides = [1, 1, 1]} : vector<4x10x32xf32> to vector<4x4x32xf32>
    %15 = vector.extract_strided_slice %5 {offsets = [1, 0], sizes = [1, 32], strides = [1, 1]} : vector<49x32xf32> to vector<1x32xf32>
    %16 = vector.shape_cast %15 : vector<1x32xf32> to vector<1x1x32xf32>
    %17 = vector.broadcast %16 : vector<1x1x32xf32> to vector<4x4x32xf32>
    %18 = arith.mulf %14, %17 : vector<4x4x32xf32>
    %19 = arith.addf %13, %18 : vector<4x4x32xf32>
    %20 = vector.extract_strided_slice %7 {offsets = [0, 2, 0], sizes = [4, 4, 32], strides = [1, 1, 1]} : vector<4x10x32xf32> to vector<4x4x32xf32>
    %21 = vector.extract_strided_slice %5 {offsets = [2, 0], sizes = [1, 32], strides = [1, 1]} : vector<49x32xf32> to vector<1x32xf32>
    %22 = vector.shape_cast %21 : vector<1x32xf32> to vector<1x1x32xf32>
    %23 = vector.broadcast %22 : vector<1x1x32xf32> to vector<4x4x32xf32>
    %24 = arith.mulf %20, %23 : vector<4x4x32xf32>
    %25 = arith.addf %19, %24 : vector<4x4x32xf32>
    %26 = vector.extract_strided_slice %7 {offsets = [0, 3, 0], sizes = [4, 4, 32], strides = [1, 1, 1]} : vector<4x10x32xf32> to vector<4x4x32xf32>
    %27 = vector.extract_strided_slice %5 {offsets = [3, 0], sizes = [1, 32], strides = [1, 1]} : vector<49x32xf32> to vector<1x32xf32>
    %28 = vector.shape_cast %27 : vector<1x32xf32> to vector<1x1x32xf32>
    %29 = vector.broadcast %28 : vector<1x1x32xf32> to vector<4x4x32xf32>
    %30 = arith.mulf %26, %29 : vector<4x4x32xf32>
    %31 = arith.addf %25, %30 : vector<4x4x32xf32>
    %32 = vector.extract_strided_slice %7 {offsets = [0, 4, 0], sizes = [4, 4, 32], strides = [1, 1, 1]} : vector<4x10x32xf32> to vector<4x4x32xf32>
    %33 = vector.extract_strided_slice %5 {offsets = [4, 0], sizes = [1, 32], strides = [1, 1]} : vector<49x32xf32> to vector<1x32xf32>
    %34 = vector.shape_cast %33 : vector<1x32xf32> to vector<1x1x32xf32>
    %35 = vector.broadcast %34 : vector<1x1x32xf32> to vector<4x4x32xf32>
    %36 = arith.mulf %32, %35 : vector<4x4x32xf32>
    %37 = arith.addf %31, %36 : vector<4x4x32xf32>
    %38 = vector.extract_strided_slice %7 {offsets = [0, 5, 0], sizes = [4, 4, 32], strides = [1, 1, 1]} : vector<4x10x32xf32> to vector<4x4x32xf32>
    %39 = vector.extract_strided_slice %5 {offsets = [5, 0], sizes = [1, 32], strides = [1, 1]} : vector<49x32xf32> to vector<1x32xf32>
    %40 = vector.shape_cast %39 : vector<1x32xf32> to vector<1x1x32xf32>
    %41 = vector.broadcast %40 : vector<1x1x32xf32> to vector<4x4x32xf32>
    %42 = arith.mulf %38, %41 : vector<4x4x32xf32>
    %43 = arith.addf %37, %42 : vector<4x4x32xf32>
    %44 = vector.extract_strided_slice %7 {offsets = [0, 6, 0], sizes = [4, 4, 32], strides = [1, 1, 1]} : vector<4x10x32xf32> to vector<4x4x32xf32>
    %45 = vector.extract_strided_slice %5 {offsets = [6, 0], sizes = [1, 32], strides = [1, 1]} : vector<49x32xf32> to vector<1x32xf32>
    %46 = vector.shape_cast %45 : vector<1x32xf32> to vector<1x1x32xf32>
    %47 = vector.broadcast %46 : vector<1x1x32xf32> to vector<4x4x32xf32>
    %48 = arith.mulf %44, %47 : vector<4x4x32xf32>
    %49 = arith.addf %43, %48 : vector<4x4x32xf32>
    %c1 = arith.constant 1 : index
    %c0_14 = arith.constant 0 : index
    %c0_15 = arith.constant 0 : index
    %50 = vector.load %arg5[%c1, %c0_14, %c0_15] : memref<10x10x32xf32, #tpu.memory_space<vmem>>, vector<4x10x32xf32>
    %51 = vector.extract_strided_slice %50 {offsets = [0, 0, 0], sizes = [4, 4, 32], strides = [1, 1, 1]} : vector<4x10x32xf32> to vector<4x4x32xf32>
    %52 = vector.extract_strided_slice %5 {offsets = [7, 0], sizes = [1, 32], strides = [1, 1]} : vector<49x32xf32> to vector<1x32xf32>
    %53 = vector.shape_cast %52 : vector<1x32xf32> to vector<1x1x32xf32>
    %54 = vector.broadcast %53 : vector<1x1x32xf32> to vector<4x4x32xf32>
    %55 = arith.mulf %51, %54 : vector<4x4x32xf32>
    %56 = arith.addf %49, %55 : vector<4x4x32xf32>
    %57 = vector.extract_strided_slice %50 {offsets = [0, 1, 0], sizes = [4, 4, 32], strides = [1, 1, 1]} : vector<4x10x32xf32> to vector<4x4x32xf32>
    %58 = vector.extract_strided_slice %5 {offsets = [8, 0], sizes = [1, 32], strides = [1, 1]} : vector<49x32xf32> to vector<1x32xf32>
    %59 = vector.shape_cast %58 : vector<1x32xf32> to vector<1x1x32xf32>
    %60 = vector.broadcast %59 : vector<1x1x32xf32> to vector<4x4x32xf32>
    %61 = arith.mulf %57, %60 : vector<4x4x32xf32>
    %62 = arith.addf %56, %61 : vector<4x4x32xf32>
    %63 = vector.extract_strided_slice %50 {offsets = [0, 2, 0], sizes = [4, 4, 32], strides = [1, 1, 1]} : vector<4x10x32xf32> to vector<4x4x32xf32>
    %64 = vector.extract_strided_slice %5 {offsets = [9, 0], sizes = [1, 32], strides = [1, 1]} : vector<49x32xf32> to vector<1x32xf32>
    %65 = vector.shape_cast %64 : vector<1x32xf32> to vector<1x1x32xf32>
    %66 = vector.broadcast %65 : vector<1x1x32xf32> to vector<4x4x32xf32>
    %67 = arith.mulf %63, %66 : vector<4x4x32xf32>
    %68 = arith.addf %62, %67 : vector<4x4x32xf32>
    %69 = vector.extract_strided_slice %50 {offsets = [0, 3, 0], sizes = [4, 4, 32], strides = [1, 1, 1]} : vector<4x10x32xf32> to vector<4x4x32xf32>
    %70 = vector.extract_strided_slice %5 {offsets = [10, 0], sizes = [1, 32], strides = [1, 1]} : vector<49x32xf32> to vector<1x32xf32>
    %71 = vector.shape_cast %70 : vector<1x32xf32> to vector<1x1x32xf32>
    %72 = vector.broadcast %71 : vector<1x1x32xf32> to vector<4x4x32xf32>
    %73 = arith.mulf %69, %72 : vector<4x4x32xf32>
    %74 = arith.addf %68, %73 : vector<4x4x32xf32>
    %75 = vector.extract_strided_slice %50 {offsets = [0, 4, 0], sizes = [4, 4, 32], strides = [1, 1, 1]} : vector<4x10x32xf32> to vector<4x4x32xf32>
    %76 = vector.extract_strided_slice %5 {offsets = [11, 0], sizes = [1, 32], strides = [1, 1]} : vector<49x32xf32> to vector<1x32xf32>
    %77 = vector.shape_cast %76 : vector<1x32xf32> to vector<1x1x32xf32>
    %78 = vector.broadcast %77 : vector<1x1x32xf32> to vector<4x4x32xf32>
    %79 = arith.mulf %75, %78 : vector<4x4x32xf32>
    %80 = arith.addf %74, %79 : vector<4x4x32xf32>
    %81 = vector.extract_strided_slice %50 {offsets = [0, 5, 0], sizes = [4, 4, 32], strides = [1, 1, 1]} : vector<4x10x32xf32> to vector<4x4x32xf32>
    %82 = vector.extract_strided_slice %5 {offsets = [12, 0], sizes = [1, 32], strides = [1, 1]} : vector<49x32xf32> to vector<1x32xf32>
    %83 = vector.shape_cast %82 : vector<1x32xf32> to vector<1x1x32xf32>
    %84 = vector.broadcast %83 : vector<1x1x32xf32> to vector<4x4x32xf32>
    %85 = arith.mulf %81, %84 : vector<4x4x32xf32>
    %86 = arith.addf %80, %85 : vector<4x4x32xf32>
    %87 = vector.extract_strided_slice %50 {offsets = [0, 6, 0], sizes = [4, 4, 32], strides = [1, 1, 1]} : vector<4x10x32xf32> to vector<4x4x32xf32>
    %88 = vector.extract_strided_slice %5 {offsets = [13, 0], sizes = [1, 32], strides = [1, 1]} : vector<49x32xf32> to vector<1x32xf32>
    %89 = vector.shape_cast %88 : vector<1x32xf32> to vector<1x1x32xf32>
    %90 = vector.broadcast %89 : vector<1x1x32xf32> to vector<4x4x32xf32>
    %91 = arith.mulf %87, %90 : vector<4x4x32xf32>
    %92 = arith.addf %86, %91 : vector<4x4x32xf32>
    %c2 = arith.constant 2 : index
    %c0_16 = arith.constant 0 : index
    %c0_17 = arith.constant 0 : index
    %93 = vector.load %arg5[%c2, %c0_16, %c0_17] : memref<10x10x32xf32, #tpu.memory_space<vmem>>, vector<4x10x32xf32>
    %94 = vector.extract_strided_slice %93 {offsets = [0, 0, 0], sizes = [4, 4, 32], strides = [1, 1, 1]} : vector<4x10x32xf32> to vector<4x4x32xf32>
    %95 = vector.extract_strided_slice %5 {offsets = [14, 0], sizes = [1, 32], strides = [1, 1]} : vector<49x32xf32> to vector<1x32xf32>
    %96 = vector.shape_cast %95 : vector<1x32xf32> to vector<1x1x32xf32>
    %97 = vector.broadcast %96 : vector<1x1x32xf32> to vector<4x4x32xf32>
    %98 = arith.mulf %94, %97 : vector<4x4x32xf32>
    %99 = arith.addf %92, %98 : vector<4x4x32xf32>
    %100 = vector.extract_strided_slice %93 {offsets = [0, 1, 0], sizes = [4, 4, 32], strides = [1, 1, 1]} : vector<4x10x32xf32> to vector<4x4x32xf32>
    %101 = vector.extract_strided_slice %5 {offsets = [15, 0], sizes = [1, 32], strides = [1, 1]} : vector<49x32xf32> to vector<1x32xf32>
    %102 = vector.shape_cast %101 : vector<1x32xf32> to vector<1x1x32xf32>
    %103 = vector.broadcast %102 : vector<1x1x32xf32> to vector<4x4x32xf32>
    %104 = arith.mulf %100, %103 : vector<4x4x32xf32>
    %105 = arith.addf %99, %104 : vector<4x4x32xf32>
    %106 = vector.extract_strided_slice %93 {offsets = [0, 2, 0], sizes = [4, 4, 32], strides = [1, 1, 1]} : vector<4x10x32xf32> to vector<4x4x32xf32>
    %107 = vector.extract_strided_slice %5 {offsets = [16, 0], sizes = [1, 32], strides = [1, 1]} : vector<49x32xf32> to vector<1x32xf32>
    %108 = vector.shape_cast %107 : vector<1x32xf32> to vector<1x1x32xf32>
    %109 = vector.broadcast %108 : vector<1x1x32xf32> to vector<4x4x32xf32>
    %110 = arith.mulf %106, %109 : vector<4x4x32xf32>
    %111 = arith.addf %105, %110 : vector<4x4x32xf32>
    %112 = vector.extract_strided_slice %93 {offsets = [0, 3, 0], sizes = [4, 4, 32], strides = [1, 1, 1]} : vector<4x10x32xf32> to vector<4x4x32xf32>
    %113 = vector.extract_strided_slice %5 {offsets = [17, 0], sizes = [1, 32], strides = [1, 1]} : vector<49x32xf32> to vector<1x32xf32>
    %114 = vector.shape_cast %113 : vector<1x32xf32> to vector<1x1x32xf32>
    %115 = vector.broadcast %114 : vector<1x1x32xf32> to vector<4x4x32xf32>
    %116 = arith.mulf %112, %115 : vector<4x4x32xf32>
    %117 = arith.addf %111, %116 : vector<4x4x32xf32>
    %118 = vector.extract_strided_slice %93 {offsets = [0, 4, 0], sizes = [4, 4, 32], strides = [1, 1, 1]} : vector<4x10x32xf32> to vector<4x4x32xf32>
    %119 = vector.extract_strided_slice %5 {offsets = [18, 0], sizes = [1, 32], strides = [1, 1]} : vector<49x32xf32> to vector<1x32xf32>
    %120 = vector.shape_cast %119 : vector<1x32xf32> to vector<1x1x32xf32>
    %121 = vector.broadcast %120 : vector<1x1x32xf32> to vector<4x4x32xf32>
    %122 = arith.mulf %118, %121 : vector<4x4x32xf32>
    %123 = arith.addf %117, %122 : vector<4x4x32xf32>
    %124 = vector.extract_strided_slice %93 {offsets = [0, 5, 0], sizes = [4, 4, 32], strides = [1, 1, 1]} : vector<4x10x32xf32> to vector<4x4x32xf32>
    %125 = vector.extract_strided_slice %5 {offsets = [19, 0], sizes = [1, 32], strides = [1, 1]} : vector<49x32xf32> to vector<1x32xf32>
    %126 = vector.shape_cast %125 : vector<1x32xf32> to vector<1x1x32xf32>
    %127 = vector.broadcast %126 : vector<1x1x32xf32> to vector<4x4x32xf32>
    %128 = arith.mulf %124, %127 : vector<4x4x32xf32>
    %129 = arith.addf %123, %128 : vector<4x4x32xf32>
    %130 = vector.extract_strided_slice %93 {offsets = [0, 6, 0], sizes = [4, 4, 32], strides = [1, 1, 1]} : vector<4x10x32xf32> to vector<4x4x32xf32>
    %131 = vector.extract_strided_slice %5 {offsets = [20, 0], sizes = [1, 32], strides = [1, 1]} : vector<49x32xf32> to vector<1x32xf32>
    %132 = vector.shape_cast %131 : vector<1x32xf32> to vector<1x1x32xf32>
    %133 = vector.broadcast %132 : vector<1x1x32xf32> to vector<4x4x32xf32>
    %134 = arith.mulf %130, %133 : vector<4x4x32xf32>
    %135 = arith.addf %129, %134 : vector<4x4x32xf32>
    %c3_18 = arith.constant 3 : index
    %c0_19 = arith.constant 0 : index
    %c0_20 = arith.constant 0 : index
    %136 = vector.load %arg5[%c3_18, %c0_19, %c0_20] : memref<10x10x32xf32, #tpu.memory_space<vmem>>, vector<4x10x32xf32>
    %137 = vector.extract_strided_slice %136 {offsets = [0, 0, 0], sizes = [4, 4, 32], strides = [1, 1, 1]} : vector<4x10x32xf32> to vector<4x4x32xf32>
    %138 = vector.extract_strided_slice %5 {offsets = [21, 0], sizes = [1, 32], strides = [1, 1]} : vector<49x32xf32> to vector<1x32xf32>
    %139 = vector.shape_cast %138 : vector<1x32xf32> to vector<1x1x32xf32>
    %140 = vector.broadcast %139 : vector<1x1x32xf32> to vector<4x4x32xf32>
    %141 = arith.mulf %137, %140 : vector<4x4x32xf32>
    %142 = arith.addf %135, %141 : vector<4x4x32xf32>
    %143 = vector.extract_strided_slice %136 {offsets = [0, 1, 0], sizes = [4, 4, 32], strides = [1, 1, 1]} : vector<4x10x32xf32> to vector<4x4x32xf32>
    %144 = vector.extract_strided_slice %5 {offsets = [22, 0], sizes = [1, 32], strides = [1, 1]} : vector<49x32xf32> to vector<1x32xf32>
    %145 = vector.shape_cast %144 : vector<1x32xf32> to vector<1x1x32xf32>
    %146 = vector.broadcast %145 : vector<1x1x32xf32> to vector<4x4x32xf32>
    %147 = arith.mulf %143, %146 : vector<4x4x32xf32>
    %148 = arith.addf %142, %147 : vector<4x4x32xf32>
    %149 = vector.extract_strided_slice %136 {offsets = [0, 2, 0], sizes = [4, 4, 32], strides = [1, 1, 1]} : vector<4x10x32xf32> to vector<4x4x32xf32>
    %150 = vector.extract_strided_slice %5 {offsets = [23, 0], sizes = [1, 32], strides = [1, 1]} : vector<49x32xf32> to vector<1x32xf32>
    %151 = vector.shape_cast %150 : vector<1x32xf32> to vector<1x1x32xf32>
    %152 = vector.broadcast %151 : vector<1x1x32xf32> to vector<4x4x32xf32>
    %153 = arith.mulf %149, %152 : vector<4x4x32xf32>
    %154 = arith.addf %148, %153 : vector<4x4x32xf32>
    %155 = vector.extract_strided_slice %136 {offsets = [0, 3, 0], sizes = [4, 4, 32], strides = [1, 1, 1]} : vector<4x10x32xf32> to vector<4x4x32xf32>
    %156 = vector.extract_strided_slice %5 {offsets = [24, 0], sizes = [1, 32], strides = [1, 1]} : vector<49x32xf32> to vector<1x32xf32>
    %157 = vector.shape_cast %156 : vector<1x32xf32> to vector<1x1x32xf32>
    %158 = vector.broadcast %157 : vector<1x1x32xf32> to vector<4x4x32xf32>
    %159 = arith.mulf %155, %158 : vector<4x4x32xf32>
    %160 = arith.addf %154, %159 : vector<4x4x32xf32>
    %161 = vector.extract_strided_slice %136 {offsets = [0, 4, 0], sizes = [4, 4, 32], strides = [1, 1, 1]} : vector<4x10x32xf32> to vector<4x4x32xf32>
    %162 = vector.extract_strided_slice %5 {offsets = [25, 0], sizes = [1, 32], strides = [1, 1]} : vector<49x32xf32> to vector<1x32xf32>
    %163 = vector.shape_cast %162 : vector<1x32xf32> to vector<1x1x32xf32>
    %164 = vector.broadcast %163 : vector<1x1x32xf32> to vector<4x4x32xf32>
    %165 = arith.mulf %161, %164 : vector<4x4x32xf32>
    %166 = arith.addf %160, %165 : vector<4x4x32xf32>
    %167 = vector.extract_strided_slice %136 {offsets = [0, 5, 0], sizes = [4, 4, 32], strides = [1, 1, 1]} : vector<4x10x32xf32> to vector<4x4x32xf32>
    %168 = vector.extract_strided_slice %5 {offsets = [26, 0], sizes = [1, 32], strides = [1, 1]} : vector<49x32xf32> to vector<1x32xf32>
    %169 = vector.shape_cast %168 : vector<1x32xf32> to vector<1x1x32xf32>
    %170 = vector.broadcast %169 : vector<1x1x32xf32> to vector<4x4x32xf32>
    %171 = arith.mulf %167, %170 : vector<4x4x32xf32>
    %172 = arith.addf %166, %171 : vector<4x4x32xf32>
    %173 = vector.extract_strided_slice %136 {offsets = [0, 6, 0], sizes = [4, 4, 32], strides = [1, 1, 1]} : vector<4x10x32xf32> to vector<4x4x32xf32>
    %174 = vector.extract_strided_slice %5 {offsets = [27, 0], sizes = [1, 32], strides = [1, 1]} : vector<49x32xf32> to vector<1x32xf32>
    %175 = vector.shape_cast %174 : vector<1x32xf32> to vector<1x1x32xf32>
    %176 = vector.broadcast %175 : vector<1x1x32xf32> to vector<4x4x32xf32>
    %177 = arith.mulf %173, %176 : vector<4x4x32xf32>
    %178 = arith.addf %172, %177 : vector<4x4x32xf32>
    %c4 = arith.constant 4 : index
    %c0_21 = arith.constant 0 : index
    %c0_22 = arith.constant 0 : index
    %179 = vector.load %arg5[%c4, %c0_21, %c0_22] : memref<10x10x32xf32, #tpu.memory_space<vmem>>, vector<4x10x32xf32>
    %180 = vector.extract_strided_slice %179 {offsets = [0, 0, 0], sizes = [4, 4, 32], strides = [1, 1, 1]} : vector<4x10x32xf32> to vector<4x4x32xf32>
    %181 = vector.extract_strided_slice %5 {offsets = [28, 0], sizes = [1, 32], strides = [1, 1]} : vector<49x32xf32> to vector<1x32xf32>
    %182 = vector.shape_cast %181 : vector<1x32xf32> to vector<1x1x32xf32>
    %183 = vector.broadcast %182 : vector<1x1x32xf32> to vector<4x4x32xf32>
    %184 = arith.mulf %180, %183 : vector<4x4x32xf32>
    %185 = arith.addf %178, %184 : vector<4x4x32xf32>
    %186 = vector.extract_strided_slice %179 {offsets = [0, 1, 0], sizes = [4, 4, 32], strides = [1, 1, 1]} : vector<4x10x32xf32> to vector<4x4x32xf32>
    %187 = vector.extract_strided_slice %5 {offsets = [29, 0], sizes = [1, 32], strides = [1, 1]} : vector<49x32xf32> to vector<1x32xf32>
    %188 = vector.shape_cast %187 : vector<1x32xf32> to vector<1x1x32xf32>
    %189 = vector.broadcast %188 : vector<1x1x32xf32> to vector<4x4x32xf32>
    %190 = arith.mulf %186, %189 : vector<4x4x32xf32>
    %191 = arith.addf %185, %190 : vector<4x4x32xf32>
    %192 = vector.extract_strided_slice %179 {offsets = [0, 2, 0], sizes = [4, 4, 32], strides = [1, 1, 1]} : vector<4x10x32xf32> to vector<4x4x32xf32>
    %193 = vector.extract_strided_slice %5 {offsets = [30, 0], sizes = [1, 32], strides = [1, 1]} : vector<49x32xf32> to vector<1x32xf32>
    %194 = vector.shape_cast %193 : vector<1x32xf32> to vector<1x1x32xf32>
    %195 = vector.broadcast %194 : vector<1x1x32xf32> to vector<4x4x32xf32>
    %196 = arith.mulf %192, %195 : vector<4x4x32xf32>
    %197 = arith.addf %191, %196 : vector<4x4x32xf32>
    %198 = vector.extract_strided_slice %179 {offsets = [0, 3, 0], sizes = [4, 4, 32], strides = [1, 1, 1]} : vector<4x10x32xf32> to vector<4x4x32xf32>
    %199 = vector.extract_strided_slice %5 {offsets = [31, 0], sizes = [1, 32], strides = [1, 1]} : vector<49x32xf32> to vector<1x32xf32>
    %200 = vector.shape_cast %199 : vector<1x32xf32> to vector<1x1x32xf32>
    %201 = vector.broadcast %200 : vector<1x1x32xf32> to vector<4x4x32xf32>
    %202 = arith.mulf %198, %201 : vector<4x4x32xf32>
    %203 = arith.addf %197, %202 : vector<4x4x32xf32>
    %204 = vector.extract_strided_slice %179 {offsets = [0, 4, 0], sizes = [4, 4, 32], strides = [1, 1, 1]} : vector<4x10x32xf32> to vector<4x4x32xf32>
    %205 = vector.extract_strided_slice %5 {offsets = [32, 0], sizes = [1, 32], strides = [1, 1]} : vector<49x32xf32> to vector<1x32xf32>
    %206 = vector.shape_cast %205 : vector<1x32xf32> to vector<1x1x32xf32>
    %207 = vector.broadcast %206 : vector<1x1x32xf32> to vector<4x4x32xf32>
    %208 = arith.mulf %204, %207 : vector<4x4x32xf32>
    %209 = arith.addf %203, %208 : vector<4x4x32xf32>
    %210 = vector.extract_strided_slice %179 {offsets = [0, 5, 0], sizes = [4, 4, 32], strides = [1, 1, 1]} : vector<4x10x32xf32> to vector<4x4x32xf32>
    %211 = vector.extract_strided_slice %5 {offsets = [33, 0], sizes = [1, 32], strides = [1, 1]} : vector<49x32xf32> to vector<1x32xf32>
    %212 = vector.shape_cast %211 : vector<1x32xf32> to vector<1x1x32xf32>
    %213 = vector.broadcast %212 : vector<1x1x32xf32> to vector<4x4x32xf32>
    %214 = arith.mulf %210, %213 : vector<4x4x32xf32>
    %215 = arith.addf %209, %214 : vector<4x4x32xf32>
    %216 = vector.extract_strided_slice %179 {offsets = [0, 6, 0], sizes = [4, 4, 32], strides = [1, 1, 1]} : vector<4x10x32xf32> to vector<4x4x32xf32>
    %217 = vector.extract_strided_slice %5 {offsets = [34, 0], sizes = [1, 32], strides = [1, 1]} : vector<49x32xf32> to vector<1x32xf32>
    %218 = vector.shape_cast %217 : vector<1x32xf32> to vector<1x1x32xf32>
    %219 = vector.broadcast %218 : vector<1x1x32xf32> to vector<4x4x32xf32>
    %220 = arith.mulf %216, %219 : vector<4x4x32xf32>
    %221 = arith.addf %215, %220 : vector<4x4x32xf32>
    %c5 = arith.constant 5 : index
    %c0_23 = arith.constant 0 : index
    %c0_24 = arith.constant 0 : index
    %222 = vector.load %arg5[%c5, %c0_23, %c0_24] : memref<10x10x32xf32, #tpu.memory_space<vmem>>, vector<4x10x32xf32>
    %223 = vector.extract_strided_slice %222 {offsets = [0, 0, 0], sizes = [4, 4, 32], strides = [1, 1, 1]} : vector<4x10x32xf32> to vector<4x4x32xf32>
    %224 = vector.extract_strided_slice %5 {offsets = [35, 0], sizes = [1, 32], strides = [1, 1]} : vector<49x32xf32> to vector<1x32xf32>
    %225 = vector.shape_cast %224 : vector<1x32xf32> to vector<1x1x32xf32>
    %226 = vector.broadcast %225 : vector<1x1x32xf32> to vector<4x4x32xf32>
    %227 = arith.mulf %223, %226 : vector<4x4x32xf32>
    %228 = arith.addf %221, %227 : vector<4x4x32xf32>
    %229 = vector.extract_strided_slice %222 {offsets = [0, 1, 0], sizes = [4, 4, 32], strides = [1, 1, 1]} : vector<4x10x32xf32> to vector<4x4x32xf32>
    %230 = vector.extract_strided_slice %5 {offsets = [36, 0], sizes = [1, 32], strides = [1, 1]} : vector<49x32xf32> to vector<1x32xf32>
    %231 = vector.shape_cast %230 : vector<1x32xf32> to vector<1x1x32xf32>
    %232 = vector.broadcast %231 : vector<1x1x32xf32> to vector<4x4x32xf32>
    %233 = arith.mulf %229, %232 : vector<4x4x32xf32>
    %234 = arith.addf %228, %233 : vector<4x4x32xf32>
    %235 = vector.extract_strided_slice %222 {offsets = [0, 2, 0], sizes = [4, 4, 32], strides = [1, 1, 1]} : vector<4x10x32xf32> to vector<4x4x32xf32>
    %236 = vector.extract_strided_slice %5 {offsets = [37, 0], sizes = [1, 32], strides = [1, 1]} : vector<49x32xf32> to vector<1x32xf32>
    %237 = vector.shape_cast %236 : vector<1x32xf32> to vector<1x1x32xf32>
    %238 = vector.broadcast %237 : vector<1x1x32xf32> to vector<4x4x32xf32>
    %239 = arith.mulf %235, %238 : vector<4x4x32xf32>
    %240 = arith.addf %234, %239 : vector<4x4x32xf32>
    %241 = vector.extract_strided_slice %222 {offsets = [0, 3, 0], sizes = [4, 4, 32], strides = [1, 1, 1]} : vector<4x10x32xf32> to vector<4x4x32xf32>
    %242 = vector.extract_strided_slice %5 {offsets = [38, 0], sizes = [1, 32], strides = [1, 1]} : vector<49x32xf32> to vector<1x32xf32>
    %243 = vector.shape_cast %242 : vector<1x32xf32> to vector<1x1x32xf32>
    %244 = vector.broadcast %243 : vector<1x1x32xf32> to vector<4x4x32xf32>
    %245 = arith.mulf %241, %244 : vector<4x4x32xf32>
    %246 = arith.addf %240, %245 : vector<4x4x32xf32>
    %247 = vector.extract_strided_slice %222 {offsets = [0, 4, 0], sizes = [4, 4, 32], strides = [1, 1, 1]} : vector<4x10x32xf32> to vector<4x4x32xf32>
    %248 = vector.extract_strided_slice %5 {offsets = [39, 0], sizes = [1, 32], strides = [1, 1]} : vector<49x32xf32> to vector<1x32xf32>
    %249 = vector.shape_cast %248 : vector<1x32xf32> to vector<1x1x32xf32>
    %250 = vector.broadcast %249 : vector<1x1x32xf32> to vector<4x4x32xf32>
    %251 = arith.mulf %247, %250 : vector<4x4x32xf32>
    %252 = arith.addf %246, %251 : vector<4x4x32xf32>
    %253 = vector.extract_strided_slice %222 {offsets = [0, 5, 0], sizes = [4, 4, 32], strides = [1, 1, 1]} : vector<4x10x32xf32> to vector<4x4x32xf32>
    %254 = vector.extract_strided_slice %5 {offsets = [40, 0], sizes = [1, 32], strides = [1, 1]} : vector<49x32xf32> to vector<1x32xf32>
    %255 = vector.shape_cast %254 : vector<1x32xf32> to vector<1x1x32xf32>
    %256 = vector.broadcast %255 : vector<1x1x32xf32> to vector<4x4x32xf32>
    %257 = arith.mulf %253, %256 : vector<4x4x32xf32>
    %258 = arith.addf %252, %257 : vector<4x4x32xf32>
    %259 = vector.extract_strided_slice %222 {offsets = [0, 6, 0], sizes = [4, 4, 32], strides = [1, 1, 1]} : vector<4x10x32xf32> to vector<4x4x32xf32>
    %260 = vector.extract_strided_slice %5 {offsets = [41, 0], sizes = [1, 32], strides = [1, 1]} : vector<49x32xf32> to vector<1x32xf32>
    %261 = vector.shape_cast %260 : vector<1x32xf32> to vector<1x1x32xf32>
    %262 = vector.broadcast %261 : vector<1x1x32xf32> to vector<4x4x32xf32>
    %263 = arith.mulf %259, %262 : vector<4x4x32xf32>
    %264 = arith.addf %258, %263 : vector<4x4x32xf32>
    %c6 = arith.constant 6 : index
    %c0_25 = arith.constant 0 : index
    %c0_26 = arith.constant 0 : index
    %265 = vector.load %arg5[%c6, %c0_25, %c0_26] : memref<10x10x32xf32, #tpu.memory_space<vmem>>, vector<4x10x32xf32>
    %266 = vector.extract_strided_slice %265 {offsets = [0, 0, 0], sizes = [4, 4, 32], strides = [1, 1, 1]} : vector<4x10x32xf32> to vector<4x4x32xf32>
    %267 = vector.extract_strided_slice %5 {offsets = [42, 0], sizes = [1, 32], strides = [1, 1]} : vector<49x32xf32> to vector<1x32xf32>
    %268 = vector.shape_cast %267 : vector<1x32xf32> to vector<1x1x32xf32>
    %269 = vector.broadcast %268 : vector<1x1x32xf32> to vector<4x4x32xf32>
    %270 = arith.mulf %266, %269 : vector<4x4x32xf32>
    %271 = arith.addf %264, %270 : vector<4x4x32xf32>
    %272 = vector.extract_strided_slice %265 {offsets = [0, 1, 0], sizes = [4, 4, 32], strides = [1, 1, 1]} : vector<4x10x32xf32> to vector<4x4x32xf32>
    %273 = vector.extract_strided_slice %5 {offsets = [43, 0], sizes = [1, 32], strides = [1, 1]} : vector<49x32xf32> to vector<1x32xf32>
    %274 = vector.shape_cast %273 : vector<1x32xf32> to vector<1x1x32xf32>
    %275 = vector.broadcast %274 : vector<1x1x32xf32> to vector<4x4x32xf32>
    %276 = arith.mulf %272, %275 : vector<4x4x32xf32>
    %277 = arith.addf %271, %276 : vector<4x4x32xf32>
    %278 = vector.extract_strided_slice %265 {offsets = [0, 2, 0], sizes = [4, 4, 32], strides = [1, 1, 1]} : vector<4x10x32xf32> to vector<4x4x32xf32>
    %279 = vector.extract_strided_slice %5 {offsets = [44, 0], sizes = [1, 32], strides = [1, 1]} : vector<49x32xf32> to vector<1x32xf32>
    %280 = vector.shape_cast %279 : vector<1x32xf32> to vector<1x1x32xf32>
    %281 = vector.broadcast %280 : vector<1x1x32xf32> to vector<4x4x32xf32>
    %282 = arith.mulf %278, %281 : vector<4x4x32xf32>
    %283 = arith.addf %277, %282 : vector<4x4x32xf32>
    %284 = vector.extract_strided_slice %265 {offsets = [0, 3, 0], sizes = [4, 4, 32], strides = [1, 1, 1]} : vector<4x10x32xf32> to vector<4x4x32xf32>
    %285 = vector.extract_strided_slice %5 {offsets = [45, 0], sizes = [1, 32], strides = [1, 1]} : vector<49x32xf32> to vector<1x32xf32>
    %286 = vector.shape_cast %285 : vector<1x32xf32> to vector<1x1x32xf32>
    %287 = vector.broadcast %286 : vector<1x1x32xf32> to vector<4x4x32xf32>
    %288 = arith.mulf %284, %287 : vector<4x4x32xf32>
    %289 = arith.addf %283, %288 : vector<4x4x32xf32>
    %290 = vector.extract_strided_slice %265 {offsets = [0, 4, 0], sizes = [4, 4, 32], strides = [1, 1, 1]} : vector<4x10x32xf32> to vector<4x4x32xf32>
    %291 = vector.extract_strided_slice %5 {offsets = [46, 0], sizes = [1, 32], strides = [1, 1]} : vector<49x32xf32> to vector<1x32xf32>
    %292 = vector.shape_cast %291 : vector<1x32xf32> to vector<1x1x32xf32>
    %293 = vector.broadcast %292 : vector<1x1x32xf32> to vector<4x4x32xf32>
    %294 = arith.mulf %290, %293 : vector<4x4x32xf32>
    %295 = arith.addf %289, %294 : vector<4x4x32xf32>
    %296 = vector.extract_strided_slice %265 {offsets = [0, 5, 0], sizes = [4, 4, 32], strides = [1, 1, 1]} : vector<4x10x32xf32> to vector<4x4x32xf32>
    %297 = vector.extract_strided_slice %5 {offsets = [47, 0], sizes = [1, 32], strides = [1, 1]} : vector<49x32xf32> to vector<1x32xf32>
    %298 = vector.shape_cast %297 : vector<1x32xf32> to vector<1x1x32xf32>
    %299 = vector.broadcast %298 : vector<1x1x32xf32> to vector<4x4x32xf32>
    %300 = arith.mulf %296, %299 : vector<4x4x32xf32>
    %301 = arith.addf %295, %300 : vector<4x4x32xf32>
    %302 = vector.extract_strided_slice %265 {offsets = [0, 6, 0], sizes = [4, 4, 32], strides = [1, 1, 1]} : vector<4x10x32xf32> to vector<4x4x32xf32>
    %303 = vector.extract_strided_slice %5 {offsets = [48, 0], sizes = [1, 32], strides = [1, 1]} : vector<49x32xf32> to vector<1x32xf32>
    %304 = vector.shape_cast %303 : vector<1x32xf32> to vector<1x1x32xf32>
    %305 = vector.broadcast %304 : vector<1x1x32xf32> to vector<4x4x32xf32>
    %306 = arith.mulf %302, %305 : vector<4x4x32xf32>
    %307 = arith.addf %301, %306 : vector<4x4x32xf32>
    %c0_27 = arith.constant 0 : index
    %c0_28 = arith.constant 0 : index
    %308 = vector.load %arg3[%c0_27, %c0_28] : memref<1x32xf32, #tpu.memory_space<vmem>>, vector<1x32xf32>
    %309 = vector.shape_cast %308 : vector<1x32xf32> to vector<1x1x32xf32>
    %310 = vector.broadcast %309 : vector<1x1x32xf32> to vector<4x4x32xf32>
    %311 = arith.addf %307, %310 : vector<4x4x32xf32>
    %c0_29 = arith.constant 0 : index
    %c0_30 = arith.constant 0 : index
    %c0_31 = arith.constant 0 : index
    %c0_32 = arith.constant 0 : index
    %312 = vector.load %arg4[%c0_29, %c0_30, %c0_31, %c0_32] : memref<1x4x4x32xf32, #tpu.memory_space<vmem>>, vector<1x4x4x32xf32>
    %313 = vector.shape_cast %312 : vector<1x4x4x32xf32> to vector<4x4x32xf32>
    %314 = vector.shape_cast %311 : vector<4x4x32xf32> to vector<1x4x4x32xf32>
    tpu.vector_store %arg4[%c0_29, %c0_30, %c0_31, %c0_32], %314 {strides = array<i32>} : memref<1x4x4x32xf32, #tpu.memory_space<vmem>>, vector<1x4x4x32xf32>,
    return
  }
  func.func @transform_0(%arg0: i32) -> (i32, i32, i32, i32) {
    %c0_i32 = arith.constant 0 : i32
    %c0_i32_0 = arith.constant 0 : i32
    %c0_i32_1 = arith.constant 0 : i32
    %c0_i32_2 = arith.constant 0 : i32
    return %arg0, %c0_i32, %c0_i32_0, %c0_i32_1 : i32, i32, i32, i32
  }
  func.func @transform_1(%arg0: i32) -> (i32, i32) {
    %c0_i32 = arith.constant 0 : i32
    %c0_i32_0 = arith.constant 0 : i32
    %c0_i32_1 = arith.constant 0 : i32
    return %c0_i32, %c0_i32_0 : i32, i32
  }
  func.func @transform_2(%arg0: i32) -> (i32, i32) {
    %c0_i32 = arith.constant 0 : i32
    %c0_i32_0 = arith.constant 0 : i32
    %c0_i32_1 = arith.constant 0 : i32
    return %c0_i32, %c0_i32_0 : i32, i32
  }
  func.func @transform_3(%arg0: i32) -> (i32, i32, i32, i32) {
    %c0_i32 = arith.constant 0 : i32
    %c0_i32_0 = arith.constant 0 : i32
    %c0_i32_1 = arith.constant 0 : i32
    %c0_i32_2 = arith.constant 0 : i32
    return %arg0, %c0_i32, %c0_i32_0, %c0_i32_1 : i32, i32, i32, i32
  }
}

module attributes {stable_mosaic.version = 11 : i64} {
  func.func @_xattn_kernel(%arg0: i32, %arg1: i32, %arg2: memref<1x16x32xf32, #tpu.memory_space<vmem>>, %arg3: memref<1x16x32xf32, #tpu.memory_space<vmem>>, %arg4: memref<1x32xf32, #tpu.memory_space<vmem>>, %arg5: memref<1x32xf32, #tpu.memory_space<vmem>>, %arg6: memref<32x32xf32, #tpu.memory_space<vmem>>, %arg7: memref<1x32xf32, #tpu.memory_space<vmem>>, %arg8: memref<32x32xf32, #tpu.memory_space<vmem>>, %arg9: memref<1x32xf32, #tpu.memory_space<vmem>>, %arg10: memref<32x32xf32, #tpu.memory_space<vmem>>, %arg11: memref<1x32xf32, #tpu.memory_space<vmem>>, %arg12: memref<32x32xf32, #tpu.memory_space<vmem>>, %arg13: memref<1x32xf32, #tpu.memory_space<vmem>>, %arg14: memref<1x32xf32, #tpu.memory_space<vmem>>, %arg15: memref<1x32xf32, #tpu.memory_space<vmem>>, %arg16: memref<32x128xf32, #tpu.memory_space<vmem>>, %arg17: memref<1x128xf32, #tpu.memory_space<vmem>>, %arg18: memref<128x32xf32, #tpu.memory_space<vmem>>, %arg19: memref<1x32xf32, #tpu.memory_space<vmem>>, %arg20: memref<1x16x32xf32, #tpu.memory_space<vmem>>) attributes {dimension_semantics = [#tpu.dimension_semantics<parallel>, #tpu.dimension_semantics<parallel>], iteration_bounds = array<i64: 2, 1>, scalar_prefetch = 0 : i64, scratch_operands = 0 : i64, tpu.core_type = #tpu.core_type<tc>, window_params = [{transform_indices = @transform_0, window_bounds = array<i64: 1, 16, 32>}, {transform_indices = @transform_1, window_bounds = array<i64: 1, 16, 32>}, {pipeline_mode = #tpu.pipeline_mode<synchronous>, transform_indices = @transform_2, window_bounds = array<i64: 1, 32>}, {pipeline_mode = #tpu.pipeline_mode<synchronous>, transform_indices = @transform_3, window_bounds = array<i64: 1, 32>}, {pipeline_mode = #tpu.pipeline_mode<synchronous>, transform_indices = @transform_4, window_bounds = array<i64: 32, 32>}, {pipeline_mode = #tpu.pipeline_mode<synchronous>, transform_indices = @transform_5, window_bounds = array<i64: 1, 32>}, {pipeline_mode = #tpu.pipeline_mode<synchronous>, transform_indices = @transform_6, window_bounds = array<i64: 32, 32>}, {pipeline_mode = #tpu.pipeline_mode<synchronous>, transform_indices = @transform_7, window_bounds = array<i64: 1, 32>}, {pipeline_mode = #tpu.pipeline_mode<synchronous>, transform_indices = @transform_8, window_bounds = array<i64: 32, 32>}, {pipeline_mode = #tpu.pipeline_mode<synchronous>, transform_indices = @transform_9, window_bounds = array<i64: 1, 32>}, {pipeline_mode = #tpu.pipeline_mode<synchronous>, transform_indices = @transform_10, window_bounds = array<i64: 32, 32>}, {pipeline_mode = #tpu.pipeline_mode<synchronous>, transform_indices = @transform_11, window_bounds = array<i64: 1, 32>}, {pipeline_mode = #tpu.pipeline_mode<synchronous>, transform_indices = @transform_12, window_bounds = array<i64: 1, 32>}, {pipeline_mode = #tpu.pipeline_mode<synchronous>, transform_indices = @transform_13, window_bounds = array<i64: 1, 32>}, {pipeline_mode = #tpu.pipeline_mode<synchronous>, transform_indices = @transform_14, window_bounds = array<i64: 32, 128>}, {pipeline_mode = #tpu.pipeline_mode<synchronous>, transform_indices = @transform_15, window_bounds = array<i64: 1, 128>}, {pipeline_mode = #tpu.pipeline_mode<synchronous>, transform_indices = @transform_16, window_bounds = array<i64: 128, 32>}, {pipeline_mode = #tpu.pipeline_mode<synchronous>, transform_indices = @transform_17, window_bounds = array<i64: 1, 32>}, {transform_indices = @transform_18, window_bounds = array<i64: 1, 16, 32>}]} {
    %c0 = arith.constant 0 : index
    %c0_0 = arith.constant 0 : index
    %c0_1 = arith.constant 0 : index
    %0 = vector.load %arg2[%c0, %c0_0, %c0_1] : memref<1x16x32xf32, #tpu.memory_space<vmem>>, vector<1x16x32xf32>
    %1 = vector.shape_cast %0 : vector<1x16x32xf32> to vector<16x32xf32>
    %c0_2 = arith.constant 0 : index
    %c0_3 = arith.constant 0 : index
    %c0_4 = arith.constant 0 : index
    %2 = vector.load %arg3[%c0_2, %c0_3, %c0_4] : memref<1x16x32xf32, #tpu.memory_space<vmem>>, vector<1x16x32xf32>
    %3 = vector.shape_cast %2 : vector<1x16x32xf32> to vector<16x32xf32>
    %cst = arith.constant dense<0.000000e+00> : vector<16xf32>
    %4 = vector.multi_reduction <add>, %1, %cst [1] : vector<16x32xf32> to vector<16xf32>
    %5 = vector.shape_cast %4 : vector<16xf32> to vector<16x1xf32>
    %cst_5 = arith.constant 3.200000e+01 : f32
    %6 = vector.broadcast %cst_5 : f32 to vector<16x1xf32>
    %7 = arith.divf %5, %6 : vector<16x1xf32>
    %8 = vector.broadcast %7 : vector<16x1xf32> to vector<16x32xf32>
    %9 = arith.subf %1, %8 : vector<16x32xf32>
    %10 = arith.mulf %9, %9 : vector<16x32xf32>
    %cst_6 = arith.constant dense<0.000000e+00> : vector<16xf32>
    %11 = vector.multi_reduction <add>, %10, %cst_6 [1] : vector<16x32xf32> to vector<16xf32>
    %12 = vector.shape_cast %11 : vector<16xf32> to vector<16x1xf32>
    %cst_7 = arith.constant 3.200000e+01 : f32
    %13 = vector.broadcast %cst_7 : f32 to vector<16x1xf32>
    %14 = arith.divf %12, %13 : vector<16x1xf32>
    %15 = vector.broadcast %7 : vector<16x1xf32> to vector<16x32xf32>
    %16 = arith.subf %1, %15 : vector<16x32xf32>
    %cst_8 = arith.constant 9.99999974E-6 : f32
    %17 = vector.broadcast %cst_8 : f32 to vector<16x1xf32>
    %18 = arith.addf %14, %17 : vector<16x1xf32>
    %19 = math.rsqrt %18 : vector<16x1xf32>
    %20 = vector.broadcast %19 : vector<16x1xf32> to vector<16x32xf32>
    %21 = arith.mulf %16, %20 : vector<16x32xf32>
    %c0_9 = arith.constant 0 : index
    %c0_10 = arith.constant 0 : index
    %22 = vector.load %arg4[%c0_9, %c0_10] : memref<1x32xf32, #tpu.memory_space<vmem>>, vector<1x32xf32>
    %23 = vector.broadcast %22 : vector<1x32xf32> to vector<16x32xf32>
    %24 = arith.mulf %21, %23 : vector<16x32xf32>
    %c0_11 = arith.constant 0 : index
    %c0_12 = arith.constant 0 : index
    %25 = vector.load %arg5[%c0_11, %c0_12] : memref<1x32xf32, #tpu.memory_space<vmem>>, vector<1x32xf32>
    %26 = vector.broadcast %25 : vector<1x32xf32> to vector<16x32xf32>
    %27 = arith.addf %24, %26 : vector<16x32xf32>
    %28 = arith.truncf %27 : vector<16x32xf32> to vector<16x32xbf16>
    %c0_13 = arith.constant 0 : index
    %c0_14 = arith.constant 0 : index
    %29 = vector.load %arg6[%c0_13, %c0_14] : memref<32x32xf32, #tpu.memory_space<vmem>>, vector<32x32xf32>
    %30 = arith.truncf %29 : vector<32x32xf32> to vector<32x32xbf16>
    %cst_15 = arith.constant dense<0.000000e+00> : vector<16x32xf32>
    %31 = tpu.matmul %28, %30, %cst_15 {dimension_numbers = #tpu.dot_dimension_numbers<[1], [0], [0], [1], [0, 0, 1, 1], [], []>} : vector<16x32xbf16>, vector<32x32xbf16>, vector<16x32xf32> -> vector<16x32xf32>
    %c0_16 = arith.constant 0 : index
    %c0_17 = arith.constant 0 : index
    %32 = vector.load %arg7[%c0_16, %c0_17] : memref<1x32xf32, #tpu.memory_space<vmem>>, vector<1x32xf32>
    %33 = vector.broadcast %32 : vector<1x32xf32> to vector<16x32xf32>
    %34 = arith.addf %31, %33 : vector<16x32xf32>
    %35 = arith.truncf %3 : vector<16x32xf32> to vector<16x32xbf16>
    %c0_18 = arith.constant 0 : index
    %c0_19 = arith.constant 0 : index
    %36 = vector.load %arg8[%c0_18, %c0_19] : memref<32x32xf32, #tpu.memory_space<vmem>>, vector<32x32xf32>
    %37 = arith.truncf %36 : vector<32x32xf32> to vector<32x32xbf16>
    %cst_20 = arith.constant dense<0.000000e+00> : vector<16x32xf32>
    %38 = tpu.matmul %35, %37, %cst_20 {dimension_numbers = #tpu.dot_dimension_numbers<[1], [0], [0], [1], [0, 0, 1, 1], [], []>} : vector<16x32xbf16>, vector<32x32xbf16>, vector<16x32xf32> -> vector<16x32xf32>
    %c0_21 = arith.constant 0 : index
    %c0_22 = arith.constant 0 : index
    %39 = vector.load %arg9[%c0_21, %c0_22] : memref<1x32xf32, #tpu.memory_space<vmem>>, vector<1x32xf32>
    %40 = vector.broadcast %39 : vector<1x32xf32> to vector<16x32xf32>
    %41 = arith.addf %38, %40 : vector<16x32xf32>
    %42 = arith.truncf %3 : vector<16x32xf32> to vector<16x32xbf16>
    %c0_23 = arith.constant 0 : index
    %c0_24 = arith.constant 0 : index
    %43 = vector.load %arg10[%c0_23, %c0_24] : memref<32x32xf32, #tpu.memory_space<vmem>>, vector<32x32xf32>
    %44 = arith.truncf %43 : vector<32x32xf32> to vector<32x32xbf16>
    %cst_25 = arith.constant dense<0.000000e+00> : vector<16x32xf32>
    %45 = tpu.matmul %42, %44, %cst_25 {dimension_numbers = #tpu.dot_dimension_numbers<[1], [0], [0], [1], [0, 0, 1, 1], [], []>} : vector<16x32xbf16>, vector<32x32xbf16>, vector<16x32xf32> -> vector<16x32xf32>
    %c0_26 = arith.constant 0 : index
    %c0_27 = arith.constant 0 : index
    %46 = vector.load %arg11[%c0_26, %c0_27] : memref<1x32xf32, #tpu.memory_space<vmem>>, vector<1x32xf32>
    %47 = vector.broadcast %46 : vector<1x32xf32> to vector<16x32xf32>
    %48 = arith.addf %45, %47 : vector<16x32xf32>
    %49 = arith.truncf %34 : vector<16x32xf32> to vector<16x32xbf16>
    %50 = tpu.transpose %41, [1, 0] : vector<16x32xf32> -> vector<32x16xf32>
    %51 = arith.truncf %50 : vector<32x16xf32> to vector<32x16xbf16>
    %cst_28 = arith.constant dense<0.000000e+00> : vector<16x16xf32>
    %52 = tpu.matmul %49, %51, %cst_28 {dimension_numbers = #tpu.dot_dimension_numbers<[1], [0], [0], [1], [0, 0, 1, 1], [], []>} : vector<16x32xbf16>, vector<32x16xbf16>, vector<16x16xf32> -> vector<16x16xf32>
    %cst_29 = arith.constant dense<0xFF800000> : vector<16xf32>
    %53 = vector.multi_reduction <maximumf>, %52, %cst_29 [1] : vector<16x16xf32> to vector<16xf32>
    %54 = vector.shape_cast %53 : vector<16xf32> to vector<16x1xf32>
    %55 = vector.broadcast %54 : vector<16x1xf32> to vector<16x16xf32>
    %56 = arith.subf %52, %55 : vector<16x16xf32>
    %57 = math.exp %56 : vector<16x16xf32>
    %cst_30 = arith.constant dense<0.000000e+00> : vector<16xf32>
    %58 = vector.multi_reduction <add>, %57, %cst_30 [1] : vector<16x16xf32> to vector<16xf32>
    %59 = vector.shape_cast %58 : vector<16xf32> to vector<16x1xf32>
    %60 = tpu.reciprocal %59 {approx = true} : vector<16x1xf32> -> vector<16x1xf32>
    %61 = vector.broadcast %60 : vector<16x1xf32> to vector<16x16xf32>
    %62 = arith.mulf %57, %61 : vector<16x16xf32>
    %63 = arith.truncf %62 : vector<16x16xf32> to vector<16x16xbf16>
    %64 = arith.truncf %48 : vector<16x32xf32> to vector<16x32xbf16>
    %cst_31 = arith.constant dense<0.000000e+00> : vector<16x32xf32>
    %65 = tpu.matmul %63, %64, %cst_31 {dimension_numbers = #tpu.dot_dimension_numbers<[1], [0], [0], [1], [0, 0, 1, 1], [], []>} : vector<16x16xbf16>, vector<16x32xbf16>, vector<16x32xf32> -> vector<16x32xf32>
    %66 = arith.truncf %65 : vector<16x32xf32> to vector<16x32xbf16>
    %c0_32 = arith.constant 0 : index
    %c0_33 = arith.constant 0 : index
    %67 = vector.load %arg12[%c0_32, %c0_33] : memref<32x32xf32, #tpu.memory_space<vmem>>, vector<32x32xf32>
    %68 = arith.truncf %67 : vector<32x32xf32> to vector<32x32xbf16>
    %cst_34 = arith.constant dense<0.000000e+00> : vector<16x32xf32>
    %69 = tpu.matmul %66, %68, %cst_34 {dimension_numbers = #tpu.dot_dimension_numbers<[1], [0], [0], [1], [0, 0, 1, 1], [], []>} : vector<16x32xbf16>, vector<32x32xbf16>, vector<16x32xf32> -> vector<16x32xf32>
    %70 = arith.addf %1, %69 : vector<16x32xf32>
    %c0_35 = arith.constant 0 : index
    %c0_36 = arith.constant 0 : index
    %71 = vector.load %arg13[%c0_35, %c0_36] : memref<1x32xf32, #tpu.memory_space<vmem>>, vector<1x32xf32>
    %72 = vector.broadcast %71 : vector<1x32xf32> to vector<16x32xf32>
    %73 = arith.addf %70, %72 : vector<16x32xf32>
    %cst_37 = arith.constant dense<0.000000e+00> : vector<16xf32>
    %74 = vector.multi_reduction <add>, %73, %cst_37 [1] : vector<16x32xf32> to vector<16xf32>
    %75 = vector.shape_cast %74 : vector<16xf32> to vector<16x1xf32>
    %cst_38 = arith.constant 3.200000e+01 : f32
    %76 = vector.broadcast %cst_38 : f32 to vector<16x1xf32>
    %77 = arith.divf %75, %76 : vector<16x1xf32>
    %78 = vector.broadcast %77 : vector<16x1xf32> to vector<16x32xf32>
    %79 = arith.subf %73, %78 : vector<16x32xf32>
    %80 = arith.mulf %79, %79 : vector<16x32xf32>
    %cst_39 = arith.constant dense<0.000000e+00> : vector<16xf32>
    %81 = vector.multi_reduction <add>, %80, %cst_39 [1] : vector<16x32xf32> to vector<16xf32>
    %82 = vector.shape_cast %81 : vector<16xf32> to vector<16x1xf32>
    %cst_40 = arith.constant 3.200000e+01 : f32
    %83 = vector.broadcast %cst_40 : f32 to vector<16x1xf32>
    %84 = arith.divf %82, %83 : vector<16x1xf32>
    %85 = vector.broadcast %77 : vector<16x1xf32> to vector<16x32xf32>
    %86 = arith.subf %73, %85 : vector<16x32xf32>
    %cst_41 = arith.constant 9.99999974E-6 : f32
    %87 = vector.broadcast %cst_41 : f32 to vector<16x1xf32>
    %88 = arith.addf %84, %87 : vector<16x1xf32>
    %89 = math.rsqrt %88 : vector<16x1xf32>
    %90 = vector.broadcast %89 : vector<16x1xf32> to vector<16x32xf32>
    %91 = arith.mulf %86, %90 : vector<16x32xf32>
    %c0_42 = arith.constant 0 : index
    %c0_43 = arith.constant 0 : index
    %92 = vector.load %arg14[%c0_42, %c0_43] : memref<1x32xf32, #tpu.memory_space<vmem>>, vector<1x32xf32>
    %93 = vector.broadcast %92 : vector<1x32xf32> to vector<16x32xf32>
    %94 = arith.mulf %91, %93 : vector<16x32xf32>
    %c0_44 = arith.constant 0 : index
    %c0_45 = arith.constant 0 : index
    %95 = vector.load %arg15[%c0_44, %c0_45] : memref<1x32xf32, #tpu.memory_space<vmem>>, vector<1x32xf32>
    %96 = vector.broadcast %95 : vector<1x32xf32> to vector<16x32xf32>
    %97 = arith.addf %94, %96 : vector<16x32xf32>
    %98 = arith.truncf %97 : vector<16x32xf32> to vector<16x32xbf16>
    %c0_46 = arith.constant 0 : index
    %c0_47 = arith.constant 0 : index
    %99 = vector.load %arg16[%c0_46, %c0_47] : memref<32x128xf32, #tpu.memory_space<vmem>>, vector<32x128xf32>
    %100 = arith.truncf %99 : vector<32x128xf32> to vector<32x128xbf16>
    %cst_48 = arith.constant dense<0.000000e+00> : vector<16x128xf32>
    %101 = tpu.matmul %98, %100, %cst_48 {dimension_numbers = #tpu.dot_dimension_numbers<[1], [0], [0], [1], [0, 0, 1, 1], [], []>} : vector<16x32xbf16>, vector<32x128xbf16>, vector<16x128xf32> -> vector<16x128xf32>
    %c0_49 = arith.constant 0 : index
    %c0_50 = arith.constant 0 : index
    %102 = vector.load %arg17[%c0_49, %c0_50] : memref<1x128xf32, #tpu.memory_space<vmem>>, vector<1x128xf32>
    %103 = vector.broadcast %102 : vector<1x128xf32> to vector<16x128xf32>
    %104 = arith.addf %101, %103 : vector<16x128xf32>
    %105 = arith.mulf %104, %104 : vector<16x128xf32>
    %106 = arith.mulf %104, %105 : vector<16x128xf32>
    %cst_51 = arith.constant 4.471500e-02 : f32
    %107 = vector.broadcast %cst_51 : f32 to vector<16x128xf32>
    %108 = arith.mulf %107, %106 : vector<16x128xf32>
    %109 = arith.addf %104, %108 : vector<16x128xf32>
    %cst_52 = arith.constant 0.797884583 : f32
    %110 = vector.broadcast %cst_52 : f32 to vector<16x128xf32>
    %111 = arith.mulf %110, %109 : vector<16x128xf32>
    %112 = math.tanh %111 : vector<16x128xf32>
    %cst_53 = arith.constant 1.000000e+00 : f32
    %113 = vector.broadcast %cst_53 : f32 to vector<16x128xf32>
    %114 = arith.addf %113, %112 : vector<16x128xf32>
    %cst_54 = arith.constant 5.000000e-01 : f32
    %115 = vector.broadcast %cst_54 : f32 to vector<16x128xf32>
    %116 = arith.mulf %115, %114 : vector<16x128xf32>
    %117 = arith.mulf %104, %116 : vector<16x128xf32>
    %118 = arith.truncf %117 : vector<16x128xf32> to vector<16x128xbf16>
    %c0_55 = arith.constant 0 : index
    %c0_56 = arith.constant 0 : index
    %119 = vector.load %arg18[%c0_55, %c0_56] : memref<128x32xf32, #tpu.memory_space<vmem>>, vector<128x32xf32>
    %120 = arith.truncf %119 : vector<128x32xf32> to vector<128x32xbf16>
    %cst_57 = arith.constant dense<0.000000e+00> : vector<16x32xf32>
    %121 = tpu.matmul %118, %120, %cst_57 {dimension_numbers = #tpu.dot_dimension_numbers<[1], [0], [0], [1], [0, 0, 1, 1], [], []>} : vector<16x128xbf16>, vector<128x32xbf16>, vector<16x32xf32> -> vector<16x32xf32>
    %122 = arith.addf %73, %121 : vector<16x32xf32>
    %c0_58 = arith.constant 0 : index
    %c0_59 = arith.constant 0 : index
    %123 = vector.load %arg19[%c0_58, %c0_59] : memref<1x32xf32, #tpu.memory_space<vmem>>, vector<1x32xf32>
    %124 = vector.broadcast %123 : vector<1x32xf32> to vector<16x32xf32>
    %125 = arith.addf %122, %124 : vector<16x32xf32>
    %c0_60 = arith.constant 0 : index
    %c0_61 = arith.constant 0 : index
    %c0_62 = arith.constant 0 : index
    %126 = vector.load %arg20[%c0_60, %c0_61, %c0_62] : memref<1x16x32xf32, #tpu.memory_space<vmem>>, vector<1x16x32xf32>
    %127 = vector.shape_cast %126 : vector<1x16x32xf32> to vector<16x32xf32>
    %128 = vector.shape_cast %125 : vector<16x32xf32> to vector<1x16x32xf32>
    tpu.vector_store %arg20[%c0_60, %c0_61, %c0_62], %128 {strides = array<i32>} : memref<1x16x32xf32, #tpu.memory_space<vmem>>, vector<1x16x32xf32>,
    return
  }
  func.func @transform_0(%arg0: i32, %arg1: i32) -> (i32, i32, i32) {
    %c0_i32 = arith.constant 0 : i32
    %c0_i32_0 = arith.constant 0 : i32
    return %arg0, %arg1, %c0_i32 : i32, i32, i32
  }
  func.func @transform_1(%arg0: i32, %arg1: i32) -> (i32, i32, i32) {
    %c0_i32 = arith.constant 0 : i32
    %c0_i32_0 = arith.constant 0 : i32
    %c0_i32_1 = arith.constant 0 : i32
    return %arg0, %c0_i32, %c0_i32_0 : i32, i32, i32
  }
  func.func @transform_2(%arg0: i32, %arg1: i32) -> (i32, i32) {
    %c0_i32 = arith.constant 0 : i32
    %c0_i32_0 = arith.constant 0 : i32
    %c0_i32_1 = arith.constant 0 : i32
    return %c0_i32, %c0_i32_0 : i32, i32
  }
  func.func @transform_3(%arg0: i32, %arg1: i32) -> (i32, i32) {
    %c0_i32 = arith.constant 0 : i32
    %c0_i32_0 = arith.constant 0 : i32
    %c0_i32_1 = arith.constant 0 : i32
    return %c0_i32, %c0_i32_0 : i32, i32
  }
  func.func @transform_4(%arg0: i32, %arg1: i32) -> (i32, i32) {
    %c0_i32 = arith.constant 0 : i32
    %c0_i32_0 = arith.constant 0 : i32
    %c0_i32_1 = arith.constant 0 : i32
    return %c0_i32, %c0_i32_0 : i32, i32
  }
  func.func @transform_5(%arg0: i32, %arg1: i32) -> (i32, i32) {
    %c0_i32 = arith.constant 0 : i32
    %c0_i32_0 = arith.constant 0 : i32
    %c0_i32_1 = arith.constant 0 : i32
    return %c0_i32, %c0_i32_0 : i32, i32
  }
  func.func @transform_6(%arg0: i32, %arg1: i32) -> (i32, i32) {
    %c0_i32 = arith.constant 0 : i32
    %c0_i32_0 = arith.constant 0 : i32
    %c0_i32_1 = arith.constant 0 : i32
    return %c0_i32, %c0_i32_0 : i32, i32
  }
  func.func @transform_7(%arg0: i32, %arg1: i32) -> (i32, i32) {
    %c0_i32 = arith.constant 0 : i32
    %c0_i32_0 = arith.constant 0 : i32
    %c0_i32_1 = arith.constant 0 : i32
    return %c0_i32, %c0_i32_0 : i32, i32
  }
  func.func @transform_8(%arg0: i32, %arg1: i32) -> (i32, i32) {
    %c0_i32 = arith.constant 0 : i32
    %c0_i32_0 = arith.constant 0 : i32
    %c0_i32_1 = arith.constant 0 : i32
    return %c0_i32, %c0_i32_0 : i32, i32
  }
  func.func @transform_9(%arg0: i32, %arg1: i32) -> (i32, i32) {
    %c0_i32 = arith.constant 0 : i32
    %c0_i32_0 = arith.constant 0 : i32
    %c0_i32_1 = arith.constant 0 : i32
    return %c0_i32, %c0_i32_0 : i32, i32
  }
  func.func @transform_10(%arg0: i32, %arg1: i32) -> (i32, i32) {
    %c0_i32 = arith.constant 0 : i32
    %c0_i32_0 = arith.constant 0 : i32
    %c0_i32_1 = arith.constant 0 : i32
    return %c0_i32, %c0_i32_0 : i32, i32
  }
  func.func @transform_11(%arg0: i32, %arg1: i32) -> (i32, i32) {
    %c0_i32 = arith.constant 0 : i32
    %c0_i32_0 = arith.constant 0 : i32
    %c0_i32_1 = arith.constant 0 : i32
    return %c0_i32, %c0_i32_0 : i32, i32
  }
  func.func @transform_12(%arg0: i32, %arg1: i32) -> (i32, i32) {
    %c0_i32 = arith.constant 0 : i32
    %c0_i32_0 = arith.constant 0 : i32
    %c0_i32_1 = arith.constant 0 : i32
    return %c0_i32, %c0_i32_0 : i32, i32
  }
  func.func @transform_13(%arg0: i32, %arg1: i32) -> (i32, i32) {
    %c0_i32 = arith.constant 0 : i32
    %c0_i32_0 = arith.constant 0 : i32
    %c0_i32_1 = arith.constant 0 : i32
    return %c0_i32, %c0_i32_0 : i32, i32
  }
  func.func @transform_14(%arg0: i32, %arg1: i32) -> (i32, i32) {
    %c0_i32 = arith.constant 0 : i32
    %c0_i32_0 = arith.constant 0 : i32
    %c0_i32_1 = arith.constant 0 : i32
    return %c0_i32, %c0_i32_0 : i32, i32
  }
  func.func @transform_15(%arg0: i32, %arg1: i32) -> (i32, i32) {
    %c0_i32 = arith.constant 0 : i32
    %c0_i32_0 = arith.constant 0 : i32
    %c0_i32_1 = arith.constant 0 : i32
    return %c0_i32, %c0_i32_0 : i32, i32
  }
  func.func @transform_16(%arg0: i32, %arg1: i32) -> (i32, i32) {
    %c0_i32 = arith.constant 0 : i32
    %c0_i32_0 = arith.constant 0 : i32
    %c0_i32_1 = arith.constant 0 : i32
    return %c0_i32, %c0_i32_0 : i32, i32
  }
  func.func @transform_17(%arg0: i32, %arg1: i32) -> (i32, i32) {
    %c0_i32 = arith.constant 0 : i32
    %c0_i32_0 = arith.constant 0 : i32
    %c0_i32_1 = arith.constant 0 : i32
    return %c0_i32, %c0_i32_0 : i32, i32
  }
  func.func @transform_18(%arg0: i32, %arg1: i32) -> (i32, i32, i32) {
    %c0_i32 = arith.constant 0 : i32
    %c0_i32_0 = arith.constant 0 : i32
    return %arg0, %arg1, %c0_i32 : i32, i32, i32
  }
}

module attributes {stable_mosaic.version = 11 : i64} {
  func.func @_convnext_mlp_kernel(%arg0: i32, %arg1: memref<32x32xf32, #tpu.memory_space<vmem>>, %arg2: memref<32x32xf32, #tpu.memory_space<vmem>>, %arg3: memref<1x32xf32, #tpu.memory_space<vmem>>, %arg4: memref<1x32xf32, #tpu.memory_space<vmem>>, %arg5: memref<32x128xf32, #tpu.memory_space<vmem>>, %arg6: memref<1x128xf32, #tpu.memory_space<vmem>>, %arg7: memref<128x32xf32, #tpu.memory_space<vmem>>, %arg8: memref<1x32xf32, #tpu.memory_space<vmem>>, %arg9: memref<32x32xf32, #tpu.memory_space<vmem>>) attributes {dimension_semantics = [#tpu.dimension_semantics<parallel>], iteration_bounds = array<i64: 1>, scalar_prefetch = 0 : i64, scratch_operands = 0 : i64, tpu.core_type = #tpu.core_type<tc>, window_params = [{transform_indices = @transform_0, window_bounds = array<i64: 32, 32>}, {transform_indices = @transform_1, window_bounds = array<i64: 32, 32>}, {pipeline_mode = #tpu.pipeline_mode<synchronous>, transform_indices = @transform_2, window_bounds = array<i64: 1, 32>}, {pipeline_mode = #tpu.pipeline_mode<synchronous>, transform_indices = @transform_3, window_bounds = array<i64: 1, 32>}, {pipeline_mode = #tpu.pipeline_mode<synchronous>, transform_indices = @transform_4, window_bounds = array<i64: 32, 128>}, {pipeline_mode = #tpu.pipeline_mode<synchronous>, transform_indices = @transform_5, window_bounds = array<i64: 1, 128>}, {pipeline_mode = #tpu.pipeline_mode<synchronous>, transform_indices = @transform_6, window_bounds = array<i64: 128, 32>}, {pipeline_mode = #tpu.pipeline_mode<synchronous>, transform_indices = @transform_7, window_bounds = array<i64: 1, 32>}, {transform_indices = @transform_8, window_bounds = array<i64: 32, 32>}]} {
    %c0 = arith.constant 0 : index
    %c0_0 = arith.constant 0 : index
    %0 = vector.load %arg1[%c0, %c0_0] : memref<32x32xf32, #tpu.memory_space<vmem>>, vector<32x32xf32>
    %cst = arith.constant dense<0.000000e+00> : vector<32xf32>
    %1 = vector.multi_reduction <add>, %0, %cst [1] : vector<32x32xf32> to vector<32xf32>
    %2 = vector.shape_cast %1 : vector<32xf32> to vector<32x1xf32>
    %cst_1 = arith.constant 3.200000e+01 : f32
    %3 = vector.broadcast %cst_1 : f32 to vector<32x1xf32>
    %4 = arith.divf %2, %3 : vector<32x1xf32>
    %5 = vector.broadcast %4 : vector<32x1xf32> to vector<32x32xf32>
    %6 = arith.subf %0, %5 : vector<32x32xf32>
    %7 = arith.mulf %6, %6 : vector<32x32xf32>
    %cst_2 = arith.constant dense<0.000000e+00> : vector<32xf32>
    %8 = vector.multi_reduction <add>, %7, %cst_2 [1] : vector<32x32xf32> to vector<32xf32>
    %9 = vector.shape_cast %8 : vector<32xf32> to vector<32x1xf32>
    %cst_3 = arith.constant 3.200000e+01 : f32
    %10 = vector.broadcast %cst_3 : f32 to vector<32x1xf32>
    %11 = arith.divf %9, %10 : vector<32x1xf32>
    %12 = vector.broadcast %4 : vector<32x1xf32> to vector<32x32xf32>
    %13 = arith.subf %0, %12 : vector<32x32xf32>
    %cst_4 = arith.constant 9.99999997E-7 : f32
    %14 = vector.broadcast %cst_4 : f32 to vector<32x1xf32>
    %15 = arith.addf %11, %14 : vector<32x1xf32>
    %16 = math.rsqrt %15 : vector<32x1xf32>
    %17 = vector.broadcast %16 : vector<32x1xf32> to vector<32x32xf32>
    %18 = arith.mulf %13, %17 : vector<32x32xf32>
    %c0_5 = arith.constant 0 : index
    %c0_6 = arith.constant 0 : index
    %19 = vector.load %arg3[%c0_5, %c0_6] : memref<1x32xf32, #tpu.memory_space<vmem>>, vector<1x32xf32>
    %20 = vector.broadcast %19 : vector<1x32xf32> to vector<32x32xf32>
    %21 = arith.mulf %18, %20 : vector<32x32xf32>
    %c0_7 = arith.constant 0 : index
    %c0_8 = arith.constant 0 : index
    %22 = vector.load %arg4[%c0_7, %c0_8] : memref<1x32xf32, #tpu.memory_space<vmem>>, vector<1x32xf32>
    %23 = vector.broadcast %22 : vector<1x32xf32> to vector<32x32xf32>
    %24 = arith.addf %21, %23 : vector<32x32xf32>
    %25 = arith.truncf %24 : vector<32x32xf32> to vector<32x32xbf16>
    %c0_9 = arith.constant 0 : index
    %c0_10 = arith.constant 0 : index
    %26 = vector.load %arg5[%c0_9, %c0_10] : memref<32x128xf32, #tpu.memory_space<vmem>>, vector<32x128xf32>
    %27 = arith.truncf %26 : vector<32x128xf32> to vector<32x128xbf16>
    %cst_11 = arith.constant dense<0.000000e+00> : vector<32x128xf32>
    %28 = tpu.matmul %25, %27, %cst_11 {dimension_numbers = #tpu.dot_dimension_numbers<[1], [0], [0], [1], [0, 0, 1, 1], [], []>} : vector<32x32xbf16>, vector<32x128xbf16>, vector<32x128xf32> -> vector<32x128xf32>
    %c0_12 = arith.constant 0 : index
    %c0_13 = arith.constant 0 : index
    %29 = vector.load %arg6[%c0_12, %c0_13] : memref<1x128xf32, #tpu.memory_space<vmem>>, vector<1x128xf32>
    %30 = vector.broadcast %29 : vector<1x128xf32> to vector<32x128xf32>
    %31 = arith.addf %28, %30 : vector<32x128xf32>
    %32 = arith.mulf %31, %31 : vector<32x128xf32>
    %33 = arith.mulf %31, %32 : vector<32x128xf32>
    %cst_14 = arith.constant 4.471500e-02 : f32
    %34 = vector.broadcast %cst_14 : f32 to vector<32x128xf32>
    %35 = arith.mulf %34, %33 : vector<32x128xf32>
    %36 = arith.addf %31, %35 : vector<32x128xf32>
    %cst_15 = arith.constant 0.797884583 : f32
    %37 = vector.broadcast %cst_15 : f32 to vector<32x128xf32>
    %38 = arith.mulf %37, %36 : vector<32x128xf32>
    %39 = math.tanh %38 : vector<32x128xf32>
    %cst_16 = arith.constant 1.000000e+00 : f32
    %40 = vector.broadcast %cst_16 : f32 to vector<32x128xf32>
    %41 = arith.addf %40, %39 : vector<32x128xf32>
    %cst_17 = arith.constant 5.000000e-01 : f32
    %42 = vector.broadcast %cst_17 : f32 to vector<32x128xf32>
    %43 = arith.mulf %42, %41 : vector<32x128xf32>
    %44 = arith.mulf %31, %43 : vector<32x128xf32>
    %45 = arith.truncf %44 : vector<32x128xf32> to vector<32x128xbf16>
    %c0_18 = arith.constant 0 : index
    %c0_19 = arith.constant 0 : index
    %46 = vector.load %arg7[%c0_18, %c0_19] : memref<128x32xf32, #tpu.memory_space<vmem>>, vector<128x32xf32>
    %47 = arith.truncf %46 : vector<128x32xf32> to vector<128x32xbf16>
    %cst_20 = arith.constant dense<0.000000e+00> : vector<32x32xf32>
    %48 = tpu.matmul %45, %47, %cst_20 {dimension_numbers = #tpu.dot_dimension_numbers<[1], [0], [0], [1], [0, 0, 1, 1], [], []>} : vector<32x128xbf16>, vector<128x32xbf16>, vector<32x32xf32> -> vector<32x32xf32>
    %c0_21 = arith.constant 0 : index
    %c0_22 = arith.constant 0 : index
    %49 = vector.load %arg8[%c0_21, %c0_22] : memref<1x32xf32, #tpu.memory_space<vmem>>, vector<1x32xf32>
    %50 = vector.broadcast %49 : vector<1x32xf32> to vector<32x32xf32>
    %51 = arith.addf %48, %50 : vector<32x32xf32>
    %c0_23 = arith.constant 0 : index
    %c0_24 = arith.constant 0 : index
    %52 = vector.load %arg2[%c0_23, %c0_24] : memref<32x32xf32, #tpu.memory_space<vmem>>, vector<32x32xf32>
    %53 = arith.addf %51, %52 : vector<32x32xf32>
    %c0_25 = arith.constant 0 : index
    %c0_26 = arith.constant 0 : index
    %54 = vector.load %arg9[%c0_25, %c0_26] : memref<32x32xf32, #tpu.memory_space<vmem>>, vector<32x32xf32>
    tpu.vector_store %arg9[%c0_25, %c0_26], %53 {strides = array<i32>} : memref<32x32xf32, #tpu.memory_space<vmem>>, vector<32x32xf32>,
    return
  }
  func.func @transform_0(%arg0: i32) -> (i32, i32) {
    %c0_i32 = arith.constant 0 : i32
    %c0_i32_0 = arith.constant 0 : i32
    return %arg0, %c0_i32 : i32, i32
  }
  func.func @transform_1(%arg0: i32) -> (i32, i32) {
    %c0_i32 = arith.constant 0 : i32
    %c0_i32_0 = arith.constant 0 : i32
    return %arg0, %c0_i32 : i32, i32
  }
  func.func @transform_2(%arg0: i32) -> (i32, i32) {
    %c0_i32 = arith.constant 0 : i32
    %c0_i32_0 = arith.constant 0 : i32
    %c0_i32_1 = arith.constant 0 : i32
    return %c0_i32, %c0_i32_0 : i32, i32
  }
  func.func @transform_3(%arg0: i32) -> (i32, i32) {
    %c0_i32 = arith.constant 0 : i32
    %c0_i32_0 = arith.constant 0 : i32
    %c0_i32_1 = arith.constant 0 : i32
    return %c0_i32, %c0_i32_0 : i32, i32
  }
  func.func @transform_4(%arg0: i32) -> (i32, i32) {
    %c0_i32 = arith.constant 0 : i32
    %c0_i32_0 = arith.constant 0 : i32
    %c0_i32_1 = arith.constant 0 : i32
    return %c0_i32, %c0_i32_0 : i32, i32
  }
  func.func @transform_5(%arg0: i32) -> (i32, i32) {
    %c0_i32 = arith.constant 0 : i32
    %c0_i32_0 = arith.constant 0 : i32
    %c0_i32_1 = arith.constant 0 : i32
    return %c0_i32, %c0_i32_0 : i32, i32
  }
  func.func @transform_6(%arg0: i32) -> (i32, i32) {
    %c0_i32 = arith.constant 0 : i32
    %c0_i32_0 = arith.constant 0 : i32
    %c0_i32_1 = arith.constant 0 : i32
    return %c0_i32, %c0_i32_0 : i32, i32
  }
  func.func @transform_7(%arg0: i32) -> (i32, i32) {
    %c0_i32 = arith.constant 0 : i32
    %c0_i32_0 = arith.constant 0 : i32
    %c0_i32_1 = arith.constant 0 : i32
    return %c0_i32, %c0_i32_0 : i32, i32
  }
  func.func @transform_8(%arg0: i32) -> (i32, i32) {
    %c0_i32 = arith.constant 0 : i32
    %c0_i32_0 = arith.constant 0 : i32
    return %arg0, %c0_i32 : i32, i32
  }
}

module attributes {stable_mosaic.version = 11 : i64} {
  func.func @_dwconv_kernel(%arg0: i32, %arg1: memref<1x4x4x32xf32, #tpu.memory_space<vmem>>, %arg2: memref<49x32xf32, #tpu.memory_space<vmem>>, %arg3: memref<1x32xf32, #tpu.memory_space<vmem>>, %arg4: memref<1x4x4x32xf32, #tpu.memory_space<vmem>>, %arg5: memref<10x10x32xf32, #tpu.memory_space<vmem>>) attributes {dimension_semantics = [#tpu.dimension_semantics<parallel>], iteration_bounds = array<i64: 2>, scalar_prefetch = 0 : i64, scratch_operands = 1 : i64, tpu.core_type = #tpu.core_type<tc>, window_params = [{transform_indices = @transform_0, window_bounds = array<i64: 1, 4, 4, 32>}, {pipeline_mode = #tpu.pipeline_mode<synchronous>, transform_indices = @transform_1, window_bounds = array<i64: 49, 32>}, {pipeline_mode = #tpu.pipeline_mode<synchronous>, transform_indices = @transform_2, window_bounds = array<i64: 1, 32>}, {transform_indices = @transform_3, window_bounds = array<i64: 1, 4, 4, 32>}]} {
    %c0 = arith.constant 0 : index
    %c0_0 = arith.constant 0 : index
    %c0_1 = arith.constant 0 : index
    %c0_2 = arith.constant 0 : index
    %0 = vector.load %arg1[%c0, %c0_0, %c0_1, %c0_2] : memref<1x4x4x32xf32, #tpu.memory_space<vmem>>, vector<1x4x4x32xf32>
    %1 = vector.shape_cast %0 : vector<1x4x4x32xf32> to vector<4x4x32xf32>
    %cst = arith.constant 0.000000e+00 : f32
    %2 = vector.broadcast %cst : f32 to vector<10x10x32xf32>
    %c0_3 = arith.constant 0 : index
    %c0_4 = arith.constant 0 : index
    %c0_5 = arith.constant 0 : index
    %3 = vector.load %arg5[%c0_3, %c0_4, %c0_5] : memref<10x10x32xf32, #tpu.memory_space<vmem>>, vector<10x10x32xf32>
    tpu.vector_store %arg5[%c0_3, %c0_4, %c0_5], %2 {strides = array<i32>} : memref<10x10x32xf32, #tpu.memory_space<vmem>>, vector<10x10x32xf32>,
    %c3 = arith.constant 3 : index
    %c3_6 = arith.constant 3 : index
    %c0_7 = arith.constant 0 : index
    %4 = vector.load %arg5[%c3, %c3_6, %c0_7] : memref<10x10x32xf32, #tpu.memory_space<vmem>>, vector<4x4x32xf32>
    tpu.vector_store %arg5[%c3, %c3_6, %c0_7], %1 {strides = array<i32>} : memref<10x10x32xf32, #tpu.memory_space<vmem>>, vector<4x4x32xf32>,
    %c0_8 = arith.constant 0 : index
    %c0_9 = arith.constant 0 : index
    %5 = vector.load %arg2[%c0_8, %c0_9] : memref<49x32xf32, #tpu.memory_space<vmem>>, vector<49x32xf32>
    %cst_10 = arith.constant 0.000000e+00 : f32
    %6 = vector.broadcast %cst_10 : f32 to vector<4x4x32xf32>
    %c0_11 = arith.constant 0 : index
    %c0_12 = arith.constant 0 : index
    %c0_13 = arith.constant 0 : index
    %7 = vector.load %arg5[%c0_11, %c0_12, %c0_13] : memref<10x10x32xf32, #tpu.memory_space<vmem>>, vector<4x10x32xf32>
    %8 = vector.extract_strided_slice %7 {offsets = [0, 0, 0], sizes = [4, 4, 32], strides = [1, 1, 1]} : vector<4x10x32xf32> to vector<4x4x32xf32>
    %9 = vector.extract_strided_slice %5 {offsets = [0, 0], sizes = [1, 32], strides = [1, 1]} : vector<49x32xf32> to vector<1x32xf32>
    %10 = vector.shape_cast %9 : vector<1x32xf32> to vector<1x1x32xf32>
    %11 = vector.broadcast %10 : vector<1x1x32xf32> to vector<4x4x32xf32>
    %12 = arith.mulf %8, %11 : vector<4x4x32xf32>
    %13 = arith.addf %6, %12 : vector<4x4x32xf32>
    %14 = vector.extract_strided_slice %7 {offsets = [0, 1, 0], sizes = [4, 4, 32], strides = [1, 1, 1]} : vector<4x10x32xf32> to vector<4x4x32xf32>
    %15 = vector.extract_strided_slice %5 {offsets = [1, 0], sizes = [1, 32], strides = [1, 1]} : vector<49x32xf32> to vector<1x32xf32>
    %16 = vector.shape_cast %15 : vector<1x32xf32> to vector<1x1x32xf32>
    %17 = vector.broadcast %16 : vector<1x1x32xf32> to vector<4x4x32xf32>
    %18 = arith.mulf %14, %17 : vector<4x4x32xf32>
    %19 = arith.addf %13, %18 : vector<4x4x32xf32>
    %20 = vector.extract_strided_slice %7 {offsets = [0, 2, 0], sizes = [4, 4, 32], strides = [1, 1, 1]} : vector<4x10x32xf32> to vector<4x4x32xf32>
    %21 = vector.extract_strided_slice %5 {offsets = [2, 0], sizes = [1, 32], strides = [1, 1]} : vector<49x32xf32> to vector<1x32xf32>
    %22 = vector.shape_cast %21 : vector<1x32xf32> to vector<1x1x32xf32>
    %23 = vector.broadcast %22 : vector<1x1x32xf32> to vector<4x4x32xf32>
    %24 = arith.mulf %20, %23 : vector<4x4x32xf32>
    %25 = arith.addf %19, %24 : vector<4x4x32xf32>
    %26 = vector.extract_strided_slice %7 {offsets = [0, 3, 0], sizes = [4, 4, 32], strides = [1, 1, 1]} : vector<4x10x32xf32> to vector<4x4x32xf32>
    %27 = vector.extract_strided_slice %5 {offsets = [3, 0], sizes = [1, 32], strides = [1, 1]} : vector<49x32xf32> to vector<1x32xf32>
    %28 = vector.shape_cast %27 : vector<1x32xf32> to vector<1x1x32xf32>
    %29 = vector.broadcast %28 : vector<1x1x32xf32> to vector<4x4x32xf32>
    %30 = arith.mulf %26, %29 : vector<4x4x32xf32>
    %31 = arith.addf %25, %30 : vector<4x4x32xf32>
    %32 = vector.extract_strided_slice %7 {offsets = [0, 4, 0], sizes = [4, 4, 32], strides = [1, 1, 1]} : vector<4x10x32xf32> to vector<4x4x32xf32>
    %33 = vector.extract_strided_slice %5 {offsets = [4, 0], sizes = [1, 32], strides = [1, 1]} : vector<49x32xf32> to vector<1x32xf32>
    %34 = vector.shape_cast %33 : vector<1x32xf32> to vector<1x1x32xf32>
    %35 = vector.broadcast %34 : vector<1x1x32xf32> to vector<4x4x32xf32>
    %36 = arith.mulf %32, %35 : vector<4x4x32xf32>
    %37 = arith.addf %31, %36 : vector<4x4x32xf32>
    %38 = vector.extract_strided_slice %7 {offsets = [0, 5, 0], sizes = [4, 4, 32], strides = [1, 1, 1]} : vector<4x10x32xf32> to vector<4x4x32xf32>
    %39 = vector.extract_strided_slice %5 {offsets = [5, 0], sizes = [1, 32], strides = [1, 1]} : vector<49x32xf32> to vector<1x32xf32>
    %40 = vector.shape_cast %39 : vector<1x32xf32> to vector<1x1x32xf32>
    %41 = vector.broadcast %40 : vector<1x1x32xf32> to vector<4x4x32xf32>
    %42 = arith.mulf %38, %41 : vector<4x4x32xf32>
    %43 = arith.addf %37, %42 : vector<4x4x32xf32>
    %44 = vector.extract_strided_slice %7 {offsets = [0, 6, 0], sizes = [4, 4, 32], strides = [1, 1, 1]} : vector<4x10x32xf32> to vector<4x4x32xf32>
    %45 = vector.extract_strided_slice %5 {offsets = [6, 0], sizes = [1, 32], strides = [1, 1]} : vector<49x32xf32> to vector<1x32xf32>
    %46 = vector.shape_cast %45 : vector<1x32xf32> to vector<1x1x32xf32>
    %47 = vector.broadcast %46 : vector<1x1x32xf32> to vector<4x4x32xf32>
    %48 = arith.mulf %44, %47 : vector<4x4x32xf32>
    %49 = arith.addf %43, %48 : vector<4x4x32xf32>
    %c1 = arith.constant 1 : index
    %c0_14 = arith.constant 0 : index
    %c0_15 = arith.constant 0 : index
    %50 = vector.load %arg5[%c1, %c0_14, %c0_15] : memref<10x10x32xf32, #tpu.memory_space<vmem>>, vector<4x10x32xf32>
    %51 = vector.extract_strided_slice %50 {offsets = [0, 0, 0], sizes = [4, 4, 32], strides = [1, 1, 1]} : vector<4x10x32xf32> to vector<4x4x32xf32>
    %52 = vector.extract_strided_slice %5 {offsets = [7, 0], sizes = [1, 32], strides = [1, 1]} : vector<49x32xf32> to vector<1x32xf32>
    %53 = vector.shape_cast %52 : vector<1x32xf32> to vector<1x1x32xf32>
    %54 = vector.broadcast %53 : vector<1x1x32xf32> to vector<4x4x32xf32>
    %55 = arith.mulf %51, %54 : vector<4x4x32xf32>
    %56 = arith.addf %49, %55 : vector<4x4x32xf32>
    %57 = vector.extract_strided_slice %50 {offsets = [0, 1, 0], sizes = [4, 4, 32], strides = [1, 1, 1]} : vector<4x10x32xf32> to vector<4x4x32xf32>
    %58 = vector.extract_strided_slice %5 {offsets = [8, 0], sizes = [1, 32], strides = [1, 1]} : vector<49x32xf32> to vector<1x32xf32>
    %59 = vector.shape_cast %58 : vector<1x32xf32> to vector<1x1x32xf32>
    %60 = vector.broadcast %59 : vector<1x1x32xf32> to vector<4x4x32xf32>
    %61 = arith.mulf %57, %60 : vector<4x4x32xf32>
    %62 = arith.addf %56, %61 : vector<4x4x32xf32>
    %63 = vector.extract_strided_slice %50 {offsets = [0, 2, 0], sizes = [4, 4, 32], strides = [1, 1, 1]} : vector<4x10x32xf32> to vector<4x4x32xf32>
    %64 = vector.extract_strided_slice %5 {offsets = [9, 0], sizes = [1, 32], strides = [1, 1]} : vector<49x32xf32> to vector<1x32xf32>
    %65 = vector.shape_cast %64 : vector<1x32xf32> to vector<1x1x32xf32>
    %66 = vector.broadcast %65 : vector<1x1x32xf32> to vector<4x4x32xf32>
    %67 = arith.mulf %63, %66 : vector<4x4x32xf32>
    %68 = arith.addf %62, %67 : vector<4x4x32xf32>
    %69 = vector.extract_strided_slice %50 {offsets = [0, 3, 0], sizes = [4, 4, 32], strides = [1, 1, 1]} : vector<4x10x32xf32> to vector<4x4x32xf32>
    %70 = vector.extract_strided_slice %5 {offsets = [10, 0], sizes = [1, 32], strides = [1, 1]} : vector<49x32xf32> to vector<1x32xf32>
    %71 = vector.shape_cast %70 : vector<1x32xf32> to vector<1x1x32xf32>
    %72 = vector.broadcast %71 : vector<1x1x32xf32> to vector<4x4x32xf32>
    %73 = arith.mulf %69, %72 : vector<4x4x32xf32>
    %74 = arith.addf %68, %73 : vector<4x4x32xf32>
    %75 = vector.extract_strided_slice %50 {offsets = [0, 4, 0], sizes = [4, 4, 32], strides = [1, 1, 1]} : vector<4x10x32xf32> to vector<4x4x32xf32>
    %76 = vector.extract_strided_slice %5 {offsets = [11, 0], sizes = [1, 32], strides = [1, 1]} : vector<49x32xf32> to vector<1x32xf32>
    %77 = vector.shape_cast %76 : vector<1x32xf32> to vector<1x1x32xf32>
    %78 = vector.broadcast %77 : vector<1x1x32xf32> to vector<4x4x32xf32>
    %79 = arith.mulf %75, %78 : vector<4x4x32xf32>
    %80 = arith.addf %74, %79 : vector<4x4x32xf32>
    %81 = vector.extract_strided_slice %50 {offsets = [0, 5, 0], sizes = [4, 4, 32], strides = [1, 1, 1]} : vector<4x10x32xf32> to vector<4x4x32xf32>
    %82 = vector.extract_strided_slice %5 {offsets = [12, 0], sizes = [1, 32], strides = [1, 1]} : vector<49x32xf32> to vector<1x32xf32>
    %83 = vector.shape_cast %82 : vector<1x32xf32> to vector<1x1x32xf32>
    %84 = vector.broadcast %83 : vector<1x1x32xf32> to vector<4x4x32xf32>
    %85 = arith.mulf %81, %84 : vector<4x4x32xf32>
    %86 = arith.addf %80, %85 : vector<4x4x32xf32>
    %87 = vector.extract_strided_slice %50 {offsets = [0, 6, 0], sizes = [4, 4, 32], strides = [1, 1, 1]} : vector<4x10x32xf32> to vector<4x4x32xf32>
    %88 = vector.extract_strided_slice %5 {offsets = [13, 0], sizes = [1, 32], strides = [1, 1]} : vector<49x32xf32> to vector<1x32xf32>
    %89 = vector.shape_cast %88 : vector<1x32xf32> to vector<1x1x32xf32>
    %90 = vector.broadcast %89 : vector<1x1x32xf32> to vector<4x4x32xf32>
    %91 = arith.mulf %87, %90 : vector<4x4x32xf32>
    %92 = arith.addf %86, %91 : vector<4x4x32xf32>
    %c2 = arith.constant 2 : index
    %c0_16 = arith.constant 0 : index
    %c0_17 = arith.constant 0 : index
    %93 = vector.load %arg5[%c2, %c0_16, %c0_17] : memref<10x10x32xf32, #tpu.memory_space<vmem>>, vector<4x10x32xf32>
    %94 = vector.extract_strided_slice %93 {offsets = [0, 0, 0], sizes = [4, 4, 32], strides = [1, 1, 1]} : vector<4x10x32xf32> to vector<4x4x32xf32>
    %95 = vector.extract_strided_slice %5 {offsets = [14, 0], sizes = [1, 32], strides = [1, 1]} : vector<49x32xf32> to vector<1x32xf32>
    %96 = vector.shape_cast %95 : vector<1x32xf32> to vector<1x1x32xf32>
    %97 = vector.broadcast %96 : vector<1x1x32xf32> to vector<4x4x32xf32>
    %98 = arith.mulf %94, %97 : vector<4x4x32xf32>
    %99 = arith.addf %92, %98 : vector<4x4x32xf32>
    %100 = vector.extract_strided_slice %93 {offsets = [0, 1, 0], sizes = [4, 4, 32], strides = [1, 1, 1]} : vector<4x10x32xf32> to vector<4x4x32xf32>
    %101 = vector.extract_strided_slice %5 {offsets = [15, 0], sizes = [1, 32], strides = [1, 1]} : vector<49x32xf32> to vector<1x32xf32>
    %102 = vector.shape_cast %101 : vector<1x32xf32> to vector<1x1x32xf32>
    %103 = vector.broadcast %102 : vector<1x1x32xf32> to vector<4x4x32xf32>
    %104 = arith.mulf %100, %103 : vector<4x4x32xf32>
    %105 = arith.addf %99, %104 : vector<4x4x32xf32>
    %106 = vector.extract_strided_slice %93 {offsets = [0, 2, 0], sizes = [4, 4, 32], strides = [1, 1, 1]} : vector<4x10x32xf32> to vector<4x4x32xf32>
    %107 = vector.extract_strided_slice %5 {offsets = [16, 0], sizes = [1, 32], strides = [1, 1]} : vector<49x32xf32> to vector<1x32xf32>
    %108 = vector.shape_cast %107 : vector<1x32xf32> to vector<1x1x32xf32>
    %109 = vector.broadcast %108 : vector<1x1x32xf32> to vector<4x4x32xf32>
    %110 = arith.mulf %106, %109 : vector<4x4x32xf32>
    %111 = arith.addf %105, %110 : vector<4x4x32xf32>
    %112 = vector.extract_strided_slice %93 {offsets = [0, 3, 0], sizes = [4, 4, 32], strides = [1, 1, 1]} : vector<4x10x32xf32> to vector<4x4x32xf32>
    %113 = vector.extract_strided_slice %5 {offsets = [17, 0], sizes = [1, 32], strides = [1, 1]} : vector<49x32xf32> to vector<1x32xf32>
    %114 = vector.shape_cast %113 : vector<1x32xf32> to vector<1x1x32xf32>
    %115 = vector.broadcast %114 : vector<1x1x32xf32> to vector<4x4x32xf32>
    %116 = arith.mulf %112, %115 : vector<4x4x32xf32>
    %117 = arith.addf %111, %116 : vector<4x4x32xf32>
    %118 = vector.extract_strided_slice %93 {offsets = [0, 4, 0], sizes = [4, 4, 32], strides = [1, 1, 1]} : vector<4x10x32xf32> to vector<4x4x32xf32>
    %119 = vector.extract_strided_slice %5 {offsets = [18, 0], sizes = [1, 32], strides = [1, 1]} : vector<49x32xf32> to vector<1x32xf32>
    %120 = vector.shape_cast %119 : vector<1x32xf32> to vector<1x1x32xf32>
    %121 = vector.broadcast %120 : vector<1x1x32xf32> to vector<4x4x32xf32>
    %122 = arith.mulf %118, %121 : vector<4x4x32xf32>
    %123 = arith.addf %117, %122 : vector<4x4x32xf32>
    %124 = vector.extract_strided_slice %93 {offsets = [0, 5, 0], sizes = [4, 4, 32], strides = [1, 1, 1]} : vector<4x10x32xf32> to vector<4x4x32xf32>
    %125 = vector.extract_strided_slice %5 {offsets = [19, 0], sizes = [1, 32], strides = [1, 1]} : vector<49x32xf32> to vector<1x32xf32>
    %126 = vector.shape_cast %125 : vector<1x32xf32> to vector<1x1x32xf32>
    %127 = vector.broadcast %126 : vector<1x1x32xf32> to vector<4x4x32xf32>
    %128 = arith.mulf %124, %127 : vector<4x4x32xf32>
    %129 = arith.addf %123, %128 : vector<4x4x32xf32>
    %130 = vector.extract_strided_slice %93 {offsets = [0, 6, 0], sizes = [4, 4, 32], strides = [1, 1, 1]} : vector<4x10x32xf32> to vector<4x4x32xf32>
    %131 = vector.extract_strided_slice %5 {offsets = [20, 0], sizes = [1, 32], strides = [1, 1]} : vector<49x32xf32> to vector<1x32xf32>
    %132 = vector.shape_cast %131 : vector<1x32xf32> to vector<1x1x32xf32>
    %133 = vector.broadcast %132 : vector<1x1x32xf32> to vector<4x4x32xf32>
    %134 = arith.mulf %130, %133 : vector<4x4x32xf32>
    %135 = arith.addf %129, %134 : vector<4x4x32xf32>
    %c3_18 = arith.constant 3 : index
    %c0_19 = arith.constant 0 : index
    %c0_20 = arith.constant 0 : index
    %136 = vector.load %arg5[%c3_18, %c0_19, %c0_20] : memref<10x10x32xf32, #tpu.memory_space<vmem>>, vector<4x10x32xf32>
    %137 = vector.extract_strided_slice %136 {offsets = [0, 0, 0], sizes = [4, 4, 32], strides = [1, 1, 1]} : vector<4x10x32xf32> to vector<4x4x32xf32>
    %138 = vector.extract_strided_slice %5 {offsets = [21, 0], sizes = [1, 32], strides = [1, 1]} : vector<49x32xf32> to vector<1x32xf32>
    %139 = vector.shape_cast %138 : vector<1x32xf32> to vector<1x1x32xf32>
    %140 = vector.broadcast %139 : vector<1x1x32xf32> to vector<4x4x32xf32>
    %141 = arith.mulf %137, %140 : vector<4x4x32xf32>
    %142 = arith.addf %135, %141 : vector<4x4x32xf32>
    %143 = vector.extract_strided_slice %136 {offsets = [0, 1, 0], sizes = [4, 4, 32], strides = [1, 1, 1]} : vector<4x10x32xf32> to vector<4x4x32xf32>
    %144 = vector.extract_strided_slice %5 {offsets = [22, 0], sizes = [1, 32], strides = [1, 1]} : vector<49x32xf32> to vector<1x32xf32>
    %145 = vector.shape_cast %144 : vector<1x32xf32> to vector<1x1x32xf32>
    %146 = vector.broadcast %145 : vector<1x1x32xf32> to vector<4x4x32xf32>
    %147 = arith.mulf %143, %146 : vector<4x4x32xf32>
    %148 = arith.addf %142, %147 : vector<4x4x32xf32>
    %149 = vector.extract_strided_slice %136 {offsets = [0, 2, 0], sizes = [4, 4, 32], strides = [1, 1, 1]} : vector<4x10x32xf32> to vector<4x4x32xf32>
    %150 = vector.extract_strided_slice %5 {offsets = [23, 0], sizes = [1, 32], strides = [1, 1]} : vector<49x32xf32> to vector<1x32xf32>
    %151 = vector.shape_cast %150 : vector<1x32xf32> to vector<1x1x32xf32>
    %152 = vector.broadcast %151 : vector<1x1x32xf32> to vector<4x4x32xf32>
    %153 = arith.mulf %149, %152 : vector<4x4x32xf32>
    %154 = arith.addf %148, %153 : vector<4x4x32xf32>
    %155 = vector.extract_strided_slice %136 {offsets = [0, 3, 0], sizes = [4, 4, 32], strides = [1, 1, 1]} : vector<4x10x32xf32> to vector<4x4x32xf32>
    %156 = vector.extract_strided_slice %5 {offsets = [24, 0], sizes = [1, 32], strides = [1, 1]} : vector<49x32xf32> to vector<1x32xf32>
    %157 = vector.shape_cast %156 : vector<1x32xf32> to vector<1x1x32xf32>
    %158 = vector.broadcast %157 : vector<1x1x32xf32> to vector<4x4x32xf32>
    %159 = arith.mulf %155, %158 : vector<4x4x32xf32>
    %160 = arith.addf %154, %159 : vector<4x4x32xf32>
    %161 = vector.extract_strided_slice %136 {offsets = [0, 4, 0], sizes = [4, 4, 32], strides = [1, 1, 1]} : vector<4x10x32xf32> to vector<4x4x32xf32>
    %162 = vector.extract_strided_slice %5 {offsets = [25, 0], sizes = [1, 32], strides = [1, 1]} : vector<49x32xf32> to vector<1x32xf32>
    %163 = vector.shape_cast %162 : vector<1x32xf32> to vector<1x1x32xf32>
    %164 = vector.broadcast %163 : vector<1x1x32xf32> to vector<4x4x32xf32>
    %165 = arith.mulf %161, %164 : vector<4x4x32xf32>
    %166 = arith.addf %160, %165 : vector<4x4x32xf32>
    %167 = vector.extract_strided_slice %136 {offsets = [0, 5, 0], sizes = [4, 4, 32], strides = [1, 1, 1]} : vector<4x10x32xf32> to vector<4x4x32xf32>
    %168 = vector.extract_strided_slice %5 {offsets = [26, 0], sizes = [1, 32], strides = [1, 1]} : vector<49x32xf32> to vector<1x32xf32>
    %169 = vector.shape_cast %168 : vector<1x32xf32> to vector<1x1x32xf32>
    %170 = vector.broadcast %169 : vector<1x1x32xf32> to vector<4x4x32xf32>
    %171 = arith.mulf %167, %170 : vector<4x4x32xf32>
    %172 = arith.addf %166, %171 : vector<4x4x32xf32>
    %173 = vector.extract_strided_slice %136 {offsets = [0, 6, 0], sizes = [4, 4, 32], strides = [1, 1, 1]} : vector<4x10x32xf32> to vector<4x4x32xf32>
    %174 = vector.extract_strided_slice %5 {offsets = [27, 0], sizes = [1, 32], strides = [1, 1]} : vector<49x32xf32> to vector<1x32xf32>
    %175 = vector.shape_cast %174 : vector<1x32xf32> to vector<1x1x32xf32>
    %176 = vector.broadcast %175 : vector<1x1x32xf32> to vector<4x4x32xf32>
    %177 = arith.mulf %173, %176 : vector<4x4x32xf32>
    %178 = arith.addf %172, %177 : vector<4x4x32xf32>
    %c4 = arith.constant 4 : index
    %c0_21 = arith.constant 0 : index
    %c0_22 = arith.constant 0 : index
    %179 = vector.load %arg5[%c4, %c0_21, %c0_22] : memref<10x10x32xf32, #tpu.memory_space<vmem>>, vector<4x10x32xf32>
    %180 = vector.extract_strided_slice %179 {offsets = [0, 0, 0], sizes = [4, 4, 32], strides = [1, 1, 1]} : vector<4x10x32xf32> to vector<4x4x32xf32>
    %181 = vector.extract_strided_slice %5 {offsets = [28, 0], sizes = [1, 32], strides = [1, 1]} : vector<49x32xf32> to vector<1x32xf32>
    %182 = vector.shape_cast %181 : vector<1x32xf32> to vector<1x1x32xf32>
    %183 = vector.broadcast %182 : vector<1x1x32xf32> to vector<4x4x32xf32>
    %184 = arith.mulf %180, %183 : vector<4x4x32xf32>
    %185 = arith.addf %178, %184 : vector<4x4x32xf32>
    %186 = vector.extract_strided_slice %179 {offsets = [0, 1, 0], sizes = [4, 4, 32], strides = [1, 1, 1]} : vector<4x10x32xf32> to vector<4x4x32xf32>
    %187 = vector.extract_strided_slice %5 {offsets = [29, 0], sizes = [1, 32], strides = [1, 1]} : vector<49x32xf32> to vector<1x32xf32>
    %188 = vector.shape_cast %187 : vector<1x32xf32> to vector<1x1x32xf32>
    %189 = vector.broadcast %188 : vector<1x1x32xf32> to vector<4x4x32xf32>
    %190 = arith.mulf %186, %189 : vector<4x4x32xf32>
    %191 = arith.addf %185, %190 : vector<4x4x32xf32>
    %192 = vector.extract_strided_slice %179 {offsets = [0, 2, 0], sizes = [4, 4, 32], strides = [1, 1, 1]} : vector<4x10x32xf32> to vector<4x4x32xf32>
    %193 = vector.extract_strided_slice %5 {offsets = [30, 0], sizes = [1, 32], strides = [1, 1]} : vector<49x32xf32> to vector<1x32xf32>
    %194 = vector.shape_cast %193 : vector<1x32xf32> to vector<1x1x32xf32>
    %195 = vector.broadcast %194 : vector<1x1x32xf32> to vector<4x4x32xf32>
    %196 = arith.mulf %192, %195 : vector<4x4x32xf32>
    %197 = arith.addf %191, %196 : vector<4x4x32xf32>
    %198 = vector.extract_strided_slice %179 {offsets = [0, 3, 0], sizes = [4, 4, 32], strides = [1, 1, 1]} : vector<4x10x32xf32> to vector<4x4x32xf32>
    %199 = vector.extract_strided_slice %5 {offsets = [31, 0], sizes = [1, 32], strides = [1, 1]} : vector<49x32xf32> to vector<1x32xf32>
    %200 = vector.shape_cast %199 : vector<1x32xf32> to vector<1x1x32xf32>
    %201 = vector.broadcast %200 : vector<1x1x32xf32> to vector<4x4x32xf32>
    %202 = arith.mulf %198, %201 : vector<4x4x32xf32>
    %203 = arith.addf %197, %202 : vector<4x4x32xf32>
    %204 = vector.extract_strided_slice %179 {offsets = [0, 4, 0], sizes = [4, 4, 32], strides = [1, 1, 1]} : vector<4x10x32xf32> to vector<4x4x32xf32>
    %205 = vector.extract_strided_slice %5 {offsets = [32, 0], sizes = [1, 32], strides = [1, 1]} : vector<49x32xf32> to vector<1x32xf32>
    %206 = vector.shape_cast %205 : vector<1x32xf32> to vector<1x1x32xf32>
    %207 = vector.broadcast %206 : vector<1x1x32xf32> to vector<4x4x32xf32>
    %208 = arith.mulf %204, %207 : vector<4x4x32xf32>
    %209 = arith.addf %203, %208 : vector<4x4x32xf32>
    %210 = vector.extract_strided_slice %179 {offsets = [0, 5, 0], sizes = [4, 4, 32], strides = [1, 1, 1]} : vector<4x10x32xf32> to vector<4x4x32xf32>
    %211 = vector.extract_strided_slice %5 {offsets = [33, 0], sizes = [1, 32], strides = [1, 1]} : vector<49x32xf32> to vector<1x32xf32>
    %212 = vector.shape_cast %211 : vector<1x32xf32> to vector<1x1x32xf32>
    %213 = vector.broadcast %212 : vector<1x1x32xf32> to vector<4x4x32xf32>
    %214 = arith.mulf %210, %213 : vector<4x4x32xf32>
    %215 = arith.addf %209, %214 : vector<4x4x32xf32>
    %216 = vector.extract_strided_slice %179 {offsets = [0, 6, 0], sizes = [4, 4, 32], strides = [1, 1, 1]} : vector<4x10x32xf32> to vector<4x4x32xf32>
    %217 = vector.extract_strided_slice %5 {offsets = [34, 0], sizes = [1, 32], strides = [1, 1]} : vector<49x32xf32> to vector<1x32xf32>
    %218 = vector.shape_cast %217 : vector<1x32xf32> to vector<1x1x32xf32>
    %219 = vector.broadcast %218 : vector<1x1x32xf32> to vector<4x4x32xf32>
    %220 = arith.mulf %216, %219 : vector<4x4x32xf32>
    %221 = arith.addf %215, %220 : vector<4x4x32xf32>
    %c5 = arith.constant 5 : index
    %c0_23 = arith.constant 0 : index
    %c0_24 = arith.constant 0 : index
    %222 = vector.load %arg5[%c5, %c0_23, %c0_24] : memref<10x10x32xf32, #tpu.memory_space<vmem>>, vector<4x10x32xf32>
    %223 = vector.extract_strided_slice %222 {offsets = [0, 0, 0], sizes = [4, 4, 32], strides = [1, 1, 1]} : vector<4x10x32xf32> to vector<4x4x32xf32>
    %224 = vector.extract_strided_slice %5 {offsets = [35, 0], sizes = [1, 32], strides = [1, 1]} : vector<49x32xf32> to vector<1x32xf32>
    %225 = vector.shape_cast %224 : vector<1x32xf32> to vector<1x1x32xf32>
    %226 = vector.broadcast %225 : vector<1x1x32xf32> to vector<4x4x32xf32>
    %227 = arith.mulf %223, %226 : vector<4x4x32xf32>
    %228 = arith.addf %221, %227 : vector<4x4x32xf32>
    %229 = vector.extract_strided_slice %222 {offsets = [0, 1, 0], sizes = [4, 4, 32], strides = [1, 1, 1]} : vector<4x10x32xf32> to vector<4x4x32xf32>
    %230 = vector.extract_strided_slice %5 {offsets = [36, 0], sizes = [1, 32], strides = [1, 1]} : vector<49x32xf32> to vector<1x32xf32>
    %231 = vector.shape_cast %230 : vector<1x32xf32> to vector<1x1x32xf32>
    %232 = vector.broadcast %231 : vector<1x1x32xf32> to vector<4x4x32xf32>
    %233 = arith.mulf %229, %232 : vector<4x4x32xf32>
    %234 = arith.addf %228, %233 : vector<4x4x32xf32>
    %235 = vector.extract_strided_slice %222 {offsets = [0, 2, 0], sizes = [4, 4, 32], strides = [1, 1, 1]} : vector<4x10x32xf32> to vector<4x4x32xf32>
    %236 = vector.extract_strided_slice %5 {offsets = [37, 0], sizes = [1, 32], strides = [1, 1]} : vector<49x32xf32> to vector<1x32xf32>
    %237 = vector.shape_cast %236 : vector<1x32xf32> to vector<1x1x32xf32>
    %238 = vector.broadcast %237 : vector<1x1x32xf32> to vector<4x4x32xf32>
    %239 = arith.mulf %235, %238 : vector<4x4x32xf32>
    %240 = arith.addf %234, %239 : vector<4x4x32xf32>
    %241 = vector.extract_strided_slice %222 {offsets = [0, 3, 0], sizes = [4, 4, 32], strides = [1, 1, 1]} : vector<4x10x32xf32> to vector<4x4x32xf32>
    %242 = vector.extract_strided_slice %5 {offsets = [38, 0], sizes = [1, 32], strides = [1, 1]} : vector<49x32xf32> to vector<1x32xf32>
    %243 = vector.shape_cast %242 : vector<1x32xf32> to vector<1x1x32xf32>
    %244 = vector.broadcast %243 : vector<1x1x32xf32> to vector<4x4x32xf32>
    %245 = arith.mulf %241, %244 : vector<4x4x32xf32>
    %246 = arith.addf %240, %245 : vector<4x4x32xf32>
    %247 = vector.extract_strided_slice %222 {offsets = [0, 4, 0], sizes = [4, 4, 32], strides = [1, 1, 1]} : vector<4x10x32xf32> to vector<4x4x32xf32>
    %248 = vector.extract_strided_slice %5 {offsets = [39, 0], sizes = [1, 32], strides = [1, 1]} : vector<49x32xf32> to vector<1x32xf32>
    %249 = vector.shape_cast %248 : vector<1x32xf32> to vector<1x1x32xf32>
    %250 = vector.broadcast %249 : vector<1x1x32xf32> to vector<4x4x32xf32>
    %251 = arith.mulf %247, %250 : vector<4x4x32xf32>
    %252 = arith.addf %246, %251 : vector<4x4x32xf32>
    %253 = vector.extract_strided_slice %222 {offsets = [0, 5, 0], sizes = [4, 4, 32], strides = [1, 1, 1]} : vector<4x10x32xf32> to vector<4x4x32xf32>
    %254 = vector.extract_strided_slice %5 {offsets = [40, 0], sizes = [1, 32], strides = [1, 1]} : vector<49x32xf32> to vector<1x32xf32>
    %255 = vector.shape_cast %254 : vector<1x32xf32> to vector<1x1x32xf32>
    %256 = vector.broadcast %255 : vector<1x1x32xf32> to vector<4x4x32xf32>
    %257 = arith.mulf %253, %256 : vector<4x4x32xf32>
    %258 = arith.addf %252, %257 : vector<4x4x32xf32>
    %259 = vector.extract_strided_slice %222 {offsets = [0, 6, 0], sizes = [4, 4, 32], strides = [1, 1, 1]} : vector<4x10x32xf32> to vector<4x4x32xf32>
    %260 = vector.extract_strided_slice %5 {offsets = [41, 0], sizes = [1, 32], strides = [1, 1]} : vector<49x32xf32> to vector<1x32xf32>
    %261 = vector.shape_cast %260 : vector<1x32xf32> to vector<1x1x32xf32>
    %262 = vector.broadcast %261 : vector<1x1x32xf32> to vector<4x4x32xf32>
    %263 = arith.mulf %259, %262 : vector<4x4x32xf32>
    %264 = arith.addf %258, %263 : vector<4x4x32xf32>
    %c6 = arith.constant 6 : index
    %c0_25 = arith.constant 0 : index
    %c0_26 = arith.constant 0 : index
    %265 = vector.load %arg5[%c6, %c0_25, %c0_26] : memref<10x10x32xf32, #tpu.memory_space<vmem>>, vector<4x10x32xf32>
    %266 = vector.extract_strided_slice %265 {offsets = [0, 0, 0], sizes = [4, 4, 32], strides = [1, 1, 1]} : vector<4x10x32xf32> to vector<4x4x32xf32>
    %267 = vector.extract_strided_slice %5 {offsets = [42, 0], sizes = [1, 32], strides = [1, 1]} : vector<49x32xf32> to vector<1x32xf32>
    %268 = vector.shape_cast %267 : vector<1x32xf32> to vector<1x1x32xf32>
    %269 = vector.broadcast %268 : vector<1x1x32xf32> to vector<4x4x32xf32>
    %270 = arith.mulf %266, %269 : vector<4x4x32xf32>
    %271 = arith.addf %264, %270 : vector<4x4x32xf32>
    %272 = vector.extract_strided_slice %265 {offsets = [0, 1, 0], sizes = [4, 4, 32], strides = [1, 1, 1]} : vector<4x10x32xf32> to vector<4x4x32xf32>
    %273 = vector.extract_strided_slice %5 {offsets = [43, 0], sizes = [1, 32], strides = [1, 1]} : vector<49x32xf32> to vector<1x32xf32>
    %274 = vector.shape_cast %273 : vector<1x32xf32> to vector<1x1x32xf32>
    %275 = vector.broadcast %274 : vector<1x1x32xf32> to vector<4x4x32xf32>
    %276 = arith.mulf %272, %275 : vector<4x4x32xf32>
    %277 = arith.addf %271, %276 : vector<4x4x32xf32>
    %278 = vector.extract_strided_slice %265 {offsets = [0, 2, 0], sizes = [4, 4, 32], strides = [1, 1, 1]} : vector<4x10x32xf32> to vector<4x4x32xf32>
    %279 = vector.extract_strided_slice %5 {offsets = [44, 0], sizes = [1, 32], strides = [1, 1]} : vector<49x32xf32> to vector<1x32xf32>
    %280 = vector.shape_cast %279 : vector<1x32xf32> to vector<1x1x32xf32>
    %281 = vector.broadcast %280 : vector<1x1x32xf32> to vector<4x4x32xf32>
    %282 = arith.mulf %278, %281 : vector<4x4x32xf32>
    %283 = arith.addf %277, %282 : vector<4x4x32xf32>
    %284 = vector.extract_strided_slice %265 {offsets = [0, 3, 0], sizes = [4, 4, 32], strides = [1, 1, 1]} : vector<4x10x32xf32> to vector<4x4x32xf32>
    %285 = vector.extract_strided_slice %5 {offsets = [45, 0], sizes = [1, 32], strides = [1, 1]} : vector<49x32xf32> to vector<1x32xf32>
    %286 = vector.shape_cast %285 : vector<1x32xf32> to vector<1x1x32xf32>
    %287 = vector.broadcast %286 : vector<1x1x32xf32> to vector<4x4x32xf32>
    %288 = arith.mulf %284, %287 : vector<4x4x32xf32>
    %289 = arith.addf %283, %288 : vector<4x4x32xf32>
    %290 = vector.extract_strided_slice %265 {offsets = [0, 4, 0], sizes = [4, 4, 32], strides = [1, 1, 1]} : vector<4x10x32xf32> to vector<4x4x32xf32>
    %291 = vector.extract_strided_slice %5 {offsets = [46, 0], sizes = [1, 32], strides = [1, 1]} : vector<49x32xf32> to vector<1x32xf32>
    %292 = vector.shape_cast %291 : vector<1x32xf32> to vector<1x1x32xf32>
    %293 = vector.broadcast %292 : vector<1x1x32xf32> to vector<4x4x32xf32>
    %294 = arith.mulf %290, %293 : vector<4x4x32xf32>
    %295 = arith.addf %289, %294 : vector<4x4x32xf32>
    %296 = vector.extract_strided_slice %265 {offsets = [0, 5, 0], sizes = [4, 4, 32], strides = [1, 1, 1]} : vector<4x10x32xf32> to vector<4x4x32xf32>
    %297 = vector.extract_strided_slice %5 {offsets = [47, 0], sizes = [1, 32], strides = [1, 1]} : vector<49x32xf32> to vector<1x32xf32>
    %298 = vector.shape_cast %297 : vector<1x32xf32> to vector<1x1x32xf32>
    %299 = vector.broadcast %298 : vector<1x1x32xf32> to vector<4x4x32xf32>
    %300 = arith.mulf %296, %299 : vector<4x4x32xf32>
    %301 = arith.addf %295, %300 : vector<4x4x32xf32>
    %302 = vector.extract_strided_slice %265 {offsets = [0, 6, 0], sizes = [4, 4, 32], strides = [1, 1, 1]} : vector<4x10x32xf32> to vector<4x4x32xf32>
    %303 = vector.extract_strided_slice %5 {offsets = [48, 0], sizes = [1, 32], strides = [1, 1]} : vector<49x32xf32> to vector<1x32xf32>
    %304 = vector.shape_cast %303 : vector<1x32xf32> to vector<1x1x32xf32>
    %305 = vector.broadcast %304 : vector<1x1x32xf32> to vector<4x4x32xf32>
    %306 = arith.mulf %302, %305 : vector<4x4x32xf32>
    %307 = arith.addf %301, %306 : vector<4x4x32xf32>
    %c0_27 = arith.constant 0 : index
    %c0_28 = arith.constant 0 : index
    %308 = vector.load %arg3[%c0_27, %c0_28] : memref<1x32xf32, #tpu.memory_space<vmem>>, vector<1x32xf32>
    %309 = vector.shape_cast %308 : vector<1x32xf32> to vector<1x1x32xf32>
    %310 = vector.broadcast %309 : vector<1x1x32xf32> to vector<4x4x32xf32>
    %311 = arith.addf %307, %310 : vector<4x4x32xf32>
    %c0_29 = arith.constant 0 : index
    %c0_30 = arith.constant 0 : index
    %c0_31 = arith.constant 0 : index
    %c0_32 = arith.constant 0 : index
    %312 = vector.load %arg4[%c0_29, %c0_30, %c0_31, %c0_32] : memref<1x4x4x32xf32, #tpu.memory_space<vmem>>, vector<1x4x4x32xf32>
    %313 = vector.shape_cast %312 : vector<1x4x4x32xf32> to vector<4x4x32xf32>
    %314 = vector.shape_cast %311 : vector<4x4x32xf32> to vector<1x4x4x32xf32>
    tpu.vector_store %arg4[%c0_29, %c0_30, %c0_31, %c0_32], %314 {strides = array<i32>} : memref<1x4x4x32xf32, #tpu.memory_space<vmem>>, vector<1x4x4x32xf32>,
    return
  }
  func.func @transform_0(%arg0: i32) -> (i32, i32, i32, i32) {
    %c0_i32 = arith.constant 0 : i32
    %c0_i32_0 = arith.constant 0 : i32
    %c0_i32_1 = arith.constant 0 : i32
    %c0_i32_2 = arith.constant 0 : i32
    return %arg0, %c0_i32, %c0_i32_0, %c0_i32_1 : i32, i32, i32, i32
  }
  func.func @transform_1(%arg0: i32) -> (i32, i32) {
    %c0_i32 = arith.constant 0 : i32
    %c0_i32_0 = arith.constant 0 : i32
    %c0_i32_1 = arith.constant 0 : i32
    return %c0_i32, %c0_i32_0 : i32, i32
  }
  func.func @transform_2(%arg0: i32) -> (i32, i32) {
    %c0_i32 = arith.constant 0 : i32
    %c0_i32_0 = arith.constant 0 : i32
    %c0_i32_1 = arith.constant 0 : i32
    return %c0_i32, %c0_i32_0 : i32, i32
  }
  func.func @transform_3(%arg0: i32) -> (i32, i32, i32, i32) {
    %c0_i32 = arith.constant 0 : i32
    %c0_i32_0 = arith.constant 0 : i32
    %c0_i32_1 = arith.constant 0 : i32
    %c0_i32_2 = arith.constant 0 : i32
    return %arg0, %c0_i32, %c0_i32_0, %c0_i32_1 : i32, i32, i32, i32
  }
}

module attributes {stable_mosaic.version = 11 : i64} {
  func.func @_convnext_mlp_kernel(%arg0: i32, %arg1: memref<32x32xf32, #tpu.memory_space<vmem>>, %arg2: memref<32x32xf32, #tpu.memory_space<vmem>>, %arg3: memref<1x32xf32, #tpu.memory_space<vmem>>, %arg4: memref<1x32xf32, #tpu.memory_space<vmem>>, %arg5: memref<32x128xf32, #tpu.memory_space<vmem>>, %arg6: memref<1x128xf32, #tpu.memory_space<vmem>>, %arg7: memref<128x32xf32, #tpu.memory_space<vmem>>, %arg8: memref<1x32xf32, #tpu.memory_space<vmem>>, %arg9: memref<32x32xf32, #tpu.memory_space<vmem>>) attributes {dimension_semantics = [#tpu.dimension_semantics<parallel>], iteration_bounds = array<i64: 1>, scalar_prefetch = 0 : i64, scratch_operands = 0 : i64, tpu.core_type = #tpu.core_type<tc>, window_params = [{transform_indices = @transform_0, window_bounds = array<i64: 32, 32>}, {transform_indices = @transform_1, window_bounds = array<i64: 32, 32>}, {pipeline_mode = #tpu.pipeline_mode<synchronous>, transform_indices = @transform_2, window_bounds = array<i64: 1, 32>}, {pipeline_mode = #tpu.pipeline_mode<synchronous>, transform_indices = @transform_3, window_bounds = array<i64: 1, 32>}, {pipeline_mode = #tpu.pipeline_mode<synchronous>, transform_indices = @transform_4, window_bounds = array<i64: 32, 128>}, {pipeline_mode = #tpu.pipeline_mode<synchronous>, transform_indices = @transform_5, window_bounds = array<i64: 1, 128>}, {pipeline_mode = #tpu.pipeline_mode<synchronous>, transform_indices = @transform_6, window_bounds = array<i64: 128, 32>}, {pipeline_mode = #tpu.pipeline_mode<synchronous>, transform_indices = @transform_7, window_bounds = array<i64: 1, 32>}, {transform_indices = @transform_8, window_bounds = array<i64: 32, 32>}]} {
    %c0 = arith.constant 0 : index
    %c0_0 = arith.constant 0 : index
    %0 = vector.load %arg1[%c0, %c0_0] : memref<32x32xf32, #tpu.memory_space<vmem>>, vector<32x32xf32>
    %cst = arith.constant dense<0.000000e+00> : vector<32xf32>
    %1 = vector.multi_reduction <add>, %0, %cst [1] : vector<32x32xf32> to vector<32xf32>
    %2 = vector.shape_cast %1 : vector<32xf32> to vector<32x1xf32>
    %cst_1 = arith.constant 3.200000e+01 : f32
    %3 = vector.broadcast %cst_1 : f32 to vector<32x1xf32>
    %4 = arith.divf %2, %3 : vector<32x1xf32>
    %5 = vector.broadcast %4 : vector<32x1xf32> to vector<32x32xf32>
    %6 = arith.subf %0, %5 : vector<32x32xf32>
    %7 = arith.mulf %6, %6 : vector<32x32xf32>
    %cst_2 = arith.constant dense<0.000000e+00> : vector<32xf32>
    %8 = vector.multi_reduction <add>, %7, %cst_2 [1] : vector<32x32xf32> to vector<32xf32>
    %9 = vector.shape_cast %8 : vector<32xf32> to vector<32x1xf32>
    %cst_3 = arith.constant 3.200000e+01 : f32
    %10 = vector.broadcast %cst_3 : f32 to vector<32x1xf32>
    %11 = arith.divf %9, %10 : vector<32x1xf32>
    %12 = vector.broadcast %4 : vector<32x1xf32> to vector<32x32xf32>
    %13 = arith.subf %0, %12 : vector<32x32xf32>
    %cst_4 = arith.constant 9.99999997E-7 : f32
    %14 = vector.broadcast %cst_4 : f32 to vector<32x1xf32>
    %15 = arith.addf %11, %14 : vector<32x1xf32>
    %16 = math.rsqrt %15 : vector<32x1xf32>
    %17 = vector.broadcast %16 : vector<32x1xf32> to vector<32x32xf32>
    %18 = arith.mulf %13, %17 : vector<32x32xf32>
    %c0_5 = arith.constant 0 : index
    %c0_6 = arith.constant 0 : index
    %19 = vector.load %arg3[%c0_5, %c0_6] : memref<1x32xf32, #tpu.memory_space<vmem>>, vector<1x32xf32>
    %20 = vector.broadcast %19 : vector<1x32xf32> to vector<32x32xf32>
    %21 = arith.mulf %18, %20 : vector<32x32xf32>
    %c0_7 = arith.constant 0 : index
    %c0_8 = arith.constant 0 : index
    %22 = vector.load %arg4[%c0_7, %c0_8] : memref<1x32xf32, #tpu.memory_space<vmem>>, vector<1x32xf32>
    %23 = vector.broadcast %22 : vector<1x32xf32> to vector<32x32xf32>
    %24 = arith.addf %21, %23 : vector<32x32xf32>
    %25 = arith.truncf %24 : vector<32x32xf32> to vector<32x32xbf16>
    %c0_9 = arith.constant 0 : index
    %c0_10 = arith.constant 0 : index
    %26 = vector.load %arg5[%c0_9, %c0_10] : memref<32x128xf32, #tpu.memory_space<vmem>>, vector<32x128xf32>
    %27 = arith.truncf %26 : vector<32x128xf32> to vector<32x128xbf16>
    %cst_11 = arith.constant dense<0.000000e+00> : vector<32x128xf32>
    %28 = tpu.matmul %25, %27, %cst_11 {dimension_numbers = #tpu.dot_dimension_numbers<[1], [0], [0], [1], [0, 0, 1, 1], [], []>} : vector<32x32xbf16>, vector<32x128xbf16>, vector<32x128xf32> -> vector<32x128xf32>
    %c0_12 = arith.constant 0 : index
    %c0_13 = arith.constant 0 : index
    %29 = vector.load %arg6[%c0_12, %c0_13] : memref<1x128xf32, #tpu.memory_space<vmem>>, vector<1x128xf32>
    %30 = vector.broadcast %29 : vector<1x128xf32> to vector<32x128xf32>
    %31 = arith.addf %28, %30 : vector<32x128xf32>
    %32 = arith.mulf %31, %31 : vector<32x128xf32>
    %33 = arith.mulf %31, %32 : vector<32x128xf32>
    %cst_14 = arith.constant 4.471500e-02 : f32
    %34 = vector.broadcast %cst_14 : f32 to vector<32x128xf32>
    %35 = arith.mulf %34, %33 : vector<32x128xf32>
    %36 = arith.addf %31, %35 : vector<32x128xf32>
    %cst_15 = arith.constant 0.797884583 : f32
    %37 = vector.broadcast %cst_15 : f32 to vector<32x128xf32>
    %38 = arith.mulf %37, %36 : vector<32x128xf32>
    %39 = math.tanh %38 : vector<32x128xf32>
    %cst_16 = arith.constant 1.000000e+00 : f32
    %40 = vector.broadcast %cst_16 : f32 to vector<32x128xf32>
    %41 = arith.addf %40, %39 : vector<32x128xf32>
    %cst_17 = arith.constant 5.000000e-01 : f32
    %42 = vector.broadcast %cst_17 : f32 to vector<32x128xf32>
    %43 = arith.mulf %42, %41 : vector<32x128xf32>
    %44 = arith.mulf %31, %43 : vector<32x128xf32>
    %45 = arith.truncf %44 : vector<32x128xf32> to vector<32x128xbf16>
    %c0_18 = arith.constant 0 : index
    %c0_19 = arith.constant 0 : index
    %46 = vector.load %arg7[%c0_18, %c0_19] : memref<128x32xf32, #tpu.memory_space<vmem>>, vector<128x32xf32>
    %47 = arith.truncf %46 : vector<128x32xf32> to vector<128x32xbf16>
    %cst_20 = arith.constant dense<0.000000e+00> : vector<32x32xf32>
    %48 = tpu.matmul %45, %47, %cst_20 {dimension_numbers = #tpu.dot_dimension_numbers<[1], [0], [0], [1], [0, 0, 1, 1], [], []>} : vector<32x128xbf16>, vector<128x32xbf16>, vector<32x32xf32> -> vector<32x32xf32>
    %c0_21 = arith.constant 0 : index
    %c0_22 = arith.constant 0 : index
    %49 = vector.load %arg8[%c0_21, %c0_22] : memref<1x32xf32, #tpu.memory_space<vmem>>, vector<1x32xf32>
    %50 = vector.broadcast %49 : vector<1x32xf32> to vector<32x32xf32>
    %51 = arith.addf %48, %50 : vector<32x32xf32>
    %c0_23 = arith.constant 0 : index
    %c0_24 = arith.constant 0 : index
    %52 = vector.load %arg2[%c0_23, %c0_24] : memref<32x32xf32, #tpu.memory_space<vmem>>, vector<32x32xf32>
    %53 = arith.addf %51, %52 : vector<32x32xf32>
    %c0_25 = arith.constant 0 : index
    %c0_26 = arith.constant 0 : index
    %54 = vector.load %arg9[%c0_25, %c0_26] : memref<32x32xf32, #tpu.memory_space<vmem>>, vector<32x32xf32>
    tpu.vector_store %arg9[%c0_25, %c0_26], %53 {strides = array<i32>} : memref<32x32xf32, #tpu.memory_space<vmem>>, vector<32x32xf32>,
    return
  }
  func.func @transform_0(%arg0: i32) -> (i32, i32) {
    %c0_i32 = arith.constant 0 : i32
    %c0_i32_0 = arith.constant 0 : i32
    return %arg0, %c0_i32 : i32, i32
  }
  func.func @transform_1(%arg0: i32) -> (i32, i32) {
    %c0_i32 = arith.constant 0 : i32
    %c0_i32_0 = arith.constant 0 : i32
    return %arg0, %c0_i32 : i32, i32
  }
  func.func @transform_2(%arg0: i32) -> (i32, i32) {
    %c0_i32 = arith.constant 0 : i32
    %c0_i32_0 = arith.constant 0 : i32
    %c0_i32_1 = arith.constant 0 : i32
    return %c0_i32, %c0_i32_0 : i32, i32
  }
  func.func @transform_3(%arg0: i32) -> (i32, i32) {
    %c0_i32 = arith.constant 0 : i32
    %c0_i32_0 = arith.constant 0 : i32
    %c0_i32_1 = arith.constant 0 : i32
    return %c0_i32, %c0_i32_0 : i32, i32
  }
  func.func @transform_4(%arg0: i32) -> (i32, i32) {
    %c0_i32 = arith.constant 0 : i32
    %c0_i32_0 = arith.constant 0 : i32
    %c0_i32_1 = arith.constant 0 : i32
    return %c0_i32, %c0_i32_0 : i32, i32
  }
  func.func @transform_5(%arg0: i32) -> (i32, i32) {
    %c0_i32 = arith.constant 0 : i32
    %c0_i32_0 = arith.constant 0 : i32
    %c0_i32_1 = arith.constant 0 : i32
    return %c0_i32, %c0_i32_0 : i32, i32
  }
  func.func @transform_6(%arg0: i32) -> (i32, i32) {
    %c0_i32 = arith.constant 0 : i32
    %c0_i32_0 = arith.constant 0 : i32
    %c0_i32_1 = arith.constant 0 : i32
    return %c0_i32, %c0_i32_0 : i32, i32
  }
  func.func @transform_7(%arg0: i32) -> (i32, i32) {
    %c0_i32 = arith.constant 0 : i32
    %c0_i32_0 = arith.constant 0 : i32
    %c0_i32_1 = arith.constant 0 : i32
    return %c0_i32, %c0_i32_0 : i32, i32
  }
  func.func @transform_8(%arg0: i32) -> (i32, i32) {
    %c0_i32 = arith.constant 0 : i32
    %c0_i32_0 = arith.constant 0 : i32
    return %arg0, %c0_i32 : i32, i32
  }
}

module attributes {stable_mosaic.version = 11 : i64} {
  func.func @_linear_kernel(%arg0: i32, %arg1: memref<32x32xf32, #tpu.memory_space<vmem>>, %arg2: memref<32x768xf32, #tpu.memory_space<vmem>>, %arg3: memref<1x768xf32, #tpu.memory_space<vmem>>, %arg4: memref<32x768xf32, #tpu.memory_space<vmem>>) attributes {dimension_semantics = [#tpu.dimension_semantics<parallel>], iteration_bounds = array<i64: 1>, scalar_prefetch = 0 : i64, scratch_operands = 0 : i64, tpu.core_type = #tpu.core_type<tc>, window_params = [{transform_indices = @transform_0, window_bounds = array<i64: 32, 32>}, {pipeline_mode = #tpu.pipeline_mode<synchronous>, transform_indices = @transform_1, window_bounds = array<i64: 32, 768>}, {pipeline_mode = #tpu.pipeline_mode<synchronous>, transform_indices = @transform_2, window_bounds = array<i64: 1, 768>}, {transform_indices = @transform_3, window_bounds = array<i64: 32, 768>}]} {
    %c0 = arith.constant 0 : index
    %c0_0 = arith.constant 0 : index
    %0 = vector.load %arg1[%c0, %c0_0] : memref<32x32xf32, #tpu.memory_space<vmem>>, vector<32x32xf32>
    %1 = arith.truncf %0 : vector<32x32xf32> to vector<32x32xbf16>
    %c0_1 = arith.constant 0 : index
    %c0_2 = arith.constant 0 : index
    %2 = vector.load %arg2[%c0_1, %c0_2] : memref<32x768xf32, #tpu.memory_space<vmem>>, vector<32x768xf32>
    %3 = arith.truncf %2 : vector<32x768xf32> to vector<32x768xbf16>
    %cst = arith.constant dense<0.000000e+00> : vector<32x768xf32>
    %4 = tpu.matmul %1, %3, %cst {dimension_numbers = #tpu.dot_dimension_numbers<[1], [0], [0], [1], [0, 0, 1, 1], [], []>} : vector<32x32xbf16>, vector<32x768xbf16>, vector<32x768xf32> -> vector<32x768xf32>
    %c0_3 = arith.constant 0 : index
    %c0_4 = arith.constant 0 : index
    %5 = vector.load %arg3[%c0_3, %c0_4] : memref<1x768xf32, #tpu.memory_space<vmem>>, vector<1x768xf32>
    %6 = vector.broadcast %5 : vector<1x768xf32> to vector<32x768xf32>
    %7 = arith.addf %4, %6 : vector<32x768xf32>
    %8 = arith.negf %7 : vector<32x768xf32>
    %9 = math.exp %8 : vector<32x768xf32>
    %cst_5 = arith.constant 1.000000e+00 : f32
    %10 = vector.broadcast %cst_5 : f32 to vector<32x768xf32>
    %11 = arith.addf %10, %9 : vector<32x768xf32>
    %12 = arith.divf %10, %11 : vector<32x768xf32>
    %c0_6 = arith.constant 0 : index
    %c0_7 = arith.constant 0 : index
    %13 = vector.load %arg4[%c0_6, %c0_7] : memref<32x768xf32, #tpu.memory_space<vmem>>, vector<32x768xf32>
    tpu.vector_store %arg4[%c0_6, %c0_7], %12 {strides = array<i32>} : memref<32x768xf32, #tpu.memory_space<vmem>>, vector<32x768xf32>,
    return
  }
  func.func @transform_0(%arg0: i32) -> (i32, i32) {
    %c0_i32 = arith.constant 0 : i32
    %c0_i32_0 = arith.constant 0 : i32
    return %arg0, %c0_i32 : i32, i32
  }
  func.func @transform_1(%arg0: i32) -> (i32, i32) {
    %c0_i32 = arith.constant 0 : i32
    %c0_i32_0 = arith.constant 0 : i32
    %c0_i32_1 = arith.constant 0 : i32
    return %c0_i32, %c0_i32_0 : i32, i32
  }
  func.func @transform_2(%arg0: i32) -> (i32, i32) {
    %c0_i32 = arith.constant 0 : i32
    %c0_i32_0 = arith.constant 0 : i32
    %c0_i32_1 = arith.constant 0 : i32
    return %c0_i32, %c0_i32_0 : i32, i32
  }
  func.func @transform_3(%arg0: i32) -> (i32, i32) {
    %c0_i32 = arith.constant 0 : i32
    %c0_i32_0 = arith.constant 0 : i32
    return %arg0, %c0_i32 : i32, i32
  }
}

</mosaic_0001>

<bundles_post_ra>
// kernel: rgb_context_decoder_forward.10
= control target key start
LH: loop header
LB: loop body
LE: loop exit
PB: predicated region body
PF: predicated region fallthrough
CT: control target
= control target key end

     0   :  { %vm127_vm0 = vcmask 261120   ;;  %s329_s1 = inlined_call_operand.vmem [shape: f32[256,32], index: 1, kind: input, shape index: {}]   ;;  %s330_s2 = inlined_call_operand.vmem [shape: f32[1,32], index: 2, kind: input, shape index: {}]   ;;  %s331_s0 = inlined_call_operand.vmem [shape: f32[32,256], index: 0, kind: input, shape index: {}]   ;;  %s332_s3 = inlined_call_operand.vmem [shape: f32[32,32], index: 3, kind: input, shape index: {}]   ;;  %s333_s4 = inlined_call_operand.vmem [shape: f32[32,32], index: 4, kind: output, shape index: {}]  }
   0x1   :  { %v43_v0 = vld [vmem:[%s329_s1 + $0x70] sm:$0xff]  ;;  %v44_v1 = vld [vmem:[%s329_s1 + $0x78] sm:$0xff]  ;;  %v41_v5 = vld [vmem:[%s329_s1 + $0x60] sm:$0xff] }
   0x2   :  { %v59_v2 = vld [vmem:[%s329_s1 + $0xf0] sm:$0xff]  ;;  %v68_v3 = vpack.c.bf16 %v44_v1, %v43_v0  ;;  %v60_v4 = vld [vmem:[%s329_s1 + $0xf8] sm:$0xff]  ;;  %v42_v6 = vld [vmem:[%s329_s1 + $0x68] sm:$0xff] }
   0x3   :  { %v76_v7 = vpack.c.bf16 %v60_v4, %v59_v2  ;;  %v57_v8 = vld [vmem:[%s329_s1 + $0xe0] sm:$0xff]  ;;  %v58_v9 = vld [vmem:[%s329_s1 + $0xe8] sm:$0xff]  ;;  %v67_v10 = vpack.c.bf16 %v42_v6, %v41_v5  ;;  %v39_v12 = vld [vmem:[%s329_s1 + $0x50] sm:$0xff] }
   0x4   :  { %81 = vmatpush.bf16.msra.mxu0 %v68_v3  ;;  %136 = vmatpush.bf16.msra.mxu2 %v68_v3  ;;  %v75_v11 = vpack.c.bf16 %v58_v9, %v57_v8  ;;  %v40_v13 = vld [vmem:[%s329_s1 + $0x58] sm:$0xff]  ;;  %v55_v14 = vld [vmem:[%s329_s1 + $0xd0] sm:$0xff]  ;;  %v37_v18 = vld [vmem:[%s329_s1 + $0x40] sm:$0xff] }
   0x5   :  { %100 = vmatpush.bf16.msra.mxu1 %v76_v7  ;;  %144 = vmatpush.bf16.msra.mxu3 %v76_v7  ;;  %v56_v15 = vld [vmem:[%s329_s1 + $0xd8] sm:$0xff]  ;;  %v66_v16 = vpack.c.bf16 %v40_v13, %v39_v12  ;;  %v38_v19 = vld [vmem:[%s329_s1 + $0x48] sm:$0xff]  ;;  %v53_v20 = vld [vmem:[%s329_s1 + $0xc0] sm:$0xff] }
   0x6   :  { %v74_v17 = vpack.c.bf16 %v56_v15, %v55_v14  ;;  %v54_v21 = vld [vmem:[%s329_s1 + $0xc8] sm:$0xff]  ;;  %v65_v22 = vpack.c.bf16 %v38_v19, %v37_v18  ;;  %v35_v24 = vld [vmem:[%s329_s1 + $0x30] sm:$0xff]  ;;  %v36_v25 = vld [vmem:[%s329_s1 + $0x38] sm:$0xff] }
   0x7   :  { %v73_v23 = vpack.c.bf16 %v54_v21, %v53_v20  ;;  %v51_v26 = vld [vmem:[%s329_s1 + $0xb0] sm:$0xff]  ;;  %v52_v27 = vld [vmem:[%s329_s1 + $0xb8] sm:$0xff]  ;;  %v64_v28 = vpack.c.bf16 %v36_v25, %v35_v24  ;;  %v33_v30 = vld [vmem:[%s329_s1 + $0x20] sm:$0xff] }
   0x8   :  { %82 = vmatpush.bf16.msra.mxu0 %v67_v10  ;;  %137 = vmatpush.bf16.msra.mxu2 %v67_v10  ;;  %v72_v29 = vpack.c.bf16 %v52_v27, %v51_v26  ;;  %v34_v31 = vld [vmem:[%s329_s1 + $0x28] sm:$0xff]  ;;  %v49_v32 = vld [vmem:[%s329_s1 + $0xa0] sm:$0xff]  ;;  %v31_v36 = vld [vmem:[%s329_s1 + $0x10] sm:$0xff] }
   0x9   :  { %101 = vmatpush.bf16.msra.mxu1 %v75_v11  ;;  %145 = vmatpush.bf16.msra.mxu3 %v75_v11  ;;  %v50_v33 = vld [vmem:[%s329_s1 + $0xa8] sm:$0xff]  ;;  %v63_v34 = vpack.c.bf16 %v34_v31, %v33_v30  ;;  %v32_v37 = vld [vmem:[%s329_s1 + $0x18] sm:$0xff]  ;;  %v47_v38 = vld [vmem:[%s329_s1 + $0x90] sm:$0xff] }
   0xa   :  { %v71_v35 = vpack.c.bf16 %v50_v33, %v49_v32  ;;  %v48_v39 = vld [vmem:[%s329_s1 + $0x98] sm:$0xff]  ;;  %v62_v40 = vpack.c.bf16 %v32_v37, %v31_v36  ;;  %v29_v42 = vld [vmem:[%s329_s1] sm:$0xff]  ;;  %v30_v43 = vld [vmem:[%s329_s1 + $0x8] sm:$0xff] }
   0xb   :  { %v70_v41 = vpack.c.bf16 %v48_v39, %v47_v38  ;;  %v45_v44 = vld [vmem:[%s329_s1 + $0x80] sm:$0xff]  ;;  %v46_v45 = vld [vmem:[%s329_s1 + $0x88] sm:$0xff]  ;;  %v19_v47 = vld [vmem:[%s331_s0 + $0x10] sm:$0xff]  ;;  %v61_v48 = vpack.c.bf16 %v30_v43, %v29_v42 }
   0xc   :  { %83 = vmatpush.bf16.msra.mxu0 %v66_v16  ;;  %138 = vmatpush.bf16.msra.mxu2 %v66_v16  ;;  %v17_v46 = vld [vmem:[%s331_s0] sm:$0xff]  ;;  %v23_v50 = vld [vmem:[%s331_s0 + $0x30] sm:$0xff]  ;;  %v18_v51 = vld [vmem:[%s331_s0 + $0x8] sm:$0xff]  ;;  %v69_v52 = vpack.c.bf16 %v46_v45, %v45_v44 }
   0xd   :  { %102 = vmatpush.bf16.msra.mxu1 %v74_v17  ;;  %146 = vmatpush.bf16.msra.mxu3 %v74_v17  ;;  %v21_v49 = vld [vmem:[%s331_s0 + $0x20] sm:$0xff]  ;;  %v20_v53 = vld [vmem:[%s331_s0 + $0x18] sm:$0xff]  ;;  %v22_v54 = vld [vmem:[%s331_s0 + $0x28] sm:$0xff]  ;;  %v25_v56 = vpack.c.bf16 %v19_v47, %v17_v46 }
   0xe   :  { %v24_v55 = vld [vmem:[%s331_s0 + $0x38] sm:$0xff]  ;;  %v27_v57 = vpack.c.bf16 %v23_v50, %v21_v49  ;;  %v26_v58 = vpack.c.bf16 %v20_v53, %v18_v51  ;;  %v152_v60 = vld [vmem:[%s330_s2] ss:$0 sm:$0xff]  ;;  %v121_v6 = vld [vmem:[%s332_s3 + $0x10] sm:$0xff] }
   0xf   :  { %v28_v59 = vpack.c.bf16 %v24_v55, %v22_v54  ;;  %v119_v0 = vld [vmem:[%s332_s3] sm:$0xff]  ;;  %v120_v11 = vld [vmem:[%s332_s3 + $0x8] sm:$0xff]  ;;  %v122_v18 = vld [vmem:[%s332_s3 + $0x18] sm:$0xff] }
  0x10   :  { %84 = vmatpush.bf16.msra.mxu0 %v65_v22  ;;  %139 = vmatpush.bf16.msra.mxu2 %v65_v22 }
  0x11   :  { %103 = vmatpush.bf16.msra.mxu1 %v73_v23  ;;  %147 = vmatpush.bf16.msra.mxu3 %v73_v23 }
  0x14   :  { %85 = vmatpush.bf16.msra.mxu0 %v64_v28  ;;  %140 = vmatpush.bf16.msra.mxu2 %v64_v28 }
  0x15   :  { %104 = vmatpush.bf16.msra.mxu1 %v72_v29  ;;  %148 = vmatpush.bf16.msra.mxu3 %v72_v29 }
  0x18   :  { %86 = vmatpush.bf16.msra.mxu0 %v63_v34  ;;  %141 = vmatpush.bf16.msra.mxu2 %v63_v34 }
  0x19   :  { %105 = vmatpush.bf16.msra.mxu1 %v71_v35  ;;  %149 = vmatpush.bf16.msra.mxu3 %v71_v35 }
  0x1c   :  { %87 = vmatpush.bf16.msra.mxu0 %v62_v40  ;;  %142 = vmatpush.bf16.msra.mxu2 %v62_v40 }
  0x1d   :  { %106 = vmatpush.bf16.msra.mxu1 %v70_v41  ;;  %150 = vmatpush.bf16.msra.mxu3 %v70_v41 }
  0x20   :  { %88 = vmatpush.bf16.msra.mxu0 %v61_v48  ;;  %143 = vmatpush.bf16.msra.mxu2 %v61_v48 }
  0x21   :  { %107 = vmatpush.bf16.msra.mxu1 %v69_v52  ;;  %151 = vmatpush.bf16.msra.mxu3 %v69_v52 }
  0x23   :  { %89 = vmatmul.bf16.vlgmr.msra.gmra.mxu0 %v25_v56  ;;  %94 = vmatmul.bf16.vlgmr.msra.gmra.mxu2 %v27_v57 }
  0x24   :  { %108 = vmatmul.bf16.vlgmr.msra.gmra.mxu1 %v26_v58  ;;  %113 = vmatmul.bf16.vlgmr.msra.gmra.mxu3 %v28_v59 }
  0xa0   :  { %v90_v61 = vpop.f32.mrf.mxu0 }
  0xa1   :  { %v91_v62 = vadd.f32 %v152_v60, %v90_v61  ;;  %v109_v63 = vpop.f32.mrf.mxu1 }
  0xa3   :  { %v110_v1 = vadd.f32 %v109_v63, %v91_v62 }
  0xa5   :  { %v123_v2 = vadd.f32 %v119_v0, %v110_v1 }
  0xa6   :  { %v95_v3 = vpop.f32.mrf.mxu2 }
  0xa7   :  { %128 = vst.msk [vmem:[%s333_s4] sm:$0xff] %vm127_vm0, %v123_v2  ;;  %v96_v4 = vadd.f32 %v152_v60, %v95_v3  ;;  %v114_v5 = vpop.f32.mrf.mxu3 }
  0xa8   :  { %v92_v7 = vpop.f32.mrf.mxu0 }
  0xa9   :  { %v115_v8 = vadd.f32 %v114_v5, %v96_v4  ;;  %v93_v9 = vadd.f32 %v152_v60, %v92_v7  ;;  %v111_v10 = vpop.f32.mrf.mxu1 }
  0xab   :  { %v125_v12 = vadd.f32 %v121_v6, %v115_v8  ;;  %v112_v13 = vadd.f32 %v111_v10, %v93_v9 }
  0xad   :  { %130 = vst.msk [vmem:[%s333_s4 + $0x10] sm:$0xff] %vm127_vm0, %v125_v12  ;;  %v124_v14 = vadd.f32 %v120_v11, %v112_v13 }
  0xae   :  { %v97_v15 = vpop.f32.mrf.mxu2 }
  0xaf   :  { %129 = vst.msk [vmem:[%s333_s4 + $0x8] sm:$0xff] %vm127_vm0, %v124_v14  ;;  %v98_v16 = vadd.f32 %v152_v60, %v97_v15  ;;  %v116_v17 = vpop.f32.mrf.mxu3 }
  0xb1   :  { %v117_v19 = vadd.f32 %v116_v17, %v98_v16 }
  0xb3   :  { %v126_v20 = vadd.f32 %v122_v18, %v117_v19 }
  0xb5   :  { %131 = vst.msk [vmem:[%s333_s4 + $0x18] sm:$0xff] %vm127_vm0, %v126_v20 }

// kernel: rgb_context_decoder_forward.12
= control target key start
LH: loop header
LB: loop body
LE: loop exit
PB: predicated region body
PF: predicated region fallthrough
CT: control target
= control target key end

     0   :  { %vm31_vm0 = vcmask 261120   ;;  %v306_v8 = vmov 32.0   ;;  %s477_s0 = inlined_call_operand.vmem [shape: f32[32,32], index: 0, kind: input, shape index: {}]   ;;  %s478_s1 = inlined_call_operand.vmem [shape: f32[1,32], index: 1, kind: input, shape index: {}]   ;;  %s479_s2 = inlined_call_operand.vmem [shape: f32[1,32], index: 2, kind: input, shape index: {}]   ;;  %s480_s4 = inlined_call_operand.vmem [shape: f32[1,128], index: 4, kind: input, shape index: {}]   ;;  %s481_s3 = inlined_call_operand.vmem [shape: f32[32,128], index: 3, kind: input, shape index: {}]   ;;  %s482_s6 = inlined_call_operand.vmem [shape: f32[1,32], index: 6, kind: input, shape index: {}]   ;;  %s483_s5 = inlined_call_operand.vmem [shape: f32[128,32], index: 5, kind: input, shape index: {}]   ;;  %s484_s7 = inlined_call_operand.vmem [shape: f32[32,32], index: 7, kind: output, shape index: {}]  }
   0x1   :  { %v29_v0 = vld [vmem:[%s477_s0 + $0x10] sm:$0xff]  ;;  %v27_v1 = vld [vmem:[%s477_s0] sm:$0xff]  ;;  %v30_v4 = vld [vmem:[%s477_s0 + $0x18] sm:$0xff]  ;;  %288 = vrcp.f32 %v306_v8 }
   0x2   :  { %v38_v2 = vsel %vm31_vm0, %v29_v0, 0.0  ;;  %v32_v3 = vsel %vm31_vm0, %v27_v1, 0.0  ;;  %v28_v5 = vld [vmem:[%s477_s0 + $0x8] sm:$0xff]  ;;  %v41_v6 = vsel %vm31_vm0, %v30_v4, 0.0  ;;  %v147_v35 = vld [vmem:[%s481_s3 + $0x10] sm:$0xff]  ;;  %v148_v36 = vld [vmem:[%s481_s3 + $0x18] sm:$0xff] }
   0x3   :  { %39 = vadd.xlane.f32.xlu1 %v38_v2  ;;  %33 = vadd.xlane.f32.xlu0 %v32_v3  ;;  %v35_v7 = vsel %vm31_vm0, %v28_v5, 0.0  ;;  %v150_v37 = vpack.c.bf16 %v148_v36, %v147_v35  ;;  %v145_v39 = vld [vmem:[%s481_s3] sm:$0xff]  ;;  %v146_v40 = vld [vmem:[%s481_s3 + $0x8] sm:$0xff]  ;;  %v232_v35 = vld [vmem:[%s483_s5 + $0x70] sm:$0xff] }
   0x4   :  { %v149_v43 = vpack.c.bf16 %v146_v40, %v145_v39  ;;  %v233_v36 = vld [vmem:[%s483_s5 + $0x78] sm:$0xff]  ;;  %v228_v39 = vld [vmem:[%s483_s5 + $0x50] sm:$0xff] }
   0x5   :  { %167 = vmatpush.bf16.msra.mxu0 %v150_v37  ;;  %v241_v37 = vpack.c.bf16 %v233_v36, %v232_v35  ;;  %v229_v40 = vld [vmem:[%s483_s5 + $0x58] sm:$0xff] }
   0x7   :  { %v289_v9 = vpop.eup %288  ;;  %246 = vmatpush.bf16.msra.mxu1 %v241_v37  ;;  %275 = vmatpush.bf16.msra.mxu2 %v241_v37 }
   0x8   :  { %v45_v10 = vmul.f32 32.0, %v289_v9  ;;  %vm49_vm1 = vweird.f32 %v289_v9 }
   0x9   :  { %168 = vmatpush.bf16.msra.mxu0 %v149_v43  ;;  %v227_v43 = vld [vmem:[%s483_s5 + $0x48] sm:$0xff] }
   0xa   :  { %v46_v11 = vsub.f32 1.0, %v45_v10 }
   0xb   :  { %42 = vadd.xlane.f32.xlu1 %v41_v6  ;;  %36 = vadd.xlane.f32.xlu0 %v35_v7 }
   0xc   :  { %v47_v12 = vmul.f32 %v289_v9, %v46_v11 }
   0xe   :  { %v48_v13 = vadd.f32 %v289_v9, %v47_v12 }
  0x10   :  { %v50_v14 = vsel %vm49_vm1, %v289_v9, %v48_v13  ;;  %v284_v9 = vld [vmem:[%s478_s1] ss:$0 sm:$0xff] }
  0x76   :  { %v40_v15 = vpop.xlane.xlu1 %39  ;;  %v34_v16 = vpop.xlane.xlu0 %33 }
  0x77   :  { %v53_v17 = vmul.f32 %v50_v14, %v40_v15  ;;  %v51_v18 = vmul.f32 %v50_v14, %v34_v16  ;;  %v285_v16 = vld [vmem:[%s479_s2] ss:$0 sm:$0xff] }
  0x79   :  { %v363_v19 = vsub.f32 %v29_v0, %v53_v17  ;;  %v365_v20 = vsub.f32 %v27_v1, %v51_v18 }
  0x7b   :  { %v61_v21 = vmul.f32 %v363_v19, %v363_v19  ;;  %v59_v22 = vmul.f32 %v365_v20, %v365_v20 }
  0x7d   :  { %v69_v23 = vsel %vm31_vm0, %v61_v21, 0.0  ;;  %v63_v24 = vsel %vm31_vm0, %v59_v22, 0.0 }
  0x7e   :  { %v43_v25 = vpop.xlane.xlu1 %42  ;;  %70 = vadd.xlane.f32.xlu0 %v69_v23  ;;  %64 = vadd.xlane.f32.xlu2 %v63_v24  ;;  %v37_v26 = vpop.xlane.xlu0 %36 }
  0x7f   :  { %v54_v27 = vmul.f32 %v50_v14, %v43_v25  ;;  %v52_v28 = vmul.f32 %v50_v14, %v37_v26 }
  0x81   :  { %v373_v29 = vsub.f32 %v30_v4, %v54_v27  ;;  %v375_v30 = vsub.f32 %v28_v5, %v52_v28 }
  0x83   :  { %v62_v31 = vmul.f32 %v373_v29, %v373_v29  ;;  %v60_v32 = vmul.f32 %v375_v30, %v375_v30 }
  0x85   :  { %v72_v33 = vsel %vm31_vm0, %v62_v31, 0.0  ;;  %v66_v34 = vsel %vm31_vm0, %v60_v32, 0.0 }
  0x86   :  { %73 = vadd.xlane.f32.xlu1 %v72_v33  ;;  %67 = vadd.xlane.f32.xlu2 %v66_v34 }
  0xf1   :  { %v65_v38 = vpop.xlane.xlu2 %64  ;;  %v71_v42 = vpop.xlane.xlu0 %70 }
  0xf2   :  { %v75_v41 = vmul.f32 %v65_v38, %v50_v14  ;;  %v77_v45 = vmul.f32 %v71_v42, %v50_v14  ;;  %v226_v42 = vld [vmem:[%s483_s5 + $0x40] sm:$0xff] }
  0xf4   :  { %v79_v44 = vadd.f32 1e-06, %v75_v41  ;;  %v81_v46 = vadd.f32 1e-06, %v77_v45  ;;  %v239_v41 = vpack.c.bf16 %v229_v40, %v228_v39  ;;  %v224_v45 = vld [vmem:[%s483_s5 + $0x30] sm:$0xff] }
  0xf5   :  { %v287_v40 = vld [vmem:[%s482_s6] ss:$0 sm:$0xff] }
  0xf6   :  { %290 = vrsqrt.f32 %v79_v44  ;;  %vm89_vm3 = vweird.f32 %v79_v44  ;;  %vm109_vm10 = vweird.f32 %v81_v46 }
  0xf7   :  { %292 = vrsqrt.f32 %v81_v46 }
  0xf9   :  { %v74_v47 = vpop.xlane.xlu1 %73  ;;  %v68_v48 = vpop.xlane.xlu2 %67 }
  0xfa   :  { %v78_v49 = vmul.f32 %v74_v47, %v50_v14  ;;  %v76_v50 = vmul.f32 %v68_v48, %v50_v14  ;;  %v222_v48 = vld [vmem:[%s483_s5 + $0x20] sm:$0xff] }
  0xfc   :  { %v291_v51 = vpop.eup %290  ;;  %v82_v52 = vadd.f32 1e-06, %v78_v49  ;;  %v80_v53 = vadd.f32 1e-06, %v76_v50  ;;  %v223_v49 = vld [vmem:[%s483_s5 + $0x28] sm:$0xff] }
  0xfd   :  { %v84_v54 = vmul.f32 %v291_v51, %v79_v44  ;;  %v293_v57 = vpop.eup %292  ;;  %vm90_vm2 = vweird.f32 %v291_v51  ;;  %v238_v44 = vpack.c.bf16 %v227_v43, %v226_v42  ;;  %v236_v50 = vpack.c.bf16 %v223_v49, %v222_v48 }
  0xfe   :  { %294 = vrsqrt.f32 %v82_v52  ;;  %v104_v63 = vmul.f32 %v293_v57, %v81_v46  ;;  %vm91_vm4 = vmor %vm89_vm3, %vm90_vm2  ;;  %vm99_vm6 = vweird.f32 %v80_v53  ;;  %vm119_vm8 = vweird.f32 %v82_v52  ;;  %v225_v46 = vld [vmem:[%s483_s5 + $0x38] sm:$0xff] }
  0xff   :  { %v85_v55 = vmul.f32 %v291_v51, %v84_v54  ;;  %296 = vrsqrt.f32 %v80_v53  ;;  %vm110_vm11 = vweird.f32 %v293_v57  ;;  %v237_v47 = vpack.c.bf16 %v225_v46, %v224_v45  ;;  %v286_v54 = vld [vmem:[%s480_s4] ss:$0 sm:$0xff] }
 0x100   :  { %v105_v4 = vmul.f32 %v293_v57, %v104_v63  ;;  %vm111_vm13 = vmor %vm109_vm10, %vm110_vm11 }
 0x101   :  { %v86_v56 = vmul.f32 0.5, %v85_v55  ;;  %v218_v55 = vld [vmem:[%s483_s5] sm:$0xff] }
 0x102   :  { %v106_v10 = vmul.f32 0.5, %v105_v4 }
 0x103   :  { %v87_v58 = vsub.f32 1.5, %v86_v56  ;;  %v219_v56 = vld [vmem:[%s483_s5 + $0x8] sm:$0xff] }
 0x104   :  { %v295_v59 = vpop.eup %294  ;;  %v107_v17 = vsub.f32 1.5, %v106_v10 }
 0x105   :  { %v297_v60 = vpop.eup %296  ;;  %v114_v61 = vmul.f32 %v295_v59, %v82_v52  ;;  %v88_v62 = vmul.f32 %v291_v51, %v87_v58  ;;  %vm120_vm9 = vweird.f32 %v295_v59  ;;  %v221_v52 = vld [vmem:[%s483_s5 + $0x18] sm:$0xff] }
 0x106   :  { %v94_v0 = vmul.f32 %v297_v60, %v80_v53  ;;  %vm100_vm5 = vweird.f32 %v297_v60  ;;  %vm121_vm12 = vmor %vm119_vm8, %vm120_vm9  ;;  %v108_v23 = vmul.f32 %v293_v57, %v107_v17 }
 0x107   :  { %v115_v1 = vmul.f32 %v295_v59, %v114_v61  ;;  %v92_v3 = vsel %vm91_vm4, %v291_v51, %v88_v62  ;;  %vm101_vm7 = vmor %vm99_vm6, %vm100_vm5  ;;  %v220_v51 = vld [vmem:[%s483_s5 + $0x10] sm:$0xff] }
 0x108   :  { %v95_v2 = vmul.f32 %v297_v60, %v94_v0  ;;  %v123_v8 = vmul.f32 %v92_v3, %v365_v20  ;;  %v112_v26 = vsel %vm111_vm13, %v293_v57, %v108_v23  ;;  %v235_v53 = vpack.c.bf16 %v221_v52, %v220_v51 }
 0x109   :  { %v116_v6 = vmul.f32 0.5, %v115_v1  ;;  %v125_v28 = vmul.f32 %v112_v26, %v363_v19  ;;  %v230_v19 = vld [vmem:[%s483_s5 + $0x60] sm:$0xff]  ;;  %v234_v57 = vpack.c.bf16 %v219_v56, %v218_v55 }
 0x10a   :  { %v96_v5 = vmul.f32 0.5, %v95_v2  ;;  %v131_v15 = vmul.f32 %v284_v9, %v123_v8 }
 0x10b   :  { %v117_v12 = vsub.f32 1.5, %v116_v6  ;;  %v133_v31 = vmul.f32 %v284_v9, %v125_v28 }
 0x10c   :  { %v97_v7 = vsub.f32 1.5, %v96_v5  ;;  %v139_v21 = vadd.f32 %v285_v16, %v131_v15 }
 0x10d   :  { %v118_v20 = vmul.f32 %v295_v59, %v117_v12  ;;  %v141_v33 = vadd.f32 %v285_v16, %v133_v31 }
 0x10e   :  { %v98_v11 = vmul.f32 %v297_v60, %v97_v7 }
 0x10f   :  { %v122_v25 = vsel %vm121_vm12, %v295_v59, %v118_v20 }
 0x110   :  { %v102_v13 = vsel %vm101_vm7, %v297_v60, %v98_v11  ;;  %v126_v27 = vmul.f32 %v122_v25, %v373_v29  ;;  %v231_v29 = vld [vmem:[%s483_s5 + $0x68] sm:$0xff] }
 0x111   :  { %v124_v14 = vmul.f32 %v102_v13, %v375_v30  ;;  %v240_v38 = vpack.c.bf16 %v231_v29, %v230_v19 }
 0x112   :  { %v134_v30 = vmul.f32 %v284_v9, %v126_v27 }
 0x113   :  { %v132_v18 = vmul.f32 %v284_v9, %v124_v14  ;;  %247 = vmatpush.bf16.msra.mxu1 %v240_v38  ;;  %276 = vmatpush.bf16.msra.mxu2 %v240_v38 }
 0x114   :  { %v142_v32 = vadd.f32 %v285_v16, %v134_v30 }
 0x115   :  { %v140_v22 = vadd.f32 %v285_v16, %v132_v18 }
 0x116   :  { %v144_v34 = vpack.c.bf16 %v142_v32, %v141_v33 }
 0x117   :  { %v143_v24 = vpack.c.bf16 %v140_v22, %v139_v21  ;;  %248 = vmatpush.bf16.msra.mxu1 %v239_v41  ;;  %277 = vmatpush.bf16.msra.mxu2 %v239_v41 }
 0x119   :  { %273 = vmatmul.msk.bf16.vlgmr.msra.gmra.mxu0 %vm31_vm0, %v143_v24 }
 0x11b   :  { %249 = vmatpush.bf16.msra.mxu1 %v238_v44  ;;  %278 = vmatpush.bf16.msra.mxu2 %v238_v44 }
 0x11f   :  { %250 = vmatpush.bf16.msra.mxu1 %v237_v47  ;;  %279 = vmatpush.bf16.msra.mxu2 %v237_v47 }
 0x123   :  { %251 = vmatpush.bf16.msra.mxu1 %v236_v50  ;;  %280 = vmatpush.bf16.msra.mxu2 %v236_v50 }
 0x127   :  { %252 = vmatpush.bf16.msra.mxu1 %v235_v53  ;;  %281 = vmatpush.bf16.msra.mxu2 %v235_v53 }
 0x129   :  { %274 = vmatmul.msk.bf16.gmra.mxu0 %vm31_vm0, %v144_v34 }
 0x12b   :  { %253 = vmatpush.bf16.msra.mxu1 %v234_v57  ;;  %282 = vmatpush.bf16.msra.mxu2 %v234_v57 }
 0x196   :  { %v170_v58 = vpop.f32.mrf.mxu0 }
 0x197   :  { %v171_v59 = vadd.f32 %v286_v54, %v170_v58 }
 0x199   :  { %v180_v60 = vmul.f32 %v171_v59, %v171_v59 }
 0x19b   :  { %v184_v61 = vmul.f32 %v180_v60, %v171_v59 }
 0x19d   :  { %v188_v62 = vmul.f32 0.044715, %v184_v61 }
 0x19e   :  { %v172_v63 = vpop.f32.mrf.mxu0 }
 0x19f   :  { %v192_v0 = vadd.f32 %v188_v62, %v171_v59  ;;  %v173_v1 = vadd.f32 %v286_v54, %v172_v63 }
 0x1a1   :  { %v181_v2 = vmul.f32 %v173_v1, %v173_v1  ;;  %v196_v3 = vmul.f32 0.7978846, %v192_v0 }
 0x1a3   :  { %v185_v4 = vmul.f32 %v181_v2, %v173_v1  ;;  %298 = vtanh.f32 %v196_v3 }
 0x1a5   :  { %v189_v5 = vmul.f32 0.044715, %v185_v4 }
 0x1a6   :  { %v175_v6 = vpop.f32.mrf.mxu0 }
 0x1a7   :  { %v193_v7 = vadd.f32 %v189_v5, %v173_v1  ;;  %v176_v8 = vadd.f32 %v286_v54, %v175_v6 }
 0x1a9   :  { %v182_v9 = vmul.f32 %v176_v8, %v176_v8  ;;  %v197_v10 = vmul.f32 0.7978846, %v193_v7  ;;  %v299_v11 = vpop.eup %298 }
 0x1aa   :  { %v204_v15 = vadd.f32 1.0, %v299_v11 }
 0x1ab   :  { %v186_v12 = vmul.f32 %v182_v9, %v176_v8  ;;  %300 = vtanh.f32 %v197_v10 }
 0x1ac   :  { %v208_v23 = vmul.f32 0.5, %v204_v15 }
 0x1ad   :  { %v190_v13 = vmul.f32 0.044715, %v186_v12 }
 0x1ae   :  { %v177_v14 = vpop.f32.mrf.mxu0  ;;  %v212_v27 = vmul.f32 %v208_v23, %v171_v59 }
 0x1af   :  { %v194_v16 = vadd.f32 %v190_v13, %v176_v8  ;;  %v178_v17 = vadd.f32 %v286_v54, %v177_v14 }
 0x1b1   :  { %v301_v18 = vpop.eup %300  ;;  %v183_v20 = vmul.f32 %v178_v17, %v178_v17  ;;  %v198_v21 = vmul.f32 0.7978846, %v194_v16 }
 0x1b2   :  { %v205_v22 = vadd.f32 1.0, %v301_v18 }
 0x1b3   :  { %v187_v24 = vmul.f32 %v183_v20, %v178_v17  ;;  %302 = vtanh.f32 %v198_v21 }
 0x1b4   :  { %v209_v25 = vmul.f32 0.5, %v205_v22 }
 0x1b5   :  { %v191_v26 = vmul.f32 0.044715, %v187_v24 }
 0x1b6   :  { %v213_v28 = vmul.f32 %v209_v25, %v173_v1 }
 0x1b7   :  { %v195_v30 = vadd.f32 %v191_v26, %v178_v17 }
 0x1b8   :  { %v216_v31 = vpack.c.bf16 %v213_v28, %v212_v27 }
 0x1b9   :  { %v199_v32 = vmul.f32 0.7978846, %v195_v30  ;;  %v303_v33 = vpop.eup %302 }
 0x1ba   :  { %254 = vmatmul.bf16.vlgmr.msra.gmra.mxu1 %v216_v31  ;;  %v206_v34 = vadd.f32 1.0, %v303_v33 }
 0x1bb   :  { %304 = vtanh.f32 %v199_v32 }
 0x1bc   :  { %v210_v37 = vmul.f32 0.5, %v206_v34 }
 0x1be   :  { %v214_v29 = vmul.f32 %v210_v37, %v176_v8 }
 0x1c1   :  { %v305_v35 = vpop.eup %304 }
 0x1c2   :  { %v207_v36 = vadd.f32 1.0, %v305_v35 }
 0x1c4   :  { %v211_v19 = vmul.f32 0.5, %v207_v36 }
 0x1c6   :  { %v215_v38 = vmul.f32 %v211_v19, %v178_v17 }
 0x1c8   :  { %v217_v39 = vpack.c.bf16 %v215_v38, %v214_v29 }
 0x1ca   :  { %259 = vmatmul.bf16.vlgmr.msra.gmra.mxu2 %v217_v39 }
 0x237   :  { %v255_v41 = vpop.f32.mrf.mxu1 }
 0x238   :  { %v256_v42 = vadd.f32 %v287_v40, %v255_v41 }
 0x23a   :  { %265 = vst.msk [vmem:[%s484_s7] sm:$0xff] %vm31_vm0, %v256_v42 }
 0x23f   :  { %v257_v43 = vpop.f32.mrf.mxu1 }
 0x240   :  { %v258_v44 = vadd.f32 %v287_v40, %v257_v43 }
 0x242   :  { %266 = vst.msk [vmem:[%s484_s7 + $0x8] sm:$0xff] %vm31_vm0, %v258_v44 }
 0x24d   :  { %v260_v45 = vpop.f32.mrf.mxu2 }
 0x24e   :  { %v261_v46 = vadd.f32 %v287_v40, %v260_v45 }
 0x250   :  { %267 = vst.msk [vmem:[%s484_s7 + $0x10] sm:$0xff] %vm31_vm0, %v261_v46 }
 0x255   :  { %v262_v47 = vpop.f32.mrf.mxu2 }
 0x256   :  { %v263_v48 = vadd.f32 %v287_v40, %v262_v47 }
 0x258   :  { %268 = vst.msk [vmem:[%s484_s7 + $0x18] sm:$0xff] %vm31_vm0, %v263_v48 }

// kernel: rgb_context_decoder_forward.13
= control target key start
LH: loop header
LB: loop body
LE: loop exit
PB: predicated region body
PF: predicated region fallthrough
CT: control target
= control target key end

     0   :  { %s1361_s27 = smov 0   ;;  %s1363_s28 = smov 0   ;;  %s1595_s0 = inlined_call_operand.vmem [shape: f32[2,16,32], index: 0, kind: input, shape index: {}]   ;;  %s1596_s1 = inlined_call_operand.vmem [shape: f32[2,16,32], index: 1, kind: input, shape index: {}]   ;;  %s1597_s2 = inlined_call_operand.vmem [shape: f32[1,32], index: 2, kind: input, shape index: {}]   ;;  %s1598_s3 = inlined_call_operand.vmem [shape: f32[1,32], index: 3, kind: input, shape index: {}]   ;;  %s1599_s4 = inlined_call_operand.vmem [shape: f32[32,32], index: 4, kind: input, shape index: {}]   ;;  %s1600_s5 = inlined_call_operand.vmem [shape: f32[1,32], index: 5, kind: input, shape index: {}]   ;;  %s1601_s6 = inlined_call_operand.vmem [shape: f32[32,32], index: 6, kind: input, shape index: {}]   ;;  %s1602_s7 = inlined_call_operand.vmem [shape: f32[1,32], index: 7, kind: input, shape index: {}]   ;;  %s1603_s8 = inlined_call_operand.vmem [shape: f32[32,32], index: 8, kind: input, shape index: {}]   ;;  %s1604_s9 = inlined_call_operand.vmem [shape: f32[1,32], index: 9, kind: input, shape index: {}]   ;;  %s1605_s10 = inlined_call_operand.vmem [shape: f32[32,32], index: 10, kind: input, shape index: {}]   ;;  %s1606_s11 = inlined_call_operand.vmem [shape: f32[1,32], index: 11, kind: input, shape index: {}]   ;;  %s1607_s12 = inlined_call_operand.vmem [shape: f32[1,32], index: 12, kind: input, shape index: {}]   ;;  %s1608_s13 = inlined_call_operand.vmem [shape: f32[1,32], index: 13, kind: input, shape index: {}]   ;;  %s1609_s14 = inlined_call_operand.vmem [shape: f32[32,128], index: 14, kind: input, shape index: {}]   ;;  %s1610_s15 = inlined_call_operand.vmem [shape: f32[1,128], index: 15, kind: input, shape index: {}]   ;;  %s1611_s16 = inlined_call_operand.vmem [shape: f32[128,32], index: 16, kind: input, shape index: {}]   ;;  %s1612_s17 = inlined_call_operand.vmem [shape: f32[1,32], index: 17, kind: input, shape index: {}]   ;;  %s1613_s18 = inlined_call_operand.vmem [shape: f32[2,16,32], index: 18, kind: output, shape index: {}]  }
   0x1   :  { %1614 = sst [smem:[#allocation2_spill]] %s1595_s0  ;;  %s1365_s29 = smov 0  }
   0x2   :  { %1615 = sst [smem:[#allocation3_spill]] %s1596_s1 }
   0x3   :  { %1616 = sst [smem:[#allocation4_spill]] %s1597_s2 }
   0x4 LB: > { %s40_s30 = sadd.s32 1, %s1259_s28  ;;  %p1164_p0 = scmp.ge.s32.totalorder %s1263_s29, 1  ;;  %s1263_s29 = sphi %s1365_s29, %s28_s29   ;;  %s1259_s28 = sphi %s1363_s28, %s1621_s28   ;;  %s1255_s27 = sphi %s1361_s27, %s1620_s27  }
   0x5   : > { %p42_p1 = scmp.ge.s32.totalorder %s40_s30, 2  ;;  %p543_p2 = scmp.lt.s32.totalorder %s1263_s29, 3 }
   0x7   : > { %s1623_s30 = smov (%p42_p1, %s40_s30), 0  ;;  %p544_p3 = pnand %p1164_p0, %p543_p2 }
   0x8   : > { %p611_p4 = scmp.lt.s32.totalorder (!%p544_p3), %s1255_s27, 1  ;;  %s1617_s0 = sld [smem:[#allocation2_spill]] (!%p544_p3) }
   0x9   : > { %547 = sbr.rel (%p544_p3) target bundleno = 1686 (0x696), region = 92  ;;  %s1618_s21 = sld [smem:[#allocation3_spill]] (!%p544_p3) }
   0xa   : > { %s1619_s2 = sld [smem:[#allocation4_spill]] (!%p544_p3) }
   0xe   : > { %v735_v0 = vld [vmem:[%s1601_s6 + $0x10] sm:$0xff]  ;;  %v736_v1 = vld [vmem:[%s1601_s6 + $0x18] sm:$0xff]  ;;  %v733_v2 = vld [vmem:[%s1601_s6] sm:$0xff]  ;;  %s1625_s27 = smov (!%p611_p4, %s1255_s27), 1  ;;  %vm640_vm0 = vcmask 261120   ;;  %v1265_v13 = vmov 32.0  }
   0xf   : > { %v738_v3 = vpack.c.bf16 %v736_v1, %v735_v0  ;;  %v734_v4 = vld [vmem:[%s1601_s6 + $0x8] sm:$0xff]  ;;  %s1391_s24 = sshll.u32 %s1625_s27, 4  ;;  %1219 = vrcp.f32 %v1265_v13  ;;  %v1209_v27 = vld [vmem:[%s1602_s7] ss:$0 sm:$0xff]  ;;  %v707_v35 = vld [vmem:[%s1599_s4 + $0x10] sm:$0xff]  ;;  %vm836_vm8 = vcmask 130048  }
  0x10   : > { %v737_v5 = vpack.c.bf16 %v734_v4, %v733_v2  ;;  %s618_s19 = scalar_lea.vmem %s1617_s0, %s1391_s24  ;;  %s624_s22 = scalar_lea.vmem %s1618_s21, %s1391_s24  ;;  %v708_v36 = vld [vmem:[%s1599_s4 + $0x18] sm:$0xff]  ;;  %v705_v38 = vld [vmem:[%s1599_s4] sm:$0xff]  ;;  %v706_v39 = vld [vmem:[%s1599_s4 + $0x8] sm:$0xff] }
  0x11   : > { %752 = vmatpush.bf16.msra.mxu1 %v738_v3  ;;  %v1397_v6 = vld [vmem:[%s618_s19] sm:$0xff]  ;;  %v639_v9 = vld [vmem:[%s624_s22 + $0x8] sm:$0xff]  ;;  %v710_v37 = vpack.c.bf16 %v708_v36, %v707_v35  ;;  %v709_v41 = vpack.c.bf16 %v706_v39, %v705_v38 }
  0x12   : > { %v641_v7 = vsel %vm640_vm0, %v1397_v6, 0.0  ;;  %v638_v8 = vld [vmem:[%s624_s22] sm:$0xff]  ;;  %v1407_v11 = vld [vmem:[%s618_s19 + $0x8] sm:$0xff]  ;;  %s633_s22 = scalar_lea.vmem %s1613_s18, %s1391_s24 }
  0x13   : > { %642 = vadd.xlane.f32.xlu0 %v641_v7  ;;  %v1405_v10 = vpack.c.bf16 %v639_v9, %v638_v8  ;;  %v644_v12 = vsel %vm640_vm0, %v1407_v11, 0.0  ;;  %724 = vmatpush.bf16.msra.mxu0 %v710_v37  ;;  %v1210_v60 = vld [vmem:[%s1619_s2] ss:$0 sm:$0xff] }
  0x14   : > { %v1211_v1 = vld [vmem:[%s1598_s3] ss:$0 sm:$0xff] }
  0x15   : > { %753 = vmatpush.bf16.msra.mxu1 %v737_v5  ;;  %v1220_v14 = vpop.eup %1219  ;;  %v1213_v36 = vld [vmem:[%s1604_s9] ss:$0 sm:$0xff] }
  0x16   : > { %v648_v15 = vmul.f32 32.0, %v1220_v14  ;;  %vm652_vm1 = vweird.f32 %v1220_v14 }
  0x17   : > { %725 = vmatpush.bf16.msra.mxu0 %v709_v41 }
  0x18   : > { %1172 = vmatmul.msk.bf16.vlgmr.msra.gmra.mxu1 %vm640_vm0, %v1405_v10  ;;  %v649_v16 = vsub.f32 1.0, %v648_v15 }
  0x1a   : > { %v650_v17 = vmul.f32 %v1220_v14, %v649_v16  ;;  %v1212_v16 = vld [vmem:[%s1600_s5] ss:$0 sm:$0xff] }
  0x1b   : > { %645 = vadd.xlane.f32.xlu0 %v644_v12 }
  0x1c   : > { %v651_v18 = vadd.f32 %v1220_v14, %v650_v17 }
  0x1e   : > { %v1413_v19 = vsel %vm652_vm1, %v1220_v14, %v651_v18 }
  0x86   : > { %v643_v20 = vpop.xlane.xlu0 %642 }
  0x87   : > { %v654_v21 = vmul.f32 %v1413_v19, %v643_v20 }
  0x89   : > { %v656_v22 = vsub.f32 %v1397_v6, %v654_v21 }
  0x8b   : > { %v658_v23 = vmul.f32 %v656_v22, %v656_v22 }
  0x8d   : > { %v660_v24 = vsel %vm640_vm0, %v658_v23, 0.0  ;;  %v763_v23 = vld [vmem:[%s1603_s8 + $0x18] sm:$0xff] }
  0x8e   : > { %661 = vadd.xlane.f32.xlu1 %v660_v24  ;;  %v646_v25 = vpop.xlane.xlu0 %645  ;;  %v760_v24 = vld [vmem:[%s1603_s8] sm:$0xff] }
  0x8f   : > { %v655_v26 = vmul.f32 %v1413_v19, %v646_v25 }
  0x91   : > { %v657_v28 = vsub.f32 %v1407_v11, %v655_v26  ;;  %v761_v26 = vld [vmem:[%s1603_s8 + $0x8] sm:$0xff] }
  0x93   : > { %v659_v30 = vmul.f32 %v657_v28, %v657_v28 }
  0x95   : > { %v755_v29 = vpop.f32.mrf.mxu1  ;;  %v663_v32 = vsel %vm640_vm0, %v659_v30, 0.0 }
  0x96   : > { %v756_v31 = vadd.f32 %v1209_v27, %v755_v29  ;;  %664 = vadd.xlane.f32.xlu1 %v663_v32 }
  0x98   : > { %785 = vxpose.xlu2.b32.start [1/2] (short) (narrow) %v756_v31, 32 }
  0x9d   : > { %v757_v33 = vpop.f32.mrf.mxu1 }
  0x9e   : > { %v758_v34 = vadd.f32 %v1209_v27, %v757_v33  ;;  %v764_v27 = vpack.c.bf16 %v761_v26, %v760_v24  ;;  %v968_v24 = vld [vmem:[%s1609_s14 + $0x8] sm:$0xff] }
  0xa0   : > { %786 = vxpose.xlu2.b32.end [2/2] (short) (narrow) %v758_v34, 32 }
 0x101   : > { %v662_v40 = vpop.xlane.xlu1 %661 }
 0x102   : > { %v666_v42 = vmul.f32 %v662_v40, %v1413_v19 }
 0x104   : > { %v668_v43 = vadd.f32 1e-05, %v666_v42 }
 0x106   : > { %1221 = vrsqrt.f32 %v668_v43  ;;  %vm676_vm3 = vweird.f32 %v668_v43 }
 0x109   : > { %v665_v44 = vpop.xlane.xlu1 %664 }
 0x10a   : > { %v667_v45 = vmul.f32 %v665_v44, %v1413_v19 }
 0x10c   : > { %v1222_v46 = vpop.eup %1221  ;;  %v669_v47 = vadd.f32 1e-05, %v667_v45 }
 0x10d   : > { %v671_v48 = vmul.f32 %v1222_v46, %v668_v43  ;;  %vm677_vm2 = vweird.f32 %v1222_v46 }
 0x10e   : > { %1223 = vrsqrt.f32 %v669_v47  ;;  %vm678_vm4 = vmor %vm676_vm3, %vm677_vm2  ;;  %vm686_vm6 = vweird.f32 %v669_v47 }
 0x10f   : > { %v672_v49 = vmul.f32 %v1222_v46, %v671_v48  ;;  %v882_v48 = vld [vmem:[%s1605_s10 + $0x18] sm:$0xff] }
 0x111   : > { %v673_v50 = vmul.f32 0.5, %v672_v49 }
 0x113   : > { %v674_v51 = vsub.f32 1.5, %v673_v50 }
 0x114   : > { %v1224_v52 = vpop.eup %1223 }
 0x115   : > { %v675_v53 = vmul.f32 %v1222_v46, %v674_v51  ;;  %v681_v54 = vmul.f32 %v1224_v52, %v669_v47  ;;  %vm687_vm5 = vweird.f32 %v1224_v52  ;;  %v881_v47 = vld [vmem:[%s1605_s10 + $0x10] sm:$0xff] }
 0x116   : > { %vm688_vm7 = vmor %vm686_vm6, %vm687_vm5  ;;  %v884_v49 = vpack.c.bf16 %v882_v48, %v881_v47  ;;  %v1216_v48 = vld [vmem:[%s1608_s13] ss:$0 sm:$0xff] }
 0x117   : > { %v682_v55 = vmul.f32 %v1224_v52, %v681_v54  ;;  %v679_v56 = vsel %vm678_vm4, %v1222_v46, %v675_v53 }
 0x118   : > { %v690_v59 = vmul.f32 %v679_v56, %v656_v22  ;;  %v762_v22 = vld [vmem:[%s1603_s8 + $0x10] sm:$0xff]  ;;  %894 = vmatpush.bf16.msrb.mxu1 %v884_v49 }
 0x119   : > { %v683_v57 = vmul.f32 0.5, %v682_v55  ;;  %v765_v25 = vpack.c.bf16 %v763_v23, %v762_v22  ;;  %v967_v23 = vld [vmem:[%s1609_s14] sm:$0xff] }
 0x11a   : > { %v696_v0 = vmul.f32 %v1210_v60, %v690_v59  ;;  %v971_v26 = vpack.c.bf16 %v968_v24, %v967_v23 }
 0x11b   : > { %v684_v58 = vsub.f32 1.5, %v683_v57  ;;  %776 = vmatpush.bf16.msra.mxu2 %v765_v25  ;;  %v879_v57 = vld [vmem:[%s1605_s10] sm:$0xff] }
 0x11c   : > { %v702_v3 = vadd.f32 %v1211_v1, %v696_v0 }
 0x11d   : > { %v685_v61 = vmul.f32 %v1224_v52, %v684_v58  ;;  %v880_v58 = vld [vmem:[%s1605_s10 + $0x8] sm:$0xff] }
 0x11e   : > { %v883_v59 = vpack.c.bf16 %v880_v58, %v879_v57  ;;  %v1026_v57 = vld [vmem:[%s1611_s16 + $0x68] sm:$0xff] }
 0x11f   : > { %v689_v62 = vsel %vm688_vm7, %v1224_v52, %v685_v61  ;;  %777 = vmatpush.bf16.msra.mxu2 %v764_v27 }
 0x120   : > { %v691_v63 = vmul.f32 %v689_v62, %v657_v28  ;;  %895 = vmatpush.bf16.msrb.mxu1 %v883_v59  ;;  %v1023_v59 = vld [vmem:[%s1611_s16 + $0x50] sm:$0xff] }
 0x122   : > { %v697_v2 = vmul.f32 %v1210_v60, %v691_v63  ;;  %1173 = vmatmul.msk.bf16.vlgmr.msra.gmra.mxu2 %vm640_vm0, %v1405_v10  ;;  %v1214_v63 = vld [vmem:[%s1606_s11] ss:$0 sm:$0xff] }
 0x124   : > { %v703_v4 = vadd.f32 %v1211_v1, %v697_v2 }
 0x126   : > { %v704_v5 = vpack.c.bf16 %v703_v4, %v702_v3 }
 0x128   : > { %1171 = vmatmul.msk.bf16.vlgmr.msra.gmra.mxu0 %vm640_vm0, %v704_v5 }
 0x131   : > { %v801_v7 = vpop.trf.xlu2 }
 0x139   : > { %v802_v8 = vpop.trf.xlu2 }
 0x13a   : > { %v817_v14 = vpack.c.bf16 %v802_v8, %v801_v7 }
 0x141   : > { %v803_v9 = vpop.trf.xlu2 }
 0x149   : > { %v804_v12 = vpop.trf.xlu2 }
 0x14a   : > { %v818_v13 = vpack.c.bf16 %v804_v12, %v803_v9 }
 0x14c   : > { %828 = vmatpush.bf16.msra.mxu3 %v818_v13 }
 0x150   : > { %829 = vmatpush.bf16.msra.mxu3 %v817_v14 }
 0x1a5   : > { %v727_v15 = vpop.f32.mrf.mxu0  ;;  %v779_v34 = vpop.f32.mrf.mxu2 }
 0x1a6   : > { %v728_v18 = vadd.f32 %v1212_v16, %v727_v15  ;;  %v780_v38 = vadd.f32 %v1213_v36, %v779_v34 }
 0x1ad   : > { %v729_v17 = vpop.f32.mrf.mxu0  ;;  %v781_v39 = vpop.f32.mrf.mxu2 }
 0x1ae   : > { %v730_v20 = vadd.f32 %v1212_v16, %v729_v17  ;;  %v782_v42 = vadd.f32 %v1213_v36, %v781_v39 }
 0x1b0   : > { %v784_v21 = vpack.c.bf16 %v730_v20, %v728_v18  ;;  %v860_v44 = vpack.c.bf16 %v782_v42, %v780_v38  ;;  %v969_v20 = vld [vmem:[%s1609_s14 + $0x10] sm:$0xff] }
 0x1b2   : > { %1174 = vmatmul.msk.bf16.vlgmr.msra.gmra.mxu3 %vm640_vm0, %v784_v21  ;;  %871 = vmatpush.bf16.msrb.mxu0 %v860_v44  ;;  %v970_v21 = vld [vmem:[%s1609_s14 + $0x18] sm:$0xff] }
 0x1b3   : > { %v972_v22 = vpack.c.bf16 %v970_v21, %v969_v20 }
 0x1b5   : > { %986 = vmatpush.bf16.msrb.mxu2 %v972_v22 }
 0x1b9   : > { %987 = vmatpush.bf16.msrb.mxu2 %v971_v26 }
 0x235   : > { %v831_v28 = vpop.f32.mrf.mxu3 }
 0x236   : > { %v837_v29 = vsel %vm836_vm8, %v831_v28, -inf }
 0x237   : > { %838 = vmax.xlane.f32.xlu0 %v837_v29 }
 0x23d   : > { %v833_v30 = vpop.f32.mrf.mxu3 }
 0x23e   : > { %v840_v31 = vsel %vm836_vm8, %v833_v30, -inf }
 0x23f   : > { %841 = vmax.xlane.f32.xlu1 %v840_v31 }
 0x2aa   : > { %v839_v32 = vpop.xlane.xlu0 %838 }
 0x2ab   : > { %v843_v33 = vsub.f32 %v831_v28, %v839_v32 }
 0x2ad   : > { %v845_v35 = vmul.f32 1.442695, %v843_v33 }
 0x2af   : > { %1225 = vpow2.f32 %v845_v35 }
 0x2b2   : > { %v842_v37 = vpop.xlane.xlu1 %841 }
 0x2b3   : > { %v844_v10 = vsub.f32 %v833_v30, %v842_v37 }
 0x2b5   : > { %v1226_v40 = vpop.eup %1225  ;;  %v847_v41 = vmul.f32 1.442695, %v844_v10 }
 0x2b6   : > { %v849_v43 = vsel %vm836_vm8, %v1226_v40, 0.0 }
 0x2b7   : > { %1227 = vpow2.f32 %v847_v41  ;;  %850 = vadd.xlane.f32.xlu2 %v849_v43 }
 0x2bd   : > { %v1228_v45 = vpop.eup %1227 }
 0x2be   : > { %v852_v46 = vsel %vm836_vm8, %v1228_v45, 0.0 }
 0x2bf   : > { %853 = vadd.xlane.f32.xlu0 %v852_v46 }
 0x32a   : > { %v851_v50 = vpop.xlane.xlu2 %850 }
 0x32b   : > { %1229 = vrcp.f32 %v851_v50 }
 0x331   : > { %v1230_v52 = vpop.eup %1229 }
 0x332   : > { %v854_v51 = vpop.xlane.xlu0 %853  ;;  %v857_v54 = vmul.f32 %v1230_v52, %v1226_v40 }
 0x333   : > { %1231 = vrcp.f32 %v854_v51 }
 0x339   : > { %v1232_v53 = vpop.eup %1231 }
 0x33a   : > { %v858_v55 = vmul.f32 %v1232_v53, %v1228_v45  ;;  %v1027_v53 = vld [vmem:[%s1611_s16 + $0x70] sm:$0xff] }
 0x33c   : > { %v859_v56 = vpack.c.bf16 %v858_v55, %v857_v54  ;;  %v1028_v54 = vld [vmem:[%s1611_s16 + $0x78] sm:$0xff] }
 0x33d   : > { %v1036_v55 = vpack.c.bf16 %v1028_v54, %v1027_v53 }
 0x33e   : > { %1175 = vmatmul.msk.bf16.vlgmr.msrb.gmra.mxu0 %vm836_vm8, %v859_v56  ;;  %v1025_v56 = vld [vmem:[%s1611_s16 + $0x60] sm:$0xff] }
 0x33f   : > { %1037 = vmatpush.bf16.msrb.mxu3 %v1036_v55  ;;  %v1035_v58 = vpack.c.bf16 %v1026_v57, %v1025_v56 }
 0x343   : > { %1038 = vmatpush.bf16.msrb.mxu3 %v1035_v58 }
 0x3bb   : > { %v873_v60 = vpop.f32.mrf.mxu0 }
 0x3c3   : > { %v875_v61 = vpop.f32.mrf.mxu0 }
 0x3c4   : > { %v878_v62 = vpack.c.bf16 %v875_v61, %v873_v60  ;;  %v1024_v60 = vld [vmem:[%s1611_s16 + $0x58] sm:$0xff] }
 0x3c5   : > { %v1034_v61 = vpack.c.bf16 %v1024_v60, %v1023_v59 }
 0x3c6   : > { %1176 = vmatmul.msk.bf16.vlgmr.msrb.gmra.mxu1 %vm640_vm0, %v878_v62  ;;  %v1021_v62 = vld [vmem:[%s1611_s16 + $0x40] sm:$0xff] }
 0x3c7   : > { %1039 = vmatpush.bf16.msrb.mxu3 %v1034_v61 }
 0x443   : > { %v897_v0 = vpop.f32.mrf.mxu1 }
 0x444   : > { %v902_v1 = vadd.f32 %v897_v0, %v1397_v6 }
 0x446   : > { %v1488_v2 = vadd.f32 %v1214_v63, %v902_v1  ;;  %v1019_v1 = vld [vmem:[%s1611_s16 + $0x30] sm:$0xff] }
 0x448   : > { %v910_v3 = vsel %vm640_vm0, %v1488_v2, 0.0 }
 0x449   : > { %911 = vadd.xlane.f32.xlu1 %v910_v3  ;;  %v1020_v3 = vld [vmem:[%s1611_s16 + $0x38] sm:$0xff] }
 0x44b   : > { %v899_v4 = vpop.f32.mrf.mxu1 }
 0x44c   : > { %v903_v5 = vadd.f32 %v899_v4, %v1407_v11  ;;  %v1032_v4 = vpack.c.bf16 %v1020_v3, %v1019_v1 }
 0x44e   : > { %v1493_v7 = vadd.f32 %v1214_v63, %v903_v5  ;;  %v1022_v63 = vld [vmem:[%s1611_s16 + $0x48] sm:$0xff]  ;;  %v1017_v5 = vld [vmem:[%s1611_s16 + $0x20] sm:$0xff] }
 0x44f   : > { %v1033_v0 = vpack.c.bf16 %v1022_v63, %v1021_v62 }
 0x450   : > { %v913_v8 = vsel %vm640_vm0, %v1493_v7, 0.0 }
 0x451   : > { %914 = vadd.xlane.f32.xlu0 %v913_v8  ;;  %1040 = vmatpush.bf16.msrb.mxu3 %v1033_v0  ;;  %v1018_v8 = vld [vmem:[%s1611_s16 + $0x28] sm:$0xff] }
 0x455   : > { %1041 = vmatpush.bf16.msrb.mxu3 %v1032_v4 }
 0x4bc   : > { %v912_v9 = vpop.xlane.xlu1 %911 }
 0x4bd   : > { %v916_v12 = vmul.f32 %v912_v9, %v1413_v19  ;;  %v1031_v9 = vpack.c.bf16 %v1018_v8, %v1017_v5 }
 0x4bf   : > { %v918_v6 = vsub.f32 %v1488_v2, %v916_v12  ;;  %v1015_v12 = vld [vmem:[%s1611_s16 + $0x10] sm:$0xff]  ;;  %1042 = vmatpush.bf16.msrb.mxu3 %v1031_v9 }
 0x4c1   : > { %v920_v13 = vmul.f32 %v918_v6, %v918_v6 }
 0x4c3   : > { %v922_v14 = vsel %vm640_vm0, %v920_v13, 0.0 }
 0x4c4   : > { %923 = vadd.xlane.f32.xlu1 %v922_v14  ;;  %v915_v15 = vpop.xlane.xlu0 %914  ;;  %v1013_v14 = vld [vmem:[%s1611_s16] sm:$0xff] }
 0x4c5   : > { %v917_v16 = vmul.f32 %v915_v15, %v1413_v19  ;;  %v1014_v15 = vld [vmem:[%s1611_s16 + $0x8] sm:$0xff] }
 0x4c7   : > { %v919_v11 = vsub.f32 %v1493_v7, %v917_v16  ;;  %v1217_v16 = vld [vmem:[%s1610_s15] ss:$0 sm:$0xff] }
 0x4c9   : > { %v921_v17 = vmul.f32 %v919_v11, %v919_v11 }
 0x4cb   : > { %v925_v18 = vsel %vm640_vm0, %v921_v17, 0.0 }
 0x4cc   : > { %926 = vadd.xlane.f32.xlu0 %v925_v18 }
 0x537   : > { %v924_v25 = vpop.xlane.xlu1 %923 }
 0x538   : > { %v928_v27 = vmul.f32 %v924_v25, %v1413_v19 }
 0x53a   : > { %v930_v28 = vadd.f32 1e-05, %v928_v27 }
 0x53c   : > { %1233 = vrsqrt.f32 %v930_v28  ;;  %vm938_vm10 = vweird.f32 %v930_v28 }
 0x53f   : > { %v927_v29 = vpop.xlane.xlu0 %926 }
 0x540   : > { %v929_v30 = vmul.f32 %v927_v29, %v1413_v19  ;;  %v1215_v19 = vld [vmem:[%s1607_s12] ss:$0 sm:$0xff] }
 0x542   : > { %v1234_v31 = vpop.eup %1233  ;;  %v931_v32 = vadd.f32 1e-05, %v929_v30 }
 0x543   : > { %v933_v33 = vmul.f32 %v1234_v31, %v930_v28  ;;  %vm939_vm9 = vweird.f32 %v1234_v31 }
 0x544   : > { %1235 = vrsqrt.f32 %v931_v32  ;;  %vm940_vm11 = vmor %vm938_vm10, %vm939_vm9  ;;  %vm948_vm13 = vweird.f32 %v931_v32 }
 0x545   : > { %v934_v34 = vmul.f32 %v1234_v31, %v933_v33 }
 0x547   : > { %v935_v35 = vmul.f32 0.5, %v934_v34 }
 0x549   : > { %v936_v36 = vsub.f32 1.5, %v935_v35 }
 0x54a   : > { %v1236_v37 = vpop.eup %1235 }
 0x54b   : > { %v937_v10 = vmul.f32 %v1234_v31, %v936_v36  ;;  %v943_v38 = vmul.f32 %v1236_v37, %v931_v32  ;;  %vm949_vm12 = vweird.f32 %v1236_v37 }
 0x54c   : > { %vm950_vm14 = vmor %vm948_vm13, %vm949_vm12 }
 0x54d   : > { %v944_v39 = vmul.f32 %v1236_v37, %v943_v38  ;;  %v941_v40 = vsel %vm940_vm11, %v1234_v31, %v937_v10 }
 0x54e   : > { %v952_v43 = vmul.f32 %v941_v40, %v918_v6  ;;  %v1016_v6 = vld [vmem:[%s1611_s16 + $0x18] sm:$0xff]  ;;  %v1218_v40 = vld [vmem:[%s1612_s17] ss:$0 sm:$0xff] }
 0x54f   : > { %v945_v41 = vmul.f32 0.5, %v944_v39  ;;  %v1030_v13 = vpack.c.bf16 %v1016_v6, %v1015_v12 }
 0x550   : > { %v958_v47 = vmul.f32 %v1215_v19, %v952_v43 }
 0x551   : > { %v946_v42 = vsub.f32 1.5, %v945_v41  ;;  %1043 = vmatpush.bf16.msrb.mxu3 %v1030_v13 }
 0x552   : > { %v964_v50 = vadd.f32 %v1216_v48, %v958_v47 }
 0x553   : > { %v947_v44 = vmul.f32 %v1236_v37, %v946_v42 }
 0x555   : > { %v951_v45 = vsel %vm950_vm14, %v1236_v37, %v947_v44 }
 0x556   : > { %v953_v46 = vmul.f32 %v951_v45, %v919_v11  ;;  %v1029_v11 = vpack.c.bf16 %v1014_v15, %v1013_v14 }
 0x558   : > { %v959_v49 = vmul.f32 %v1215_v19, %v953_v46  ;;  %1044 = vmatpush.bf16.msrb.mxu3 %v1029_v11 }
 0x55a   : > { %v965_v51 = vadd.f32 %v1216_v48, %v959_v49 }
 0x55c   : > { %v966_v52 = vpack.c.bf16 %v965_v51, %v964_v50 }
 0x55e   : > { %1177 = vmatmul.msk.bf16.vlgmr.msrb.gmra.mxu2 %vm640_vm0, %v966_v52 }
 0x5e1   : > { %v989_v17 = vpop.f32.mrf.mxu2 }
 0x5e2   : > { %v990_v18 = vadd.f32 %v1217_v16, %v989_v17 }
 0x5e4   : > { %v994_v20 = vmul.f32 %v990_v18, %v990_v18 }
 0x5e6   : > { %v996_v21 = vmul.f32 %v994_v20, %v990_v18 }
 0x5e8   : > { %v998_v22 = vmul.f32 0.044715, %v996_v21 }
 0x5e9   : > { %v991_v23 = vpop.f32.mrf.mxu2 }
 0x5ea   : > { %v1000_v24 = vadd.f32 %v998_v22, %v990_v18  ;;  %v992_v25 = vadd.f32 %v1217_v16, %v991_v23 }
 0x5ec   : > { %v1002_v26 = vmul.f32 0.7978846, %v1000_v24  ;;  %v995_v27 = vmul.f32 %v992_v25, %v992_v25 }
 0x5ee   : > { %v997_v28 = vmul.f32 %v995_v27, %v992_v25  ;;  %1237 = vtanh.f32 %v1002_v26 }
 0x5f0   : > { %v999_v29 = vmul.f32 0.044715, %v997_v28 }
 0x5f2   : > { %v1001_v30 = vadd.f32 %v999_v29, %v992_v25 }
 0x5f4   : > { %v1003_v31 = vmul.f32 0.7978846, %v1001_v30  ;;  %v1238_v32 = vpop.eup %1237 }
 0x5f5   : > { %v1006_v33 = vadd.f32 1.0, %v1238_v32 }
 0x5f6   : > { %1239 = vtanh.f32 %v1003_v31 }
 0x5f7   : > { %v1008_v36 = vmul.f32 0.5, %v1006_v33 }
 0x5f9   : > { %v1010_v10 = vmul.f32 %v1008_v36, %v990_v18 }
 0x5fc   : > { %v1240_v34 = vpop.eup %1239 }
 0x5fd   : > { %v1007_v35 = vadd.f32 1.0, %v1240_v34 }
 0x5ff   : > { %v1009_v37 = vmul.f32 0.5, %v1007_v35 }
 0x601   : > { %v1011_v38 = vmul.f32 %v1009_v37, %v992_v25 }
 0x603   : > { %v1012_v39 = vpack.c.bf16 %v1011_v38, %v1010_v10 }
 0x605   : > { %1045 = vmatmul.bf16.vlgmr.msrb.gmra.mxu3 %v1012_v39 }
 0x688   : > { %v1046_v41 = vpop.f32.mrf.mxu3 }
 0x689   : > { %v1051_v42 = vadd.f32 %v1046_v41, %v1488_v2 }
 0x68b   : > { %v1057_v43 = vadd.f32 %v1218_v40, %v1051_v42 }
 0x68d   : > { %1059 = vst.msk [vmem:[%s633_s22] sm:$0xff] %vm640_vm0, %v1057_v43 }
 0x690   : > { %v1048_v19 = vpop.f32.mrf.mxu3 }
 0x691   : > { %v1052_v44 = vadd.f32 %v1048_v19, %v1493_v7 }
 0x693   : > { %v1058_v45 = vadd.f32 %v1218_v40, %v1052_v44 }
 0x695   : > { %1060 = vst.msk [vmem:[%s633_s22 + $0x8] sm:$0xff] %vm640_vm0, %v1058_v45 }
 0x696 PF: > { %s28_s29 = sadd.s32 1, %s1263_s29   ;;  %s1620_s27 = smov %s1259_s28 }
 0x697   : > { %p25_p5 = scmp.ge.s32.totalorder %s28_s29, 4   ;;  %s1621_s28 = smov %s1623_s30 }
 0x699   :  { %27 = sbr.rel (!%p25_p5) target bundleno = 4 (0x4), region = 125 }

// kernel: rgb_context_decoder_forward.11
= control target key start
LH: loop header
LB: loop body
LE: loop exit
PB: predicated region body
PF: predicated region fallthrough
CT: control target
= control target key end

     0   :  { %s1562_s12 = smov 0   ;;  %s2517_s0 = inlined_call_operand.vmem [shape: f32[2,4,4,32], index: 0, kind: input, shape index: {}]   ;;  %s2518_s1 = inlined_call_operand.vmem [shape: f32[49,32], index: 1, kind: input, shape index: {}]   ;;  %s2519_s2 = inlined_call_operand.vmem [shape: f32[1,32], index: 2, kind: input, shape index: {}]   ;;  %s2520_s3 = inlined_call_operand.vmem [shape: f32[2,4,4,32], index: 3, kind: output, shape index: {}]  }
   0x1 LB: > { %s1509_s13 = sadd.s32 4294967295, %s1539_s12   ;;  %p1513_p0 = scmp.ge.s32.totalorder %s1539_s12, 1  ;;  %s1539_s12 = sphi %s1562_s12, %s13_s12  }
   0x2   : > { %p137_p1 = scmp.lt.s32.totalorder %s1539_s12, 3 }
   0x4   : > { %p138_p2 = pnand %p1513_p0, %p137_p1 }
   0x6   : > { %141 = sbr.rel (%p138_p2) target bundleno = 228 (0xe4), region = 32 }
   0xb   : > { %vm175_vm0 = vcmask 261120   ;;  %v1541_v0 = vmov 0.0   ;;  %v203_v1 = vld [vmem:[%s2518_s1] sm:$0xff]  ;;  %vm177_vm1 = vcmask 254976   ;;  %v1603_v8 = vld [vmem:[%s2518_s1 + $0x8] sm:$0xff]  ;;  %v1619_v15 = vld [vmem:[%s2518_s1 + $0x10] sm:$0xff] }
   0xc   : > { %176 = vst.msk [vmem:[#allocation2] sm:$0xff] %vm175_vm0, %v1541_v0  ;;  %v1581_v2 = vperm.slane %v203_v1, 0  ;;  %v1583_v3 = vperm.slane %v203_v1, 1  ;;  %v1587_v4 = vperm.slane %v203_v1, 2  ;;  %v1593_v6 = vperm.slane %v203_v1, 3  ;;  %p1758_p3 = scmp.lt.s32.totalorder %s1509_s13, 1 }
   0xd   : > { %179 = vst.msk [vmem:[#allocation2 + $0x10] sm:$0xff] %vm175_vm0, %v1541_v0  ;;  %v1622_v16 = vperm.slane %v1603_v8, 0  ;;  %v1629_v18 = vperm.slane %v1603_v8, 1  ;;  %v1632_v19 = vperm.slane %v1603_v8, 2  ;;  %v1635_v20 = vperm.slane %v1603_v8, 7 }
   0xe   : > { %181 = vst.msk [vmem:[#allocation2 + $0x20] sm:$0xff] %vm175_vm0, %v1541_v0  ;;  %v1646_v26 = vperm.slane %v1619_v15, 0  ;;  %v1649_v27 = vperm.slane %v1619_v15, 1  ;;  %v1651_v28 = vperm.slane %v203_v1, 4  ;;  %v1653_v29 = vperm.slane %v203_v1, 5  ;;  %s2587_s13 = smov (!%p1758_p3, %s1509_s13), 1 }
   0xf   : > { %183 = vst.msk [vmem:[#allocation2 + $0x30] sm:$0xff] %vm175_vm0, %v1541_v0  ;;  %vm328_vm2 = vcmask 1042432   ;;  %v1659_v32 = vperm.slane %v203_v1, 6  ;;  %vm366_vm3 = vcmask 1041408   ;;  %v1665_v34 = vperm.slane %v203_v1, 7  ;;  %s1520_s21 = sshll.u32 %s2587_s13, 4 }
  0x10   : > { %185 = vst.msk [vmem:[#allocation2 + $0x40] sm:$0xff] %vm175_vm0, %v1541_v0  ;;  %v1670_v35 = vperm.slane %v1603_v8, 3  ;;  %v1675_v40 = vperm.slane %v1603_v8, 4  ;;  %v1691_v56 = vperm.slane %v1603_v8, 5  ;;  %s1827_s26 = scalar_lea.vmem %s2517_s0, %s1520_s21  ;;  %vm198_vm4 = vcmask 257024   ;;  %s2415_s10 = scalar_lea.vmem %s2520_s3, %s1520_s21 }
  0x11   : > { %187 = vst.msk [vmem:[#allocation2 + $0x50] sm:$0xff] %vm175_vm0, %v1541_v0 }
  0x12   : > { %189 = vst.msk [vmem:[#allocation2 + $0x60] sm:$0xff] %vm175_vm0, %v1541_v0 }
  0x13   : > { %v210_v5 = vld [vmem:[#allocation2] sm:$0xff]  ;;  %191 = vst.msk [vmem:[#allocation2 + $0x70] sm:$0xff] %vm175_vm0, %v1541_v0 }
  0x14   : > { %v228_v7 = vmul.f32 %v1583_v3, %v210_v5  ;;  %193 = vst.msk [vmem:[#allocation2 + $0x80] sm:$0xff] %vm175_vm0, %v1541_v0  ;;  %v1605_v9 = vld [vmem:[#allocation2 + $0x10] sm:$0xff]  ;;  %v219_v10 = vmul.f32 %v1581_v2, %v210_v5  ;;  %v249_v11 = vmul.f32 %v1587_v4, %v210_v5  ;;  %v270_v14 = vmul.f32 %v1593_v6, %v210_v5 }
  0x15   : > { %195 = vst.msk [vmem:[#allocation2 + $0x90] sm:$0xff] %vm175_vm0, %v1541_v0  ;;  %v229_v12 = vmul.f32 %v1583_v3, %v1605_v9  ;;  %v220_v17 = vmul.f32 %v1581_v2, %v1605_v9  ;;  %v1639_v23 = vld [vmem:[#allocation2 + $0x20] sm:$0xff]  ;;  %v250_v25 = vmul.f32 %v1587_v4, %v1605_v9  ;;  %v271_v31 = vmul.f32 %v1593_v6, %v1605_v9 }
  0x16   : > { %v236_v13 = vrot.slane %v228_v7, 1  ;;  %178 = vst.msk [vmem:[#allocation2 + $0x8] sm:$0x3] %vm177_vm1, %v1541_v0  ;;  %v257_v22 = vrot.slane %v249_v11, 2  ;;  %v278_v30 = vrot.slane %v270_v14, 3  ;;  %v230_v33 = vmul.f32 %v1583_v3, %v1639_v23 }
  0x17   : > { %180 = vst.msk [vmem:[#allocation2 + $0x18] sm:$0x3] %vm177_vm1, %v1541_v0  ;;  %v237_v24 = vrot.slane %v229_v12, 1  ;;  %v258_v37 = vrot.slane %v250_v25, 2  ;;  %v221_v41 = vmul.f32 %v1581_v2, %v1639_v23  ;;  %v251_v42 = vmul.f32 %v1587_v4, %v1639_v23 }
  0x18   : > { %182 = vst.msk [vmem:[#allocation2 + $0x28] sm:$0x3] %vm177_vm1, %v1541_v0  ;;  %v244_v21 = vadd.f32 %v236_v13, %v219_v10  ;;  %v291_v43 = vmul.f32 %v1651_v28, %v210_v5  ;;  %v312_v44 = vmul.f32 %v1653_v29, %v210_v5  ;;  %v279_v45 = vrot.slane %v271_v31, 3 }
  0x19   : > { %184 = vst.msk [vmem:[#allocation2 + $0x38] sm:$0x3] %vm177_vm1, %v1541_v0  ;;  %v245_v36 = vadd.f32 %v237_v24, %v220_v17  ;;  %v350_v48 = vmul.f32 %v1659_v32, %v210_v5  ;;  %v238_v49 = vrot.slane %v230_v33, 1  ;;  %v272_v57 = vmul.f32 %v1593_v6, %v1639_v23 }
  0x1a   : > { %186 = vst.msk [vmem:[#allocation2 + $0x48] sm:$0x3] %vm177_vm1, %v1541_v0  ;;  %v265_v39 = vadd.f32 %v257_v22, %v244_v21  ;;  %v299_v50 = vrot.slane %v291_v43, 4  ;;  %v329_v51 = vrot.slane %v312_v44, 5  ;;  %v292_v61 = vmul.f32 %v1651_v28, %v1605_v9 }
  0x1b   : > { %188 = vst.msk [vmem:[#allocation2 + $0x58] sm:$0x3] %vm177_vm1, %v1541_v0  ;;  %v367_v54 = vrot.slane %v350_v48, 6  ;;  %v266_v55 = vadd.f32 %v258_v37, %v245_v36  ;;  %v406_v62 = vmul.f32 %v1622_v16, %v1605_v9  ;;  %v314_v1 = vmul.f32 %v1653_v29, %v1605_v9 }
  0x1c   : > { %190 = vst.msk [vmem:[#allocation2 + $0x68] sm:$0x3] %vm177_vm1, %v1541_v0  ;;  %v286_v46 = vadd.f32 %v278_v30, %v265_v39  ;;  %v246_v5 = vadd.f32 %v238_v49, %v221_v41  ;;  %v259_v7 = vrot.slane %v251_v42, 2  ;;  %v300_v11 = vrot.slane %v292_v61, 4 }
  0x1d   : > { %v211_v38 = vld [vmem:[#allocation2 + $0x8] sm:$0x3]  ;;  %192 = vst.msk [vmem:[#allocation2 + $0x78] sm:$0x3] %vm177_vm1, %v1541_v0  ;;  %v407_v12 = vmul.f32 %v1622_v16, %v1639_v23  ;;  %v427_v13 = vmul.f32 %v1629_v18, %v1605_v9  ;;  %v397_v22 = vmul.f32 %v1665_v34, %v1605_v9  ;;  %v332_v25 = vrot.slane %v314_v1, 5 }
  0x1e   : > { %194 = vst.msk [vmem:[#allocation2 + $0x88] sm:$0x3] %vm177_vm1, %v1541_v0  ;;  %v313_v47 = vmul.f32 %v1653_v29, %v211_v38  ;;  %v351_v52 = vmul.f32 %v1659_v32, %v211_v38  ;;  %v307_v58 = vadd.f32 %v299_v50, %v286_v46  ;;  %v213_v60 = vld [vmem:[#allocation2 + $0x18] sm:$0x3]  ;;  %v280_v30 = vrot.slane %v272_v57, 3 }
  0x1f   : > { %196 = vst.msk [vmem:[#allocation2 + $0x98] sm:$0x3] %vm177_vm1, %v1541_v0  ;;  %v287_v0 = vadd.f32 %v279_v45, %v266_v55  ;;  %v315_v17 = vmul.f32 %v1653_v29, %v213_v60  ;;  %v414_v31 = vrot.slane %v406_v62, 1  ;;  %v448_v33 = vmul.f32 %v1632_v19, %v1605_v9  ;;  %v215_v38 = vld [vmem:[#allocation2 + $0x28] sm:$0x3] }
  0x20   : > { %v330_v53 = vrot.slane %v313_v47, 5  ;;  %v368_v59 = vrot.slane %v351_v52, 6  ;;  %v267_v39 = vadd.f32 %v259_v7, %v246_v5  ;;  %v352_v41 = vmul.f32 %v1659_v32, %v1605_v9 }
  0x21   : > { %v308_v24 = vadd.f32 %v300_v11, %v287_v0  ;;  %v333_v36 = vrot.slane %v315_v17, 5  ;;  %v353_v42 = vmul.f32 %v1659_v32, %v213_v60  ;;  %v428_v43 = vmul.f32 %v1629_v18, %v1639_v23  ;;  %v217_v0 = vld [vmem:[#allocation2 + $0x38] sm:$0x3] }
  0x22   : > { %v331_v63 = vsel %vm328_vm2, %v329_v51, %v330_v53  ;;  %v369_v14 = vsel %vm366_vm3, %v367_v54, %v368_v59  ;;  %v293_v44 = vmul.f32 %v1651_v28, %v1639_v23  ;;  %v1721_v46 = vperm.slane %v1603_v8, 6  ;;  %v389_v51 = vld [vmem:[#allocation2 + $0x18] sm:$0x3] }
  0x23   : > { %v345_v10 = vadd.f32 %v331_v63, %v307_v58  ;;  %v334_v45 = vsel %vm328_vm2, %v332_v25, %v333_v36  ;;  %v435_v47 = vrot.slane %v427_v13, 2  ;;  %v370_v50 = vrot.slane %v352_v41, 6 }
  0x24   : > { %v346_v49 = vadd.f32 %v334_v45, %v308_v24  ;;  %v415_v52 = vrot.slane %v407_v12, 1  ;;  %v316_v53 = vmul.f32 %v1653_v29, %v1639_v23  ;;  %v317_v54 = vmul.f32 %v1653_v29, %v215_v38 }
  0x25   : > { %v383_v21 = vadd.f32 %v369_v14, %v345_v10  ;;  %v371_v55 = vrot.slane %v353_v42, 6  ;;  %v456_v57 = vrot.slane %v448_v33, 3  ;;  %v288_v58 = vadd.f32 %v280_v30, %v267_v39 }
  0x26   : > { %v469_v60 = vmul.f32 %v1670_v35, %v1605_v9  ;;  %v301_v8 = vrot.slane %v293_v44, 4  ;;  %v490_v62 = vmul.f32 %v1675_v40, %v1605_v9  ;;  %v491_v63 = vmul.f32 %v1675_v40, %v389_v51 }
  0x27   : > { %v401_v37 = vadd.f32 %v397_v22, %v383_v21  ;;  %v372_v61 = vsel %vm366_vm3, %v370_v50, %v371_v55  ;;  %v398_v5 = vmul.f32 %v1665_v34, %v1639_v23  ;;  %v436_v11 = vrot.slane %v428_v43, 2 }
  0x28   : > { %v384_v1 = vadd.f32 %v372_v61, %v346_v49  ;;  %v477_v10 = vrot.slane %v469_v60, 4  ;;  %v449_v12 = vmul.f32 %v1632_v19, %v1639_v23  ;;  %v335_v13 = vrot.slane %v316_v53, 5  ;;  %v391_v49 = vld [vmem:[#allocation2 + $0x28] sm:$0x3]  ;;  %v393_v60 = vld [vmem:[#allocation2 + $0x38] sm:$0x3] }
  0x29   : > { %v422_v48 = vadd.f32 %v414_v31, %v401_v37  ;;  %v336_v14 = vrot.slane %v317_v54, 5  ;;  %v582_v17 = vmul.f32 %v1635_v20, %v1639_v23  ;;  %v506_v24 = vrot.slane %v490_v62, 5 }
  0x2a   : > { %v402_v21 = vadd.f32 %v398_v5, %v384_v1  ;;  %v1740_v25 = vmul.f32 %v1646_v26, %v1639_v23  ;;  %v1744_v30 = vmul.f32 %v1649_v27, %v1639_v23  ;;  %v1747_v31 = vmul.f32 %v1653_v29, %v217_v0  ;;  %v395_v1 = vld [vmem:[#allocation2 + $0x48] sm:$0x3] }
  0x2b   : > { %v443_v59 = vadd.f32 %v435_v47, %v422_v48  ;;  %v507_v33 = vrot.slane %v491_v63, 5  ;;  %v309_v36 = vadd.f32 %v301_v8, %v288_v58  ;;  %v527_v39 = vmul.f32 %v1691_v56, %v1605_v9 }
  0x2c   : > { %v423_v37 = vadd.f32 %v415_v52, %v402_v21  ;;  %v528_v41 = vmul.f32 %v1691_v56, %v389_v51  ;;  %v457_v42 = vrot.slane %v449_v12, 3  ;;  %v337_v43 = vsel %vm328_vm2, %v335_v13, %v336_v14 }
  0x2d   : > { %v464_v7 = vadd.f32 %v456_v57, %v443_v59  ;;  %v354_v44 = vmul.f32 %v1659_v32, %v1639_v23  ;;  %v508_v45 = vsel %vm328_vm2, %v506_v24, %v507_v33  ;;  %v590_v47 = vrot.slane %v582_v17, 1 }
  0x2e   : > { %v355_v48 = vmul.f32 %v1659_v32, %v215_v38  ;;  %v1764_v9 = vmul.f32 %v1659_v32, %v217_v0  ;;  %v444_v51 = vadd.f32 %v436_v11, %v423_v37  ;;  %v470_v52 = vmul.f32 %v1670_v35, %v1639_v23  ;;  %v1896_v0 = vld [vmem:[#allocation2 + $0x48] sm:$0x3] }
  0x2f   : > { %v485_v22 = vadd.f32 %v477_v10, %v464_v7  ;;  %v543_v53 = vrot.slane %v527_v39, 6  ;;  %v544_v54 = vrot.slane %v528_v41, 6  ;;  %v611_v55 = vrot.slane %v1740_v25, 2  ;;  %v565_v39 = vld [vmem:[#allocation2 + $0x28] sm:$0x3] }
  0x30   : > { %v632_v57 = vrot.slane %v1744_v30, 3  ;;  %v347_v38 = vadd.f32 %v337_v43, %v309_v36  ;;  %v373_v59 = vrot.slane %v354_v44, 6  ;;  %v492_v8 = vmul.f32 %v1675_v40, %v1639_v23 }
  0x31   : > { %v522_v50 = vadd.f32 %v508_v45, %v485_v22  ;;  %v493_v61 = vmul.f32 %v1675_v40, %v391_v49  ;;  %v545_v62 = vsel %vm366_vm3, %v543_v53, %v544_v54  ;;  %v374_v63 = vrot.slane %v355_v48, 6 }
  0x32   : > { %v573_v7 = vmul.f32 %v1721_v46, %v1639_v23  ;;  %v465_v10 = vadd.f32 %v457_v42, %v444_v51  ;;  %v478_v11 = vrot.slane %v470_v52, 4  ;;  %v529_v12 = vmul.f32 %v1691_v56, %v1639_v23  ;;  %v567_v51 = vld [vmem:[#allocation2 + $0x38] sm:$0x3] }
  0x33   : > { %v559_v5 = vadd.f32 %v545_v62, %v522_v50  ;;  %v530_v13 = vmul.f32 %v1691_v56, %v391_v49  ;;  %v1788_v14 = vmul.f32 %v1675_v40, %v393_v60  ;;  %v1791_v21 = vperm.slane %v1619_v15, 2  ;;  %v1815_v49 = vld [vmem:[%s2518_s1 + $0x18] sm:$0xff] }
  0x34   : > { %v1794_v22 = vperm.slane %v1619_v15, 3  ;;  %v1797_v24 = vmul.f32 %v1675_v40, %v395_v1  ;;  %v509_v25 = vrot.slane %v492_v8, 5  ;;  %v510_v30 = vrot.slane %v493_v61, 5  ;;  %v1898_v50 = vld [vmem:[#allocation2 + $0x58] sm:$0x3] }
  0x35   : > { %v577_v17 = vadd.f32 %v573_v7, %v559_v5  ;;  %v1800_v33 = vmul.f32 %v1691_v56, %v393_v60  ;;  %v375_v36 = vsel %vm366_vm3, %v373_v59, %v374_v63  ;;  %v1805_v37 = vmul.f32 %v1691_v56, %v395_v1  ;;  %v571_v60 = vld [vmem:[#allocation2 + $0x58] sm:$0x3] }
  0x36   : > { %v1808_v42 = vperm.slane %v1619_v15, 4  ;;  %v1810_v43 = vadd.f32 %v375_v36, %v347_v38  ;;  %v486_v44 = vadd.f32 %v478_v11, %v465_v10  ;;  %v546_v45 = vrot.slane %v529_v12, 6  ;;  %v740_v11 = vld [vmem:[#allocation2 + $0x38] sm:$0x3]  ;;  %v172_v36 = vld [vmem:[%s1827_s26 + $0x4] sm:$0xf] }
  0x37   : > { %2537 = vst [vmem:[#allocation3_spill] sm:$0xff] %v1805_v37  ;;  %v598_v41 = vadd.f32 %v590_v47, %v577_v17  ;;  %v547_v48 = vrot.slane %v530_v13, 6  ;;  %v645_v47 = vmul.f32 %v1791_v21, %v1639_v23  ;;  %v666_v53 = vmul.f32 %v1794_v22, %v1639_v23  ;;  %v171_v13 = vld [vmem:[%s1827_s26] sm:$0xf] }
  0x38   : > { %v511_v54 = vsel %vm328_vm2, %v509_v25, %v510_v30  ;;  %v667_v8 = vmul.f32 %v1794_v22, %v565_v39  ;;  %v703_v63 = vmul.f32 %v1808_v42, %v1639_v23  ;;  %v704_v1 = vmul.f32 %v1808_v42, %v565_v39  ;;  %v742_v30 = vld [vmem:[#allocation2 + $0x48] sm:$0x3]  ;;  %199 = vst.msk [vmem:[#allocation2 + $0x33] sm:$0xf] %vm198_vm4, %v171_v13 }
  0x39   : > { %v619_v52 = vadd.f32 %v611_v55, %v598_v41  ;;  %v569_v55 = vld [vmem:[#allocation2 + $0x48] sm:$0x3]  ;;  %v523_v5 = vadd.f32 %v511_v54, %v486_v44  ;;  %v548_v7 = vsel %vm366_vm3, %v546_v45, %v547_v48  ;;  %v1839_v10 = vmul.f32 %v1794_v22, %v567_v51  ;;  %v744_v45 = vld [vmem:[#allocation2 + $0x58] sm:$0x3]  ;;  %200 = vst.msk [vmem:[#allocation2 + $0x43] sm:$0xf] %vm198_vm4, %v172_v36 }
  0x3a   : > { %v1842_v12 = vperm.slane %v1815_v49, 2  ;;  %v653_v17 = vrot.slane %v645_v47, 4  ;;  %v1846_v25 = vmul.f32 %v1794_v22, %v569_v55  ;;  %v682_v23 = vrot.slane %v666_v53, 5  ;;  %v746_v48 = vld [vmem:[#allocation2 + $0x68] sm:$0x3] }
  0x3b   : > { %v640_v62 = vadd.f32 %v632_v57, %v619_v52  ;;  %v1849_v57 = vmul.f32 %v1794_v22, %v571_v60  ;;  %v683_v39 = vrot.slane %v667_v8, 5  ;;  %v1853_v41 = vmul.f32 %v1808_v42, %v567_v51  ;;  %v1861_v52 = vld [vmem:[%s2518_s1 + $0x20] sm:$0xff] }
  0x3c   : > { %v1856_v44 = vmul.f32 %v1808_v42, %v569_v55  ;;  %2540 = vst [vmem:[#allocation6_spill] sm:$0xff] %v1861_v52  ;;  %v1864_v53 = vmul.f32 %v1808_v42, %v571_v60  ;;  %v719_v54 = vrot.slane %v703_v63, 6  ;;  %v720_v8 = vrot.slane %v704_v1, 6 }
  0x3d   : > { %2538 = vst [vmem:[#allocation4_spill] sm:$0xff] %v1849_v57  ;;  %v661_v47 = vadd.f32 %v653_v17, %v640_v62  ;;  %v1867_v51 = vadd.f32 %v548_v7, %v523_v5  ;;  %v1871_v61 = vmul.f32 %v1842_v12, %v740_v11  ;;  %v1874_v38 = vperm.slane %v1815_v49, 3 }
  0x3e   : > { %2539 = vst [vmem:[#allocation5_spill] sm:$0xff] %v1856_v44  ;;  %v1879_v60 = vmul.f32 %v1842_v12, %v742_v30  ;;  %v1882_v63 = vmul.f32 %v1842_v12, %v744_v45  ;;  %v1885_v1 = vmul.f32 %v1842_v12, %v746_v48  ;;  %v684_v5 = vsel %vm328_vm2, %v682_v23, %v683_v39 }
  0x3f   : > { %2541 = vst [vmem:[#allocation7_spill] sm:$0xff] %v1864_v53  ;;  %v1891_v17 = vperm.slane %v1861_v52, 1  ;;  %v698_v36 = vadd.f32 %v684_v5, %v661_v47  ;;  %v721_v62 = vsel %vm366_vm3, %v719_v54, %v720_v8  ;;  %v1902_v39 = vmul.f32 %v1874_v38, %v740_v11  ;;  %v1910_v54 = vld [vmem:[#allocation2 + $0x68] sm:$0x3]  ;;  %v1929_v23 = vld [vmem:[#allocation2 + $0x30] sm:$0xff] }
  0x40   : > { %2542 = vst [vmem:[#allocation8_spill] sm:$0xff] %v1879_v60  ;;  %v1905_v7 = vmul.f32 %v1874_v38, %v742_v30  ;;  %v1908_v47 = vmul.f32 %v1874_v38, %v744_v45  ;;  %v1916_v59 = vperm.slane %v1861_v52, 2  ;;  %v1919_v11 = vmul.f32 %v1874_v38, %v746_v48 }
  0x41   : > { %2543 = vst [vmem:[#allocation9_spill] sm:$0xff] %v1882_v63  ;;  %v1923_v30 = vmul.f32 %v1891_v17, %v1896_v0  ;;  %v1927_v45 = vmul.f32 %v1891_v17, %v1898_v50  ;;  %v1932_v5 = vperm.slane %v1619_v15, 5  ;;  %v735_v55 = vadd.f32 %v721_v62, %v698_v36  ;;  %v1947_v62 = vld [vmem:[#allocation2 + $0x78] sm:$0x3] }
  0x42   : > { %2544 = vst [vmem:[#allocation10_spill] sm:$0xff] %v1885_v1  ;;  %v1936_v8 = vmul.f32 %v1891_v17, %v1910_v54  ;;  %v231_v48 = vmul.f32 %v1583_v3, %v1929_v23  ;;  %v252_v13 = vmul.f32 %v1587_v4, %v1929_v23  ;;  %v399_v52 = vmul.f32 %v1665_v34, %v1929_v23 }
  0x43   : > { %2545 = vst [vmem:[#allocation11_spill] sm:$0xff] %v1891_v17  ;;  %v222_v36 = vmul.f32 %v1581_v2, %v1929_v23  ;;  %v273_v3 = vmul.f32 %v1593_v6, %v1929_v23  ;;  %v408_v4 = vmul.f32 %v1622_v16, %v1929_v23  ;;  %v294_v63 = vmul.f32 %v1651_v28, %v1929_v23 }
  0x44   : > { %2546 = vst [vmem:[#allocation12_spill] sm:$0xff] %v1902_v39  ;;  %v239_v53 = vrot.slane %v231_v48, 1  ;;  %v318_v1 = vmul.f32 %v1653_v29, %v1929_v23  ;;  %v260_v57 = vrot.slane %v252_v13, 2  ;;  %v429_v48 = vmul.f32 %v1629_v18, %v1929_v23 }
  0x45   : > { %2547 = vst [vmem:[#allocation13_spill] sm:$0xff] %v1905_v7  ;;  %v416_v2 = vrot.slane %v408_v4, 1  ;;  %v1965_v6 = vmul.f32 %v1891_v17, %v1947_v62  ;;  %v356_v58 = vmul.f32 %v1659_v32, %v1929_v23  ;;  %v450_v28 = vmul.f32 %v1632_v19, %v1929_v23 }
  0x46   : > { %2548 = vst [vmem:[#allocation14_spill] sm:$0xff] %v1908_v47  ;;  %v403_v47 = vadd.f32 %v399_v52, %v1810_v43  ;;  %v247_v7 = vadd.f32 %v239_v53, %v222_v36  ;;  %v1972_v29 = vperm.slane %v1619_v15, 6  ;;  %v281_v52 = vrot.slane %v273_v3, 3 }
  0x47   : > { %2549 = vst [vmem:[#allocation15_spill] sm:$0xff] %v1919_v11  ;;  %v437_v13 = vrot.slane %v429_v48, 2  ;;  %v302_v36 = vrot.slane %v294_v63, 4  ;;  %v338_v4 = vrot.slane %v318_v1, 5  ;;  %v471_v11 = vmul.f32 %v1670_v35, %v1929_v23 }
  0x48   : > { %v268_v43 = vadd.f32 %v260_v57, %v247_v7  ;;  %v424_v53 = vadd.f32 %v416_v2, %v403_v47  ;;  %v574_v17 = vmul.f32 %v1721_v46, %v1929_v23  ;;  %v583_v44 = vmul.f32 %v1635_v20, %v1929_v23 }
  0x49   : > { %v604_v57 = vmul.f32 %v1646_v26, %v1929_v23  ;;  %v458_v7 = vrot.slane %v450_v28, 3  ;;  %v494_v63 = vmul.f32 %v1675_v40, %v1929_v23  ;;  %v625_v47 = vmul.f32 %v1649_v27, %v1929_v23 }
  0x4a   : > { %v289_v32 = vadd.f32 %v281_v52, %v268_v43  ;;  %v445_v60 = vadd.f32 %v437_v13, %v424_v53  ;;  %v578_v1 = vadd.f32 %v574_v17, %v1867_v51  ;;  %v591_v48 = vrot.slane %v583_v44, 1  ;;  %v173_v52 = vld [vmem:[%s1827_s26 + $0x8] sm:$0xf] }
  0x4b   : > { %v1989_v43 = vperm.slane %v1619_v15, 7  ;;  %v2550_v53 = vrot.slane %v1747_v31, 5  ;;  %v376_v13 = vrot.slane %v356_v58, 6  ;;  %v531_v51 = vmul.f32 %v1691_v56, %v1929_v23  ;;  %201 = vst.msk [vmem:[#allocation2 + $0x53] sm:$0xf] %vm198_vm4, %v173_v52 }
  0x4c   : > { %v310_v2 = vadd.f32 %v302_v36, %v289_v32  ;;  %v466_v39 = vadd.f32 %v458_v7, %v445_v60  ;;  %v479_v17 = vrot.slane %v471_v11, 4  ;;  %v599_v37 = vadd.f32 %v591_v48, %v578_v1  ;;  %v2006_v11 = vld [vmem:[#allocation2 + $0x40] sm:$0xff] }
  0x4d   : > { %v340_v28 = vsel %vm328_vm2, %v338_v4, %v2550_v53  ;;  %v612_v3 = vrot.slane %v604_v57, 2  ;;  %v748_v44 = vmul.f32 %v1932_v5, %v1929_v23  ;;  %v512_v15 = vrot.slane %v494_v63, 5 }
  0x4e   : > { %v633_v36 = vrot.slane %v625_v47, 3  ;;  %v646_v31 = vmul.f32 %v1791_v21, %v1929_v23  ;;  %v757_v58 = vmul.f32 %v1972_v29, %v1929_v23  ;;  %v348_v60 = vadd.f32 %v340_v28, %v310_v2 }
  0x4f   : > { %v620_v4 = vadd.f32 %v612_v3, %v599_v37  ;;  %v668_v32 = vmul.f32 %v1794_v22, %v1929_v23  ;;  %v752_v7 = vadd.f32 %v748_v44, %v735_v55  ;;  %v1037_v57 = vrot.slane %v1927_v45, 5 }
  0x50   : > { %v1040_v1 = vrot.slane %v1936_v8, 5  ;;  %v487_v63 = vadd.f32 %v479_v17, %v466_v39  ;;  %v2011_v47 = vperm.slane %v1815_v49, 0  ;;  %v549_v48 = vrot.slane %v531_v51, 6 }
  0x51   : > { %v641_v52 = vadd.f32 %v633_v36, %v620_v4  ;;  %v765_v53 = vrot.slane %v757_v58, 1  ;;  %v778_v37 = vmul.f32 %v1989_v43, %v1929_v23  ;;  %v2551_v3 = vrot.slane %v1788_v14, 5 }
  0x52   : > { %v705_v2 = vmul.f32 %v1808_v42, %v1929_v23  ;;  %v2552_v28 = vrot.slane %v1764_v9, 6  ;;  %v400_v17 = vmul.f32 %v1665_v34, %v2006_v11  ;;  %v654_v51 = vrot.slane %v646_v31, 4 }
  0x53   : > { %v514_v55 = vsel %vm328_vm2, %v512_v15, %v2551_v3  ;;  %v685_v44 = vrot.slane %v668_v32, 5  ;;  %v773_v36 = vadd.f32 %v765_v53, %v752_v7  ;;  %v2027_v4 = vmul.f32 %v1916_v59, %v1896_v0 }
  0x54   : > { %v378_v39 = vsel %vm366_vm3, %v376_v13, %v2552_v28  ;;  %v524_v14 = vadd.f32 %v514_v55, %v487_v63  ;;  %v409_v15 = vmul.f32 %v1622_v16, %v2006_v11  ;;  %v430_v9 = vmul.f32 %v1629_v18, %v2006_v11 }
  0x55   : > { %v386_v58 = vadd.f32 %v378_v39, %v348_v60  ;;  %v2035_v13 = vmul.f32 %v1916_v59, %v1898_v50  ;;  %v662_v34 = vadd.f32 %v654_v51, %v641_v52  ;;  %v786_v31 = vrot.slane %v778_v37, 2  ;;  %v174_v51 = vld [vmem:[%s1827_s26 + $0xc] sm:$0xf] }
  0x56   : > { %v722_v7 = vrot.slane %v705_v2, 6  ;;  %v2038_v60 = vperm.slane %v1815_v49, 1  ;;  %v417_v0 = vrot.slane %v409_v15, 1  ;;  %v451_v63 = vmul.f32 %v1632_v19, %v2006_v11  ;;  %202 = vst.msk [vmem:[#allocation2 + $0x63] sm:$0xf] %vm198_vm4, %v174_v51 }
  0x57   : > { %v404_v32 = vadd.f32 %v400_v17, %v386_v58  ;;  %v2553_v16 = vrot.slane %v1839_v10, 5  ;;  %v794_v53 = vadd.f32 %v786_v31, %v773_v36  ;;  %v799_v50 = vmul.f32 %v2011_v47, %v1929_v23 }
  0x58   : > { %v2554_v52 = vrot.slane %v1800_v33, 6  ;;  %v438_v55 = vrot.slane %v430_v9, 2  ;;  %v575_v28 = vmul.f32 %v1721_v46, %v2006_v11  ;;  %v472_v19 = vmul.f32 %v1670_v35, %v2006_v11 }
  0x59   : > { %v687_v18 = vsel %vm328_vm2, %v685_v44, %v2553_v16  ;;  %v425_v3 = vadd.f32 %v417_v0, %v404_v32  ;;  %v584_v10 = vmul.f32 %v1635_v20, %v2006_v11  ;;  %v605_v17 = vmul.f32 %v1646_v26, %v2006_v11 }
  0x5a   : > { %v551_v37 = vsel %vm366_vm3, %v549_v48, %v2554_v52  ;;  %v699_v39 = vadd.f32 %v687_v18, %v662_v34  ;;  %v459_v44 = vrot.slane %v451_v63, 3  ;;  %v496_v48 = vmul.f32 %v1675_v40, %v2006_v11 }
  0x5b   : > { %v561_v2 = vadd.f32 %v551_v37, %v524_v14  ;;  %v446_v33 = vadd.f32 %v438_v55, %v425_v3  ;;  %v2064_v58 = vmul.f32 %v1916_v59, %v1910_v54  ;;  %v807_v35 = vrot.slane %v799_v50, 3 }
  0x5c   : > { %v592_v14 = vrot.slane %v584_v10, 1  ;;  %v626_v15 = vmul.f32 %v1649_v27, %v2006_v11  ;;  %v820_v34 = vmul.f32 %v2038_v60, %v1929_v23  ;;  %v841_v40 = vmul.f32 %v1842_v12, %v1929_v23 }
  0x5d   : > { %v579_v36 = vadd.f32 %v575_v28, %v561_v2  ;;  %v467_v31 = vadd.f32 %v459_v44, %v446_v33  ;;  %v815_v32 = vadd.f32 %v807_v35, %v794_v53  ;;  %v613_v63 = vrot.slane %v605_v17, 2 }
  0x5e   : > { %v2555_v54 = vrot.slane %v1853_v41, 6  ;;  %v480_v18 = vrot.slane %v472_v19, 4  ;;  %v515_v50 = vrot.slane %v496_v48, 5  ;;  %v533_v52 = vmul.f32 %v1691_v56, %v2006_v11 }
  0x5f   : > { %v600_v0 = vadd.f32 %v592_v14, %v579_v36  ;;  %v634_v55 = vrot.slane %v626_v15, 3  ;;  %v647_v2 = vmul.f32 %v1791_v21, %v2006_v11  ;;  %v670_v53 = vmul.f32 %v1794_v22, %v2006_v11 }
  0x60   : > { %v724_v16 = vsel %vm366_vm3, %v722_v7, %v2555_v54  ;;  %v828_v28 = vrot.slane %v820_v34, 4  ;;  %v488_v10 = vadd.f32 %v480_v18, %v467_v31  ;;  %v749_v41 = vmul.f32 %v1932_v5, %v2006_v11 }
  0x61   : > { %v736_v37 = vadd.f32 %v724_v16, %v699_v39  ;;  %v621_v3 = vadd.f32 %v613_v63, %v600_v0  ;;  %v758_v7 = vmul.f32 %v1972_v29, %v2006_v11  ;;  %v2088_v56 = vmul.f32 %v1916_v59, %v1947_v62  ;;  %v2108_v16 = vld [vmem:[#allocation2 + $0x50] sm:$0xff] }
  0x62   : > { %v857_v39 = vrot.slane %v841_v40, 5  ;;  %v878_v19 = vmul.f32 %v1874_v38, %v1929_v23  ;;  %v836_v51 = vadd.f32 %v828_v28, %v815_v32  ;;  %v2556_v33 = vrot.slane %v1797_v24, 5  ;;  %v2559_v28 = vld [vmem:[#allocation3_spill] sm:$0xff] }
  0x63   : > { %v642_v17 = vadd.f32 %v634_v55, %v621_v3  ;;  %v552_v48 = vrot.slane %v533_v52, 6  ;;  %v753_v36 = vadd.f32 %v749_v41, %v736_v37  ;;  %v655_v35 = vrot.slane %v647_v2, 4 }
  0x64   : > { %v517_v44 = vsel %vm328_vm2, %v515_v50, %v2556_v33  ;;  %v688_v14 = vrot.slane %v670_v53, 5  ;;  %v707_v15 = vmul.f32 %v1808_v42, %v2006_v11  ;;  %v779_v62 = vmul.f32 %v1989_v43, %v2006_v11 }
  0x65   : > { %v525_v34 = vadd.f32 %v517_v44, %v488_v10  ;;  %v766_v40 = vrot.slane %v758_v7, 1  ;;  %v800_v23 = vmul.f32 %v2011_v47, %v2006_v11  ;;  %v821_v24 = vmul.f32 %v2038_v60, %v2006_v11 }
  0x66   : > { %v1071_v31 = vrot.slane %v2027_v4, 6  ;;  %v1074_v32 = vrot.slane %v2035_v13, 6  ;;  %v2557_v0 = vrot.slane %v1871_v61, 5  ;;  %v663_v54 = vadd.f32 %v655_v35, %v642_v17 }
  0x67   : > { %v1077_v18 = vrot.slane %v2064_v58, 6  ;;  %v894_v52 = vrot.slane %v878_v19, 6  ;;  %v774_v37 = vadd.f32 %v766_v40, %v753_v36  ;;  %v2558_v3 = vrot.slane %v1846_v25, 5  ;;  %v2561_v36 = vld [vmem:[#allocation12_spill] sm:$0xff] }
  0x68   : > { %v859_v63 = vsel %vm328_vm2, %v857_v39, %v2557_v0  ;;  %v725_v2 = vrot.slane %v707_v15, 6  ;;  %v787_v53 = vrot.slane %v779_v62, 2  ;;  %v2560_v10 = vrot.slane %v2559_v28, 6 }
  0x69   : > { %v873_v50 = vadd.f32 %v859_v63, %v836_v51  ;;  %v690_v55 = vsel %vm328_vm2, %v688_v14, %v2558_v3  ;;  %v808_v41 = vrot.slane %v800_v23, 3  ;;  %v829_v7 = vrot.slane %v821_v24, 4  ;;  %v2563_v24 = vld [vmem:[#allocation5_spill] sm:$0xff] }
  0x6a   : > { %v554_v61 = vsel %vm366_vm3, %v552_v48, %v2560_v10  ;;  %v576_v17 = vmul.f32 %v1721_v46, %v2108_v16  ;;  %v700_v33 = vadd.f32 %v690_v55, %v663_v54  ;;  %v843_v19 = vmul.f32 %v1842_v12, %v2006_v11  ;;  %v2144_v54 = vld [vmem:[#allocation2 + $0x70] sm:$0xff] }
  0x6b   : > { %v562_v39 = vadd.f32 %v554_v61, %v525_v34  ;;  %v585_v25 = vmul.f32 %v1635_v20, %v2108_v16  ;;  %v606_v51 = vmul.f32 %v1646_v26, %v2108_v16  ;;  %v795_v44 = vadd.f32 %v787_v53, %v774_v37 }
  0x6c   : > { %v2127_v48 = vmul.f32 %v1874_v38, %v2006_v11  ;;  %v2562_v35 = vrot.slane %v2561_v36, 6  ;;  %v2133_v62 = vperm.slane %v1815_v49, 4  ;;  %v627_v20 = vmul.f32 %v1649_v27, %v2108_v16 }
  0x6d   : > { %v580_v46 = vadd.f32 %v576_v17, %v562_v39  ;;  %v593_v34 = vrot.slane %v585_v25, 1  ;;  %v614_v40 = vrot.slane %v606_v51, 2  ;;  %v648_v26 = vmul.f32 %v1791_v21, %v2108_v16 }
  0x6e   : > { %v896_v14 = vsel %vm366_vm3, %v894_v52, %v2562_v35  ;;  %v672_v23 = vmul.f32 %v1794_v22, %v2108_v16  ;;  %v2564_v0 = vrot.slane %v2563_v24, 6  ;;  %v750_v37 = vmul.f32 %v1932_v5, %v2108_v16 }
  0x6f   : > { %v910_v15 = vadd.f32 %v896_v14, %v873_v50  ;;  %v601_v50 = vadd.f32 %v593_v34, %v580_v46  ;;  %v759_v27 = vmul.f32 %v1972_v29, %v2108_v16  ;;  %v816_v3 = vadd.f32 %v808_v41, %v795_v44  ;;  %v2565_v44 = vld [vmem:[#allocation8_spill] sm:$0xff]  ;;  %v2172_v46 = vld [vmem:[#allocation2 + $0x60] sm:$0xff] }
  0x70   : > { %v727_v63 = vsel %vm366_vm3, %v725_v2, %v2564_v0  ;;  %v860_v55 = vrot.slane %v843_v19, 5  ;;  %v2151_v21 = vperm.slane %v1815_v49, 5  ;;  %v709_v22 = vmul.f32 %v1808_v42, %v2108_v16 }
  0x71   : > { %v737_v52 = vadd.f32 %v727_v63, %v700_v33  ;;  %v2156_v2 = vperm.slane %v1815_v49, 6  ;;  %v622_v53 = vadd.f32 %v614_v40, %v601_v50  ;;  %v635_v28 = vrot.slane %v627_v20, 3 }
  0x72   : > { %v897_v61 = vrot.slane %v2127_v48, 6  ;;  %v924_v39 = vmul.f32 %v2133_v62, %v2006_v11  ;;  %v2163_v41 = vmul.f32 %v2133_v62, %v2144_v54  ;;  %v691_v17 = vrot.slane %v672_v23, 5 }
  0x73   : > { %v754_v10 = vadd.f32 %v750_v37, %v737_v52  ;;  %v643_v33 = vadd.f32 %v635_v28, %v622_v53  ;;  %v656_v19 = vrot.slane %v648_v26, 4  ;;  %v767_v25 = vrot.slane %v759_v27, 1  ;;  %v2569_v28 = vld [vmem:[#allocation7_spill] sm:$0xff] }
  0x74   : > { %v780_v42 = vmul.f32 %v1989_v43, %v2108_v16  ;;  %v837_v51 = vadd.f32 %v829_v7, %v816_v3  ;;  %v2566_v36 = vrot.slane %v2565_v44, 5  ;;  %v933_v48 = vmul.f32 %v2151_v21, %v2006_v11  ;;  %v2567_v7 = vld [vmem:[#allocation4_spill] sm:$0xff] }
  0x75   : > { %v728_v14 = vrot.slane %v709_v22, 6  ;;  %v954_v34 = vmul.f32 %v2156_v2, %v2006_v11  ;;  %v2178_v20 = vmul.f32 %v2151_v21, %v2144_v54  ;;  %v664_v40 = vadd.f32 %v656_v19, %v643_v33 }
  0x76   : > { %v862_v35 = vsel %vm328_vm2, %v860_v55, %v2566_v36  ;;  %v775_v26 = vadd.f32 %v767_v25, %v754_v10  ;;  %v2568_v23 = vrot.slane %v2567_v7, 5  ;;  %v801_v0 = vmul.f32 %v2011_v47, %v2108_v16  ;;  %v2571_v36 = vld [vmem:[#allocation13_spill] sm:$0xff] }
  0x77   : > { %v822_v63 = vmul.f32 %v2038_v60, %v2108_v16  ;;  %v845_v50 = vmul.f32 %v1842_v12, %v2108_v16  ;;  %v788_v37 = vrot.slane %v780_v42, 2  ;;  %v751_v27 = vmul.f32 %v1932_v5, %v2172_v46 }
  0x78   : > { %v693_v24 = vsel %vm328_vm2, %v691_v17, %v2568_v23  ;;  %v760_v3 = vmul.f32 %v1972_v29, %v2172_v46  ;;  %v874_v55 = vadd.f32 %v862_v35, %v837_v51  ;;  %v928_v22 = vadd.f32 %v924_v39, %v910_v15 }
  0x79   : > { %v701_v52 = vadd.f32 %v693_v24, %v664_v40  ;;  %v882_v53 = vmul.f32 %v1874_v38, %v2108_v16  ;;  %v2570_v10 = vrot.slane %v2569_v28, 6  ;;  %v796_v33 = vadd.f32 %v788_v37, %v775_v26 }
  0x7a   : > { %v768_v25 = vrot.slane %v760_v3, 1  ;;  %v781_v42 = vmul.f32 %v1989_v43, %v2172_v46  ;;  %v941_v44 = vrot.slane %v933_v48, 1  ;;  %v2202_v5 = vmul.f32 %v2156_v2, %v2144_v54 }
  0x7b   : > { %v730_v17 = vsel %vm366_vm3, %v728_v14, %v2570_v10  ;;  %v809_v15 = vrot.slane %v801_v0, 3  ;;  %v830_v39 = vrot.slane %v822_v63, 4  ;;  %v863_v51 = vrot.slane %v845_v50, 5  ;;  %v2573_v50 = vld [vmem:[#allocation6_spill] sm:$0xff] }
  0x7c   : > { %v738_v19 = vadd.f32 %v730_v17, %v701_v52  ;;  %v2572_v35 = vrot.slane %v2571_v36, 6  ;;  %v900_v26 = vrot.slane %v882_v53, 6  ;;  %v802_v43 = vmul.f32 %v2011_v47, %v2172_v46 }
  0x7d   : > { %v949_v48 = vadd.f32 %v941_v44, %v928_v22  ;;  %v817_v23 = vadd.f32 %v809_v15, %v796_v33  ;;  %v925_v24 = vmul.f32 %v2133_v62, %v2108_v16  ;;  %v789_v37 = vrot.slane %v781_v42, 2  ;;  %v2574_v22 = vld [vmem:[#allocation11_spill] sm:$0xff]  ;;  %v2575_v33 = vld [vmem:[#allocation9_spill] sm:$0xff] }
  0x7e   : > { %v899_v14 = vsel %vm366_vm3, %v897_v61, %v2572_v35  ;;  %v755_v40 = vadd.f32 %v751_v27, %v738_v19  ;;  %v2214_v0 = vmul.f32 %v2151_v21, %v2108_v16  ;;  %v962_v63 = vrot.slane %v954_v34, 2 }
  0x7f   : > { %v911_v7 = vadd.f32 %v899_v14, %v874_v55  ;;  %v2217_v61 = vperm.slane %v1815_v49, 7  ;;  %v2220_v27 = vperm.slane %v2573_v50, 0  ;;  %v823_v47 = vmul.f32 %v2038_v60, %v2172_v46 }
  0x80   : > { %v776_v52 = vadd.f32 %v768_v25, %v755_v40  ;;  %v847_v55 = vmul.f32 %v1842_v12, %v2172_v46  ;;  %v1017_v53 = vmul.f32 %v2574_v22, %v2006_v11  ;;  %v810_v28 = vrot.slane %v802_v43, 3  ;;  %v2577_v40 = vld [vmem:[#allocation14_spill] sm:$0xff] }
  0x81   : > { %v970_v10 = vadd.f32 %v962_v63, %v949_v48  ;;  %v975_v34 = vmul.f32 %v2217_v61, %v2006_v11  ;;  %v996_v49 = vmul.f32 %v2220_v27, %v2006_v11  ;;  %v838_v17 = vadd.f32 %v830_v39, %v817_v23  ;;  %v2246_v39 = vld [vmem:[%s2518_s1 + $0x28] sm:$0xff] }
  0x82   : > { %v797_v3 = vadd.f32 %v789_v37, %v776_v52  ;;  %v2576_v19 = vrot.slane %v2575_v33, 5  ;;  %v884_v60 = vmul.f32 %v1874_v38, %v2172_v46  ;;  %v1054_v12 = vmul.f32 %v1916_v59, %v2006_v11 }
  0x83   : > { %v929_v42 = vadd.f32 %v925_v24, %v911_v7  ;;  %v2241_v44 = vmul.f32 %v2156_v2, %v2108_v16  ;;  %v983_v36 = vrot.slane %v975_v34, 3  ;;  %v831_v35 = vrot.slane %v823_v47, 4  ;;  %v1092_v47 = vld [vmem:[#allocation2 + $0x58] sm:$0x3] }
  0x84   : > { %v865_v25 = vsel %vm328_vm2, %v863_v51, %v2576_v19  ;;  %v818_v15 = vadd.f32 %v810_v28, %v797_v3  ;;  %v942_v51 = vrot.slane %v2214_v0, 1  ;;  %v866_v14 = vrot.slane %v847_v55, 5 }
  0x85   : > { %v1033_v38 = vrot.slane %v1017_v53, 5  ;;  %v2578_v43 = vrot.slane %v2577_v40, 6  ;;  %v991_v7 = vadd.f32 %v983_v36, %v970_v10  ;;  %v1004_v48 = vrot.slane %v996_v49, 4 }
  0x86   : > { %v2253_v23 = vperm.slane %v2573_v50, 4  ;;  %v875_v24 = vadd.f32 %v865_v25, %v838_v17  ;;  %v903_v52 = vrot.slane %v884_v60, 6  ;;  %v1070_v37 = vrot.slane %v1054_v12, 6  ;;  %v2580_v17 = vld [vmem:[#allocation10_spill] sm:$0xff] }
  0x87   : > { %v902_v11 = vsel %vm366_vm3, %v900_v26, %v2578_v43  ;;  %v2256_v63 = vperm.slane %v2246_v39, 0  ;;  %v839_v3 = vadd.f32 %v831_v35, %v818_v15  ;;  %v1012_v0 = vadd.f32 %v1004_v48, %v991_v7 }
  0x88   : > { %v2259_v55 = vperm.slane %v2573_v50, 3  ;;  %v2262_v53 = vperm.slane %v2573_v50, 5  ;;  %v2579_v26 = vrot.slane %v1923_v30, 5  ;;  %v2268_v10 = vperm.slane %v2573_v50, 6 }
  0x89   : > { %v2271_v34 = vperm.slane %v2573_v50, 7  ;;  %v2274_v49 = vperm.slane %v2246_v39, 1  ;;  %v2581_v33 = vrot.slane %v2580_v17, 5  ;;  %v2281_v25 = vmul.f32 %v2151_v21, %v2172_v46 }
  0x8a   : > { %v1035_v28 = vsel %vm328_vm2, %v1033_v38, %v2579_v26  ;;  %v1109_v60 = vmul.f32 %v2253_v23, %v2108_v16  ;;  %v912_v12 = vadd.f32 %v902_v11, %v875_v24  ;;  %v1072_v50 = vsel %vm366_vm3, %v1070_v37, %v1071_v31 }
  0x8b   : > { %v868_v19 = vsel %vm328_vm2, %v866_v14, %v2581_v33  ;;  %v1049_v30 = vadd.f32 %v1035_v28, %v1012_v0  ;;  %v1193_v15 = vmul.f32 %v2256_v63, %v2108_v16  ;;  %v1194_v36 = vmul.f32 %v2256_v63, %v1092_v47 }
  0x8c   : > { %v876_v35 = vadd.f32 %v868_v19, %v839_v3  ;;  %v1100_v21 = vmul.f32 %v2259_v55, %v2108_v16  ;;  %v1130_v38 = vmul.f32 %v2262_v53, %v2108_v16  ;;  %v1151_v40 = vmul.f32 %v2268_v10, %v2108_v16  ;;  %v2582_v3 = vld [vmem:[#allocation15_spill] sm:$0xff] }
  0x8d   : > { %v1086_v14 = vadd.f32 %v1072_v50, %v1049_v30  ;;  %v1172_v4 = vmul.f32 %v2271_v34, %v2108_v16  ;;  %v1230_v31 = vmul.f32 %v2274_v49, %v2108_v16  ;;  %v1231_v43 = vmul.f32 %v2274_v49, %v1092_v47 }
  0x8e   : > { %v926_v11 = vmul.f32 %v2133_v62, %v2172_v46  ;;  %v2306_v7 = vmul.f32 %v2156_v2, %v2172_v46  ;;  %v1117_v24 = vrot.slane %v1109_v60, 1  ;;  %v943_v37 = vrot.slane %v2281_v25, 1 }
  0x8f   : > { %v1104_v48 = vadd.f32 %v1100_v21, %v1086_v14  ;;  %v2583_v0 = vrot.slane %v2582_v3, 6  ;;  %v1209_v28 = vrot.slane %v1193_v15, 5  ;;  %v1210_v17 = vrot.slane %v1194_v36, 5  ;;  %v2327_v15 = vld [vmem:[%s2518_s1 + $0x30] ss:$0 sm:$0xff] }
  0x90   : > { %v2312_v33 = vadd.f32 %v926_v11, %v912_v12  ;;  %v1138_v30 = vrot.slane %v1130_v38, 2  ;;  %v1159_v62 = vrot.slane %v1151_v40, 3  ;;  %v1180_v50 = vrot.slane %v1172_v4, 4 }
  0x91   : > { %v905_v26 = vsel %vm366_vm3, %v903_v52, %v2583_v0  ;;  %v1125_v19 = vadd.f32 %v1117_v24, %v1104_v48  ;;  %v1246_v9 = vrot.slane %v1230_v31, 6  ;;  %v1247_v2 = vrot.slane %v1231_v43, 6  ;;  %v1268_v31 = vld [vmem:[#allocation2 + $0x68] sm:$0x3] }
  0x92   : > { %v913_v47 = vadd.f32 %v905_v26, %v876_v35  ;;  %v2315_v60 = vperm.slane %v2246_v39, 2  ;;  %v2318_v14 = vperm.slane %v2246_v39, 3  ;;  %v950_v21 = vadd.f32 %v942_v51, %v929_v42 }
  0x93   : > { %v1146_v29 = vadd.f32 %v1138_v30, %v1125_v19  ;;  %v1211_v52 = vsel %vm328_vm2, %v1209_v28, %v1210_v17  ;;  %v2322_v12 = vperm.slane %v2246_v39, 4  ;;  %v963_v36 = vrot.slane %v2241_v44, 2 }
  0x94   : > { %v976_v35 = vmul.f32 %v2217_v61, %v2108_v16  ;;  %v2333_v40 = vperm.slane %v2246_v39, 7  ;;  %v997_v42 = vmul.f32 %v2220_v27, %v2108_v16  ;;  %v1019_v51 = vmul.f32 %v2574_v22, %v2108_v16 }
  0x95   : > { %v1167_v38 = vadd.f32 %v1159_v62, %v1146_v29  ;;  %v1248_v4 = vsel %vm366_vm3, %v1246_v9, %v1247_v2  ;;  %v971_v43 = vadd.f32 %v963_v36, %v950_v21  ;;  %v1056_v44 = vmul.f32 %v1916_v59, %v2108_v16 }
  0x96   : > { %v984_v11 = vrot.slane %v976_v35, 3  ;;  %v2343_v29 = vperm.slane %v2246_v39, 5  ;;  %v2346_v24 = vperm.slane %v2246_v39, 6  ;;  %v1036_v3 = vrot.slane %v1019_v51, 5 }
  0x97   : > { %v1188_v48 = vadd.f32 %v1180_v50, %v1167_v38  ;;  %v1285_v0 = vmul.f32 %v2318_v14, %v2172_v46  ;;  %v1406_v9 = vmul.f32 %v2327_v15, %v2172_v46  ;;  %v1005_v28 = vrot.slane %v997_v42, 4 }
  0x98   : > { %v992_v26 = vadd.f32 %v984_v11, %v971_v43  ;;  %v1369_v16 = vmul.f32 %v2333_v40, %v2172_v46  ;;  %v1407_v19 = vmul.f32 %v2327_v15, %v1268_v31  ;;  %v1073_v30 = vrot.slane %v1056_v44, 6 }
  0x99   : > { %v1225_v17 = vadd.f32 %v1211_v52, %v1188_v48  ;;  %v1276_v39 = vmul.f32 %v2315_v60, %v2172_v46  ;;  %v1306_v62 = vmul.f32 %v2322_v12, %v2172_v46  ;;  %v1370_v50 = vmul.f32 %v2333_v40, %v1268_v31 }
  0x9a   : > { %v1013_v2 = vadd.f32 %v1005_v28, %v992_v26  ;;  %v1327_v36 = vmul.f32 %v2343_v29, %v2172_v46  ;;  %v1348_v52 = vmul.f32 %v2346_v24, %v2172_v46  ;;  %v1038_v35 = vsel %vm328_vm2, %v1036_v3, %v1037_v57  ;;  %v1094_v28 = vld [vmem:[#allocation2 + $0x68] sm:$0x3] }
  0x9b   : > { %v1262_v21 = vadd.f32 %v1248_v4, %v1225_v17  ;;  %v1293_v38 = vrot.slane %v1285_v0, 1  ;;  %v1422_v42 = vrot.slane %v1406_v9, 6  ;;  %v1110_v43 = vmul.f32 %v2253_v23, %v2172_v46 }
  0x9c   : > { %v1050_v51 = vadd.f32 %v1038_v35, %v1013_v2  ;;  %v1385_v31 = vrot.slane %v1369_v16, 5  ;;  %v1423_v44 = vrot.slane %v1407_v19, 6  ;;  %v1075_v4 = vsel %vm366_vm3, %v1073_v30, %v1074_v32 }
  0x9d   : > { %v1280_v11 = vadd.f32 %v1276_v39, %v1262_v21  ;;  %v1386_v48 = vrot.slane %v1370_v50, 5  ;;  %v1101_v45 = vmul.f32 %v2259_v55, %v2172_v46  ;;  %v1131_v57 = vmul.f32 %v2262_v53, %v2172_v46 }
  0x9e   : > { %v1087_v26 = vadd.f32 %v1075_v4, %v1050_v51  ;;  %v2377_v3 = vadd.f32 %v2163_v41, %v913_v47  ;;  %v1314_v9 = vrot.slane %v1306_v62, 2  ;;  %v1335_v17 = vrot.slane %v1327_v36, 3  ;;  %v1269_v4 = vld [vmem:[#allocation2 + $0x70] sm:$0xff] }
  0x9f   : > { %v1301_v0 = vadd.f32 %v1293_v38, %v1280_v11  ;;  %v1118_v19 = vrot.slane %v1110_v43, 1  ;;  %v1152_v13 = vmul.f32 %v2268_v10, %v2172_v46  ;;  %v1195_v32 = vmul.f32 %v2256_v63, %v2172_v46 }
  0xa0   : > { %v1105_v16 = vadd.f32 %v1101_v45, %v1087_v26  ;;  %v1356_v39 = vrot.slane %v1348_v52, 4  ;;  %v1424_v50 = vsel %vm366_vm3, %v1422_v42, %v1423_v44  ;;  %v1196_v2 = vmul.f32 %v2256_v63, %v1094_v28 }
  0xa1   : > { %v1322_v30 = vadd.f32 %v1314_v9, %v1301_v0  ;;  %v1387_v41 = vsel %vm328_vm2, %v1385_v31, %v1386_v48  ;;  %v1139_v21 = vrot.slane %v1131_v57, 2  ;;  %v1173_v62 = vmul.f32 %v2271_v34, %v2172_v46 }
  0xa2   : > { %v1126_v47 = vadd.f32 %v1118_v19, %v1105_v16  ;;  %v1232_v35 = vmul.f32 %v2274_v49, %v2172_v46  ;;  %v1233_v38 = vmul.f32 %v2274_v49, %v1094_v28  ;;  %v951_v52 = vadd.f32 %v943_v37, %v2312_v33 }
  0xa3   : > { %v1343_v36 = vadd.f32 %v1335_v17, %v1322_v30  ;;  %v1160_v51 = vrot.slane %v1152_v13, 3  ;;  %v1212_v43 = vrot.slane %v1195_v32, 5  ;;  %v964_v11 = vrot.slane %v2306_v7, 2  ;;  %v2404_v7 = vld [vmem:[%s2519_s2] ss:$0 sm:$0xff] }
  0xa4   : > { %v1147_v42 = vadd.f32 %v1139_v21, %v1126_v47  ;;  %v1213_v44 = vrot.slane %v1196_v2, 5  ;;  %v977_v48 = vmul.f32 %v2217_v61, %v2172_v46  ;;  %v998_v26 = vmul.f32 %v2220_v27, %v2172_v46 }
  0xa5   : > { %v1364_v31 = vadd.f32 %v1356_v39, %v1343_v36  ;;  %v1181_v28 = vrot.slane %v1173_v62, 4  ;;  %v972_v57 = vadd.f32 %v964_v11, %v951_v52  ;;  %v1021_v25 = vmul.f32 %v2574_v22, %v2172_v46  ;;  %v1270_v39 = vld [vmem:[#allocation2 + $0x78] sm:$0x3] }
  0xa6   : > { %v1168_v45 = vadd.f32 %v1160_v51, %v1147_v42  ;;  %v1249_v33 = vrot.slane %v1232_v35, 6  ;;  %v1250_v0 = vrot.slane %v1233_v38, 6  ;;  %v985_v9 = vrot.slane %v977_v48, 3 }
  0xa7   : > { %v1401_v37 = vadd.f32 %v1387_v41, %v1364_v31  ;;  %v1286_v16 = vmul.f32 %v2318_v14, %v1269_v4  ;;  %v1039_v19 = vrot.slane %v1021_v25, 5  ;;  %v1058_v13 = vmul.f32 %v1916_v59, %v2172_v46  ;;  %v1096_v25 = vld [vmem:[#allocation2 + $0x78] sm:$0x3] }
  0xa8   : > { %v1189_v17 = vadd.f32 %v1181_v28, %v1168_v45  ;;  %v1214_v30 = vsel %vm328_vm2, %v1212_v43, %v1213_v44  ;;  %v993_v2 = vadd.f32 %v985_v9, %v972_v57  ;;  %v1006_v41 = vrot.slane %v998_v26, 4 }
  0xa9   : > { %v1438_v32 = vadd.f32 %v1424_v50, %v1401_v37  ;;  %v1277_v21 = vmul.f32 %v2315_v60, %v1269_v4  ;;  %v1307_v62 = vmul.f32 %v2322_v12, %v1269_v4  ;;  %v1076_v36 = vrot.slane %v1058_v13, 6 }
  0xaa   : > { %v1226_v47 = vadd.f32 %v1214_v30, %v1189_v17  ;;  %v1251_v50 = vsel %vm366_vm3, %v1249_v33, %v1250_v0  ;;  %v1328_v35 = vmul.f32 %v2343_v29, %v1269_v4  ;;  %v1014_v38 = vadd.f32 %v1006_v41, %v993_v2 }
  0xab   : > { %v1446_v46 = vadd.f32 %v2404_v7, %v1438_v32  ;;  %v1371_v42 = vmul.f32 %v2333_v40, %v1269_v4  ;;  %v1372_v51 = vmul.f32 %v2333_v40, %v1270_v39  ;;  %v1041_v43 = vsel %vm328_vm2, %v1039_v19, %v1040_v1 }
  0xac   : > { %v1263_v52 = vadd.f32 %v1251_v50, %v1226_v47  ;;  %v1294_v11 = vrot.slane %v1286_v16, 1  ;;  %v1349_v31 = vmul.f32 %v2346_v24, %v1269_v4  ;;  %v1051_v44 = vadd.f32 %v1041_v43, %v1014_v38 }
  0xad   : > { %1450 = vst.msk [vmem:[%s2415_s10] sm:$0xf] %vm198_vm4, %v1446_v46  ;;  %v1111_v48 = vmul.f32 %v2253_v23, %v2144_v54  ;;  %v1315_v45 = vrot.slane %v1307_v62, 2  ;;  %v1408_v28 = vmul.f32 %v2327_v15, %v1269_v4  ;;  %v1078_v57 = vsel %vm366_vm3, %v1076_v36, %v1077_v18 }
  0xae   : > { %v1281_v26 = vadd.f32 %v1277_v21, %v1263_v52  ;;  %v1409_v8 = vmul.f32 %v2327_v15, %v1270_v39  ;;  %v1088_v1 = vadd.f32 %v1078_v57, %v1051_v44  ;;  %v1102_v37 = vmul.f32 %v2259_v55, %v2144_v54 }
  0xaf   : > { %v1132_v33 = vmul.f32 %v2262_v53, %v2144_v54  ;;  %v1336_v9 = vrot.slane %v1328_v35, 3  ;;  %v1388_v17 = vrot.slane %v1371_v42, 5  ;;  %v1389_v16 = vrot.slane %v1372_v51, 5 }
  0xb0   : > { %v1302_v0 = vadd.f32 %v1294_v11, %v1281_v26  ;;  %v1357_v19 = vrot.slane %v1349_v31, 4  ;;  %v1106_v4 = vadd.f32 %v1102_v37, %v1088_v1  ;;  %v1119_v13 = vrot.slane %v1111_v48, 1 }
  0xb1   : > { %v1153_v58 = vmul.f32 %v2268_v10, %v2144_v54  ;;  %v1174_v32 = vmul.f32 %v2271_v34, %v2144_v54  ;;  %v1197_v30 = vmul.f32 %v2256_v63, %v2144_v54  ;;  %v1198_v39 = vmul.f32 %v2256_v63, %v1096_v25 }
  0xb2   : > { %v1323_v18 = vadd.f32 %v1315_v45, %v1302_v0  ;;  %v1425_v2 = vrot.slane %v1408_v28, 6  ;;  %v1426_v41 = vrot.slane %v1409_v8, 6  ;;  %v1127_v47 = vadd.f32 %v1119_v13, %v1106_v4  ;;  %v1097_v0 = vld [vmem:[#allocation2 + $0x80] sm:$0xff] }
  0xb3   : > { %v1140_v21 = vrot.slane %v1132_v33, 2  ;;  %v1390_v36 = vsel %vm328_vm2, %v1388_v17, %v1389_v16  ;;  %v1234_v46 = vmul.f32 %v2274_v49, %v2144_v54  ;;  %v1235_v50 = vmul.f32 %v2274_v49, %v1096_v25  ;;  %v1271_v25 = vld [vmem:[#allocation2 + $0x80] sm:$0xff] }
  0xb4   : > { %v1344_v62 = vadd.f32 %v1336_v9, %v1323_v18  ;;  %v1161_v38 = vrot.slane %v1153_v58, 3  ;;  %v2584_v52 = vrot.slane %v2178_v20, 1  ;;  %v965_v51 = vrot.slane %v2202_v5, 2 }
  0xb5   : > { %v1148_v35 = vadd.f32 %v1140_v21, %v1127_v47  ;;  %v1182_v11 = vrot.slane %v1174_v32, 4  ;;  %v1215_v31 = vrot.slane %v1197_v30, 5  ;;  %v1216_v44 = vrot.slane %v1198_v39, 5  ;;  %v1272_v32 = vld [vmem:[#allocation2 + $0x88] sm:$0x3] }
  0xb6   : > { %v952_v42 = vadd.f32 %v2584_v52, %v2377_v3  ;;  %v1365_v43 = vadd.f32 %v1357_v19, %v1344_v62  ;;  %v978_v45 = vmul.f32 %v2217_v61, %v2144_v54  ;;  %v999_v28 = vmul.f32 %v2220_v27, %v2144_v54 }
  0xb7   : > { %v1169_v48 = vadd.f32 %v1161_v38, %v1148_v35  ;;  %v1252_v8 = vrot.slane %v1234_v46, 6  ;;  %v1253_v1 = vrot.slane %v1235_v50, 6  ;;  %v1023_v20 = vmul.f32 %v2574_v22, %v2144_v54 }
  0xb8   : > { %v973_v26 = vadd.f32 %v965_v51, %v952_v42  ;;  %v1402_v57 = vadd.f32 %v1390_v36, %v1365_v43  ;;  %v1427_v5 = vsel %vm366_vm3, %v1425_v2, %v1426_v41  ;;  %v986_v37 = vrot.slane %v978_v45, 3  ;;  %v1098_v43 = vld [vmem:[#allocation2 + $0x88] sm:$0x3] }
  0xb9   : > { %v1190_v3 = vadd.f32 %v1182_v11, %v1169_v48  ;;  %v1060_v33 = vmul.f32 %v1916_v59, %v2144_v54  ;;  %v1080_v61 = vrot.slane %v2088_v56, 6  ;;  %v1217_v27 = vsel %vm328_vm2, %v1215_v31, %v1216_v44 }
  0xba   : > { %v1439_v9 = vadd.f32 %v1427_v5, %v1402_v57  ;;  %v1042_v17 = vrot.slane %v1023_v20, 5  ;;  %v1287_v19 = vmul.f32 %v2318_v14, %v1271_v25  ;;  %v994_v4 = vadd.f32 %v986_v37, %v973_v26 }
  0xbb   : > { %v1227_v16 = vadd.f32 %v1217_v27, %v1190_v3  ;;  %v1007_v22 = vrot.slane %v999_v28, 4  ;;  %v1254_v58 = vsel %vm366_vm3, %v1252_v8, %v1253_v1  ;;  %v1308_v18 = vmul.f32 %v2322_v12, %v1271_v25 }
  0xbc   : > { %v1447_v13 = vadd.f32 %v2404_v7, %v1439_v9  ;;  %v1079_v59 = vrot.slane %v1060_v33, 6  ;;  %v1278_v56 = vmul.f32 %v2315_v60, %v1271_v25  ;;  %v1112_v39 = vmul.f32 %v2253_v23, %v1097_v0 }
  0xbd   : > { %v1264_v54 = vadd.f32 %v1254_v58, %v1227_v16  ;;  %v1015_v30 = vadd.f32 %v1007_v22, %v994_v4  ;;  %v1329_v2 = vmul.f32 %v2343_v29, %v1271_v25  ;;  %v1350_v41 = vmul.f32 %v2346_v24, %v1271_v25 }
  0xbe   : > { %1451 = vst.msk [vmem:[%s2415_s10 + $0x4] sm:$0xf] %vm198_vm4, %v1447_v13  ;;  %v2585_v47 = vrot.slane %v1965_v6, 5  ;;  %v1295_v36 = vrot.slane %v1287_v19, 1  ;;  %v1103_v50 = vmul.f32 %v2259_v55, %v1097_v0  ;;  %v1316_v35 = vrot.slane %v1308_v18, 2 }
  0xbf   : > { %v1282_v62 = vadd.f32 %v1278_v56, %v1264_v54  ;;  %v1373_v38 = vmul.f32 %v2333_v40, %v1271_v25  ;;  %v1374_v23 = vmul.f32 %v2333_v40, %v1272_v32  ;;  %v1081_v52 = vsel %vm366_vm3, %v1079_v59, %v1080_v61 }
  0xc0   : > { %v1044_v21 = vsel %vm328_vm2, %v1042_v17, %v2585_v47  ;;  %v1120_v11 = vrot.slane %v1112_v39, 1  ;;  %v1133_v6 = vmul.f32 %v2262_v53, %v1097_v0  ;;  %v1337_v31 = vrot.slane %v1329_v2, 3  ;;  %v1274_v47 = vld [vmem:[#allocation2 + $0x98] sm:$0x3] }
  0xc1   : > { %v1052_v46 = vadd.f32 %v1044_v21, %v1015_v30  ;;  %v1303_v42 = vadd.f32 %v1295_v36, %v1282_v62  ;;  %v1410_v44 = vmul.f32 %v2327_v15, %v1271_v25  ;;  %v1411_v48 = vmul.f32 %v2327_v15, %v1272_v32 }
  0xc2   : > { %v1358_v55 = vrot.slane %v1350_v41, 4  ;;  %v1154_v28 = vmul.f32 %v2268_v10, %v1097_v0  ;;  %v1391_v57 = vrot.slane %v1373_v38, 5  ;;  %v1392_v8 = vrot.slane %v1374_v23, 5 }
  0xc3   : > { %v1089_v51 = vadd.f32 %v1081_v52, %v1052_v46  ;;  %v1324_v26 = vadd.f32 %v1316_v35, %v1303_v42  ;;  %v1199_v1 = vmul.f32 %v2256_v63, %v1097_v0  ;;  %v1200_v20 = vmul.f32 %v2256_v63, %v1098_v43  ;;  %v1273_v63 = vld [vmem:[#allocation2 + $0x90] sm:$0xff] }
  0xc4   : > { %v1141_v37 = vrot.slane %v1133_v6, 2  ;;  %v1175_v53 = vmul.f32 %v2271_v34, %v1097_v0  ;;  %v1428_v33 = vrot.slane %v1410_v44, 6  ;;  %v1429_v25 = vrot.slane %v1411_v48, 6 }
  0xc5   : > { %v1107_v45 = vadd.f32 %v1103_v50, %v1089_v51  ;;  %v1345_v5 = vadd.f32 %v1337_v31, %v1324_v26  ;;  %v1236_v61 = vmul.f32 %v2274_v49, %v1097_v0  ;;  %v1237_v9 = vmul.f32 %v2274_v49, %v1098_v43 }
  0xc6   : > { %v1162_v10 = vrot.slane %v1154_v28, 3  ;;  %v1393_v16 = vsel %vm328_vm2, %v1391_v57, %v1392_v8  ;;  %v1218_v19 = vrot.slane %v1199_v1, 5  ;;  %v1219_v4 = vrot.slane %v1200_v20, 5 }
  0xc7   : > { %v1128_v3 = vadd.f32 %v1120_v11, %v1107_v45  ;;  %v1366_v27 = vadd.f32 %v1358_v55, %v1345_v5  ;;  %v1183_v58 = vrot.slane %v1175_v53, 4  ;;  %v1430_v34 = vsel %vm366_vm3, %v1428_v33, %v1429_v25 }
  0xc8   : > { %v1255_v18 = vrot.slane %v1236_v61, 6  ;;  %v1256_v59 = vrot.slane %v1237_v9, 6  ;;  %v1288_v49 = vmul.f32 %v2318_v14, %v1273_v63  ;;  %v1220_v32 = vsel %vm328_vm2, %v1218_v19, %v1219_v4 }
  0xc9   : > { %v1149_v17 = vadd.f32 %v1141_v37, %v1128_v3  ;;  %v1403_v22 = vadd.f32 %v1393_v16, %v1366_v27  ;;  %v1279_v39 = vmul.f32 %v2315_v60, %v1273_v63  ;;  %v1309_v62 = vmul.f32 %v2322_v12, %v1273_v63 }
  0xca   : > { %v1257_v2 = vsel %vm366_vm3, %v1255_v18, %v1256_v59  ;;  %v1296_v21 = vrot.slane %v1288_v49, 1  ;;  %v1330_v46 = vmul.f32 %v2343_v29, %v1273_v63  ;;  %v1375_v14 = vmul.f32 %v2333_v40, %v1273_v63 }
  0xcb   : > { %v1170_v13 = vadd.f32 %v1162_v10, %v1149_v17  ;;  %v1440_v54 = vadd.f32 %v1430_v34, %v1403_v22  ;;  %v1376_v50 = vmul.f32 %v2333_v40, %v1274_v47  ;;  %v1317_v38 = vrot.slane %v1309_v62, 2 }
  0xcc   : > { %v1351_v60 = vmul.f32 %v2346_v24, %v1273_v63  ;;  %v1412_v23 = vmul.f32 %v2327_v15, %v1273_v63  ;;  %v1413_v52 = vmul.f32 %v2327_v15, %v1274_v47  ;;  %v1338_v51 = vrot.slane %v1330_v46, 3 }
  0xcd   : > { %v1191_v0 = vadd.f32 %v1183_v58, %v1170_v13  ;;  %v1448_v56 = vadd.f32 %v2404_v7, %v1440_v54  ;;  %v1394_v43 = vrot.slane %v1375_v14, 5  ;;  %v1395_v12 = vrot.slane %v1376_v50, 5 }
  0xce   : > { %v1359_v6 = vrot.slane %v1351_v60, 4  ;;  %v1431_v29 = vrot.slane %v1412_v23, 6  ;;  %v1432_v31 = vrot.slane %v1413_v52, 6 }
  0xcf   : > { %v1228_v30 = vadd.f32 %v1220_v32, %v1191_v0  ;;  %1452 = vst.msk [vmem:[%s2415_s10 + $0x8] sm:$0xf] %vm198_vm4, %v1448_v56  ;;  %v1396_v40 = vsel %vm328_vm2, %v1394_v43, %v1395_v12 }
  0xd0   : > { %v1433_v26 = vsel %vm366_vm3, %v1431_v29, %v1432_v31 }
  0xd1   : > { %v1265_v41 = vadd.f32 %v1257_v2, %v1228_v30 }
  0xd3   : > { %v1283_v36 = vadd.f32 %v1279_v39, %v1265_v41 }
  0xd5   : > { %v1304_v35 = vadd.f32 %v1296_v21, %v1283_v36 }
  0xd7   : > { %v1325_v42 = vadd.f32 %v1317_v38, %v1304_v35 }
  0xd9   : > { %v1346_v11 = vadd.f32 %v1338_v51, %v1325_v42 }
  0xdb   : > { %v1367_v44 = vadd.f32 %v1359_v6, %v1346_v11 }
  0xdd   : > { %v1404_v48 = vadd.f32 %v1396_v40, %v1367_v44 }
  0xdf   : > { %v1441_v24 = vadd.f32 %v1433_v26, %v1404_v48 }
  0xe1   : > { %v1449_v55 = vadd.f32 %v2404_v7, %v1441_v24 }
  0xe3   : > { %1453 = vst.msk [vmem:[%s2415_s10 + $0xc] sm:$0xf] %vm198_vm4, %v1449_v55 }
  0xe4 PF: > { %s13_s12 = sadd.s32 1, %s1539_s12  }
  0xe5   : > { %p10_p4 = scmp.ge.s32.totalorder %s13_s12, 4  }
  0xe7   :  { %12 = sbr.rel (!%p10_p4) target bundleno = 1 (0x1), region = 68 }

// kernel: rgb_context_decoder_forward.16
= control target key start
LH: loop header
LB: loop body
LE: loop exit
PB: predicated region body
PF: predicated region fallthrough
CT: control target
= control target key end

     0   :  { %13 = vsyncpa [#allocation3], 0  ;;  %s673_s0 = inlined_call_operand.vmem [shape: f32[32,32], index: 0, kind: input, shape index: {}]   ;;  %s674_s1 = inlined_call_operand.vmem [shape: f32[32,32], index: 1, kind: input, shape index: {}]   ;;  %s675_s2 = inlined_call_operand.hbm [shape: f32[1,32], index: 2, kind: input, shape index: {}]   ;;  %s676_s3 = inlined_call_operand.hbm [shape: f32[1,32], index: 3, kind: input, shape index: {}]   ;;  %s677_s4 = inlined_call_operand.vmem [shape: f32[32,128], index: 4, kind: input, shape index: {}]   ;;  %s678_s5 = inlined_call_operand.hbm [shape: f32[1,128], index: 5, kind: input, shape index: {}]   ;;  %s679_s6 = inlined_call_operand.vmem [shape: f32[128,32], index: 6, kind: input, shape index: {}]   ;;  %s680_s7 = inlined_call_operand.hbm [shape: f32[1,32], index: 7, kind: input, shape index: {}]   ;;  %s681_s8 = inlined_call_operand.vmem [shape: f32[32,32], index: 8, kind: output, shape index: {}]  }
   0x1   :  { %14 = vsyncpa [#allocation5], 0  ;;  %s36_s29 = sshll.u32 %s676_s3, 4  ;;  %s37_s29 = int_to_ptr.hbm [resolvable:$true] %s36_s29 }
   0x2   :  { %15 = vsyncpa [#allocation8], 0  ;;  %s481_s30 = smov [#allocation4]   ;;  %s25_s12 = sshll.u32 %s675_s2, 4  ;;  %s26_s12 = int_to_ptr.hbm [resolvable:$true] %s25_s12 }
   0x3   :  { %s38_s9 = sshll.u32 %s481_s30, 4  ;;  %s482_s13 = smov [#allocation2]   ;;  %s39_s9 = int_to_ptr.vmem [resolvable:$true] %s38_s9 }
   0x4   :  { %41 = dma.hbm_to_vmem [thread:$0]  %s37_s29, 16, %s39_s9, [#allocation5]  }
   0x5   :  { %s27_s14 = sshll.u32 %s482_s13, 4  ;;  %s49_s17 = sshll.u32 %s678_s5, 4  ;;  %s28_s14 = int_to_ptr.vmem [resolvable:$true] %s27_s14  ;;  %s50_s17 = int_to_ptr.hbm [resolvable:$true] %s49_s17 }
   0x6   :  { %30 = dma.hbm_to_vmem [thread:$0]  %s26_s12, 16, %s28_s14, [#allocation3]  }
   0x7   :  { %s62_s19 = sshll.u32 %s680_s7, 4  ;;  %s483_s20 = smov [#allocation6]   ;;  %s63_s19 = int_to_ptr.hbm [resolvable:$true] %s62_s19 }
   0x8   :  { %s51_s21 = sshll.u32 %s483_s20, 4  ;;  %s484_s2 = smov [#allocation7]   ;;  %s52_s21 = int_to_ptr.vmem [resolvable:$true] %s51_s21 }
   0x9   :  { %54 = dma.hbm_to_vmem [thread:$0]  %s50_s17, 16, %s52_s21, [#allocation5]  }
   0xa   :  { %s64_s22 = sshll.u32 %s484_s2, 4  ;;  %s65_s22 = int_to_ptr.vmem [resolvable:$true] %s64_s22 }
   0xb   :  { %67 = dma.hbm_to_vmem [thread:$0]  %s63_s19, 16, %s65_s22, [#allocation8]  }
   0xc   :  { %475 = dma.done.wait [#allocation3], 16  }
   0xd   :  { %476 = vsyncadd [#allocation3], 4294967280 }
   0xe   :  { %477 = dma.done.wait [#allocation5], 32  }
   0xf   :  { %478 = vsyncadd [#allocation5], 4294967264 }
  0x10   :  { %479 = dma.done.wait [#allocation8], 16  }
  0x11   :  { %480 = vsyncadd [#allocation8], 4294967280  ;;  %vm89_vm0 = vcmask 261120   ;;  %v87_v0 = vld [vmem:[%s673_s0 + $0x10] sm:$0xff]  ;;  %v85_v1 = vld [vmem:[%s673_s0] sm:$0xff]  ;;  %v485_v8 = vmov 32.0  }
  0x12   :  { %v96_v2 = vsel %vm89_vm0, %v87_v0, 0.0  ;;  %v90_v3 = vsel %vm89_vm0, %v85_v1, 0.0  ;;  %v88_v4 = vld [vmem:[%s673_s0 + $0x18] sm:$0xff]  ;;  %v86_v5 = vld [vmem:[%s673_s0 + $0x8] sm:$0xff]  ;;  %361 = vrcp.f32 %v485_v8  ;;  %v205_v35 = vld [vmem:[%s677_s4 + $0x10] sm:$0xff] }
  0x13   :  { %97 = vadd.xlane.f32.xlu1 %v96_v2  ;;  %91 = vadd.xlane.f32.xlu0 %v90_v3  ;;  %v99_v6 = vsel %vm89_vm0, %v88_v4, 0.0  ;;  %v93_v7 = vsel %vm89_vm0, %v86_v5, 0.0  ;;  %v206_v36 = vld [vmem:[%s677_s4 + $0x18] sm:$0xff]  ;;  %v203_v39 = vld [vmem:[%s677_s4] sm:$0xff]  ;;  %v204_v40 = vld [vmem:[%s677_s4 + $0x8] sm:$0xff] }
  0x14   :  { %v208_v37 = vpack.c.bf16 %v206_v36, %v205_v35  ;;  %v207_v43 = vpack.c.bf16 %v204_v40, %v203_v39  ;;  %v290_v35 = vld [vmem:[%s679_s6 + $0x70] sm:$0xff]  ;;  %v291_v36 = vld [vmem:[%s679_s6 + $0x78] sm:$0xff] }
  0x15   :  { %v286_v39 = vld [vmem:[%s679_s6 + $0x50] sm:$0xff]  ;;  %v287_v40 = vld [vmem:[%s679_s6 + $0x58] sm:$0xff] }
  0x16   :  { %225 = vmatpush.bf16.msra.mxu0 %v208_v37  ;;  %v299_v37 = vpack.c.bf16 %v291_v36, %v290_v35 }
  0x18   :  { %v362_v9 = vpop.eup %361  ;;  %304 = vmatpush.bf16.msra.mxu1 %v299_v37  ;;  %344 = vmatpush.bf16.msra.mxu2 %v299_v37 }
  0x19   :  { %v103_v10 = vmul.f32 32.0, %v362_v9  ;;  %vm107_vm1 = vweird.f32 %v362_v9 }
  0x1a   :  { %226 = vmatpush.bf16.msra.mxu0 %v207_v43  ;;  %v285_v43 = vld [vmem:[%s679_s6 + $0x48] sm:$0xff] }
  0x1b   :  { %100 = vadd.xlane.f32.xlu1 %v99_v6  ;;  %94 = vadd.xlane.f32.xlu0 %v93_v7  ;;  %v104_v11 = vsub.f32 1.0, %v103_v10 }
  0x1d   :  { %v105_v12 = vmul.f32 %v362_v9, %v104_v11 }
  0x1f   :  { %v106_v13 = vadd.f32 %v362_v9, %v105_v12 }
  0x21   :  { %v108_v14 = vsel %vm107_vm1, %v362_v9, %v106_v13  ;;  %v357_v9 = vld [vmem:[#allocation2] ss:$0 sm:$0xff] }
  0x86   :  { %v98_v15 = vpop.xlane.xlu1 %97  ;;  %v92_v16 = vpop.xlane.xlu0 %91 }
  0x87   :  { %v111_v17 = vmul.f32 %v108_v14, %v98_v15  ;;  %v109_v18 = vmul.f32 %v108_v14, %v92_v16  ;;  %v358_v16 = vld [vmem:[#allocation4] ss:$0 sm:$0xff] }
  0x89   :  { %v559_v19 = vsub.f32 %v87_v0, %v111_v17  ;;  %v561_v20 = vsub.f32 %v85_v1, %v109_v18 }
  0x8b   :  { %v119_v21 = vmul.f32 %v559_v19, %v559_v19  ;;  %v117_v22 = vmul.f32 %v561_v20, %v561_v20 }
  0x8d   :  { %v127_v23 = vsel %vm89_vm0, %v119_v21, 0.0  ;;  %v121_v24 = vsel %vm89_vm0, %v117_v22, 0.0 }
  0x8e   :  { %v101_v25 = vpop.xlane.xlu1 %100  ;;  %128 = vadd.xlane.f32.xlu0 %v127_v23  ;;  %122 = vadd.xlane.f32.xlu2 %v121_v24  ;;  %v95_v26 = vpop.xlane.xlu0 %94 }
  0x8f   :  { %v112_v27 = vmul.f32 %v108_v14, %v101_v25  ;;  %v110_v28 = vmul.f32 %v108_v14, %v95_v26 }
  0x91   :  { %v569_v29 = vsub.f32 %v88_v4, %v112_v27  ;;  %v571_v30 = vsub.f32 %v86_v5, %v110_v28 }
  0x93   :  { %v120_v31 = vmul.f32 %v569_v29, %v569_v29  ;;  %v118_v32 = vmul.f32 %v571_v30, %v571_v30 }
  0x95   :  { %v130_v33 = vsel %vm89_vm0, %v120_v31, 0.0  ;;  %v124_v34 = vsel %vm89_vm0, %v118_v32, 0.0 }
  0x96   :  { %131 = vadd.xlane.f32.xlu1 %v130_v33  ;;  %125 = vadd.xlane.f32.xlu2 %v124_v34 }
 0x101   :  { %v123_v38 = vpop.xlane.xlu2 %122  ;;  %v129_v42 = vpop.xlane.xlu0 %128 }
 0x102   :  { %v133_v41 = vmul.f32 %v123_v38, %v108_v14  ;;  %v135_v45 = vmul.f32 %v129_v42, %v108_v14  ;;  %v284_v42 = vld [vmem:[%s679_s6 + $0x40] sm:$0xff] }
 0x104   :  { %v137_v44 = vadd.f32 1e-06, %v133_v41  ;;  %v139_v46 = vadd.f32 1e-06, %v135_v45  ;;  %v297_v41 = vpack.c.bf16 %v287_v40, %v286_v39  ;;  %v282_v45 = vld [vmem:[%s679_s6 + $0x30] sm:$0xff] }
 0x105   :  { %v360_v40 = vld [vmem:[#allocation7] ss:$0 sm:$0xff] }
 0x106   :  { %363 = vrsqrt.f32 %v137_v44  ;;  %vm147_vm3 = vweird.f32 %v137_v44  ;;  %vm167_vm10 = vweird.f32 %v139_v46 }
 0x107   :  { %365 = vrsqrt.f32 %v139_v46 }
 0x109   :  { %v132_v47 = vpop.xlane.xlu1 %131  ;;  %v126_v48 = vpop.xlane.xlu2 %125 }
 0x10a   :  { %v136_v49 = vmul.f32 %v132_v47, %v108_v14  ;;  %v134_v50 = vmul.f32 %v126_v48, %v108_v14  ;;  %v280_v48 = vld [vmem:[%s679_s6 + $0x20] sm:$0xff] }
 0x10c   :  { %v364_v51 = vpop.eup %363  ;;  %v140_v52 = vadd.f32 1e-06, %v136_v49  ;;  %v138_v53 = vadd.f32 1e-06, %v134_v50  ;;  %v281_v49 = vld [vmem:[%s679_s6 + $0x28] sm:$0xff] }
 0x10d   :  { %v142_v54 = vmul.f32 %v364_v51, %v137_v44  ;;  %v366_v57 = vpop.eup %365  ;;  %vm148_vm2 = vweird.f32 %v364_v51  ;;  %v296_v44 = vpack.c.bf16 %v285_v43, %v284_v42  ;;  %v294_v50 = vpack.c.bf16 %v281_v49, %v280_v48  ;;  %v323_v42 = vld [vmem:[%s674_s1] sm:$0xff] }
 0x10e   :  { %367 = vrsqrt.f32 %v140_v52  ;;  %v162_v63 = vmul.f32 %v366_v57, %v139_v46  ;;  %vm149_vm4 = vmor %vm147_vm3, %vm148_vm2  ;;  %vm157_vm6 = vweird.f32 %v138_v53  ;;  %vm177_vm8 = vweird.f32 %v140_v52  ;;  %v283_v46 = vld [vmem:[%s679_s6 + $0x38] sm:$0xff] }
 0x10f   :  { %v143_v55 = vmul.f32 %v364_v51, %v142_v54  ;;  %369 = vrsqrt.f32 %v138_v53  ;;  %vm168_vm11 = vweird.f32 %v366_v57  ;;  %v295_v47 = vpack.c.bf16 %v283_v46, %v282_v45  ;;  %v359_v54 = vld [vmem:[#allocation6] ss:$0 sm:$0xff]  ;;  %v324_v46 = vld [vmem:[%s674_s1 + $0x8] sm:$0xff] }
 0x110   :  { %v163_v4 = vmul.f32 %v366_v57, %v162_v63  ;;  %vm169_vm13 = vmor %vm167_vm10, %vm168_vm11 }
 0x111   :  { %v144_v56 = vmul.f32 0.5, %v143_v55  ;;  %v276_v55 = vld [vmem:[%s679_s6] sm:$0xff] }
 0x112   :  { %v164_v10 = vmul.f32 0.5, %v163_v4 }
 0x113   :  { %v145_v58 = vsub.f32 1.5, %v144_v56  ;;  %v277_v56 = vld [vmem:[%s679_s6 + $0x8] sm:$0xff] }
 0x114   :  { %v368_v59 = vpop.eup %367  ;;  %v165_v17 = vsub.f32 1.5, %v164_v10 }
 0x115   :  { %v370_v60 = vpop.eup %369  ;;  %v172_v61 = vmul.f32 %v368_v59, %v140_v52  ;;  %v146_v62 = vmul.f32 %v364_v51, %v145_v58  ;;  %vm178_vm9 = vweird.f32 %v368_v59  ;;  %v279_v52 = vld [vmem:[%s679_s6 + $0x18] sm:$0xff] }
 0x116   :  { %v152_v0 = vmul.f32 %v370_v60, %v138_v53  ;;  %vm158_vm5 = vweird.f32 %v370_v60  ;;  %vm179_vm12 = vmor %vm177_vm8, %vm178_vm9  ;;  %v166_v23 = vmul.f32 %v366_v57, %v165_v17 }
 0x117   :  { %v173_v1 = vmul.f32 %v368_v59, %v172_v61  ;;  %v150_v3 = vsel %vm149_vm4, %v364_v51, %v146_v62  ;;  %vm159_vm7 = vmor %vm157_vm6, %vm158_vm5  ;;  %v278_v51 = vld [vmem:[%s679_s6 + $0x10] sm:$0xff] }
 0x118   :  { %v153_v2 = vmul.f32 %v370_v60, %v152_v0  ;;  %v181_v8 = vmul.f32 %v150_v3, %v561_v20  ;;  %v170_v26 = vsel %vm169_vm13, %v366_v57, %v166_v23  ;;  %v293_v53 = vpack.c.bf16 %v279_v52, %v278_v51 }
 0x119   :  { %v174_v6 = vmul.f32 0.5, %v173_v1  ;;  %v183_v28 = vmul.f32 %v170_v26, %v559_v19  ;;  %v288_v19 = vld [vmem:[%s679_s6 + $0x60] sm:$0xff]  ;;  %v292_v57 = vpack.c.bf16 %v277_v56, %v276_v55 }
 0x11a   :  { %v154_v5 = vmul.f32 0.5, %v153_v2  ;;  %v189_v15 = vmul.f32 %v357_v9, %v181_v8 }
 0x11b   :  { %v175_v12 = vsub.f32 1.5, %v174_v6  ;;  %v191_v31 = vmul.f32 %v357_v9, %v183_v28 }
 0x11c   :  { %v155_v7 = vsub.f32 1.5, %v154_v5  ;;  %v197_v20 = vadd.f32 %v358_v16, %v189_v15 }
 0x11d   :  { %v176_v21 = vmul.f32 %v368_v59, %v175_v12  ;;  %v199_v33 = vadd.f32 %v358_v16, %v191_v31 }
 0x11e   :  { %v156_v11 = vmul.f32 %v370_v60, %v155_v7 }
 0x11f   :  { %v180_v25 = vsel %vm179_vm12, %v368_v59, %v176_v21 }
 0x120   :  { %v160_v13 = vsel %vm159_vm7, %v370_v60, %v156_v11  ;;  %v184_v27 = vmul.f32 %v180_v25, %v569_v29  ;;  %v289_v29 = vld [vmem:[%s679_s6 + $0x68] sm:$0xff] }
 0x121   :  { %v182_v14 = vmul.f32 %v160_v13, %v571_v30  ;;  %v298_v38 = vpack.c.bf16 %v289_v29, %v288_v19 }
 0x122   :  { %v192_v30 = vmul.f32 %v357_v9, %v184_v27 }
 0x123   :  { %v190_v18 = vmul.f32 %v357_v9, %v182_v14  ;;  %305 = vmatpush.bf16.msra.mxu1 %v298_v38  ;;  %345 = vmatpush.bf16.msra.mxu2 %v298_v38 }
 0x124   :  { %v200_v32 = vadd.f32 %v358_v16, %v192_v30 }
 0x125   :  { %v198_v22 = vadd.f32 %v358_v16, %v190_v18 }
 0x126   :  { %v202_v34 = vpack.c.bf16 %v200_v32, %v199_v33 }
 0x127   :  { %v201_v24 = vpack.c.bf16 %v198_v22, %v197_v20  ;;  %306 = vmatpush.bf16.msra.mxu1 %v297_v41  ;;  %346 = vmatpush.bf16.msra.mxu2 %v297_v41 }
 0x129   :  { %342 = vmatmul.msk.bf16.vlgmr.msra.gmra.mxu0 %vm89_vm0, %v201_v24 }
 0x12b   :  { %307 = vmatpush.bf16.msra.mxu1 %v296_v44  ;;  %347 = vmatpush.bf16.msra.mxu2 %v296_v44 }
 0x12f   :  { %308 = vmatpush.bf16.msra.mxu1 %v295_v47  ;;  %348 = vmatpush.bf16.msra.mxu2 %v295_v47 }
 0x133   :  { %309 = vmatpush.bf16.msra.mxu1 %v294_v50  ;;  %349 = vmatpush.bf16.msra.mxu2 %v294_v50  ;;  %v325_v50 = vld [vmem:[%s674_s1 + $0x10] sm:$0xff] }
 0x137   :  { %310 = vmatpush.bf16.msra.mxu1 %v293_v53  ;;  %350 = vmatpush.bf16.msra.mxu2 %v293_v53 }
 0x139   :  { %343 = vmatmul.msk.bf16.gmra.mxu0 %vm89_vm0, %v202_v34 }
 0x13b   :  { %311 = vmatpush.bf16.msra.mxu1 %v292_v57  ;;  %351 = vmatpush.bf16.msra.mxu2 %v292_v57 }
 0x1a6   :  { %v228_v58 = vpop.f32.mrf.mxu0 }
 0x1a7   :  { %v229_v59 = vadd.f32 %v359_v54, %v228_v58 }
 0x1a9   :  { %v238_v60 = vmul.f32 %v229_v59, %v229_v59 }
 0x1ab   :  { %v242_v61 = vmul.f32 %v238_v60, %v229_v59 }
 0x1ad   :  { %v246_v62 = vmul.f32 0.044715, %v242_v61 }
 0x1ae   :  { %v230_v63 = vpop.f32.mrf.mxu0 }
 0x1af   :  { %v250_v0 = vadd.f32 %v246_v62, %v229_v59  ;;  %v231_v1 = vadd.f32 %v359_v54, %v230_v63 }
 0x1b1   :  { %v239_v2 = vmul.f32 %v231_v1, %v231_v1  ;;  %v254_v3 = vmul.f32 0.7978846, %v250_v0 }
 0x1b3   :  { %v243_v4 = vmul.f32 %v239_v2, %v231_v1  ;;  %371 = vtanh.f32 %v254_v3 }
 0x1b5   :  { %v247_v5 = vmul.f32 0.044715, %v243_v4 }
 0x1b6   :  { %v233_v6 = vpop.f32.mrf.mxu0 }
 0x1b7   :  { %v251_v7 = vadd.f32 %v247_v5, %v231_v1  ;;  %v234_v8 = vadd.f32 %v359_v54, %v233_v6 }
 0x1b9   :  { %v240_v9 = vmul.f32 %v234_v8, %v234_v8  ;;  %v255_v10 = vmul.f32 0.7978846, %v251_v7  ;;  %v372_v11 = vpop.eup %371 }
 0x1ba   :  { %v262_v15 = vadd.f32 1.0, %v372_v11 }
 0x1bb   :  { %v244_v12 = vmul.f32 %v240_v9, %v234_v8  ;;  %373 = vtanh.f32 %v255_v10 }
 0x1bc   :  { %v266_v23 = vmul.f32 0.5, %v262_v15 }
 0x1bd   :  { %v248_v13 = vmul.f32 0.044715, %v244_v12 }
 0x1be   :  { %v235_v14 = vpop.f32.mrf.mxu0  ;;  %v270_v27 = vmul.f32 %v266_v23, %v229_v59 }
 0x1bf   :  { %v252_v16 = vadd.f32 %v248_v13, %v234_v8  ;;  %v236_v17 = vadd.f32 %v359_v54, %v235_v14  ;;  %v326_v54 = vld [vmem:[%s674_s1 + $0x18] sm:$0xff] }
 0x1c1   :  { %v374_v18 = vpop.eup %373  ;;  %v241_v21 = vmul.f32 %v236_v17, %v236_v17  ;;  %v256_v20 = vmul.f32 0.7978846, %v252_v16 }
 0x1c2   :  { %v263_v22 = vadd.f32 1.0, %v374_v18 }
 0x1c3   :  { %v245_v24 = vmul.f32 %v241_v21, %v236_v17  ;;  %375 = vtanh.f32 %v256_v20 }
 0x1c4   :  { %v267_v25 = vmul.f32 0.5, %v263_v22 }
 0x1c5   :  { %v249_v26 = vmul.f32 0.044715, %v245_v24 }
 0x1c6   :  { %v271_v28 = vmul.f32 %v267_v25, %v231_v1 }
 0x1c7   :  { %v253_v30 = vadd.f32 %v249_v26, %v236_v17 }
 0x1c8   :  { %v274_v31 = vpack.c.bf16 %v271_v28, %v270_v27 }
 0x1c9   :  { %v257_v32 = vmul.f32 0.7978846, %v253_v30  ;;  %v376_v33 = vpop.eup %375 }
 0x1ca   :  { %312 = vmatmul.bf16.vlgmr.msra.gmra.mxu1 %v274_v31  ;;  %v264_v34 = vadd.f32 1.0, %v376_v33 }
 0x1cb   :  { %377 = vtanh.f32 %v257_v32 }
 0x1cc   :  { %v268_v37 = vmul.f32 0.5, %v264_v34 }
 0x1ce   :  { %v272_v29 = vmul.f32 %v268_v37, %v234_v8 }
 0x1d1   :  { %v378_v35 = vpop.eup %377 }
 0x1d2   :  { %v265_v36 = vadd.f32 1.0, %v378_v35 }
 0x1d4   :  { %v269_v19 = vmul.f32 0.5, %v265_v36 }
 0x1d6   :  { %v273_v38 = vmul.f32 %v269_v19, %v236_v17 }
 0x1d8   :  { %v275_v39 = vpack.c.bf16 %v273_v38, %v272_v29 }
 0x1da   :  { %317 = vmatmul.bf16.vlgmr.msra.gmra.mxu2 %v275_v39 }
 0x247   :  { %v313_v41 = vpop.f32.mrf.mxu1 }
 0x248   :  { %v314_v43 = vadd.f32 %v360_v40, %v313_v41 }
 0x24a   :  { %v327_v44 = vadd.f32 %v323_v42, %v314_v43 }
 0x24c   :  { %331 = vst.msk [vmem:[%s681_s8] sm:$0xff] %vm89_vm0, %v327_v44 }
 0x24f   :  { %v315_v45 = vpop.f32.mrf.mxu1 }
 0x250   :  { %v316_v47 = vadd.f32 %v360_v40, %v315_v45 }
 0x252   :  { %v328_v48 = vadd.f32 %v324_v46, %v316_v47 }
 0x254   :  { %332 = vst.msk [vmem:[%s681_s8 + $0x8] sm:$0xff] %vm89_vm0, %v328_v48 }
 0x25d   :  { %v318_v49 = vpop.f32.mrf.mxu2 }
 0x25e   :  { %v319_v51 = vadd.f32 %v360_v40, %v318_v49 }
 0x260   :  { %v329_v52 = vadd.f32 %v325_v50, %v319_v51 }
 0x262   :  { %333 = vst.msk [vmem:[%s681_s8 + $0x10] sm:$0xff] %vm89_vm0, %v329_v52 }
 0x265   :  { %v320_v53 = vpop.f32.mrf.mxu2 }
 0x266   :  { %v321_v55 = vadd.f32 %v360_v40, %v320_v53 }
 0x268   :  { %v330_v56 = vadd.f32 %v326_v54, %v321_v55 }
 0x26a   :  { %334 = vst.msk [vmem:[%s681_s8 + $0x18] sm:$0xff] %vm89_vm0, %v330_v56 }
 0x26b   :  { %339 = vsyncpa [#allocation3], 1 }
 0x26c   :  { %340 = vsyncpa [#allocation5], 1 }
 0x26d   :  { %341 = vsyncpa [#allocation8], 1 }

// kernel: rgb_context_decoder_forward.19
= control target key start
LH: loop header
LB: loop body
LE: loop exit
PB: predicated region body
PF: predicated region fallthrough
CT: control target
= control target key end

     0   :  { %vm71_vm0 = vcmask 261120   ;;  %s1333_s1 = inlined_call_operand.vmem [shape: f32[32,768], index: 1, kind: input, shape index: {}]   ;;  %s1334_s0 = inlined_call_operand.vmem [shape: f32[32,32], index: 0, kind: input, shape index: {}]   ;;  %s1335_s2 = inlined_call_operand.vmem [shape: f32[1,768], index: 2, kind: input, shape index: {}]   ;;  %s1336_s3 = inlined_call_operand.vmem [shape: f32[32,768], index: 3, kind: output, shape index: {}]  }
   0x1   :  { %v33_v0 = vld [vmem:[%s1333_s1 + $0x60] sm:$0xff]  ;;  %v39_v1 = vld [vmem:[%s1333_s1 + $0x90] sm:$0xff]  ;;  %v34_v2 = vld [vmem:[%s1333_s1 + $0x68] sm:$0xff] }
   0x2   :  { %v51_v3 = vpack.c.bf16 %v39_v1, %v33_v0  ;;  %v40_v4 = vld [vmem:[%s1333_s1 + $0x98] sm:$0xff]  ;;  %v21_v5 = vld [vmem:[%s1333_s1] sm:$0xff]  ;;  %v27_v6 = vld [vmem:[%s1333_s1 + $0x30] sm:$0xff] }
   0x3   :  { %v52_v7 = vpack.c.bf16 %v40_v4, %v34_v2  ;;  %v22_v8 = vld [vmem:[%s1333_s1 + $0x8] sm:$0xff]  ;;  %v28_v9 = vld [vmem:[%s1333_s1 + $0x38] sm:$0xff]  ;;  %v15_v10 = vld [vmem:[%s1334_s0] sm:$0xff]  ;;  %v45_v11 = vpack.c.bf16 %v27_v6, %v21_v5 }
   0x4   :  { %84 = vmatpush.bf16.msra.mxu0 %v51_v3  ;;  %712 = vmatpush.bf16.msra.mxu2 %v51_v3  ;;  %v16_v12 = vld [vmem:[%s1334_s0 + $0x8] sm:$0xff]  ;;  %v17_v13 = vld [vmem:[%s1334_s0 + $0x10] sm:$0xff]  ;;  %v18_v14 = vld [vmem:[%s1334_s0 + $0x18] sm:$0xff]  ;;  %v46_v15 = vpack.c.bf16 %v28_v9, %v22_v8 }
   0x5   :  { %103 = vmatpush.bf16.msra.mxu1 %v52_v7  ;;  %714 = vmatpush.bf16.msra.mxu3 %v52_v7  ;;  %v35_v16 = vld [vmem:[%s1333_s1 + $0x70] sm:$0xff]  ;;  %v41_v17 = vld [vmem:[%s1333_s1 + $0xa0] sm:$0xff]  ;;  %v36_v18 = vld [vmem:[%s1333_s1 + $0x78] sm:$0xff]  ;;  %v19_v23 = vpack.c.bf16 %v16_v12, %v15_v10  ;;  %v20_v24 = vpack.c.bf16 %v18_v14, %v17_v13 }
   0x6   :  { %v53_v19 = vpack.c.bf16 %v41_v17, %v35_v16  ;;  %v42_v20 = vld [vmem:[%s1333_s1 + $0xa8] sm:$0xff]  ;;  %v37_v21 = vld [vmem:[%s1333_s1 + $0x80] sm:$0xff]  ;;  %v43_v22 = vld [vmem:[%s1333_s1 + $0xb0] sm:$0xff] }
   0x7   :  { %v54_v25 = vpack.c.bf16 %v42_v20, %v36_v18  ;;  %v38_v26 = vld [vmem:[%s1333_s1 + $0x88] sm:$0xff]  ;;  %v44_v27 = vld [vmem:[%s1333_s1 + $0xb8] sm:$0xff]  ;;  %v23_v28 = vld [vmem:[%s1333_s1 + $0x10] sm:$0xff]  ;;  %v55_v32 = vpack.c.bf16 %v43_v22, %v37_v21 }
   0x8   :  { %85 = vmatpush.bf16.msra.mxu0 %v45_v11  ;;  %713 = vmatpush.bf16.msra.mxu2 %v45_v11  ;;  %v29_v29 = vld [vmem:[%s1333_s1 + $0x40] sm:$0xff]  ;;  %v24_v30 = vld [vmem:[%s1333_s1 + $0x18] sm:$0xff]  ;;  %v30_v31 = vld [vmem:[%s1333_s1 + $0x48] sm:$0xff]  ;;  %v56_v33 = vpack.c.bf16 %v44_v27, %v38_v26 }
   0x9   :  { %104 = vmatpush.bf16.msra.mxu1 %v46_v15  ;;  %715 = vmatpush.bf16.msra.mxu3 %v46_v15  ;;  %v25_v34 = vld [vmem:[%s1333_s1 + $0x20] sm:$0xff]  ;;  %v47_v35 = vpack.c.bf16 %v29_v29, %v23_v28  ;;  %v48_v36 = vpack.c.bf16 %v30_v31, %v24_v30  ;;  %v31_v37 = vld [vmem:[%s1333_s1 + $0x50] sm:$0xff]  ;;  %v26_v38 = vld [vmem:[%s1333_s1 + $0x28] sm:$0xff] }
   0xa   :  { %v32_v39 = vld [vmem:[%s1333_s1 + $0x58] sm:$0xff]  ;;  %v49_v40 = vpack.c.bf16 %v31_v37, %v25_v34  ;;  %v57_v42 = vld [vmem:[%s1335_s2] sm:$0x3f] }
   0xb   :  { %676 = vmatmul.msk.bf16.vlgmr.msra.gmra.mxu0 %vm71_vm0, %v19_v23  ;;  %677 = vmatmul.msk.bf16.vlgmr.msra.gmra.mxu2 %vm71_vm0, %v20_v24  ;;  %v50_v41 = vpack.c.bf16 %v32_v39, %v26_v38  ;;  %v59_v43 = vperm.slane %v57_v42, 0  ;;  %v60_v44 = vperm.slane %v57_v42, 1  ;;  %v937_v5 = vperm.slane %v57_v42, 4 }
   0xc   :  { %122 = vmatpush.bf16.msrb.mxu2 %v53_v19  ;;  %678 = vmatmul.msk.bf16.vlgmr.msra.gmra.mxu1 %vm71_vm0, %v19_v23  ;;  %v941_v11 = vperm.slane %v57_v42, 5  ;;  %v950_v21 = vperm.slane %v57_v42, 2  ;;  %v952_v22 = vperm.slane %v57_v42, 3 }
   0xd   :  { %141 = vmatpush.bf16.msrb.mxu3 %v54_v25  ;;  %160 = vmatpush.bf16.msrb.mxu0 %v55_v32 }
   0xe   :  { %679 = vmatmul.msk.bf16.vlgmr.msra.gmra.mxu3 %vm71_vm0, %v20_v24  ;;  %179 = vmatpush.bf16.msrb.mxu1 %v56_v33 }
  0x10   :  { %123 = vmatpush.bf16.msrb.mxu2 %v47_v35 }
  0x11   :  { %142 = vmatpush.bf16.msrb.mxu3 %v48_v36  ;;  %161 = vmatpush.bf16.msrb.mxu0 %v49_v40 }
  0x12   :  { %180 = vmatpush.bf16.msrb.mxu1 %v50_v41 }
  0x1b   :  { %680 = vmatmul.msk.bf16.vlgmr.msrb.gmra.mxu2 %vm71_vm0, %v19_v23  ;;  %684 = vmatmul.msk.bf16.vlgmr.msrb.gmra.mxu0 %vm71_vm0, %v19_v23 }
  0x1c   :  { %686 = vmatmul.msk.bf16.vlgmr.msrb.gmra.mxu1 %vm71_vm0, %v19_v23 }
  0x1e   :  { %682 = vmatmul.msk.bf16.vlgmr.msrb.gmra.mxu3 %vm71_vm0, %v19_v23 }
  0x2b   :  { %681 = vmatmul.msk.bf16.gmra.mxu2 %vm71_vm0, %v20_v24  ;;  %685 = vmatmul.msk.bf16.gmra.mxu0 %vm71_vm0, %v20_v24 }
  0x2c   :  { %687 = vmatmul.msk.bf16.gmra.mxu1 %vm71_vm0, %v20_v24 }
  0x2e   :  { %683 = vmatmul.msk.bf16.gmra.mxu3 %vm71_vm0, %v20_v24 }
  0x88   :  { %v87_v45 = vpop.f32.mrf.mxu0 }
  0x89   :  { %v88_v46 = vadd.f32 %v87_v45, %v59_v43  ;;  %v106_v47 = vpop.f32.mrf.mxu1 }
  0x8a   :  { %v107_v48 = vadd.f32 %v106_v47, %v60_v44 }
  0x8b   :  { %v688_v49 = vmul.f32 -1.442695, %v88_v46 }
  0x8c   :  { %v689_v50 = vmul.f32 -1.442695, %v107_v48 }
  0x8d   :  { %716 = vpow2.f32 %v688_v49 }
  0x8e   :  { %718 = vpow2.f32 %v689_v50  ;;  %v92_v51 = vpop.f32.mrf.mxu2 }
  0x8f   :  { %v93_v52 = vadd.f32 %v92_v51, %v59_v43 }
  0x90   :  { %v89_v55 = vpop.f32.mrf.mxu0 }
  0x91   :  { %v111_v53 = vpop.f32.mrf.mxu3  ;;  %v700_v56 = vmul.f32 -1.442695, %v93_v52  ;;  %v90_v57 = vadd.f32 %v89_v55, %v59_v43  ;;  %v108_v58 = vpop.f32.mrf.mxu1 }
  0x92   :  { %v112_v54 = vadd.f32 %v111_v53, %v60_v44  ;;  %v109_v60 = vadd.f32 %v108_v58, %v60_v44 }
  0x93   :  { %v717_v61 = vpop.eup %716  ;;  %720 = vpow2.f32 %v700_v56  ;;  %v694_v62 = vmul.f32 -1.442695, %v90_v57 }
  0x94   :  { %v701_v59 = vmul.f32 -1.442695, %v112_v54  ;;  %v719_v63 = vpop.eup %718  ;;  %v931_v0 = vadd.f32 1.0, %v717_v61  ;;  %v695_v1 = vmul.f32 -1.442695, %v109_v60 }
  0x95   :  { %v933_v2 = vadd.f32 1.0, %v719_v63 }
  0x96   :  { %722 = vpow2.f32 %v701_v59  ;;  %v94_v3 = vpop.f32.mrf.mxu2  ;;  %v297_v9 = vand.u32 2147483647, %v931_v0  ;;  %v299_v10 = vand.u32 2147483648, %v931_v0  ;;  %vm293_vm1 = vweird.f32 %v931_v0 }
  0x97   :  { %724 = vpow2.f32 %v694_v62  ;;  %v95_v6 = vadd.f32 %v94_v3, %v59_v43  ;;  %v312_v13 = vand.u32 2147483647, %v933_v2  ;;  %v314_v14 = vand.u32 2147483648, %v933_v2 }
  0x98   :  { %726 = vrcp.f32 %v931_v0  ;;  %v163_v7 = vpop.f32.mrf.mxu0  ;;  %vm308_vm2 = vweird.f32 %v933_v2  ;;  %vm958_vm3 = vcmp.eq.f32.partialorder %v297_v9, 8.507059e+37  ;;  %v300_v28 = vor.u32 1.1754944e-38, %v299_v10 }
  0x99   :  { %728 = vrcp.f32 %v933_v2  ;;  %v113_v4 = vpop.f32.mrf.mxu3  ;;  %v721_v8 = vpop.eup %720  ;;  %v164_v19 = vadd.f32 %v163_v7, %v937_v5  ;;  %v706_v24 = vmul.f32 -1.442695, %v95_v6  ;;  %vm964_vm4 = vcmp.eq.f32.partialorder %v312_v13, 8.507059e+37 }
  0x9a   :  { %730 = vpow2.f32 %v695_v1  ;;  %v945_v15 = vadd.f32 1.0, %v721_v8  ;;  %v114_v16 = vadd.f32 %v113_v4, %v60_v44  ;;  %v182_v20 = vpop.f32.mrf.mxu1  ;;  %v315_v32 = vor.u32 1.1754944e-38, %v314_v14 }
  0x9b   :  { %v183_v34 = vadd.f32 %v182_v20, %v941_v11  ;;  %v974_v38 = vmul.f32 -1.442695, %v164_v19 }
  0x9c   :  { %v723_v12 = vpop.eup %722  ;;  %732 = vrcp.f32 %v945_v15  ;;  %v968_v33 = vmul.f32 -1.442695, %v114_v16  ;;  %v477_v36 = vand.u32 2147483647, %v945_v15  ;;  %v479_v40 = vand.u32 2147483648, %v945_v15 }
  0x9d   :  { %v725_v17 = vpop.eup %724  ;;  %v947_v18 = vadd.f32 1.0, %v723_v12  ;;  %vm473_vm6 = vweird.f32 %v945_v15  ;;  %v693_v54 = vmul.f32 -1.442695, %v183_v34 }
  0x9e   :  { %v727_v23 = vpop.eup %726  ;;  %v972_v37 = vadd.f32 1.0, %v725_v17  ;;  %vm985_vm9 = vcmp.eq.f32.partialorder %v477_v36, 8.507059e+37  ;;  %v480_v52 = vor.u32 1.1754944e-38, %v479_v40  ;;  %v125_v4 = vpop.f32.mrf.mxu2 }
  0x9f   :  { %v729_v25 = vpop.eup %728  ;;  %v289_v26 = vmul.f32 %v727_v23, %v931_v0  ;;  %734 = vrcp.f32 %v947_v18  ;;  %vm294_vm5 = vweird.f32 %v727_v23  ;;  %v492_v43 = vand.u32 2147483647, %v947_v18 }
  0xa0   :  { %v731_v29 = vpop.eup %730  ;;  %v304_v30 = vmul.f32 %v729_v25, %v933_v2  ;;  %736 = vpow2.f32 %v706_v24  ;;  %vm309_vm7 = vweird.f32 %v729_v25  ;;  %vm488_vm8 = vweird.f32 %v947_v18  ;;  %vm295_vm10 = vmor %vm293_vm1, %vm294_vm5  ;;  %v165_v27 = vpop.f32.mrf.mxu0 }
  0xa1   :  { %v290_v35 = vsub.f32 1.0, %v289_v26  ;;  %v977_v41 = vadd.f32 1.0, %v731_v29  ;;  %738 = vrcp.f32 %v972_v37  ;;  %v494_v46 = vand.u32 2147483648, %v947_v18  ;;  %vm310_vm11 = vmor %vm308_vm2, %vm309_vm7  ;;  %v144_v8 = vpop.f32.mrf.mxu3 }
  0xa2   :  { %v305_v39 = vsub.f32 1.0, %v304_v30  ;;  %v733_v44 = vpop.eup %732  ;;  %vm997_vm12 = vcmp.eq.f32.partialorder %v492_v43, 8.507059e+37  ;;  %v387_v58 = vand.u32 2147483647, %v972_v37  ;;  %vm383_vm15 = vweird.f32 %v972_v37 }
  0xa3   :  { %v291_v42 = vmul.f32 %v727_v23, %v290_v35  ;;  %v469_v49 = vmul.f32 %v733_v44, %v945_v15  ;;  %740 = vrcp.f32 %v977_v41  ;;  %v495_v63 = vor.u32 1.1754944e-38, %v494_v46 }
  0xa4   :  { %v306_v45 = vmul.f32 %v729_v25, %v305_v39  ;;  %vm474_vm13 = vweird.f32 %v733_v44  ;;  %vm1016_vm0 = vcmp.eq.f32.partialorder %v387_v58, 8.507059e+37  ;;  %v389_v13 = vand.u32 2147483648, %v972_v37 }
  0xa5   :  { %v735_v47 = vpop.eup %734  ;;  %v292_v48 = vadd.f32 %v727_v23, %v291_v42  ;;  %v470_v56 = vsub.f32 1.0, %v469_v49  ;;  %vm475_vm1 = vmor %vm473_vm6, %vm474_vm13  ;;  %v402_v19 = vand.u32 2147483647, %v977_v41  ;;  %v126_v31 = vadd.f32 %v125_v4, %v950_v21  ;;  %v184_v42 = vpop.f32.mrf.mxu1 }
  0xa6   :  { %v307_v51 = vadd.f32 %v729_v25, %v306_v45  ;;  %v484_v53 = vmul.f32 %v735_v47, %v947_v18  ;;  %v737_v59 = vpop.eup %736  ;;  %vm489_vm14 = vweird.f32 %v735_v47  ;;  %vm398_vm6 = vweird.f32 %v977_v41  ;;  %v127_v46 = vpop.f32.mrf.mxu2 }
  0xa7   :  { %v296_v55 = vsel %vm295_vm10, %v727_v23, %v292_v48  ;;  %v739_v0 = vpop.eup %738  ;;  %v471_v2 = vmul.f32 %v733_v44, %v470_v56  ;;  %v1009_v3 = vadd.f32 1.0, %v737_v59  ;;  %vm490_vm2 = vmor %vm488_vm8, %vm489_vm14  ;;  %v404_v23 = vand.u32 2147483648, %v977_v41 }
  0xa8   :  { %v301_v60 = vsel %vm958_vm3, %v300_v28, %v296_v55  ;;  %v311_v61 = vsel %vm310_vm11, %v729_v25, %v307_v51  ;;  %v485_v62 = vsub.f32 1.0, %v484_v53  ;;  %v379_v7 = vmul.f32 %v739_v0, %v972_v37 }
  0xa9   :  { %648 = vst [vmem:[%s1336_s3] sm:$0xff] %v301_v60  ;;  %v316_v1 = vsel %vm964_vm4, %v315_v32, %v311_v61  ;;  %v741_v9 = vpop.eup %740  ;;  %v472_v10 = vadd.f32 %v733_v44, %v471_v2  ;;  %742 = vrcp.f32 %v1009_v3  ;;  %vm384_vm3 = vweird.f32 %v739_v0  ;;  %v146_v51 = vpop.f32.mrf.mxu3 }
  0xaa   :  { %649 = vst [vmem:[%s1336_s3 + $0x8] sm:$0xff] %v316_v1  ;;  %v486_v6 = vmul.f32 %v735_v47, %v485_v62  ;;  %v380_v16 = vsub.f32 1.0, %v379_v7  ;;  %v394_v17 = vmul.f32 %v741_v9, %v977_v41  ;;  %744 = vpow2.f32 %v968_v33  ;;  %vm385_vm5 = vmor %vm383_vm15, %vm384_vm3 }
  0xab   :  { %v476_v20 = vsel %vm475_vm1, %v733_v44, %v472_v10  ;;  %v390_v28 = vor.u32 1.1754944e-38, %v389_v13  ;;  %vm399_vm4 = vweird.f32 %v741_v9  ;;  %746 = vpow2.f32 %v974_v38 }
  0xac   :  { %v487_v14 = vadd.f32 %v735_v47, %v486_v6  ;;  %v481_v15 = vsel %vm985_vm9, %v480_v52, %v476_v20  ;;  %v381_v25 = vmul.f32 %v739_v0, %v380_v16  ;;  %v395_v26 = vsub.f32 1.0, %v394_v17  ;;  %vm400_vm8 = vmor %vm398_vm6, %vm399_vm4 }
  0xad   :  { %660 = vst [vmem:[%s1336_s3 + $0x60] sm:$0xff] %v481_v15  ;;  %748 = vpow2.f32 %v693_v54  ;;  %vm1047_vm7 = vcmp.eq.f32.partialorder %v402_v19, 8.507059e+37  ;;  %v145_v34 = vadd.f32 %v144_v8, %v952_v22  ;;  %v166_v35 = vadd.f32 %v165_v27, %v937_v5 }
  0xae   :  { %v491_v24 = vsel %vm490_vm2, %v735_v47, %v487_v14  ;;  %v382_v29 = vadd.f32 %v739_v0, %v381_v25  ;;  %v396_v30 = vmul.f32 %v741_v9, %v395_v26  ;;  %v405_v39 = vor.u32 1.1754944e-38, %v404_v23 }
  0xaf   :  { %v496_v18 = vsel %vm997_vm12, %v495_v63, %v491_v24  ;;  %v743_v32 = vpop.eup %742  ;;  %v569_v41 = vand.u32 2147483648, %v1009_v3  ;;  %v690_v44 = vmul.f32 -1.442695, %v126_v31  ;;  %v691_v45 = vmul.f32 -1.442695, %v145_v34 }
  0xb0   :  { %661 = vst [vmem:[%s1336_s3 + $0x68] sm:$0xff] %v496_v18  ;;  %v386_v36 = vsel %vm385_vm5, %v739_v0, %v382_v29  ;;  %v397_v38 = vadd.f32 %v741_v9, %v396_v30  ;;  %v559_v40 = vmul.f32 %v743_v32, %v1009_v3  ;;  %v745_v43 = vpop.eup %744  ;;  %v698_v50 = vmul.f32 -1.442695, %v166_v35  ;;  %v168_v18 = vpop.f32.mrf.mxu0 }
  0xb1   :  { %v391_v37 = vsel %vm1016_vm0, %v390_v28, %v386_v36  ;;  %v1061_v49 = vadd.f32 1.0, %v745_v43  ;;  %v747_v52 = vpop.eup %746  ;;  %v567_v54 = vand.u32 2147483647, %v1009_v3  ;;  %750 = vpow2.f32 %v690_v44  ;;  %v149_v30 = vpop.f32.mrf.mxu3 }
  0xb2   :  { %654 = vst [vmem:[%s1336_s3 + $0x30] sm:$0xff] %v391_v37  ;;  %v401_v47 = vsel %vm400_vm8, %v741_v9, %v397_v38  ;;  %v560_v48 = vsub.f32 1.0, %v559_v40  ;;  %v185_v55 = vadd.f32 %v184_v42, %v941_v11  ;;  %vm564_vm9 = vweird.f32 %v743_v32 }
  0xb3   :  { %v406_v53 = vsel %vm1047_vm7, %v405_v39, %v401_v47  ;;  %v749_v56 = vpop.eup %748  ;;  %752 = vrcp.f32 %v1061_v49  ;;  %v128_v58 = vadd.f32 %v127_v46, %v950_v21  ;;  %v1072_v59 = vadd.f32 1.0, %v747_v52 }
  0xb4   :  { %655 = vst [vmem:[%s1336_s3 + $0x38] sm:$0xff] %v406_v53  ;;  %v561_v57 = vmul.f32 %v743_v32, %v560_v48  ;;  %v1074_v60 = vadd.f32 1.0, %v749_v56  ;;  %754 = vpow2.f32 %v691_v45  ;;  %v147_v61 = vadd.f32 %v146_v51, %v952_v22 }
  0xb5   :  { %vm563_vm10 = vweird.f32 %v1009_v3  ;;  %v570_v63 = vor.u32 1.1754944e-38, %v569_v41  ;;  %756 = vpow2.f32 %v698_v50  ;;  %v582_v0 = vand.u32 2147483647, %v1061_v49 }
  0xb6   :  { %v562_v62 = vadd.f32 %v743_v32, %v561_v57  ;;  %vm565_vm11 = vmor %vm563_vm10, %vm564_vm9  ;;  %v584_v1 = vand.u32 2147483648, %v1061_v49  ;;  %758 = vrcp.f32 %v1072_v59  ;;  %v699_v2 = vmul.f32 -1.442695, %v185_v55 }
  0xb7   :  { %vm568_vm12 = vcmp.eq.f32.partialorder %v567_v54, 8.507059e+37  ;;  %760 = vrcp.f32 %v1074_v60  ;;  %v751_v6 = vpop.eup %750  ;;  %v696_v8 = vmul.f32 -1.442695, %v128_v58  ;;  %v1082_v9 = vmul.f32 -1.442695, %v147_v61 }
  0xb8   :  { %v566_v4 = vsel %vm565_vm11, %v743_v32, %v562_v62  ;;  %vm578_vm13 = vweird.f32 %v1061_v49  ;;  %v357_v10 = vand.u32 2147483647, %v1072_v59  ;;  %v359_v12 = vand.u32 2147483648, %v1072_v59  ;;  %v170_v36 = vpop.f32.mrf.mxu0 }
  0xb9   :  { %v571_v7 = vsel %vm568_vm12, %v570_v63, %v566_v4  ;;  %v753_v3 = vpop.eup %752  ;;  %v1090_v13 = vadd.f32 1.0, %v751_v6  ;;  %vm1093_vm14 = vcmp.eq.f32.partialorder %v582_v0, 8.507059e+37  ;;  %v585_v19 = vor.u32 1.1754944e-38, %v584_v1  ;;  %v187_v1 = vpop.f32.mrf.mxu1 }
  0xba   :  { %666 = vst [vmem:[%s1336_s3 + $0x90] sm:$0xff] %v571_v7  ;;  %v755_v14 = vpop.eup %754  ;;  %v574_v16 = vmul.f32 %v753_v3, %v1061_v49  ;;  %vm353_vm15 = vweird.f32 %v1072_v59  ;;  %762 = vpow2.f32 %v699_v2  ;;  %vm368_vm0 = vweird.f32 %v1074_v60 }
  0xbb   :  { %v757_v20 = vpop.eup %756  ;;  %v372_v23 = vand.u32 2147483647, %v1074_v60  ;;  %v374_v15 = vand.u32 2147483648, %v1074_v60  ;;  %764 = vrcp.f32 %v1090_v13  ;;  %v1102_v26 = vadd.f32 1.0, %v755_v14 }
  0xbc   :  { %v759_v24 = vpop.eup %758  ;;  %v575_v25 = vsub.f32 1.0, %v574_v16  ;;  %v1104_v27 = vadd.f32 1.0, %v757_v20  ;;  %766 = vpow2.f32 %v696_v8  ;;  %vm579_vm1 = vweird.f32 %v753_v3 }
  0xbd   :  { %v761_v28 = vpop.eup %760  ;;  %v349_v29 = vmul.f32 %v759_v24, %v1072_v59  ;;  %vm1107_vm2 = vcmp.eq.f32.partialorder %v357_v10, 8.507059e+37  ;;  %v360_v31 = vor.u32 1.1754944e-38, %v359_v12  ;;  %v327_v34 = vand.u32 2147483647, %v1090_v13  ;;  %vm580_vm5 = vmor %vm578_vm13, %vm579_vm1 }
  0xbe   :  { %v576_v32 = vmul.f32 %v753_v3, %v575_v25  ;;  %v364_v33 = vmul.f32 %v761_v28, %v1074_v60  ;;  %768 = vrcp.f32 %v1102_v26  ;;  %vm1114_vm3 = vcmp.eq.f32.partialorder %v372_v23, 8.507059e+37 }
  0xbf   :  { %v350_v35 = vsub.f32 1.0, %v349_v29  ;;  %v375_v38 = vor.u32 1.1754944e-38, %v374_v15  ;;  %v1119_v39 = vadd.f32 %v168_v18, %v937_v5  ;;  %vm323_vm4 = vweird.f32 %v1090_v13 }
  0xc0   :  { %v763_v40 = vpop.eup %762  ;;  %v577_v42 = vadd.f32 %v753_v3, %v576_v32  ;;  %v365_v43 = vsub.f32 1.0, %v364_v33  ;;  %770 = vrcp.f32 %v1104_v27  ;;  %vm354_vm6 = vweird.f32 %v759_v24 }
  0xc1   :  { %v765_v37 = vpop.eup %764  ;;  %v351_v41 = vmul.f32 %v759_v24, %v350_v35  ;;  %vm369_vm7 = vweird.f32 %v761_v28  ;;  %v329_v44 = vand.u32 2147483648, %v1090_v13  ;;  %vm1128_vm8 = vcmp.eq.f32.partialorder %v327_v34, 8.507059e+37  ;;  %vm355_vm9 = vmor %vm353_vm15, %vm354_vm6 }
  0xc2   :  { %v767_v45 = vpop.eup %766  ;;  %v581_v46 = vsel %vm580_vm5, %v753_v3, %v577_v42  ;;  %v366_v47 = vmul.f32 %v761_v28, %v365_v43  ;;  %v319_v48 = vmul.f32 %v765_v37, %v1090_v13  ;;  %v342_v51 = vand.u32 2147483647, %v1102_v26  ;;  %vm370_vm11 = vmor %vm368_vm0, %vm369_vm7  ;;  %v130_v13 = vpop.f32.mrf.mxu2 }
  0xc3   :  { %v586_v49 = vsel %vm1093_vm14, %v585_v19, %v581_v46  ;;  %v352_v52 = vadd.f32 %v759_v24, %v351_v41  ;;  %v344_v53 = vand.u32 2147483648, %v1102_v26  ;;  %v447_v54 = vand.u32 2147483647, %v1104_v27 }
  0xc4   :  { %v769_v55 = vpop.eup %768  ;;  %667 = vst [vmem:[%s1336_s3 + $0x98] sm:$0xff] %v586_v49  ;;  %v367_v56 = vadd.f32 %v761_v28, %v366_v47  ;;  %v320_v57 = vsub.f32 1.0, %v319_v48  ;;  %vm324_vm10 = vweird.f32 %v765_v37  ;;  %v1143_v58 = vadd.f32 1.0, %v763_v40 }
  0xc5   :  { %v356_v61 = vsel %vm355_vm9, %v759_v24, %v352_v52  ;;  %v334_v62 = vmul.f32 %v769_v55, %v1102_v26  ;;  %v449_v63 = vand.u32 2147483648, %v1104_v27  ;;  %v1150_v0 = vadd.f32 1.0, %v767_v45  ;;  %vm325_vm15 = vmor %vm323_vm4, %vm324_vm10 }
  0xc6   :  { %v771_v2 = vpop.eup %770  ;;  %v361_v59 = vsel %vm1107_vm2, %v360_v31, %v356_v61  ;;  %v371_v4 = vsel %vm370_vm11, %v761_v28, %v367_v56  ;;  %v321_v6 = vmul.f32 %v765_v37, %v320_v57  ;;  %772 = vrcp.f32 %v1143_v58 }
  0xc7   :  { %652 = vst [vmem:[%s1336_s3 + $0x20] sm:$0xff] %v361_v59  ;;  %v376_v60 = vsel %vm1114_vm3, %v375_v38, %v371_v4  ;;  %v330_v7 = vor.u32 1.1754944e-38, %v329_v44  ;;  %v335_v8 = vsub.f32 1.0, %v334_v62  ;;  %v439_v3 = vmul.f32 %v771_v2, %v1104_v27  ;;  %v151_v59 = vpop.f32.mrf.mxu3 }
  0xc8   :  { %653 = vst [vmem:[%s1336_s3 + $0x28] sm:$0xff] %v376_v60  ;;  %v322_v10 = vadd.f32 %v765_v37, %v321_v6  ;;  %vm338_vm12 = vweird.f32 %v1102_v26  ;;  %vm1165_vm13 = vcmp.eq.f32.partialorder %v342_v51, 8.507059e+37  ;;  %vm443_vm14 = vweird.f32 %v1104_v27 }
  0xc9   :  { %v336_v14 = vmul.f32 %v769_v55, %v335_v8  ;;  %vm339_vm0 = vweird.f32 %v769_v55  ;;  %v440_v16 = vsub.f32 1.0, %v439_v3  ;;  %774 = vrcp.f32 %v1150_v0 }
  0xca   :  { %v326_v17 = vsel %vm325_vm15, %v765_v37, %v322_v10  ;;  %v345_v19 = vor.u32 1.1754944e-38, %v344_v53  ;;  %vm1174_vm1 = vcmp.eq.f32.partialorder %v447_v54, 8.507059e+37  ;;  %v450_v23 = vor.u32 1.1754944e-38, %v449_v63  ;;  %vm340_vm3 = vmor %vm338_vm12, %vm339_vm0  ;;  %v189_v37 = vpop.f32.mrf.mxu1 }
  0xcb   :  { %v331_v15 = vsel %vm1128_vm8, %v330_v7, %v326_v17  ;;  %v337_v24 = vadd.f32 %v769_v55, %v336_v14  ;;  %v441_v25 = vmul.f32 %v771_v2, %v440_v16  ;;  %vm444_vm2 = vweird.f32 %v771_v2 }
  0xcc   :  { %v773_v18 = vpop.eup %772  ;;  %650 = vst [vmem:[%s1336_s3 + $0x10] sm:$0xff] %v331_v15  ;;  %vm458_vm4 = vweird.f32 %v1143_v58  ;;  %776 = vpow2.f32 %v1082_v9  ;;  %v704_v28 = vmul.f32 -1.442695, %v1119_v39  ;;  %v188_v29 = vadd.f32 %v187_v1, %v941_v11  ;;  %vm445_vm5 = vmor %vm443_vm14, %vm444_vm2 }
  0xcd   :  { %v341_v31 = vsel %vm340_vm3, %v769_v55, %v337_v24  ;;  %v442_v32 = vadd.f32 %v771_v2, %v441_v25  ;;  %v454_v33 = vmul.f32 %v773_v18, %v1143_v58  ;;  %v462_v34 = vand.u32 2147483647, %v1143_v58 }
  0xce   :  { %v346_v35 = vsel %vm1165_vm13, %v345_v19, %v341_v31  ;;  %v464_v9 = vand.u32 2147483648, %v1143_v58  ;;  %778 = vpow2.f32 %v704_v28  ;;  %v705_v26 = vmul.f32 -1.442695, %v188_v29 }
  0xcf   :  { %v775_v38 = vpop.eup %774  ;;  %651 = vst [vmem:[%s1336_s3 + $0x18] sm:$0xff] %v346_v35  ;;  %v446_v39 = vsel %vm445_vm5, %v771_v2, %v442_v32  ;;  %v455_v40 = vsub.f32 1.0, %v454_v33  ;;  %v131_v42 = vadd.f32 %v130_v13, %v950_v21  ;;  %v150_v43 = vadd.f32 %v149_v30, %v952_v22 }
  0xd0   :  { %v451_v27 = vsel %vm1174_vm1, %v450_v23, %v446_v39  ;;  %vm459_vm6 = vweird.f32 %v773_v18  ;;  %v409_v41 = vmul.f32 %v775_v38, %v1150_v0  ;;  %780 = vpow2.f32 %v705_v26 }
  0xd1   :  { %658 = vst [vmem:[%s1336_s3 + $0x50] sm:$0xff] %v451_v27  ;;  %v456_v44 = vmul.f32 %v773_v18, %v455_v40  ;;  %v702_v45 = vmul.f32 -1.442695, %v131_v42  ;;  %v703_v46 = vmul.f32 -1.442695, %v150_v43  ;;  %v171_v47 = vadd.f32 %v170_v36, %v937_v5  ;;  %vm460_vm7 = vmor %vm458_vm4, %vm459_vm6 }
  0xd2   :  { %v777_v48 = vpop.eup %776  ;;  %v465_v50 = vor.u32 1.1754944e-38, %v464_v9  ;;  %v410_v51 = vsub.f32 1.0, %v409_v41  ;;  %v419_v49 = vand.u32 2147483648, %v1150_v0  ;;  %v190_v52 = vadd.f32 %v189_v37, %v941_v11  ;;  %v132_v11 = vpop.f32.mrf.mxu2 }
  0xd3   :  { %v457_v53 = vadd.f32 %v773_v18, %v456_v44  ;;  %v1211_v54 = vadd.f32 1.0, %v777_v48  ;;  %782 = vpow2.f32 %v702_v45  ;;  %v710_v55 = vmul.f32 -1.442695, %v171_v47 }
  0xd4   :  { %v779_v56 = vpop.eup %778  ;;  %v411_v57 = vmul.f32 %v775_v38, %v410_v51  ;;  %vm414_vm8 = vweird.f32 %v775_v38  ;;  %v417_v5 = vand.u32 2147483647, %v1150_v0  ;;  %784 = vpow2.f32 %v703_v46 }
  0xd5   :  { %v461_v61 = vsel %vm460_vm7, %v773_v18, %v457_v53  ;;  %vm463_vm9 = vcmp.eq.f32.partialorder %v462_v34, 8.507059e+37  ;;  %786 = vrcp.f32 %v1211_v54  ;;  %vm413_vm10 = vweird.f32 %v1150_v0 }
  0xd6   :  { %v781_v62 = vpop.eup %780  ;;  %v466_v63 = vsel %vm463_vm9, %v465_v50, %v461_v61  ;;  %v412_v1 = vadd.f32 %v775_v38, %v411_v57  ;;  %v1219_v2 = vadd.f32 1.0, %v779_v56  ;;  %vm415_vm11 = vmor %vm413_vm10, %vm414_vm8  ;;  %v420_v58 = vor.u32 1.1754944e-38, %v419_v49 }
  0xd7   :  { %659 = vst [vmem:[%s1336_s3 + $0x58] sm:$0xff] %v466_v63  ;;  %v1224_v4 = vadd.f32 1.0, %v781_v62  ;;  %788 = vpow2.f32 %v710_v55  ;;  %v711_v6 = vmul.f32 -1.442695, %v190_v52  ;;  %vm418_vm12 = vcmp.eq.f32.partialorder %v417_v5, 8.507059e+37 }
  0xd8   :  { %v416_v60 = vsel %vm415_vm11, %v775_v38, %v412_v1  ;;  %790 = vrcp.f32 %v1219_v2  ;;  %v133_v7 = vadd.f32 %v132_v11, %v950_v21  ;;  %v432_v3 = vand.u32 2147483647, %v1211_v54 }
  0xd9   :  { %v783_v0 = vpop.eup %782  ;;  %v421_v8 = vsel %vm418_vm12, %v420_v58, %v416_v60  ;;  %792 = vrcp.f32 %v1224_v4  ;;  %v152_v10 = vadd.f32 %v151_v59, %v952_v22  ;;  %v434_v14 = vand.u32 2147483648, %v1211_v54 }
  0xda   :  { %v785_v12 = vpop.eup %784  ;;  %656 = vst [vmem:[%s1336_s3 + $0x40] sm:$0xff] %v421_v8  ;;  %v1235_v16 = vadd.f32 1.0, %v783_v0  ;;  %v537_v21 = vand.u32 2147483647, %v1219_v2  ;;  %v539_v19 = vand.u32 2147483648, %v1219_v2  ;;  %794 = vpow2.f32 %v711_v6 }
  0xdb   :  { %v787_v17 = vpop.eup %786  ;;  %v1239_v20 = vadd.f32 1.0, %v785_v12  ;;  %vm428_vm13 = vweird.f32 %v1211_v54  ;;  %v552_v22 = vand.u32 2147483647, %v1224_v4  ;;  %v708_v15 = vmul.f32 -1.442695, %v133_v7 }
  0xdc   :  { %v424_v23 = vmul.f32 %v787_v17, %v1211_v54  ;;  %vm1244_vm14 = vcmp.eq.f32.partialorder %v432_v3, 8.507059e+37  ;;  %v554_v13 = vand.u32 2147483648, %v1224_v4  ;;  %796 = vrcp.f32 %v1235_v16 }
  0xdd   :  { %v789_v24 = vpop.eup %788  ;;  %v709_v18 = vmul.f32 -1.442695, %v152_v10  ;;  %v435_v30 = vor.u32 1.1754944e-38, %v434_v14  ;;  %vm533_vm15 = vweird.f32 %v1219_v2  ;;  %798 = vrcp.f32 %v1239_v20 }
  0xde   :  { %v791_v28 = vpop.eup %790  ;;  %v425_v29 = vsub.f32 1.0, %v424_v23  ;;  %vm1253_vm0 = vcmp.eq.f32.partialorder %v537_v21, 8.507059e+37  ;;  %v540_v34 = vor.u32 1.1754944e-38, %v539_v19  ;;  %vm548_vm1 = vweird.f32 %v1224_v4 }
  0xdf   :  { %v793_v31 = vpop.eup %792  ;;  %v529_v32 = vmul.f32 %v791_v28, %v1219_v2  ;;  %vm429_vm2 = vweird.f32 %v787_v17  ;;  %vm1259_vm3 = vcmp.eq.f32.partialorder %v552_v22, 8.507059e+37  ;;  %v555_v39 = vor.u32 1.1754944e-38, %v554_v13 }
  0xe0   :  { %v426_v35 = vmul.f32 %v787_v17, %v425_v29  ;;  %v544_v9 = vmul.f32 %v793_v31, %v1224_v4  ;;  %v795_v36 = vpop.eup %794  ;;  %v1263_v40 = vadd.f32 1.0, %v789_v24  ;;  %800 = vpow2.f32 %v708_v15  ;;  %vm430_vm5 = vmor %vm428_vm13, %vm429_vm2 }
  0xe1   :  { %v530_v38 = vsub.f32 1.0, %v529_v32  ;;  %vm503_vm4 = vweird.f32 %v1235_v16  ;;  %802 = vpow2.f32 %v709_v18  ;;  %vm534_vm6 = vweird.f32 %v791_v28 }
  0xe2   :  { %v427_v42 = vadd.f32 %v787_v17, %v426_v35  ;;  %v545_v43 = vsub.f32 1.0, %v544_v9  ;;  %v797_v37 = vpop.eup %796  ;;  %804 = vrcp.f32 %v1263_v40  ;;  %v1269_v41 = vadd.f32 1.0, %v795_v36  ;;  %vm535_vm8 = vmor %vm533_vm15, %vm534_vm6 }
  0xe3   :  { %v531_v27 = vmul.f32 %v791_v28, %v530_v38  ;;  %v799_v44 = vpop.eup %798  ;;  %vm549_vm7 = vweird.f32 %v793_v31  ;;  %v499_v47 = vmul.f32 %v797_v37, %v1235_v16  ;;  %v507_v51 = vand.u32 2147483647, %v1235_v16 }
  0xe4   :  { %v431_v45 = vsel %vm430_vm5, %v787_v17, %v427_v42  ;;  %v546_v46 = vmul.f32 %v793_v31, %v545_v43  ;;  %v514_v49 = vmul.f32 %v799_v44, %v1239_v20  ;;  %v509_v54 = vand.u32 2147483648, %v1235_v16  ;;  %vm550_vm9 = vmor %vm548_vm1, %vm549_vm7 }
  0xe5   :  { %v436_v48 = vsel %vm1244_vm14, %v435_v30, %v431_v45  ;;  %v532_v50 = vadd.f32 %v791_v28, %v531_v27  ;;  %v500_v53 = vsub.f32 1.0, %v499_v47  ;;  %v522_v55 = vand.u32 2147483647, %v1239_v20 }
  0xe6   :  { %657 = vst [vmem:[%s1336_s3 + $0x48] sm:$0xff] %v436_v48  ;;  %v547_v52 = vadd.f32 %v793_v31, %v546_v46  ;;  %v801_v56 = vpop.eup %800  ;;  %v515_v5 = vsub.f32 1.0, %v514_v49  ;;  %v524_v61 = vand.u32 2147483648, %v1239_v20  ;;  %806 = vrcp.f32 %v1269_v41 }
  0xe7   :  { %v536_v57 = vsel %vm535_vm8, %v791_v28, %v532_v50  ;;  %v803_v11 = vpop.eup %802  ;;  %v501_v1 = vmul.f32 %v797_v37, %v500_v53  ;;  %vm504_vm10 = vweird.f32 %v797_v37  ;;  %vm518_vm11 = vweird.f32 %v1239_v20 }
  0xe8   :  { %v541_v62 = vsel %vm1253_vm0, %v540_v34, %v536_v57  ;;  %v551_v63 = vsel %vm550_vm9, %v793_v31, %v547_v52  ;;  %v805_v2 = vpop.eup %804  ;;  %v516_v58 = vmul.f32 %v799_v44, %v515_v5  ;;  %vm519_vm12 = vweird.f32 %v799_v44  ;;  %vm505_vm14 = vmor %vm503_vm4, %vm504_vm10 }
  0xe9   :  { %664 = vst [vmem:[%s1336_s3 + $0x80] sm:$0xff] %v541_v62  ;;  %v556_v59 = vsel %vm1259_vm3, %v555_v39, %v551_v63  ;;  %v502_v4 = vadd.f32 %v797_v37, %v501_v1  ;;  %vm508_vm13 = vcmp.eq.f32.partialorder %v507_v51, 8.507059e+37  ;;  %v510_v6 = vor.u32 1.1754944e-38, %v509_v54  ;;  %vm520_vm0 = vmor %vm518_vm11, %vm519_vm12 }
  0xea   :  { %665 = vst [vmem:[%s1336_s3 + $0x88] sm:$0xff] %v556_v59  ;;  %v619_v60 = vmul.f32 %v805_v2, %v1263_v40  ;;  %v517_v7 = vadd.f32 %v799_v44, %v516_v58  ;;  %vm523_vm15 = vcmp.eq.f32.partialorder %v522_v55, 8.507059e+37  ;;  %v284_v0 = vadd.f32 1.0, %v801_v56 }
  0xeb   :  { %v1301_v8 = vadd.f32 1.0, %v803_v11  ;;  %v506_v3 = vsel %vm505_vm14, %v797_v37, %v502_v4  ;;  %v525_v10 = vor.u32 1.1754944e-38, %v524_v61  ;;  %v627_v14 = vand.u32 2147483647, %v1263_v40 }
  0xec   :  { %v620_v12 = vsub.f32 1.0, %v619_v60  ;;  %v807_v17 = vpop.eup %806  ;;  %v511_v21 = vsel %vm508_vm13, %v510_v6, %v506_v3  ;;  %v521_v19 = vsel %vm520_vm0, %v799_v44, %v517_v7  ;;  %v629_v20 = vand.u32 2147483648, %v1263_v40 }
  0xed   :  { %808 = vrcp.f32 %v284_v0  ;;  %662 = vst [vmem:[%s1336_s3 + $0x70] sm:$0xff] %v511_v21  ;;  %v526_v16 = vsel %vm523_vm15, %v525_v10, %v521_v19  ;;  %vm624_vm1 = vweird.f32 %v805_v2  ;;  %v634_v22 = vmul.f32 %v807_v17, %v1269_v41 }
  0xee   :  { %v621_v23 = vmul.f32 %v805_v2, %v620_v12  ;;  %663 = vst [vmem:[%s1336_s3 + $0x78] sm:$0xff] %v526_v16  ;;  %810 = vrcp.f32 %v1301_v8  ;;  %vm623_vm2 = vweird.f32 %v1263_v40  ;;  %vm628_vm4 = vcmp.eq.f32.partialorder %v627_v14, 8.507059e+37 }
  0xef   :  { %v635_v24 = vsub.f32 1.0, %v634_v22  ;;  %vm625_vm3 = vmor %vm623_vm2, %vm624_vm1  ;;  %v630_v25 = vor.u32 1.1754944e-38, %v629_v20  ;;  %v644_v13 = vand.u32 2147483648, %v1269_v41  ;;  %vm639_vm5 = vweird.f32 %v807_v17 }
  0xf0   :  { %v622_v15 = vadd.f32 %v805_v2, %v621_v23  ;;  %v642_v29 = vand.u32 2147483647, %v1269_v41  ;;  %vm638_vm6 = vweird.f32 %v1269_v41  ;;  %v599_v39 = vand.u32 2147483648, %v284_v0 }
  0xf1   :  { %v636_v28 = vmul.f32 %v807_v17, %v635_v24  ;;  %vm640_vm7 = vmor %vm638_vm6, %vm639_vm5  ;;  %v645_v35 = vor.u32 1.1754944e-38, %v644_v13  ;;  %v597_v42 = vand.u32 2147483647, %v284_v0  ;;  %vm593_vm10 = vweird.f32 %v284_v0 }
  0xf2   :  { %v626_v18 = vsel %vm625_vm3, %v805_v2, %v622_v15  ;;  %vm643_vm8 = vcmp.eq.f32.partialorder %v642_v29, 8.507059e+37  ;;  %v614_v37 = vand.u32 2147483648, %v1301_v8  ;;  %v612_v44 = vand.u32 2147483647, %v1301_v8 }
  0xf3   :  { %v809_v30 = vpop.eup %808  ;;  %v631_v31 = vsel %vm628_vm4, %v630_v25, %v626_v18  ;;  %v637_v32 = vadd.f32 %v807_v17, %v636_v28  ;;  %v600_v45 = vor.u32 1.1754944e-38, %v599_v39  ;;  %vm598_vm13 = vcmp.eq.f32.partialorder %v597_v42, 8.507059e+37 }
  0xf4   :  { %670 = vst [vmem:[%s1336_s3 + $0xb0] sm:$0xff] %v631_v31  ;;  %v589_v33 = vmul.f32 %v809_v30, %v284_v0  ;;  %v811_v34 = vpop.eup %810  ;;  %vm594_vm9 = vweird.f32 %v809_v30  ;;  %vm608_vm14 = vweird.f32 %v1301_v8  ;;  %v615_v50 = vor.u32 1.1754944e-38, %v614_v37 }
  0xf5   :  { %v641_v9 = vsel %vm640_vm7, %v807_v17, %v637_v32  ;;  %v604_v36 = vmul.f32 %v811_v34, %v1301_v8  ;;  %vm609_vm11 = vweird.f32 %v811_v34  ;;  %vm595_vm12 = vmor %vm593_vm10, %vm594_vm9  ;;  %vm613_vm0 = vcmp.eq.f32.partialorder %v612_v44, 8.507059e+37 }
  0xf6   :  { %v590_v26 = vsub.f32 1.0, %v589_v33  ;;  %v646_v38 = vsel %vm643_vm8, %v645_v35, %v641_v9  ;;  %vm610_vm15 = vmor %vm608_vm14, %vm609_vm11 }
  0xf7   :  { %671 = vst [vmem:[%s1336_s3 + $0xb8] sm:$0xff] %v646_v38  ;;  %v605_v43 = vsub.f32 1.0, %v604_v36 }
  0xf8   :  { %v591_v40 = vmul.f32 %v809_v30, %v590_v26 }
  0xf9   :  { %v606_v41 = vmul.f32 %v811_v34, %v605_v43 }
  0xfa   :  { %v592_v27 = vadd.f32 %v809_v30, %v591_v40 }
  0xfb   :  { %v607_v47 = vadd.f32 %v811_v34, %v606_v41 }
  0xfc   :  { %v596_v46 = vsel %vm595_vm12, %v809_v30, %v592_v27 }
  0xfd   :  { %v601_v48 = vsel %vm598_vm13, %v600_v45, %v596_v46  ;;  %v611_v51 = vsel %vm610_vm15, %v811_v34, %v607_v47 }
  0xfe   :  { %668 = vst [vmem:[%s1336_s3 + $0xa0] sm:$0xff] %v601_v48  ;;  %v616_v49 = vsel %vm613_vm0, %v615_v50, %v611_v51 }
  0xff   :  { %669 = vst [vmem:[%s1336_s3 + $0xa8] sm:$0xff] %v616_v49 }

// kernel: rgb_context_decoder_forward.18
= control target key start
LH: loop header
LB: loop body
LE: loop exit
PB: predicated region body
PF: predicated region fallthrough
CT: control target
= control target key end

     0   :  { %13 = vsyncpa [#allocation3], 0  ;;  %s630_s0 = inlined_call_operand.vmem [shape: f32[32,32], index: 0, kind: input, shape index: {}]   ;;  %s631_s1 = inlined_call_operand.vmem [shape: f32[32,32], index: 1, kind: input, shape index: {}]   ;;  %s632_s2 = inlined_call_operand.vmem [shape: f32[1,32], index: 2, kind: input, shape index: {}]   ;;  %s633_s3 = inlined_call_operand.hbm [shape: f32[1,32], index: 3, kind: input, shape index: {}]   ;;  %s634_s4 = inlined_call_operand.vmem [shape: f32[32,128], index: 4, kind: input, shape index: {}]   ;;  %s635_s5 = inlined_call_operand.hbm [shape: f32[1,128], index: 5, kind: input, shape index: {}]   ;;  %s636_s6 = inlined_call_operand.vmem [shape: f32[128,32], index: 6, kind: input, shape index: {}]   ;;  %s637_s7 = inlined_call_operand.hbm [shape: f32[1,32], index: 7, kind: input, shape index: {}]   ;;  %s638_s8 = inlined_call_operand.vmem [shape: f32[32,32], index: 8, kind: output, shape index: {}]  }
   0x1   :  { %14 = vsyncpa [#allocation5], 0  ;;  %s39_s29 = sshll.u32 %s635_s5, 4  ;;  %s439_s30 = smov [#allocation4]   ;;  %s40_s29 = int_to_ptr.hbm [resolvable:$true] %s39_s29 }
   0x2   :  { %s41_s9 = sshll.u32 %s439_s30, 4  ;;  %s26_s12 = sshll.u32 %s633_s3, 4  ;;  %s42_s9 = int_to_ptr.vmem [resolvable:$true] %s41_s9  ;;  %s27_s12 = int_to_ptr.hbm [resolvable:$true] %s26_s12 }
   0x3   :  { %44 = dma.hbm_to_vmem [thread:$0]  %s40_s29, 16, %s42_s9, [#allocation5]  }
   0x4   :  { %s440_s13 = smov [#allocation2]   ;;  %s52_s17 = sshll.u32 %s637_s7, 4  ;;  %s53_s17 = int_to_ptr.hbm [resolvable:$true] %s52_s17 }
   0x5   :  { %s28_s14 = sshll.u32 %s440_s13, 4  ;;  %s441_s5 = smov [#allocation6]   ;;  %s29_s14 = int_to_ptr.vmem [resolvable:$true] %s28_s14 }
   0x6   :  { %31 = dma.hbm_to_vmem [thread:$0]  %s27_s12, 16, %s29_s14, [#allocation3]  }
   0x7   :  { %s54_s18 = sshll.u32 %s441_s5, 4  ;;  %s55_s18 = int_to_ptr.vmem [resolvable:$true] %s54_s18 }
   0x8   :  { %57 = dma.hbm_to_vmem [thread:$0]  %s53_s17, 16, %s55_s18, [#allocation5]  }
   0x9   :  { %435 = dma.done.wait [#allocation3], 16  }
   0xa   :  { %436 = vsyncadd [#allocation3], 4294967280 }
   0xb   :  { %437 = dma.done.wait [#allocation5], 32  }
   0xc   :  { %438 = vsyncadd [#allocation5], 4294967264  ;;  %vm75_vm0 = vcmask 261120   ;;  %v73_v0 = vld [vmem:[%s630_s0 + $0x10] sm:$0xff]  ;;  %v71_v1 = vld [vmem:[%s630_s0] sm:$0xff]  ;;  %v442_v8 = vmov 32.0  }
   0xd   :  { %v82_v2 = vsel %vm75_vm0, %v73_v0, 0.0  ;;  %v76_v3 = vsel %vm75_vm0, %v71_v1, 0.0  ;;  %v74_v4 = vld [vmem:[%s630_s0 + $0x18] sm:$0xff]  ;;  %v72_v5 = vld [vmem:[%s630_s0 + $0x8] sm:$0xff]  ;;  %345 = vrcp.f32 %v442_v8  ;;  %v191_v35 = vld [vmem:[%s634_s4 + $0x10] sm:$0xff] }
   0xe   :  { %83 = vadd.xlane.f32.xlu1 %v82_v2  ;;  %77 = vadd.xlane.f32.xlu0 %v76_v3  ;;  %v85_v6 = vsel %vm75_vm0, %v74_v4, 0.0  ;;  %v79_v7 = vsel %vm75_vm0, %v72_v5, 0.0  ;;  %v192_v36 = vld [vmem:[%s634_s4 + $0x18] sm:$0xff]  ;;  %v189_v39 = vld [vmem:[%s634_s4] sm:$0xff]  ;;  %v190_v40 = vld [vmem:[%s634_s4 + $0x8] sm:$0xff] }
   0xf   :  { %v194_v37 = vpack.c.bf16 %v192_v36, %v191_v35  ;;  %v193_v43 = vpack.c.bf16 %v190_v40, %v189_v39  ;;  %v276_v35 = vld [vmem:[%s636_s6 + $0x70] sm:$0xff]  ;;  %v277_v36 = vld [vmem:[%s636_s6 + $0x78] sm:$0xff] }
  0x10   :  { %v272_v39 = vld [vmem:[%s636_s6 + $0x50] sm:$0xff]  ;;  %v273_v40 = vld [vmem:[%s636_s6 + $0x58] sm:$0xff] }
  0x11   :  { %211 = vmatpush.bf16.msra.mxu0 %v194_v37  ;;  %v285_v37 = vpack.c.bf16 %v277_v36, %v276_v35 }
  0x13   :  { %v346_v9 = vpop.eup %345  ;;  %290 = vmatpush.bf16.msra.mxu1 %v285_v37  ;;  %329 = vmatpush.bf16.msra.mxu2 %v285_v37 }
  0x14   :  { %v89_v10 = vmul.f32 32.0, %v346_v9  ;;  %vm93_vm1 = vweird.f32 %v346_v9 }
  0x15   :  { %212 = vmatpush.bf16.msra.mxu0 %v193_v43  ;;  %v271_v43 = vld [vmem:[%s636_s6 + $0x48] sm:$0xff] }
  0x16   :  { %86 = vadd.xlane.f32.xlu1 %v85_v6  ;;  %80 = vadd.xlane.f32.xlu0 %v79_v7  ;;  %v90_v11 = vsub.f32 1.0, %v89_v10 }
  0x18   :  { %v91_v12 = vmul.f32 %v346_v9, %v90_v11 }
  0x1a   :  { %v92_v13 = vadd.f32 %v346_v9, %v91_v12 }
  0x1c   :  { %v94_v14 = vsel %vm93_vm1, %v346_v9, %v92_v13  ;;  %v341_v9 = vld [vmem:[%s632_s2] ss:$0 sm:$0xff] }
  0x81   :  { %v84_v15 = vpop.xlane.xlu1 %83  ;;  %v78_v16 = vpop.xlane.xlu0 %77 }
  0x82   :  { %v97_v17 = vmul.f32 %v94_v14, %v84_v15  ;;  %v95_v18 = vmul.f32 %v94_v14, %v78_v16  ;;  %v342_v16 = vld [vmem:[#allocation2] ss:$0 sm:$0xff] }
  0x84   :  { %v513_v19 = vsub.f32 %v73_v0, %v97_v17  ;;  %v515_v20 = vsub.f32 %v71_v1, %v95_v18 }
  0x86   :  { %v105_v21 = vmul.f32 %v513_v19, %v513_v19  ;;  %v103_v22 = vmul.f32 %v515_v20, %v515_v20 }
  0x88   :  { %v113_v23 = vsel %vm75_vm0, %v105_v21, 0.0  ;;  %v107_v24 = vsel %vm75_vm0, %v103_v22, 0.0 }
  0x89   :  { %v87_v25 = vpop.xlane.xlu1 %86  ;;  %114 = vadd.xlane.f32.xlu0 %v113_v23  ;;  %108 = vadd.xlane.f32.xlu2 %v107_v24  ;;  %v81_v26 = vpop.xlane.xlu0 %80 }
  0x8a   :  { %v98_v27 = vmul.f32 %v94_v14, %v87_v25  ;;  %v96_v28 = vmul.f32 %v94_v14, %v81_v26 }
  0x8c   :  { %v523_v29 = vsub.f32 %v74_v4, %v98_v27  ;;  %v525_v30 = vsub.f32 %v72_v5, %v96_v28 }
  0x8e   :  { %v106_v31 = vmul.f32 %v523_v29, %v523_v29  ;;  %v104_v32 = vmul.f32 %v525_v30, %v525_v30 }
  0x90   :  { %v116_v33 = vsel %vm75_vm0, %v106_v31, 0.0  ;;  %v110_v34 = vsel %vm75_vm0, %v104_v32, 0.0 }
  0x91   :  { %117 = vadd.xlane.f32.xlu1 %v116_v33  ;;  %111 = vadd.xlane.f32.xlu2 %v110_v34 }
  0xfc   :  { %v109_v38 = vpop.xlane.xlu2 %108  ;;  %v115_v42 = vpop.xlane.xlu0 %114 }
  0xfd   :  { %v119_v41 = vmul.f32 %v109_v38, %v94_v14  ;;  %v121_v45 = vmul.f32 %v115_v42, %v94_v14  ;;  %v270_v42 = vld [vmem:[%s636_s6 + $0x40] sm:$0xff] }
  0xff   :  { %v123_v44 = vadd.f32 1e-06, %v119_v41  ;;  %v125_v46 = vadd.f32 1e-06, %v121_v45  ;;  %v283_v41 = vpack.c.bf16 %v273_v40, %v272_v39  ;;  %v268_v45 = vld [vmem:[%s636_s6 + $0x30] sm:$0xff] }
 0x100   :  { %v344_v40 = vld [vmem:[#allocation6] ss:$0 sm:$0xff] }
 0x101   :  { %347 = vrsqrt.f32 %v123_v44  ;;  %vm133_vm3 = vweird.f32 %v123_v44  ;;  %vm153_vm10 = vweird.f32 %v125_v46 }
 0x102   :  { %349 = vrsqrt.f32 %v125_v46 }
 0x104   :  { %v118_v47 = vpop.xlane.xlu1 %117  ;;  %v112_v48 = vpop.xlane.xlu2 %111 }
 0x105   :  { %v122_v49 = vmul.f32 %v118_v47, %v94_v14  ;;  %v120_v50 = vmul.f32 %v112_v48, %v94_v14  ;;  %v266_v48 = vld [vmem:[%s636_s6 + $0x20] sm:$0xff] }
 0x107   :  { %v348_v51 = vpop.eup %347  ;;  %v126_v52 = vadd.f32 1e-06, %v122_v49  ;;  %v124_v53 = vadd.f32 1e-06, %v120_v50  ;;  %v267_v49 = vld [vmem:[%s636_s6 + $0x28] sm:$0xff] }
 0x108   :  { %v128_v54 = vmul.f32 %v348_v51, %v123_v44  ;;  %v350_v57 = vpop.eup %349  ;;  %vm134_vm2 = vweird.f32 %v348_v51  ;;  %v282_v44 = vpack.c.bf16 %v271_v43, %v270_v42  ;;  %v280_v50 = vpack.c.bf16 %v267_v49, %v266_v48  ;;  %v309_v42 = vld [vmem:[%s631_s1] sm:$0xff] }
 0x109   :  { %351 = vrsqrt.f32 %v126_v52  ;;  %v148_v63 = vmul.f32 %v350_v57, %v125_v46  ;;  %vm135_vm4 = vmor %vm133_vm3, %vm134_vm2  ;;  %vm143_vm6 = vweird.f32 %v124_v53  ;;  %vm163_vm8 = vweird.f32 %v126_v52  ;;  %v269_v46 = vld [vmem:[%s636_s6 + $0x38] sm:$0xff] }
 0x10a   :  { %v129_v55 = vmul.f32 %v348_v51, %v128_v54  ;;  %353 = vrsqrt.f32 %v124_v53  ;;  %vm154_vm11 = vweird.f32 %v350_v57  ;;  %v281_v47 = vpack.c.bf16 %v269_v46, %v268_v45  ;;  %v343_v54 = vld [vmem:[#allocation4] ss:$0 sm:$0xff]  ;;  %v310_v46 = vld [vmem:[%s631_s1 + $0x8] sm:$0xff] }
 0x10b   :  { %v149_v4 = vmul.f32 %v350_v57, %v148_v63  ;;  %vm155_vm13 = vmor %vm153_vm10, %vm154_vm11 }
 0x10c   :  { %v130_v56 = vmul.f32 0.5, %v129_v55  ;;  %v262_v55 = vld [vmem:[%s636_s6] sm:$0xff] }
 0x10d   :  { %v150_v10 = vmul.f32 0.5, %v149_v4 }
 0x10e   :  { %v131_v58 = vsub.f32 1.5, %v130_v56  ;;  %v263_v56 = vld [vmem:[%s636_s6 + $0x8] sm:$0xff] }
 0x10f   :  { %v352_v59 = vpop.eup %351  ;;  %v151_v17 = vsub.f32 1.5, %v150_v10 }
 0x110   :  { %v354_v60 = vpop.eup %353  ;;  %v158_v61 = vmul.f32 %v352_v59, %v126_v52  ;;  %v132_v62 = vmul.f32 %v348_v51, %v131_v58  ;;  %vm164_vm9 = vweird.f32 %v352_v59  ;;  %v265_v52 = vld [vmem:[%s636_s6 + $0x18] sm:$0xff] }
 0x111   :  { %v138_v0 = vmul.f32 %v354_v60, %v124_v53  ;;  %vm144_vm5 = vweird.f32 %v354_v60  ;;  %vm165_vm12 = vmor %vm163_vm8, %vm164_vm9  ;;  %v152_v23 = vmul.f32 %v350_v57, %v151_v17 }
 0x112   :  { %v159_v1 = vmul.f32 %v352_v59, %v158_v61  ;;  %v136_v3 = vsel %vm135_vm4, %v348_v51, %v132_v62  ;;  %vm145_vm7 = vmor %vm143_vm6, %vm144_vm5  ;;  %v264_v51 = vld [vmem:[%s636_s6 + $0x10] sm:$0xff] }
 0x113   :  { %v139_v2 = vmul.f32 %v354_v60, %v138_v0  ;;  %v167_v8 = vmul.f32 %v136_v3, %v515_v20  ;;  %v156_v26 = vsel %vm155_vm13, %v350_v57, %v152_v23  ;;  %v279_v53 = vpack.c.bf16 %v265_v52, %v264_v51 }
 0x114   :  { %v160_v6 = vmul.f32 0.5, %v159_v1  ;;  %v169_v28 = vmul.f32 %v156_v26, %v513_v19  ;;  %v274_v19 = vld [vmem:[%s636_s6 + $0x60] sm:$0xff]  ;;  %v278_v57 = vpack.c.bf16 %v263_v56, %v262_v55 }
 0x115   :  { %v140_v5 = vmul.f32 0.5, %v139_v2  ;;  %v175_v15 = vmul.f32 %v341_v9, %v167_v8 }
 0x116   :  { %v161_v12 = vsub.f32 1.5, %v160_v6  ;;  %v177_v31 = vmul.f32 %v341_v9, %v169_v28 }
 0x117   :  { %v141_v7 = vsub.f32 1.5, %v140_v5  ;;  %v183_v21 = vadd.f32 %v342_v16, %v175_v15 }
 0x118   :  { %v162_v20 = vmul.f32 %v352_v59, %v161_v12  ;;  %v185_v33 = vadd.f32 %v342_v16, %v177_v31 }
 0x119   :  { %v142_v11 = vmul.f32 %v354_v60, %v141_v7 }
 0x11a   :  { %v166_v25 = vsel %vm165_vm12, %v352_v59, %v162_v20 }
 0x11b   :  { %v146_v13 = vsel %vm145_vm7, %v354_v60, %v142_v11  ;;  %v170_v27 = vmul.f32 %v166_v25, %v523_v29  ;;  %v275_v29 = vld [vmem:[%s636_s6 + $0x68] sm:$0xff] }
 0x11c   :  { %v168_v14 = vmul.f32 %v146_v13, %v525_v30  ;;  %v284_v38 = vpack.c.bf16 %v275_v29, %v274_v19 }
 0x11d   :  { %v178_v30 = vmul.f32 %v341_v9, %v170_v27 }
 0x11e   :  { %v176_v18 = vmul.f32 %v341_v9, %v168_v14  ;;  %291 = vmatpush.bf16.msra.mxu1 %v284_v38  ;;  %330 = vmatpush.bf16.msra.mxu2 %v284_v38 }
 0x11f   :  { %v186_v32 = vadd.f32 %v342_v16, %v178_v30 }
 0x120   :  { %v184_v22 = vadd.f32 %v342_v16, %v176_v18 }
 0x121   :  { %v188_v34 = vpack.c.bf16 %v186_v32, %v185_v33 }
 0x122   :  { %v187_v24 = vpack.c.bf16 %v184_v22, %v183_v21  ;;  %292 = vmatpush.bf16.msra.mxu1 %v283_v41  ;;  %331 = vmatpush.bf16.msra.mxu2 %v283_v41 }
 0x124   :  { %327 = vmatmul.msk.bf16.vlgmr.msra.gmra.mxu0 %vm75_vm0, %v187_v24 }
 0x126   :  { %293 = vmatpush.bf16.msra.mxu1 %v282_v44  ;;  %332 = vmatpush.bf16.msra.mxu2 %v282_v44 }
 0x12a   :  { %294 = vmatpush.bf16.msra.mxu1 %v281_v47  ;;  %333 = vmatpush.bf16.msra.mxu2 %v281_v47 }
 0x12e   :  { %295 = vmatpush.bf16.msra.mxu1 %v280_v50  ;;  %334 = vmatpush.bf16.msra.mxu2 %v280_v50  ;;  %v311_v50 = vld [vmem:[%s631_s1 + $0x10] sm:$0xff] }
 0x132   :  { %296 = vmatpush.bf16.msra.mxu1 %v279_v53  ;;  %335 = vmatpush.bf16.msra.mxu2 %v279_v53 }
 0x134   :  { %328 = vmatmul.msk.bf16.gmra.mxu0 %vm75_vm0, %v188_v34 }
 0x136   :  { %297 = vmatpush.bf16.msra.mxu1 %v278_v57  ;;  %336 = vmatpush.bf16.msra.mxu2 %v278_v57 }
 0x1a1   :  { %v214_v58 = vpop.f32.mrf.mxu0 }
 0x1a2   :  { %v215_v59 = vadd.f32 %v343_v54, %v214_v58 }
 0x1a4   :  { %v224_v60 = vmul.f32 %v215_v59, %v215_v59 }
 0x1a6   :  { %v228_v61 = vmul.f32 %v224_v60, %v215_v59 }
 0x1a8   :  { %v232_v62 = vmul.f32 0.044715, %v228_v61 }
 0x1a9   :  { %v216_v63 = vpop.f32.mrf.mxu0 }
 0x1aa   :  { %v236_v0 = vadd.f32 %v232_v62, %v215_v59  ;;  %v217_v1 = vadd.f32 %v343_v54, %v216_v63 }
 0x1ac   :  { %v225_v2 = vmul.f32 %v217_v1, %v217_v1  ;;  %v240_v3 = vmul.f32 0.7978846, %v236_v0 }
 0x1ae   :  { %v229_v4 = vmul.f32 %v225_v2, %v217_v1  ;;  %355 = vtanh.f32 %v240_v3 }
 0x1b0   :  { %v233_v5 = vmul.f32 0.044715, %v229_v4 }
 0x1b1   :  { %v219_v6 = vpop.f32.mrf.mxu0 }
 0x1b2   :  { %v237_v7 = vadd.f32 %v233_v5, %v217_v1  ;;  %v220_v8 = vadd.f32 %v343_v54, %v219_v6 }
 0x1b4   :  { %v226_v9 = vmul.f32 %v220_v8, %v220_v8  ;;  %v241_v10 = vmul.f32 0.7978846, %v237_v7  ;;  %v356_v11 = vpop.eup %355 }
 0x1b5   :  { %v248_v15 = vadd.f32 1.0, %v356_v11 }
 0x1b6   :  { %v230_v12 = vmul.f32 %v226_v9, %v220_v8  ;;  %357 = vtanh.f32 %v241_v10 }
 0x1b7   :  { %v252_v23 = vmul.f32 0.5, %v248_v15 }
 0x1b8   :  { %v234_v13 = vmul.f32 0.044715, %v230_v12 }
 0x1b9   :  { %v221_v14 = vpop.f32.mrf.mxu0  ;;  %v256_v27 = vmul.f32 %v252_v23, %v215_v59 }
 0x1ba   :  { %v238_v16 = vadd.f32 %v234_v13, %v220_v8  ;;  %v222_v17 = vadd.f32 %v343_v54, %v221_v14  ;;  %v312_v54 = vld [vmem:[%s631_s1 + $0x18] sm:$0xff] }
 0x1bc   :  { %v358_v18 = vpop.eup %357  ;;  %v227_v20 = vmul.f32 %v222_v17, %v222_v17  ;;  %v242_v21 = vmul.f32 0.7978846, %v238_v16 }
 0x1bd   :  { %v249_v22 = vadd.f32 1.0, %v358_v18 }
 0x1be   :  { %v231_v24 = vmul.f32 %v227_v20, %v222_v17  ;;  %359 = vtanh.f32 %v242_v21 }
 0x1bf   :  { %v253_v25 = vmul.f32 0.5, %v249_v22 }
 0x1c0   :  { %v235_v26 = vmul.f32 0.044715, %v231_v24 }
 0x1c1   :  { %v257_v28 = vmul.f32 %v253_v25, %v217_v1 }
 0x1c2   :  { %v239_v30 = vadd.f32 %v235_v26, %v222_v17 }
 0x1c3   :  { %v260_v31 = vpack.c.bf16 %v257_v28, %v256_v27 }
 0x1c4   :  { %v243_v32 = vmul.f32 0.7978846, %v239_v30  ;;  %v360_v33 = vpop.eup %359 }
 0x1c5   :  { %298 = vmatmul.bf16.vlgmr.msra.gmra.mxu1 %v260_v31  ;;  %v250_v34 = vadd.f32 1.0, %v360_v33 }
 0x1c6   :  { %361 = vtanh.f32 %v243_v32 }
 0x1c7   :  { %v254_v37 = vmul.f32 0.5, %v250_v34 }
 0x1c9   :  { %v258_v29 = vmul.f32 %v254_v37, %v220_v8 }
 0x1cc   :  { %v362_v35 = vpop.eup %361 }
 0x1cd   :  { %v251_v36 = vadd.f32 1.0, %v362_v35 }
 0x1cf   :  { %v255_v19 = vmul.f32 0.5, %v251_v36 }
 0x1d1   :  { %v259_v38 = vmul.f32 %v255_v19, %v222_v17 }
 0x1d3   :  { %v261_v39 = vpack.c.bf16 %v259_v38, %v258_v29 }
 0x1d5   :  { %303 = vmatmul.bf16.vlgmr.msra.gmra.mxu2 %v261_v39 }
 0x242   :  { %v299_v41 = vpop.f32.mrf.mxu1 }
 0x243   :  { %v300_v43 = vadd.f32 %v344_v40, %v299_v41 }
 0x245   :  { %v313_v44 = vadd.f32 %v309_v42, %v300_v43 }
 0x247   :  { %317 = vst.msk [vmem:[%s638_s8] sm:$0xff] %vm75_vm0, %v313_v44 }
 0x24a   :  { %v301_v45 = vpop.f32.mrf.mxu1 }
 0x24b   :  { %v302_v47 = vadd.f32 %v344_v40, %v301_v45 }
 0x24d   :  { %v314_v48 = vadd.f32 %v310_v46, %v302_v47 }
 0x24f   :  { %318 = vst.msk [vmem:[%s638_s8 + $0x8] sm:$0xff] %vm75_vm0, %v314_v48 }
 0x258   :  { %v304_v49 = vpop.f32.mrf.mxu2 }
 0x259   :  { %v305_v51 = vadd.f32 %v344_v40, %v304_v49 }
 0x25b   :  { %v315_v52 = vadd.f32 %v311_v50, %v305_v51 }
 0x25d   :  { %319 = vst.msk [vmem:[%s638_s8 + $0x10] sm:$0xff] %vm75_vm0, %v315_v52 }
 0x260   :  { %v306_v53 = vpop.f32.mrf.mxu2 }
 0x261   :  { %v307_v55 = vadd.f32 %v344_v40, %v306_v53 }
 0x263   :  { %v316_v56 = vadd.f32 %v312_v54, %v307_v55 }
 0x265   :  { %320 = vst.msk [vmem:[%s638_s8 + $0x18] sm:$0xff] %vm75_vm0, %v316_v56 }
 0x266   :  { %325 = vsyncpa [#allocation3], 1 }
 0x267   :  { %326 = vsyncpa [#allocation5], 1 }

// kernel: rgb_context_decoder_forward.15
= control target key start
LH: loop header
LB: loop body
LE: loop exit
PB: predicated region body
PF: predicated region fallthrough
CT: control target
= control target key end

     0   :  { %8 = vsyncpa [#allocation4], 0  ;;  %s1637_s12 = smov 0   ;;  %s2639_s0 = inlined_call_operand.vmem [shape: f32[2,4,4,32], index: 0, kind: input, shape index: {}]   ;;  %s2640_s1 = inlined_call_operand.vmem [shape: f32[49,32], index: 1, kind: input, shape index: {}]   ;;  %s2641_s2 = inlined_call_operand.hbm [shape: f32[1,32], index: 2, kind: input, shape index: {}]   ;;  %s2642_s3 = inlined_call_operand.vmem [shape: f32[2,4,4,32], index: 3, kind: output, shape index: {}]  }
   0x1 LB: > { %s1643_s13 = sadd.s32 4294967295, %s1613_s12   ;;  %p1538_p0 = scmp.ge.s32.totalorder %s1613_s12, 1  ;;  %s1613_s12 = sphi %s1637_s12, %s14_s12  }
   0x2   : > { %p113_p1 = scmp.lt.s32.totalorder %s1613_s12, 3  ;;  %s128_s16 = sshll.u32 %s2641_s2, 4  ;;  %s129_s16 = int_to_ptr.hbm [resolvable:$true] %s128_s16 }
   0x3   : > { %p1559_p3 = scmp.eq.s32.totalorder %s1643_s13, 0  ;;  %s1615_s17 = smov [#allocation3]  }
   0x4   : > { %p114_p2 = pnand %p1538_p0, %p113_p1  ;;  %s130_s18 = sshll.u32 %s1615_s17, 4  ;;  %s131_s18 = int_to_ptr.vmem [resolvable:$true] %s130_s18 }
   0x6   : > { %p1555_p4 = pneg %p114_p2  ;;  %151 = sbr.rel (%p114_p2) target bundleno = 225 (0xe1), region = 32 }
   0x8   : > { %p1556_p5 = pnand %p1559_p3, %p1555_p4 }
   0xa   : > { %1558 = dma.hbm_to_vmem [thread:$0]  (!%p1556_p5), %s129_s16, 16, %s131_s18, [#allocation4]  }
   0xb   : > { %1608 = dma.done.wait (%p1559_p3), [#allocation4], 16  }
   0xc   : > { %1610 = vsyncadd (%p1559_p3), [#allocation4], 4294967280  ;;  %vm190_vm0 = vcmask 261120   ;;  %v1616_v0 = vmov 0.0   ;;  %v1660_v1 = vld [vmem:[%s2640_s1] sm:$0xff]  ;;  %vm192_vm1 = vcmask 254976  }
   0xd   : > { %191 = vst.msk [vmem:[#allocation2] sm:$0xff] %vm190_vm0, %v1616_v0  ;;  %v1664_v3 = vperm.slane %v1660_v1, 0  ;;  %v1667_v4 = vperm.slane %v1660_v1, 1  ;;  %v1670_v5 = vperm.slane %v1660_v1, 2  ;;  %v1678_v8 = vperm.slane %v1660_v1, 3  ;;  %v1707_v26 = vld [vmem:[%s2640_s1 + $0x8] sm:$0xff] }
   0xe   : > { %194 = vst.msk [vmem:[#allocation2 + $0x10] sm:$0xff] %vm190_vm0, %v1616_v0  ;;  %v1701_v25 = vperm.slane %v1660_v1, 4  ;;  %vm343_vm2 = vcmask 1042432   ;;  %v1710_v27 = vperm.slane %v1660_v1, 5  ;;  %v1713_v28 = vperm.slane %v1660_v1, 6  ;;  %p176_p6 = scmp.lt.s32.totalorder %s1643_s13, 1 }
   0xf   : > { %196 = vst.msk [vmem:[#allocation2 + $0x20] sm:$0xff] %vm190_vm0, %v1616_v0  ;;  %vm381_vm3 = vcmask 1041408   ;;  %v1724_v38 = vperm.slane %v1707_v26, 0  ;;  %v1727_v39 = vperm.slane %v1707_v26, 1  ;;  %v1730_v47 = vperm.slane %v1660_v1, 7 }
  0x10   : > { %198 = vst.msk [vmem:[#allocation2 + $0x30] sm:$0xff] %vm190_vm0, %v1616_v0  ;;  %v1743_v55 = vperm.slane %v1707_v26, 2  ;;  %s2722_s13 = smov (!%p176_p6, %s1643_s13), 1  ;;  %vm213_vm4 = vcmask 257024  }
  0x11   : > { %200 = vst.msk [vmem:[#allocation2 + $0x40] sm:$0xff] %vm190_vm0, %v1616_v0  ;;  %s1549_s25 = sshll.u32 %s2722_s13, 4 }
  0x12   : > { %202 = vst.msk [vmem:[#allocation2 + $0x50] sm:$0xff] %vm190_vm0, %v1616_v0  ;;  %s1899_s30 = scalar_lea.vmem %s2639_s0, %s1549_s25  ;;  %s2545_s14 = scalar_lea.vmem %s2642_s3, %s1549_s25 }
  0x13   : > { %204 = vst.msk [vmem:[#allocation2 + $0x60] sm:$0xff] %vm190_vm0, %v1616_v0 }
  0x14   : > { %v225_v2 = vld [vmem:[#allocation2] sm:$0xff]  ;;  %206 = vst.msk [vmem:[#allocation2 + $0x70] sm:$0xff] %vm190_vm0, %v1616_v0 }
  0x15   : > { %208 = vst.msk [vmem:[#allocation2 + $0x80] sm:$0xff] %vm190_vm0, %v1616_v0  ;;  %v1674_v6 = vld [vmem:[#allocation2 + $0x10] sm:$0xff]  ;;  %v243_v7 = vmul.f32 %v1667_v4, %v225_v2  ;;  %v234_v10 = vmul.f32 %v1664_v3, %v225_v2  ;;  %v264_v12 = vmul.f32 %v1670_v5, %v225_v2  ;;  %v285_v13 = vmul.f32 %v1678_v8, %v225_v2 }
  0x16   : > { %210 = vst.msk [vmem:[#allocation2 + $0x90] sm:$0xff] %vm190_vm0, %v1616_v0  ;;  %v244_v9 = vmul.f32 %v1667_v4, %v1674_v6  ;;  %v235_v14 = vmul.f32 %v1664_v3, %v1674_v6  ;;  %v265_v16 = vmul.f32 %v1670_v5, %v1674_v6  ;;  %v286_v22 = vmul.f32 %v1678_v8, %v1674_v6  ;;  %v1721_v37 = vld [vmem:[#allocation2 + $0x20] sm:$0xff] }
  0x17   : > { %193 = vst.msk [vmem:[#allocation2 + $0x8] sm:$0x3] %vm192_vm1, %v1616_v0  ;;  %v251_v11 = vrot.slane %v243_v7, 1  ;;  %v272_v18 = vrot.slane %v264_v12, 2  ;;  %v293_v19 = vrot.slane %v285_v13, 3  ;;  %v306_v31 = vmul.f32 %v1701_v25, %v225_v2 }
  0x18   : > { %195 = vst.msk [vmem:[#allocation2 + $0x18] sm:$0x3] %vm192_vm1, %v1616_v0  ;;  %v252_v15 = vrot.slane %v244_v9, 1  ;;  %v273_v21 = vrot.slane %v265_v16, 2  ;;  %v294_v29 = vrot.slane %v286_v22, 3  ;;  %v327_v33 = vmul.f32 %v1710_v27, %v225_v2 }
  0x19   : > { %197 = vst.msk [vmem:[#allocation2 + $0x28] sm:$0x3] %vm192_vm1, %v1616_v0  ;;  %v259_v17 = vadd.f32 %v251_v11, %v234_v10  ;;  %v365_v35 = vmul.f32 %v1713_v28, %v225_v2  ;;  %v314_v40 = vrot.slane %v306_v31, 4  ;;  %v307_v49 = vmul.f32 %v1701_v25, %v1674_v6 }
  0x1a   : > { %199 = vst.msk [vmem:[#allocation2 + $0x38] sm:$0x3] %vm192_vm1, %v1616_v0  ;;  %v260_v20 = vadd.f32 %v252_v15, %v235_v14  ;;  %v344_v42 = vrot.slane %v327_v33, 5  ;;  %v245_v50 = vmul.f32 %v1667_v4, %v1721_v37  ;;  %v329_v52 = vmul.f32 %v1710_v27, %v1674_v6 }
  0x1b   : > { %201 = vst.msk [vmem:[#allocation2 + $0x48] sm:$0x3] %vm192_vm1, %v1616_v0  ;;  %v280_v24 = vadd.f32 %v272_v18, %v259_v17  ;;  %v382_v44 = vrot.slane %v365_v35, 6  ;;  %v421_v54 = vmul.f32 %v1724_v38, %v1674_v6  ;;  %v315_v57 = vrot.slane %v307_v49, 4 }
  0x1c   : > { %203 = vst.msk [vmem:[#allocation2 + $0x58] sm:$0x3] %vm192_vm1, %v1616_v0  ;;  %v281_v32 = vadd.f32 %v273_v21, %v260_v20  ;;  %v347_v59 = vrot.slane %v329_v52, 5  ;;  %v442_v61 = vmul.f32 %v1727_v39, %v1674_v6  ;;  %v412_v63 = vmul.f32 %v1730_v47, %v1674_v6 }
  0x1d   : > { %205 = vst.msk [vmem:[#allocation2 + $0x68] sm:$0x3] %vm192_vm1, %v1616_v0  ;;  %v301_v30 = vadd.f32 %v293_v19, %v280_v24  ;;  %v236_v1 = vmul.f32 %v1664_v3, %v1721_v37  ;;  %v253_v2 = vrot.slane %v245_v50, 1  ;;  %v367_v9 = vmul.f32 %v1713_v28, %v1674_v6 }
  0x1e   : > { %207 = vst.msk [vmem:[#allocation2 + $0x78] sm:$0x3] %vm192_vm1, %v1616_v0  ;;  %v226_v23 = vld [vmem:[#allocation2 + $0x8] sm:$0x3]  ;;  %v302_v48 = vadd.f32 %v294_v29, %v281_v32  ;;  %v429_v10 = vrot.slane %v421_v54, 1  ;;  %v463_v11 = vmul.f32 %v1743_v55, %v1674_v6  ;;  %v266_v14 = vmul.f32 %v1670_v5, %v1721_v37 }
  0x1f   : > { %209 = vst.msk [vmem:[#allocation2 + $0x88] sm:$0x3] %vm192_vm1, %v1616_v0  ;;  %v328_v34 = vmul.f32 %v1710_v27, %v226_v23  ;;  %v366_v36 = vmul.f32 %v1713_v28, %v226_v23  ;;  %v228_v41 = vld [vmem:[#allocation2 + $0x18] sm:$0x3]  ;;  %v322_v46 = vadd.f32 %v314_v40, %v301_v30  ;;  %v385_v16 = vrot.slane %v367_v9, 6 }
  0x20   : > { %211 = vst.msk [vmem:[#allocation2 + $0x98] sm:$0x3] %vm192_vm1, %v1616_v0  ;;  %v330_v53 = vmul.f32 %v1710_v27, %v228_v41  ;;  %v323_v0 = vadd.f32 %v315_v57, %v302_v48  ;;  %v368_v13 = vmul.f32 %v1713_v28, %v228_v41  ;;  %v450_v17 = vrot.slane %v442_v61, 2  ;;  %v404_v23 = vld [vmem:[#allocation2 + $0x18] sm:$0x3] }
  0x21   : > { %v345_v43 = vrot.slane %v328_v34, 5  ;;  %v383_v45 = vrot.slane %v366_v36, 6  ;;  %v261_v20 = vadd.f32 %v253_v2, %v236_v1  ;;  %v287_v21 = vmul.f32 %v1678_v8, %v1721_v37  ;;  %v230_v48 = vld [vmem:[#allocation2 + $0x28] sm:$0x3] }
  0x22   : > { %v348_v60 = vrot.slane %v330_v53, 5  ;;  %v386_v19 = vrot.slane %v368_v13, 6  ;;  %v422_v22 = vmul.f32 %v1724_v38, %v1721_v37  ;;  %v1765_v24 = vperm.slane %v1707_v26, 3 }
  0x23   : > { %v346_v51 = vsel %vm343_vm2, %v344_v42, %v345_v43  ;;  %v384_v58 = vsel %vm381_vm3, %v382_v44, %v383_v45  ;;  %v471_v29 = vrot.slane %v463_v11, 3  ;;  %v1769_v32 = vperm.slane %v1707_v26, 4  ;;  %v1784_v44 = vld [vmem:[%s2640_s1 + $0x10] sm:$0xff] }
  0x24   : > { %v360_v56 = vadd.f32 %v346_v51, %v322_v46  ;;  %v349_v7 = vsel %vm343_vm2, %v347_v59, %v348_v60  ;;  %v387_v30 = vsel %vm381_vm3, %v385_v16, %v386_v19  ;;  %v274_v33 = vrot.slane %v266_v14, 2 }
  0x25   : > { %v361_v15 = vadd.f32 %v349_v7, %v323_v0  ;;  %v413_v35 = vmul.f32 %v1730_v47, %v1721_v37  ;;  %v484_v36 = vmul.f32 %v1765_v24, %v1674_v6  ;;  %v505_v41 = vmul.f32 %v1769_v32, %v1674_v6 }
  0x26   : > { %v398_v62 = vadd.f32 %v384_v58, %v360_v56  ;;  %v506_v42 = vmul.f32 %v1769_v32, %v404_v23  ;;  %v1779_v43 = vperm.slane %v1707_v26, 5  ;;  %v295_v45 = vrot.slane %v287_v21, 3 }
  0x27   : > { %v399_v34 = vadd.f32 %v387_v30, %v361_v15  ;;  %v1787_v46 = vperm.slane %v1707_v26, 7  ;;  %v492_v49 = vrot.slane %v484_v36, 4  ;;  %v430_v50 = vrot.slane %v422_v22, 1 }
  0x28   : > { %v416_v12 = vadd.f32 %v412_v63, %v398_v62  ;;  %v443_v51 = vmul.f32 %v1727_v39, %v1721_v37  ;;  %v521_v53 = vrot.slane %v505_v41, 5  ;;  %v282_v54 = vadd.f32 %v274_v33, %v261_v20 }
  0x29   : > { %v417_v52 = vadd.f32 %v413_v35, %v399_v34  ;;  %v308_v56 = vmul.f32 %v1701_v25, %v1721_v37  ;;  %v522_v58 = vrot.slane %v506_v42, 5  ;;  %v1794_v59 = vperm.slane %v1784_v44, 0  ;;  %v408_v42 = vld [vmem:[#allocation2 + $0x38] sm:$0x3] }
  0x2a   : > { %v437_v18 = vadd.f32 %v429_v10, %v416_v12  ;;  %v331_v60 = vmul.f32 %v1710_v27, %v1721_v37  ;;  %v332_v61 = vmul.f32 %v1710_v27, %v230_v48  ;;  %v542_v62 = vmul.f32 %v1779_v43, %v1674_v6  ;;  %v232_v10 = vld [vmem:[#allocation2 + $0x38] sm:$0x3] }
  0x2b   : > { %v464_v63 = vmul.f32 %v1743_v55, %v1721_v37  ;;  %v1804_v0 = vperm.slane %v1784_v44, 1  ;;  %v523_v1 = vsel %vm343_vm2, %v521_v53, %v522_v58  ;;  %v543_v2 = vmul.f32 %v1779_v43, %v404_v23  ;;  %v406_v23 = vld [vmem:[#allocation2 + $0x28] sm:$0x3] }
  0x2c   : > { %v458_v31 = vadd.f32 %v450_v17, %v437_v18  ;;  %v451_v7 = vrot.slane %v443_v51, 2  ;;  %v597_v9 = vmul.f32 %v1787_v46, %v1721_v37  ;;  %v438_v11 = vadd.f32 %v430_v50, %v417_v52  ;;  %v937_v52 = vld [vmem:[#allocation2 + $0x78] sm:$0x3] }
  0x2d   : > { %v303_v13 = vadd.f32 %v295_v45, %v282_v54  ;;  %v316_v14 = vrot.slane %v308_v56, 4  ;;  %v558_v6 = vrot.slane %v542_v62, 6  ;;  %v559_v15 = vrot.slane %v543_v2, 6  ;;  %v410_v54 = vld [vmem:[#allocation2 + $0x48] sm:$0x3] }
  0x2e   : > { %v479_v40 = vadd.f32 %v471_v29, %v458_v31  ;;  %v618_v16 = vmul.f32 %v1794_v59, %v1721_v37  ;;  %v350_v17 = vrot.slane %v331_v60, 5  ;;  %v351_v18 = vrot.slane %v332_v61, 5 }
  0x2f   : > { %v1813_v19 = vperm.slane %v1707_v26, 6  ;;  %v1817_v20 = vmul.f32 %v1804_v0, %v1721_v37  ;;  %v1820_v21 = vmul.f32 %v1710_v27, %v232_v10  ;;  %v369_v22 = vmul.f32 %v1713_v28, %v1721_v37 }
  0x30   : > { %v500_v57 = vadd.f32 %v492_v49, %v479_v40  ;;  %v560_v29 = vsel %vm381_vm3, %v558_v6, %v559_v15  ;;  %v370_v30 = vmul.f32 %v1713_v28, %v230_v48  ;;  %v459_v31 = vadd.f32 %v451_v7, %v438_v11 }
  0x31   : > { %v588_v26 = vmul.f32 %v1813_v19, %v1721_v37  ;;  %v472_v34 = vrot.slane %v464_v63, 3  ;;  %v605_v35 = vrot.slane %v597_v9, 1  ;;  %v324_v36 = vadd.f32 %v316_v14, %v303_v13 }
  0x32   : > { %v537_v12 = vadd.f32 %v523_v1, %v500_v57  ;;  %v485_v40 = vmul.f32 %v1765_v24, %v1721_v37  ;;  %v352_v41 = vsel %vm343_vm2, %v350_v17, %v351_v18  ;;  %v507_v45 = vmul.f32 %v1769_v32, %v1721_v37 }
  0x33   : > { %v508_v48 = vmul.f32 %v1769_v32, %v406_v23  ;;  %v626_v50 = vrot.slane %v618_v16, 2  ;;  %v647_v51 = vrot.slane %v1817_v20, 3  ;;  %v1838_v53 = vmul.f32 %v1713_v28, %v232_v10  ;;  %v580_v10 = vld [vmem:[#allocation2 + $0x28] sm:$0x3] }
  0x34   : > { %v574_v33 = vadd.f32 %v560_v29, %v537_v12  ;;  %v388_v56 = vrot.slane %v369_v22, 6  ;;  %v389_v57 = vrot.slane %v370_v30, 6  ;;  %v480_v58 = vadd.f32 %v472_v34, %v459_v31  ;;  %v582_v29 = vld [vmem:[#allocation2 + $0x38] sm:$0x3]  ;;  %v584_v34 = vld [vmem:[#allocation2 + $0x48] sm:$0x3] }
  0x35   : > { %v362_v61 = vadd.f32 %v352_v41, %v324_v36  ;;  %v493_v62 = vrot.slane %v485_v40, 4  ;;  %v1841_v63 = vmul.f32 %v1769_v32, %v408_v42  ;;  %v1844_v1 = vperm.slane %v1784_v44, 3  ;;  %v1885_v40 = vld [vmem:[%s2640_s1 + $0x18] sm:$0xff] }
  0x36   : > { %v592_v49 = vadd.f32 %v588_v26, %v574_v33  ;;  %v1852_v2 = vmul.f32 %v1769_v32, %v410_v54  ;;  %v524_v7 = vrot.slane %v507_v45, 5  ;;  %v525_v9 = vrot.slane %v508_v48, 5 }
  0x37   : > { %v1855_v11 = vperm.slane %v1784_v44, 2  ;;  %v544_v13 = vmul.f32 %v1779_v43, %v1721_v37  ;;  %v545_v14 = vmul.f32 %v1779_v43, %v406_v23  ;;  %v1862_v6 = vperm.slane %v1784_v44, 4 }
  0x38   : > { %v613_v60 = vadd.f32 %v605_v35, %v592_v49  ;;  %2661 = vst [vmem:[#allocation6_spill] sm:$0xff] %v1852_v2  ;;  %v390_v15 = vsel %vm381_vm3, %v388_v56, %v389_v57  ;;  %v501_v16 = vadd.f32 %v493_v62, %v480_v58  ;;  %v1866_v17 = vmul.f32 %v1779_v43, %v408_v42  ;;  %v586_v35 = vld [vmem:[#allocation2 + $0x58] sm:$0x3] }
  0x39   : > { %v1868_v20 = vadd.f32 %v390_v15, %v362_v61  ;;  %v681_v30 = vmul.f32 %v1844_v1, %v1721_v37  ;;  %v682_v23 = vmul.f32 %v1844_v1, %v580_v10  ;;  %v526_v31 = vsel %vm343_vm2, %v524_v7, %v525_v9  ;;  %v755_v9 = vld [vmem:[#allocation2 + $0x38] sm:$0x3]  ;;  %v761_v61 = vld [vmem:[#allocation2 + $0x68] sm:$0x3] }
  0x3a   : > { %v634_v18 = vadd.f32 %v626_v50, %v613_v60  ;;  %v1878_v26 = vmul.f32 %v1779_v43, %v410_v54  ;;  %v660_v36 = vmul.f32 %v1855_v11, %v1721_v37  ;;  %v561_v41 = vrot.slane %v544_v13, 6  ;;  %v935_v50 = vld [vmem:[#allocation2 + $0x68] sm:$0x3] }
  0x3b   : > { %v562_v42 = vrot.slane %v545_v14, 6  ;;  %v718_v45 = vmul.f32 %v1862_v6, %v1721_v37  ;;  %v719_v48 = vmul.f32 %v1862_v6, %v580_v10  ;;  %v538_v49 = vadd.f32 %v526_v31, %v501_v16 }
  0x3c   : > { %2662 = vst [vmem:[#allocation7_spill] sm:$0xff] %v1878_v26  ;;  %v655_v54 = vadd.f32 %v647_v51, %v634_v18  ;;  %v1892_v56 = vmul.f32 %v1844_v1, %v582_v29  ;;  %v1902_v57 = vmul.f32 %v1844_v1, %v584_v34  ;;  %v1905_v37 = vmul.f32 %v1844_v1, %v586_v35  ;;  %v1910_v51 = vld [vmem:[%s2640_s1 + $0x20] sm:$0xff]  ;;  %v757_v18 = vld [vmem:[#allocation2 + $0x48] sm:$0x3] }
  0x3d   : > { %v697_v58 = vrot.slane %v681_v30, 5  ;;  %v698_v60 = vrot.slane %v682_v23, 5  ;;  %2665 = vst [vmem:[#allocation10_spill] sm:$0xff] %v1910_v51  ;;  %v668_v62 = vrot.slane %v660_v36, 4  ;;  %v1914_v7 = vmul.f32 %v1862_v6, %v582_v29  ;;  %v186_v30 = vld [vmem:[%s1899_s30] sm:$0xf] }
  0x3e   : > { %2663 = vst [vmem:[#allocation8_spill] sm:$0xff] %v1902_v57  ;;  %v1917_v10 = vperm.slane %v1885_v40, 2  ;;  %v563_v13 = vsel %vm381_vm3, %v561_v41, %v562_v42  ;;  %v1921_v14 = vmul.f32 %v1862_v6, %v584_v34  ;;  %v734_v15 = vrot.slane %v718_v45, 6  ;;  %v759_v36 = vld [vmem:[#allocation2 + $0x58] sm:$0x3] }
  0x3f   : > { %2664 = vst [vmem:[#allocation9_spill] sm:$0xff] %v1905_v37  ;;  %v735_v16 = vrot.slane %v719_v48, 6  ;;  %v1924_v23 = vadd.f32 %v563_v13, %v538_v49  ;;  %v676_v31 = vadd.f32 %v668_v62, %v655_v54  ;;  %v1928_v33 = vperm.slane %v1885_v40, 3  ;;  %v187_v48 = vld [vmem:[%s1899_s30 + $0x4] sm:$0xf] }
  0x40   : > { %2666 = vst [vmem:[#allocation11_spill] sm:$0xff] %v1921_v14  ;;  %v699_v41 = vsel %vm343_vm2, %v697_v58, %v698_v60  ;;  %v1934_v45 = vperm.slane %v1910_v51, 1  ;;  %v1938_v49 = vmul.f32 %v1862_v6, %v586_v35  ;;  %v1942_v62 = vmul.f32 %v1917_v10, %v755_v9  ;;  %v931_v13 = vld [vmem:[#allocation2 + $0x48] sm:$0x3]  ;;  %v933_v29 = vld [vmem:[#allocation2 + $0x58] sm:$0x3] }
  0x41   : > { %v1944_v58 = vld [vmem:[#allocation2 + $0x70] sm:$0xff]  ;;  %v736_v60 = vsel %vm381_vm3, %v734_v15, %v735_v16  ;;  %v1949_v42 = vmul.f32 %v1917_v10, %v757_v18  ;;  %v1952_v35 = vmul.f32 %v1917_v10, %v759_v36  ;;  %214 = vst.msk [vmem:[#allocation2 + $0x33] sm:$0xf] %vm213_vm4, %v186_v30  ;;  %v713_v54 = vadd.f32 %v699_v41, %v676_v31 }
  0x42   : > { %2667 = vst [vmem:[#allocation12_spill] sm:$0xff] %v1938_v49  ;;  %v1956_v22 = vmul.f32 %v1917_v10, %v761_v61  ;;  %v1959_v12 = vmul.f32 %v1928_v33, %v755_v9  ;;  %v1962_v15 = vperm.slane %v1910_v51, 2  ;;  %v1966_v16 = vmul.f32 %v1928_v33, %v757_v18 }
  0x43   : > { %215 = vst.msk [vmem:[#allocation2 + $0x43] sm:$0xf] %vm213_vm4, %v187_v48  ;;  %v1969_v34 = vmul.f32 %v1928_v33, %v759_v36  ;;  %v1972_v30 = vmul.f32 %v1928_v33, %v761_v61  ;;  %v1975_v31 = vmul.f32 %v1934_v45, %v931_v13  ;;  %v1979_v41 = vmul.f32 %v1934_v45, %v933_v29 }
  0x44   : > { %2668 = vst [vmem:[#allocation13_spill] sm:$0xff] %v1956_v22  ;;  %v1982_v37 = vmul.f32 %v1934_v45, %v935_v50  ;;  %v1038_v18 = vmul.f32 %v1934_v45, %v1944_v58  ;;  %v1039_v14 = vmul.f32 %v1934_v45, %v937_v52  ;;  %v1990_v26 = vadd.f32 %v736_v60, %v713_v54 }
  0x45   : > { %2669 = vst [vmem:[#allocation14_spill] sm:$0xff] %v1962_v15  ;;  %v1995_v51 = vmul.f32 %v1962_v15, %v931_v13  ;;  %v2004_v9 = vmul.f32 %v1962_v15, %v933_v29  ;;  %v2009_v22 = vmul.f32 %v1962_v15, %v935_v50  ;;  %v2017_v61 = vmul.f32 %v1962_v15, %v1944_v58 }
  0x46   : > { %2670 = vst [vmem:[#allocation15_spill] sm:$0xff] %v1972_v30  ;;  %v1057_v60 = vrot.slane %v1038_v18, 5  ;;  %v1058_v13 = vrot.slane %v1039_v14, 5  ;;  %v2020_v18 = vmul.f32 %v1962_v15, %v937_v52  ;;  %v2678_v30 = vrot.slane %v1820_v21, 5 }
  0x47   : > { %2671 = vst [vmem:[#allocation16_spill] sm:$0xff] %v1975_v31 }
  0x48   : > { %2672 = vst [vmem:[#allocation17_spill] sm:$0xff] %v1979_v41  ;;  %v2006_v49 = vld [vmem:[#allocation2 + $0x30] sm:$0xff] }
  0x49   : > { %2673 = vst [vmem:[#allocation18_spill] sm:$0xff] %v1982_v37  ;;  %v246_v2 = vmul.f32 %v1667_v4, %v2006_v49  ;;  %v267_v36 = vmul.f32 %v1670_v5, %v2006_v49  ;;  %v414_v14 = vmul.f32 %v1730_v47, %v2006_v49  ;;  %v237_v50 = vmul.f32 %v1664_v3, %v2006_v49 }
  0x4a   : > { %2674 = vst [vmem:[#allocation19_spill] sm:$0xff] %v1995_v51  ;;  %v288_v4 = vmul.f32 %v1678_v8, %v2006_v49  ;;  %v423_v5 = vmul.f32 %v1724_v38, %v2006_v49  ;;  %v309_v52 = vmul.f32 %v1701_v25, %v2006_v49  ;;  %v333_v29 = vmul.f32 %v1710_v27, %v2006_v49 }
  0x4b   : > { %2675 = vst [vmem:[#allocation20_spill] sm:$0xff] %v2004_v9  ;;  %v254_v54 = vrot.slane %v246_v2, 1  ;;  %v418_v57 = vadd.f32 %v414_v14, %v1868_v20  ;;  %v275_v41 = vrot.slane %v267_v36, 2  ;;  %v444_v2 = vmul.f32 %v1727_v39, %v2006_v49 }
  0x4c   : > { %2676 = vst [vmem:[#allocation21_spill] sm:$0xff] %v2009_v22  ;;  %v431_v3 = vrot.slane %v423_v5, 1  ;;  %v2040_v8 = vsel %vm343_vm2, %v1057_v60, %v1058_v13  ;;  %v465_v48 = vmul.f32 %v1743_v55, %v2006_v49  ;;  %v2045_v9 = vperm.slane %v1784_v44, 5 }
  0x4d   : > { %v262_v37 = vadd.f32 %v254_v54, %v237_v50  ;;  %2677 = vst [vmem:[#allocation22_spill] sm:$0xff] %v2040_v8  ;;  %v2048_v25 = vperm.slane %v1784_v44, 6  ;;  %v296_v20 = vrot.slane %v288_v4, 3  ;;  %v452_v36 = vrot.slane %v444_v2, 2 }
  0x4e   : > { %v439_v54 = vadd.f32 %v431_v3, %v418_v57  ;;  %v317_v14 = vrot.slane %v309_v52, 4  ;;  %v353_v50 = vrot.slane %v333_v29, 5  ;;  %v371_v5 = vmul.f32 %v1713_v28, %v2006_v49 }
  0x4f   : > { %v283_v27 = vadd.f32 %v275_v41, %v262_v37  ;;  %v589_v60 = vmul.f32 %v1813_v19, %v2006_v49  ;;  %v598_v51 = vmul.f32 %v1787_v46, %v2006_v49  ;;  %v619_v37 = vmul.f32 %v1794_v59, %v2006_v49 }
  0x50   : > { %v460_v8 = vadd.f32 %v452_v36, %v439_v54  ;;  %v473_v41 = vrot.slane %v465_v48, 3  ;;  %v486_v57 = vmul.f32 %v1765_v24, %v2006_v49  ;;  %v509_v29 = vmul.f32 %v1769_v32, %v2006_v49  ;;  %v188_v36 = vld [vmem:[%s1899_s30 + $0x8] sm:$0xf] }
  0x51   : > { %v304_v13 = vadd.f32 %v296_v20, %v283_v27  ;;  %v593_v28 = vadd.f32 %v589_v60, %v1924_v23  ;;  %v606_v3 = vrot.slane %v598_v51, 1  ;;  %v2065_v2 = vperm.slane %v1784_v44, 7  ;;  %216 = vst.msk [vmem:[#allocation2 + $0x53] sm:$0xf] %vm213_vm4, %v188_v36 }
  0x52   : > { %v391_v27 = vrot.slane %v371_v5, 6  ;;  %v481_v20 = vadd.f32 %v473_v41, %v460_v8  ;;  %v640_v48 = vmul.f32 %v1804_v0, %v2006_v49  ;;  %v2070_v54 = vperm.slane %v1885_v40, 0 }
  0x53   : > { %v325_v52 = vadd.f32 %v317_v14, %v304_v13  ;;  %v355_v23 = vsel %vm343_vm2, %v353_v50, %v2678_v30  ;;  %v614_v60 = vadd.f32 %v606_v3, %v593_v28  ;;  %v627_v4 = vrot.slane %v619_v37, 2  ;;  %v2086_v50 = vld [vmem:[#allocation2 + $0x40] sm:$0xff] }
  0x54   : > { %v763_v51 = vmul.f32 %v2045_v9, %v2006_v49  ;;  %v494_v44 = vrot.slane %v486_v57, 4  ;;  %v527_v8 = vrot.slane %v509_v29, 5  ;;  %v546_v14 = vmul.f32 %v1779_v43, %v2006_v49 }
  0x55   : > { %v772_v5 = vmul.f32 %v2048_v25, %v2006_v49  ;;  %v363_v13 = vadd.f32 %v355_v23, %v325_v52  ;;  %v635_v41 = vadd.f32 %v627_v4, %v614_v60  ;;  %v661_v21 = vmul.f32 %v1855_v11, %v2006_v49 }
  0x56   : > { %v767_v30 = vadd.f32 %v763_v51, %v1990_v26  ;;  %v502_v37 = vadd.f32 %v494_v44, %v481_v20  ;;  %v648_v28 = vrot.slane %v640_v48, 3  ;;  %v793_v57 = vmul.f32 %v2065_v2, %v2006_v49 }
  0x57   : > { %v780_v3 = vrot.slane %v772_v5, 1  ;;  %v1094_v29 = vrot.slane %v2017_v61, 6  ;;  %v683_v36 = vmul.f32 %v1844_v1, %v2006_v49  ;;  %v720_v4 = vmul.f32 %v1862_v6, %v2006_v49 }
  0x58   : > { %v2096_v52 = vperm.slane %v1885_v40, 1  ;;  %v656_v26 = vadd.f32 %v648_v28, %v635_v41  ;;  %v2679_v20 = vrot.slane %v1838_v53, 6  ;;  %v415_v60 = vmul.f32 %v1730_v47, %v2086_v50 }
  0x59   : > { %v788_v23 = vadd.f32 %v780_v3, %v767_v30  ;;  %v2680_v61 = vrot.slane %v1841_v63, 5  ;;  %v564_v44 = vrot.slane %v546_v14, 6  ;;  %v814_v5 = vmul.f32 %v2070_v54, %v2006_v49 }
  0x5a   : > { %v393_v48 = vsel %vm381_vm3, %v391_v27, %v2679_v20  ;;  %v669_v15 = vrot.slane %v661_v21, 4  ;;  %v801_v41 = vrot.slane %v793_v57, 2  ;;  %v424_v53 = vmul.f32 %v1724_v38, %v2086_v50 }
  0x5b   : > { %v529_v51 = vsel %vm343_vm2, %v527_v8, %v2680_v61  ;;  %v401_v22 = vadd.f32 %v393_v48, %v363_v13  ;;  %v1095_v27 = vrot.slane %v2020_v18, 6  ;;  %v700_v30 = vrot.slane %v683_v36, 5 }
  0x5c   : > { %v539_v31 = vadd.f32 %v529_v51, %v502_v37  ;;  %v445_v47 = vmul.f32 %v1727_v39, %v2086_v50  ;;  %v677_v63 = vadd.f32 %v669_v15, %v656_v26  ;;  %v737_v8 = vrot.slane %v720_v4, 6 }
  0x5d   : > { %v419_v28 = vadd.f32 %v415_v60, %v401_v22  ;;  %v809_v14 = vadd.f32 %v801_v41, %v788_v23  ;;  %v432_v3 = vrot.slane %v424_v53, 1  ;;  %v822_v20 = vrot.slane %v814_v5, 3 }
  0x5e   : > { %v835_v13 = vmul.f32 %v2096_v52, %v2006_v49  ;;  %v856_v21 = vmul.f32 %v1917_v10, %v2006_v49  ;;  %v2681_v38 = vrot.slane %v1866_v17, 6  ;;  %v466_v22 = vmul.f32 %v1743_v55, %v2086_v50 }
  0x5f   : > { %v440_v37 = vadd.f32 %v432_v3, %v419_v28  ;;  %v590_v15 = vmul.f32 %v1813_v19, %v2086_v50  ;;  %v2682_v57 = vrot.slane %v1892_v56, 5  ;;  %v453_v4 = vrot.slane %v445_v47, 2 }
  0x60   : > { %v566_v18 = vsel %vm381_vm3, %v564_v44, %v2681_v38  ;;  %v599_v26 = vmul.f32 %v1787_v46, %v2086_v50  ;;  %v620_v17 = vmul.f32 %v1794_v59, %v2086_v50  ;;  %v830_v48 = vadd.f32 %v822_v20, %v809_v14 }
  0x61   : > { %v576_v39 = vadd.f32 %v566_v18, %v539_v31  ;;  %v702_v36 = vsel %vm343_vm2, %v700_v30, %v2682_v57  ;;  %v511_v55 = vmul.f32 %v1769_v32, %v2086_v50  ;;  %v843_v60 = vrot.slane %v835_v13, 4 }
  0x62   : > { %v714_v23 = vadd.f32 %v702_v36, %v677_v63  ;;  %v893_v56 = vmul.f32 %v1928_v33, %v2006_v49  ;;  %v461_v61 = vadd.f32 %v453_v4, %v440_v37  ;;  %v607_v51 = vrot.slane %v599_v26, 1  ;;  %v189_v63 = vld [vmem:[%s1899_s30 + $0xc] sm:$0xf]  ;;  %v2685_v4 = vld [vmem:[#allocation6_spill] sm:$0xff] }
  0x63   : > { %v594_v31 = vadd.f32 %v590_v15, %v576_v39  ;;  %v872_v44 = vrot.slane %v856_v21, 5  ;;  %v474_v5 = vrot.slane %v466_v22, 3  ;;  %v487_v41 = vmul.f32 %v1765_v24, %v2086_v50  ;;  %217 = vst.msk [vmem:[#allocation2 + $0x63] sm:$0xf] %vm213_vm4, %v189_v63 }
  0x64   : > { %v2139_v53 = vmul.f32 %v1779_v43, %v2086_v50  ;;  %v628_v28 = vrot.slane %v620_v17, 2  ;;  %v641_v32 = vmul.f32 %v1804_v0, %v2086_v50  ;;  %v2683_v47 = vrot.slane %v1914_v7, 6 }
  0x65   : > { %v615_v30 = vadd.f32 %v607_v51, %v594_v31  ;;  %v851_v14 = vadd.f32 %v843_v60, %v830_v48  ;;  %v530_v3 = vrot.slane %v511_v55, 5  ;;  %v764_v24 = vmul.f32 %v2045_v9, %v2086_v50 }
  0x66   : > { %v739_v49 = vsel %vm381_vm3, %v737_v8, %v2683_v47  ;;  %v2151_v43 = vsel %vm381_vm3, %v1094_v29, %v1095_v27  ;;  %v482_v13 = vadd.f32 %v474_v5, %v461_v61  ;;  %v773_v38 = vmul.f32 %v2048_v25, %v2086_v50 }
  0x67   : > { %v751_v20 = vadd.f32 %v739_v49, %v714_v23  ;;  %v636_v21 = vadd.f32 %v628_v28, %v615_v30  ;;  %v2684_v7 = vrot.slane %v1942_v62, 5  ;;  %v495_v18 = vrot.slane %v487_v41, 4 }
  0x68   : > { %v794_v22 = vmul.f32 %v2065_v2, %v2086_v50  ;;  %v649_v39 = vrot.slane %v641_v32, 3  ;;  %v662_v15 = vmul.f32 %v1855_v11, %v2086_v50  ;;  %v685_v29 = vmul.f32 %v1844_v1, %v2086_v50 }
  0x69   : > { %v874_v8 = vsel %vm343_vm2, %v872_v44, %v2684_v7  ;;  %v768_v37 = vadd.f32 %v764_v24, %v751_v20  ;;  %v781_v27 = vrot.slane %v773_v38, 1  ;;  %v909_v36 = vrot.slane %v893_v56, 6  ;;  %v2197_v7 = vld [vmem:[#allocation2 + $0x50] sm:$0xff] }
  0x6a   : > { %v888_v57 = vadd.f32 %v874_v8, %v851_v14  ;;  %v2686_v26 = vrot.slane %v2685_v4, 5  ;;  %v567_v17 = vrot.slane %v2139_v53, 6  ;;  %v503_v23 = vadd.f32 %v495_v18, %v482_v13  ;;  %v2688_v8 = vld [vmem:[#allocation8_spill] sm:$0xff] }
  0x6b   : > { %v657_v48 = vadd.f32 %v649_v39, %v636_v21  ;;  %v722_v55 = vmul.f32 %v1862_v6, %v2086_v50  ;;  %v789_v31 = vadd.f32 %v781_v27, %v768_v37  ;;  %v802_v60 = vrot.slane %v794_v22, 2 }
  0x6c   : > { %v532_v62 = vsel %vm343_vm2, %v530_v3, %v2686_v26  ;;  %v815_v61 = vmul.f32 %v2070_v54, %v2086_v50  ;;  %v858_v51 = vmul.f32 %v1917_v10, %v2086_v50  ;;  %v2175_v56 = vperm.slane %v1885_v40, 5  ;;  %v2691_v26 = vld [vmem:[#allocation7_spill] sm:$0xff] }
  0x6d   : > { %v670_v44 = vrot.slane %v662_v15, 4  ;;  %v703_v5 = vrot.slane %v685_v29, 5  ;;  %v836_v41 = vmul.f32 %v2096_v52, %v2086_v50  ;;  %v2180_v53 = vperm.slane %v1885_v40, 6 }
  0x6e   : > { %v810_v30 = vadd.f32 %v802_v60, %v789_v31  ;;  %v2184_v28 = vmul.f32 %v1928_v33, %v2086_v50  ;;  %v2187_v32 = vperm.slane %v1885_v40, 4  ;;  %v2190_v47 = vperm.slane %v1885_v40, 7 }
  0x6f   : > { %v540_v49 = vadd.f32 %v532_v62, %v503_v23  ;;  %v678_v63 = vadd.f32 %v670_v44, %v657_v48  ;;  %v740_v14 = vrot.slane %v722_v55, 6  ;;  %v2687_v3 = vrot.slane %v1959_v12, 6  ;;  %v2690_v12 = vld [vmem:[#allocation10_spill] sm:$0xff] }
  0x70   : > { %v823_v24 = vrot.slane %v815_v61, 3  ;;  %v875_v13 = vrot.slane %v858_v51, 5  ;;  %v948_v38 = vmul.f32 %v2175_v56, %v2086_v50  ;;  %v2689_v18 = vrot.slane %v2688_v8, 5 }
  0x71   : > { %v911_v20 = vsel %vm381_vm3, %v909_v36, %v2687_v3  ;;  %v844_v37 = vrot.slane %v836_v41, 4  ;;  %v2204_v22 = vmul.f32 %v2180_v53, %v2086_v50  ;;  %v2207_v39 = vperm.slane %v2690_v12, 0 }
  0x72   : > { %v925_v21 = vadd.f32 %v911_v20, %v888_v57  ;;  %v705_v40 = vsel %vm343_vm2, %v703_v5, %v2689_v18  ;;  %v831_v15 = vadd.f32 %v823_v24, %v810_v30  ;;  %v912_v29 = vrot.slane %v2184_v28, 6  ;;  %v2694_v24 = vld [vmem:[#allocation11_spill] sm:$0xff] }
  0x73   : > { %v939_v27 = vmul.f32 %v2187_v32, %v2086_v50  ;;  %v2214_v57 = vmul.f32 %v2190_v47, %v2086_v50  ;;  %v715_v36 = vadd.f32 %v705_v40, %v678_v63  ;;  %v2218_v4 = vmul.f32 %v1934_v45, %v2086_v50 }
  0x74   : > { %v2692_v62 = vrot.slane %v2691_v26, 6  ;;  %v591_v48 = vmul.f32 %v1813_v19, %v2197_v7  ;;  %v2693_v55 = vrot.slane %v1949_v42, 5  ;;  %v956_v61 = vrot.slane %v948_v38, 1 }
  0x75   : > { %v943_v60 = vadd.f32 %v939_v27, %v925_v21  ;;  %v977_v44 = vrot.slane %v2204_v22, 2  ;;  %v2231_v5 = vmul.f32 %v2207_v39, %v2086_v50  ;;  %v600_v41 = vmul.f32 %v1787_v46, %v2197_v7 }
  0x76   : > { %v569_v23 = vsel %vm381_vm3, %v567_v17, %v2692_v62  ;;  %v877_v31 = vsel %vm343_vm2, %v875_v13, %v2693_v55  ;;  %v621_v17 = vmul.f32 %v1794_v59, %v2197_v7  ;;  %v852_v19 = vadd.f32 %v844_v37, %v831_v15 }
  0x77   : > { %v577_v51 = vadd.f32 %v569_v23, %v540_v49  ;;  %v998_v42 = vrot.slane %v2214_v57, 3  ;;  %v2240_v30 = vmul.f32 %v2187_v32, %v1944_v58  ;;  %v1048_v63 = vrot.slane %v2218_v4, 5  ;;  %v2367_v57 = vld [vmem:[%s2640_s1 + $0x28] sm:$0xff] }
  0x78   : > { %v608_v3 = vrot.slane %v600_v41, 1  ;;  %v642_v20 = vmul.f32 %v1804_v0, %v2197_v7  ;;  %v2695_v13 = vrot.slane %v2694_v24, 6  ;;  %v663_v59 = vmul.f32 %v1855_v11, %v2197_v7 }
  0x79   : > { %v595_v49 = vadd.f32 %v591_v48, %v577_v51  ;;  %v687_v21 = vmul.f32 %v1844_v1, %v2197_v7  ;;  %v765_v8 = vmul.f32 %v2045_v9, %v2197_v7  ;;  %v629_v40 = vrot.slane %v621_v17, 2 }
  0x7a   : > { %v742_v46 = vsel %vm381_vm3, %v740_v14, %v2695_v13  ;;  %v774_v37 = vmul.f32 %v2048_v25, %v2197_v7  ;;  %v795_v0 = vmul.f32 %v2065_v2, %v2197_v7  ;;  %v2258_v15 = vadd.f32 %v956_v61, %v943_v60 }
  0x7b   : > { %v752_v38 = vadd.f32 %v742_v46, %v715_v36  ;;  %v616_v18 = vadd.f32 %v608_v3, %v595_v49  ;;  %v2262_v11 = vmul.f32 %v2175_v56, %v1944_v58  ;;  %v724_v1 = vmul.f32 %v1862_v6, %v2197_v7 }
  0x7c   : > { %v650_v36 = vrot.slane %v642_v20, 3  ;;  %v782_v26 = vrot.slane %v774_v37, 1  ;;  %v816_v62 = vmul.f32 %v2070_v54, %v2197_v7  ;;  %v2270_v23 = vmul.f32 %v2180_v53, %v1944_v58 }
  0x7d   : > { %v769_v14 = vadd.f32 %v765_v8, %v752_v38  ;;  %v637_v27 = vadd.f32 %v629_v40, %v616_v18  ;;  %v706_v48 = vrot.slane %v687_v21, 5  ;;  %v837_v55 = vmul.f32 %v2096_v52, %v2197_v7  ;;  %v2285_v38 = vld [vmem:[#allocation2 + $0x60] sm:$0xff] }
  0x7e   : > { %v860_v60 = vmul.f32 %v1917_v10, %v2197_v7  ;;  %v671_v6 = vrot.slane %v663_v59, 4  ;;  %v803_v41 = vrot.slane %v795_v0, 2  ;;  %v889_v17 = vadd.f32 %v877_v31, %v852_v19  ;;  %v2696_v8 = vld [vmem:[#allocation9_spill] sm:$0xff] }
  0x7f   : > { %v658_v61 = vadd.f32 %v650_v36, %v637_v27  ;;  %v790_v51 = vadd.f32 %v782_v26, %v769_v14  ;;  %v2278_v49 = vmul.f32 %v2190_v47, %v1944_v58  ;;  %v2282_v3 = vmul.f32 %v2207_v39, %v1944_v58  ;;  %v2699_v26 = vld [vmem:[#allocation12_spill] sm:$0xff] }
  0x80   : > { %v743_v20 = vrot.slane %v724_v1, 6  ;;  %v959_v24 = vrot.slane %v2262_v11, 1  ;;  %v824_v21 = vrot.slane %v816_v62, 3  ;;  %v980_v59 = vrot.slane %v2270_v23, 2  ;;  %v2456_v23 = vld [vmem:[%s2640_s1 + $0x30] ss:$0 sm:$0xff] }
  0x81   : > { %v679_v13 = vadd.f32 %v671_v6, %v658_v61  ;;  %v811_v46 = vadd.f32 %v803_v41, %v790_v51  ;;  %v2697_v31 = vrot.slane %v2696_v8, 5  ;;  %v845_v18 = vrot.slane %v837_v55, 4 }
  0x82   : > { %v878_v40 = vrot.slane %v860_v60, 5  ;;  %v897_v1 = vmul.f32 %v1928_v33, %v2197_v7  ;;  %v2698_v14 = vrot.slane %v1966_v16, 6  ;;  %v2700_v62 = vrot.slane %v2699_v26, 6 }
  0x83   : > { %v708_v19 = vsel %vm343_vm2, %v706_v48, %v2697_v31  ;;  %v832_v0 = vadd.f32 %v824_v21, %v811_v46  ;;  %v766_v48 = vmul.f32 %v2045_v9, %v2285_v38  ;;  %v775_v55 = vmul.f32 %v2048_v25, %v2285_v38 }
  0x84   : > { %v716_v37 = vadd.f32 %v708_v19, %v679_v13  ;;  %v914_v27 = vsel %vm381_vm3, %v912_v29, %v2698_v14  ;;  %v745_v61 = vsel %vm381_vm3, %v743_v20, %v2700_v62  ;;  %v1001_v60 = vrot.slane %v2278_v49, 3 }
  0x85   : > { %v926_v36 = vadd.f32 %v914_v27, %v889_v17  ;;  %v940_v16 = vmul.f32 %v2187_v32, %v2197_v7  ;;  %v796_v28 = vmul.f32 %v2065_v2, %v2285_v38  ;;  %v853_v29 = vadd.f32 %v845_v18, %v832_v0 }
  0x86   : > { %v753_v6 = vadd.f32 %v745_v61, %v716_v37  ;;  %v949_v51 = vmul.f32 %v2175_v56, %v2197_v7  ;;  %v2314_v41 = vmul.f32 %v2180_v53, %v2197_v7  ;;  %v783_v9 = vrot.slane %v775_v55, 1 }
  0x87   : > { %v2701_v25 = vrot.slane %v1952_v35, 5  ;;  %v817_v13 = vmul.f32 %v2070_v54, %v2285_v38  ;;  %v862_v2 = vmul.f32 %v1917_v10, %v2285_v38  ;;  %v915_v46 = vrot.slane %v897_v1, 6 }
  0x88   : > { %v770_v20 = vadd.f32 %v766_v48, %v753_v6  ;;  %v944_v21 = vadd.f32 %v940_v16, %v926_v36  ;;  %v2325_v8 = vmul.f32 %v2190_v47, %v2197_v7  ;;  %v2329_v31 = vmul.f32 %v1934_v45, %v2197_v7 }
  0x89   : > { %v880_v17 = vsel %vm343_vm2, %v878_v40, %v2701_v25  ;;  %v804_v19 = vrot.slane %v796_v28, 2  ;;  %v838_v18 = vmul.f32 %v2096_v52, %v2285_v38  ;;  %v899_v54 = vmul.f32 %v1928_v33, %v2285_v38 }
  0x8a   : > { %v791_v35 = vadd.f32 %v783_v9, %v770_v20  ;;  %v1022_v10 = vrot.slane %v2282_v3, 4  ;;  %v890_v40 = vadd.f32 %v880_v17, %v853_v29  ;;  %v957_v37 = vrot.slane %v949_v51, 1  ;;  %v2703_v9 = vld [vmem:[#allocation14_spill] sm:$0xff]  ;;  %v2704_v20 = vld [vmem:[#allocation13_spill] sm:$0xff] }
  0x8b   : > { %v978_v0 = vrot.slane %v2314_v41, 2  ;;  %v2339_v1 = vmul.f32 %v2207_v39, %v2197_v7  ;;  %v825_v27 = vrot.slane %v817_v13, 3  ;;  %v881_v36 = vrot.slane %v862_v2, 5 }
  0x8c   : > { %v812_v14 = vadd.f32 %v804_v19, %v791_v35  ;;  %v2341_v26 = vadd.f32 %v957_v37, %v944_v21  ;;  %v999_v52 = vrot.slane %v2325_v8, 3  ;;  %v1051_v62 = vrot.slane %v2329_v31, 5 }
  0x8d   : > { %v985_v33 = vadd.f32 %v977_v44, %v2258_v15  ;;  %v846_v48 = vrot.slane %v838_v18, 4  ;;  %v2702_v55 = vrot.slane %v1969_v34, 6  ;;  %v918_v6 = vrot.slane %v899_v54, 6  ;;  %v2708_v54 = vld [vmem:[#allocation15_spill] sm:$0xff] }
  0x8e   : > { %v833_v61 = vadd.f32 %v825_v27, %v812_v14  ;;  %v1019_v51 = vrot.slane %v2231_v5, 4  ;;  %v1069_v25 = vmul.f32 %v2703_v9, %v2086_v50  ;;  %v2705_v22 = vrot.slane %v2704_v20, 5 }
  0x8f   : > { %v917_v16 = vsel %vm381_vm3, %v915_v46, %v2702_v55  ;;  %v1006_v29 = vadd.f32 %v998_v42, %v985_v33  ;;  %v941_v34 = vmul.f32 %v2187_v32, %v2285_v38  ;;  %v2362_v15 = vperm.slane %v2690_v12, 4  ;;  %v2706_v46 = vld [vmem:[#allocation16_spill] sm:$0xff] }
  0x90   : > { %v927_v28 = vadd.f32 %v917_v16, %v890_v40  ;;  %v854_v17 = vadd.f32 %v846_v48, %v833_v61  ;;  %v883_v44 = vsel %vm343_vm2, %v881_v36, %v2705_v22  ;;  %v1085_v42 = vrot.slane %v1069_v25, 6  ;;  %v2710_v36 = vld [vmem:[#allocation19_spill] sm:$0xff]  ;;  %v1107_v55 = vld [vmem:[#allocation2 + $0x58] sm:$0x3] }
  0x91   : > { %v1027_v5 = vadd.f32 %v1019_v51, %v1006_v29  ;;  %v2370_v50 = vperm.slane %v2690_v12, 3  ;;  %v2373_v13 = vperm.slane %v2690_v12, 5  ;;  %v950_v32 = vmul.f32 %v2175_v56, %v2285_v38 }
  0x92   : > { %v891_v2 = vadd.f32 %v883_v44, %v854_v17  ;;  %v2707_v21 = vrot.slane %v2706_v46, 5  ;;  %v2383_v19 = vperm.slane %v2690_v12, 6  ;;  %v2387_v18 = vmul.f32 %v2180_v53, %v2285_v38 }
  0x93   : > { %v2709_v40 = vrot.slane %v2708_v54, 6  ;;  %v1124_v56 = vmul.f32 %v2362_v15, %v2197_v7  ;;  %v2711_v4 = vrot.slane %v2710_v36, 6  ;;  %v2398_v33 = vperm.slane %v2690_v12, 7 }
  0x94   : > { %v1050_v35 = vsel %vm343_vm2, %v1048_v63, %v2707_v21  ;;  %v2401_v61 = vperm.slane %v2367_v57, 0  ;;  %v2405_v53 = vmul.f32 %v2190_v47, %v2285_v38  ;;  %v1115_v16 = vmul.f32 %v2370_v50, %v2197_v7 }
  0x95   : > { %v920_v37 = vsel %vm381_vm3, %v918_v6, %v2709_v40  ;;  %v1064_v14 = vadd.f32 %v1050_v35, %v1027_v5  ;;  %v1087_v63 = vsel %vm381_vm3, %v1085_v42, %v2711_v4  ;;  %v1145_v6 = vmul.f32 %v2373_v13, %v2197_v7 }
  0x96   : > { %v928_v27 = vadd.f32 %v920_v37, %v891_v2  ;;  %v2413_v29 = vmul.f32 %v2207_v39, %v2285_v38  ;;  %v1166_v51 = vmul.f32 %v2383_v19, %v2197_v7  ;;  %v2419_v47 = vperm.slane %v2367_v57, 1 }
  0x97   : > { %v1101_v48 = vadd.f32 %v1087_v63, %v1064_v14  ;;  %v945_v25 = vadd.f32 %v941_v34, %v927_v28  ;;  %v958_v17 = vrot.slane %v950_v32, 1  ;;  %v1132_v22 = vrot.slane %v1124_v56, 1 }
  0x98   : > { %v946_v12 = vadd.f32 %v2240_v30, %v928_v27  ;;  %v1187_v5 = vmul.f32 %v2398_v33, %v2197_v7  ;;  %v1208_v39 = vmul.f32 %v2401_v61, %v2197_v7  ;;  %v1209_v30 = vmul.f32 %v2401_v61, %v1107_v55 }
  0x99   : > { %v1119_v20 = vadd.f32 %v1115_v16, %v1101_v48  ;;  %v1153_v2 = vrot.slane %v1145_v6, 2  ;;  %v1245_v46 = vmul.f32 %v2419_v47, %v2197_v7  ;;  %v1246_v28 = vmul.f32 %v2419_v47, %v1107_v55 }
  0x9a   : > { %v967_v44 = vadd.f32 %v959_v24, %v946_v12  ;;  %v979_v34 = vrot.slane %v2387_v18, 2  ;;  %v2434_v11 = vmul.f32 %v1934_v45, %v2285_v38  ;;  %v1174_v24 = vrot.slane %v1166_v51, 3  ;;  %v1283_v51 = vld [vmem:[#allocation2 + $0x68] sm:$0x3] }
  0x9b   : > { %v1140_v42 = vadd.f32 %v1132_v22, %v1119_v20  ;;  %v2437_v32 = vperm.slane %v2367_v57, 2  ;;  %v2442_v54 = vperm.slane %v2367_v57, 3  ;;  %v2445_v40 = vperm.slane %v2367_v57, 4 }
  0x9c   : > { %v988_v21 = vadd.f32 %v980_v59, %v967_v44  ;;  %v1195_v37 = vrot.slane %v1187_v5, 4  ;;  %v1224_v14 = vrot.slane %v1208_v39, 5  ;;  %v1225_v56 = vrot.slane %v1209_v30, 5 }
  0x9d   : > { %v1161_v35 = vadd.f32 %v1153_v2, %v1140_v42  ;;  %v2448_v45 = vperm.slane %v2367_v57, 5  ;;  %v1261_v36 = vrot.slane %v1245_v46, 6  ;;  %v1262_v4 = vrot.slane %v1246_v28, 6 }
  0x9e   : > { %v2451_v63 = vperm.slane %v2367_v57, 6  ;;  %v2458_v59 = vadd.f32 %v958_v17, %v945_v25  ;;  %v1000_v48 = vrot.slane %v2405_v53, 3  ;;  %v1054_v55 = vrot.slane %v2434_v11, 5 }
  0x9f   : > { %v1182_v27 = vadd.f32 %v1174_v24, %v1161_v35  ;;  %v1291_v16 = vmul.f32 %v2437_v32, %v2285_v38  ;;  %v1009_v6 = vadd.f32 %v1001_v60, %v988_v21  ;;  %v1300_v20 = vmul.f32 %v2442_v54, %v2285_v38 }
  0xa0   : > { %v1321_v22 = vmul.f32 %v2445_v40, %v2285_v38  ;;  %v1226_v25 = vsel %vm343_vm2, %v1224_v14, %v1225_v56  ;;  %v1342_v17 = vmul.f32 %v2448_v45, %v2285_v38  ;;  %v2474_v44 = vperm.slane %v2367_v57, 7  ;;  %v1109_v14 = vld [vmem:[#allocation2 + $0x68] sm:$0x3]  ;;  %v2712_v56 = vld [vmem:[#allocation17_spill] sm:$0xff] }
  0xa1   : > { %v1203_v12 = vadd.f32 %v1195_v37, %v1182_v27  ;;  %v986_v49 = vadd.f32 %v978_v0, %v2341_v26  ;;  %v1263_v5 = vsel %vm381_vm3, %v1261_v36, %v1262_v4  ;;  %v1363_v39 = vmul.f32 %v2451_v63, %v2285_v38 }
  0xa2   : > { %v1421_v30 = vmul.f32 %v2456_v23, %v2285_v38  ;;  %v1422_v42 = vmul.f32 %v2456_v23, %v1283_v51  ;;  %v1020_v57 = vrot.slane %v2339_v1, 4  ;;  %v1071_v41 = vmul.f32 %v2703_v9, %v2197_v7 }
  0xa3   : > { %v1240_v60 = vadd.f32 %v1226_v25, %v1203_v12  ;;  %v1007_v2 = vadd.f32 %v999_v52, %v986_v49  ;;  %v1030_v0 = vadd.f32 %v1022_v10, %v1009_v6  ;;  %v1308_v46 = vrot.slane %v1300_v20, 1  ;;  %v2714_v12 = vld [vmem:[#allocation20_spill] sm:$0xff] }
  0xa4   : > { %v1329_v28 = vrot.slane %v1321_v22, 2  ;;  %v1350_v24 = vrot.slane %v1342_v17, 3  ;;  %v1384_v21 = vmul.f32 %v2474_v44, %v2285_v38  ;;  %v1088_v37 = vrot.slane %v1071_v41, 6 }
  0xa5   : > { %v1277_v26 = vadd.f32 %v1263_v5, %v1240_v60  ;;  %v1028_v35 = vadd.f32 %v1020_v57, %v1007_v2  ;;  %v1371_v52 = vrot.slane %v1363_v39, 4  ;;  %v1385_v1 = vmul.f32 %v2474_v44, %v1283_v51 }
  0xa6   : > { %v2713_v27 = vrot.slane %v2712_v56, 5  ;;  %v1437_v3 = vrot.slane %v1421_v30, 6  ;;  %v1438_v10 = vrot.slane %v1422_v42, 6  ;;  %v1125_v4 = vmul.f32 %v2362_v15, %v2285_v38  ;;  %v1284_v30 = vld [vmem:[#allocation2 + $0x70] sm:$0xff]  ;;  %v2716_v42 = vld [vmem:[#allocation22_spill] sm:$0xff] }
  0xa7   : > { %v1295_v8 = vadd.f32 %v1291_v16, %v1277_v26  ;;  %v2715_v20 = vrot.slane %v2714_v12, 6  ;;  %v1210_v51 = vmul.f32 %v2401_v61, %v2285_v38  ;;  %v1211_v22 = vmul.f32 %v2401_v61, %v1109_v14 }
  0xa8   : > { %v1053_v7 = vsel %vm343_vm2, %v1051_v62, %v2713_v27  ;;  %v1400_v25 = vrot.slane %v1384_v21, 5  ;;  %v1116_v62 = vmul.f32 %v2370_v50, %v2285_v38  ;;  %v1146_v17 = vmul.f32 %v2373_v13, %v2285_v38 }
  0xa9   : > { %v1065_v36 = vadd.f32 %v1053_v7, %v1028_v35  ;;  %v1316_v6 = vadd.f32 %v1308_v46, %v1295_v8  ;;  %v1090_v16 = vsel %vm381_vm3, %v1088_v37, %v2715_v20  ;;  %v1401_v60 = vrot.slane %v1385_v1, 5 }
  0xaa   : > { %v1167_v5 = vmul.f32 %v2383_v19, %v2285_v38  ;;  %v1188_v39 = vmul.f32 %v2398_v33, %v2285_v38  ;;  %v2517_v2 = vadd.f32 %v2716_v42, %v1030_v0  ;;  %v1133_v41 = vrot.slane %v1125_v4, 1 }
  0xab   : > { %v1102_v31 = vadd.f32 %v1090_v16, %v1065_v36  ;;  %v1337_v49 = vadd.f32 %v1329_v28, %v1316_v6  ;;  %v1247_v26 = vmul.f32 %v2419_v47, %v2285_v38  ;;  %v1227_v21 = vrot.slane %v1210_v51, 5 }
  0xac   : > { %v1228_v35 = vrot.slane %v1211_v22, 5  ;;  %v1248_v28 = vmul.f32 %v2419_v47, %v1109_v14  ;;  %v1439_v37 = vsel %vm381_vm3, %v1437_v3, %v1438_v10  ;;  %v1154_v1 = vrot.slane %v1146_v17, 2  ;;  %v2529_v3 = vld [vmem:[#allocation3] ss:$0 sm:$0xff] }
  0xad   : > { %v1120_v57 = vadd.f32 %v1116_v62, %v1102_v31  ;;  %v1358_v46 = vadd.f32 %v1350_v24, %v1337_v49  ;;  %v1301_v56 = vmul.f32 %v2442_v54, %v1284_v30  ;;  %v1402_v0 = vsel %vm343_vm2, %v1400_v25, %v1401_v60 }
  0xae   : > { %v1175_v7 = vrot.slane %v1167_v5, 3  ;;  %v1196_v36 = vrot.slane %v1188_v39, 4  ;;  %v1264_v6 = vrot.slane %v1247_v26, 6  ;;  %v1292_v12 = vmul.f32 %v2437_v32, %v1284_v30  ;;  %v2717_v5 = vld [vmem:[#allocation18_spill] sm:$0xff] }
  0xaf   : > { %v1141_v8 = vadd.f32 %v1133_v41, %v1120_v57  ;;  %v1379_v27 = vadd.f32 %v1371_v52, %v1358_v46  ;;  %v987_v24 = vadd.f32 %v979_v34, %v2458_v59  ;;  %v1229_v10 = vsel %vm343_vm2, %v1227_v21, %v1228_v35  ;;  %v1285_v52 = vld [vmem:[#allocation2 + $0x78] sm:$0x3] }
  0xb0   : > { %v1265_v20 = vrot.slane %v1248_v28, 6  ;;  %v1322_v16 = vmul.f32 %v2445_v40, %v1284_v30  ;;  %v1309_v22 = vrot.slane %v1301_v56, 1  ;;  %v1021_v31 = vrot.slane %v2413_v29, 4  ;;  %v2719_v28 = vld [vmem:[#allocation21_spill] sm:$0xff] }
  0xb1   : > { %v1162_v4 = vadd.f32 %v1154_v1, %v1141_v8  ;;  %v1416_v14 = vadd.f32 %v1402_v0, %v1379_v27  ;;  %v1008_v25 = vadd.f32 %v1000_v48, %v987_v24  ;;  %v1343_v18 = vmul.f32 %v2448_v45, %v1284_v30  ;;  %v1111_v1 = vld [vmem:[#allocation2 + $0x78] sm:$0x3] }
  0xb2   : > { %v1386_v34 = vmul.f32 %v2474_v44, %v1284_v30  ;;  %v1073_v59 = vmul.f32 %v2703_v9, %v2285_v38  ;;  %v1387_v53 = vmul.f32 %v2474_v44, %v1285_v52  ;;  %v1423_v29 = vmul.f32 %v2456_v23, %v1284_v30 }
  0xb3   : > { %v1183_v51 = vadd.f32 %v1175_v7, %v1162_v4  ;;  %v1453_v62 = vadd.f32 %v1439_v37, %v1416_v14  ;;  %v1029_v48 = vadd.f32 %v1021_v31, %v1008_v25  ;;  %v1424_v60 = vmul.f32 %v2456_v23, %v1285_v52 }
  0xb4   : > { %v2718_v39 = vrot.slane %v2717_v5, 5  ;;  %v1091_v9 = vrot.slane %v1073_v59, 6  ;;  %v1266_v57 = vsel %vm381_vm3, %v1264_v6, %v1265_v20  ;;  %v1126_v26 = vmul.f32 %v2362_v15, %v1944_v58 }
  0xb5   : > { %v1204_v17 = vadd.f32 %v1196_v36, %v1183_v51  ;;  %v1461_v49 = vadd.f32 %v2529_v3, %v1453_v62  ;;  %v1330_v46 = vrot.slane %v1322_v16, 2  ;;  %v1364_v21 = vmul.f32 %v2451_v63, %v1284_v30 }
  0xb6   : > { %v1056_v38 = vsel %vm343_vm2, %v1054_v55, %v2718_v39  ;;  %v1403_v35 = vrot.slane %v1386_v34, 5  ;;  %v2720_v37 = vrot.slane %v2719_v28, 6  ;;  %v1117_v56 = vmul.f32 %v2370_v50, %v1944_v58  ;;  %v1112_v34 = vld [vmem:[#allocation2 + $0x80] sm:$0xff] }
  0xb7   : > { %v1241_v42 = vadd.f32 %v1229_v10, %v1204_v17  ;;  %v1066_v41 = vadd.f32 %v1056_v38, %v1029_v48  ;;  %1465 = vst.msk [vmem:[%s2545_s14] sm:$0xf] %vm213_vm4, %v1461_v49  ;;  %v1147_v27 = vmul.f32 %v2373_v13, %v1944_v58  ;;  %v1404_v0 = vrot.slane %v1387_v53, 5  ;;  %v2573_v10 = vld [vmem:[#allocation2 + $0x80] sm:$0xff] }
  0xb8   : > { %v1093_v11 = vsel %vm381_vm3, %v1091_v9, %v2720_v37  ;;  %v1440_v7 = vrot.slane %v1423_v29, 6  ;;  %v1441_v36 = vrot.slane %v1424_v60, 6  ;;  %v1168_v30 = vmul.f32 %v2383_v19, %v1944_v58 }
  0xb9   : > { %v1278_v8 = vadd.f32 %v1266_v57, %v1241_v42  ;;  %v1103_v55 = vadd.f32 %v1093_v11, %v1066_v41  ;;  %v1134_v24 = vrot.slane %v1126_v26, 1  ;;  %v1189_v14 = vmul.f32 %v2398_v33, %v1944_v58  ;;  %v1113_v11 = vld [vmem:[#allocation2 + $0x88] sm:$0x3] }
  0xba   : > { %v1351_v20 = vrot.slane %v1343_v18, 3  ;;  %v1212_v52 = vmul.f32 %v2401_v61, %v1944_v58  ;;  %v1213_v16 = vmul.f32 %v2401_v61, %v1111_v1  ;;  %v1249_v51 = vmul.f32 %v2419_v47, %v1944_v58 }
  0xbb   : > { %v1296_v4 = vadd.f32 %v1292_v12, %v1278_v8  ;;  %v1121_v6 = vadd.f32 %v1117_v56, %v1103_v55  ;;  %v1155_v62 = vrot.slane %v1147_v27, 2  ;;  %v1250_v12 = vmul.f32 %v2419_v47, %v1111_v1 }
  0xbc   : > { %v1372_v59 = vrot.slane %v1364_v21, 4  ;;  %v1405_v17 = vsel %vm343_vm2, %v1403_v35, %v1404_v0  ;;  %v1442_v53 = vsel %vm381_vm3, %v1440_v7, %v1441_v36  ;;  %v1302_v18 = vmul.f32 %v2442_v54, %v2573_v10 }
  0xbd   : > { %v1317_v25 = vadd.f32 %v1309_v22, %v1296_v4  ;;  %v1142_v31 = vadd.f32 %v1134_v24, %v1121_v6  ;;  %v1176_v49 = vrot.slane %v1168_v30, 3  ;;  %v1197_v60 = vrot.slane %v1189_v14, 4  ;;  %v1287_v6 = vld [vmem:[#allocation2 + $0x88] sm:$0x3] }
  0xbe   : > { %v1230_v5 = vrot.slane %v1212_v52, 5  ;;  %v1231_v58 = vrot.slane %v1213_v16, 5  ;;  %v1267_v22 = vrot.slane %v1249_v51, 6  ;;  %v1104_v39 = vadd.f32 %v2151_v43, %v2517_v2 }
  0xbf   : > { %v1338_v29 = vadd.f32 %v1330_v46, %v1317_v25  ;;  %v1163_v48 = vadd.f32 %v1155_v62, %v1142_v31  ;;  %v1268_v42 = vrot.slane %v1250_v12, 6  ;;  %v1118_v57 = vmul.f32 %v2370_v50, %v1112_v34 }
  0xc0   : > { %v1293_v41 = vmul.f32 %v2437_v32, %v2573_v10  ;;  %v1310_v26 = vrot.slane %v1302_v18, 1  ;;  %v1127_v46 = vmul.f32 %v2362_v15, %v1112_v34  ;;  %v1148_v21 = vmul.f32 %v2373_v13, %v1112_v34 }
  0xc1   : > { %v1359_v38 = vadd.f32 %v1351_v20, %v1338_v29  ;;  %v1184_v9 = vadd.f32 %v1176_v49, %v1163_v48  ;;  %v1323_v37 = vmul.f32 %v2445_v40, %v2573_v10  ;;  %v1122_v43 = vadd.f32 %v1118_v57, %v1104_v39 }
  0xc2   : > { %v1232_v2 = vsel %vm343_vm2, %v1230_v5, %v1231_v58  ;;  %v1344_v50 = vmul.f32 %v2448_v45, %v2573_v10  ;;  %v1135_v8 = vrot.slane %v1127_v46, 1  ;;  %v1169_v55 = vmul.f32 %v2383_v19, %v1112_v34 }
  0xc3   : > { %v1380_v35 = vadd.f32 %v1372_v59, %v1359_v38  ;;  %v1205_v28 = vadd.f32 %v1197_v60, %v1184_v9  ;;  %v1269_v15 = vsel %vm381_vm3, %v1267_v22, %v1268_v42  ;;  %v1214_v13 = vmul.f32 %v2401_v61, %v1112_v34 }
  0xc4   : > { %v1143_v27 = vadd.f32 %v1135_v8, %v1122_v43  ;;  %v1156_v0 = vrot.slane %v1148_v21, 2  ;;  %v1190_v7 = vmul.f32 %v2398_v33, %v1112_v34  ;;  %v1215_v36 = vmul.f32 %v2401_v61, %v1113_v11  ;;  %v1288_v61 = vld [vmem:[#allocation2 + $0x90] sm:$0xff]  ;;  %v1289_v21 = vld [vmem:[#allocation2 + $0x98] sm:$0x3] }
  0xc5   : > { %v1417_v1 = vadd.f32 %v1405_v17, %v1380_v35  ;;  %v1242_v56 = vadd.f32 %v1232_v2, %v1205_v28  ;;  %v1365_v24 = vmul.f32 %v2451_v63, %v2573_v10  ;;  %v1251_v19 = vmul.f32 %v2419_v47, %v1112_v34 }
  0xc6   : > { %v1331_v14 = vrot.slane %v1323_v37, 2  ;;  %v1164_v20 = vadd.f32 %v1156_v0, %v1143_v27  ;;  %v1177_v52 = vrot.slane %v1169_v55, 3  ;;  %v1252_v16 = vmul.f32 %v2419_v47, %v1113_v11 }
  0xc7   : > { %v1454_v30 = vadd.f32 %v1442_v53, %v1417_v1  ;;  %v1279_v4 = vadd.f32 %v1269_v15, %v1242_v56  ;;  %v1233_v33 = vrot.slane %v1214_v13, 5  ;;  %v1234_v31 = vrot.slane %v1215_v36, 5 }
  0xc8   : > { %v1388_v62 = vmul.f32 %v2474_v44, %v2573_v10  ;;  %v1389_v12 = vmul.f32 %v2474_v44, %v1287_v6  ;;  %v1185_v59 = vadd.f32 %v1177_v52, %v1164_v20  ;;  %v1198_v17 = vrot.slane %v1190_v7, 4 }
  0xc9   : > { %v1462_v51 = vadd.f32 %v2529_v3, %v1454_v30  ;;  %v1297_v25 = vadd.f32 %v1293_v41, %v1279_v4  ;;  %v1425_v53 = vmul.f32 %v2456_v23, %v2573_v10  ;;  %v1270_v47 = vrot.slane %v1251_v19, 6 }
  0xca   : > { %v1271_v18 = vrot.slane %v1252_v16, 6  ;;  %v1426_v29 = vmul.f32 %v2456_v23, %v1287_v6  ;;  %v1206_v48 = vadd.f32 %v1198_v17, %v1185_v59  ;;  %v1303_v49 = vmul.f32 %v2442_v54, %v1288_v61 }
  0xcb   : > { %1466 = vst.msk [vmem:[%s2545_s14 + $0x4] sm:$0xf] %vm213_vm4, %v1462_v51  ;;  %v1318_v34 = vadd.f32 %v1310_v26, %v1297_v25  ;;  %v1352_v5 = vrot.slane %v1344_v50, 3  ;;  %v1235_v58 = vsel %vm343_vm2, %v1233_v33, %v1234_v31  ;;  %v1406_v22 = vrot.slane %v1388_v62, 5 }
  0xcc   : > { %v1407_v39 = vrot.slane %v1389_v12, 5  ;;  %v1243_v38 = vadd.f32 %v1235_v58, %v1206_v48  ;;  %v1294_v9 = vmul.f32 %v2437_v32, %v1288_v61  ;;  %v1373_v57 = vrot.slane %v1365_v24, 4 }
  0xcd   : > { %v1339_v60 = vadd.f32 %v1331_v14, %v1318_v34  ;;  %v1443_v41 = vrot.slane %v1425_v53, 6  ;;  %v1272_v10 = vsel %vm381_vm3, %v1270_v47, %v1271_v18  ;;  %v1444_v26 = vrot.slane %v1426_v29, 6 }
  0xce   : > { %v1280_v46 = vadd.f32 %v1272_v10, %v1243_v38  ;;  %v1311_v35 = vrot.slane %v1303_v49, 1  ;;  %v1324_v54 = vmul.f32 %v2445_v40, %v1288_v61  ;;  %v1408_v37 = vsel %vm343_vm2, %v1406_v22, %v1407_v39 }
  0xcf   : > { %v1360_v42 = vadd.f32 %v1352_v5, %v1339_v60  ;;  %v1345_v43 = vmul.f32 %v2448_v45, %v1288_v61  ;;  %v1390_v32 = vmul.f32 %v2474_v44, %v1288_v61  ;;  %v1391_v50 = vmul.f32 %v2474_v44, %v1289_v21 }
  0xd0   : > { %v1298_v11 = vadd.f32 %v1294_v9, %v1280_v46  ;;  %v1445_v8 = vsel %vm381_vm3, %v1443_v41, %v1444_v26  ;;  %v1332_v1 = vrot.slane %v1324_v54, 2  ;;  %v1366_v56 = vmul.f32 %v2451_v63, %v1288_v61 }
  0xd1   : > { %v1381_v28 = vadd.f32 %v1373_v57, %v1360_v42  ;;  %v1427_v40 = vmul.f32 %v2456_v23, %v1288_v61  ;;  %v1428_v13 = vmul.f32 %v2456_v23, %v1289_v21  ;;  %v1353_v45 = vrot.slane %v1345_v43, 3 }
  0xd2   : > { %v1319_v55 = vadd.f32 %v1311_v35, %v1298_v11  ;;  %v1409_v7 = vrot.slane %v1390_v32, 5  ;;  %v1410_v36 = vrot.slane %v1391_v50, 5  ;;  %v1374_v44 = vrot.slane %v1366_v56, 4 }
  0xd3   : > { %v1418_v2 = vadd.f32 %v1408_v37, %v1381_v28  ;;  %v1446_v4 = vrot.slane %v1427_v40, 6  ;;  %v1447_v6 = vrot.slane %v1428_v13, 6 }
  0xd4   : > { %v1340_v27 = vadd.f32 %v1332_v1, %v1319_v55  ;;  %v1411_v63 = vsel %vm343_vm2, %v1409_v7, %v1410_v36 }
  0xd5   : > { %v1455_v15 = vadd.f32 %v1445_v8, %v1418_v2  ;;  %v1448_v14 = vsel %vm381_vm3, %v1446_v4, %v1447_v6 }
  0xd6   : > { %v1361_v30 = vadd.f32 %v1353_v45, %v1340_v27 }
  0xd7   : > { %v1463_v0 = vadd.f32 %v2529_v3, %v1455_v15 }
  0xd8   : > { %v1382_v24 = vadd.f32 %v1374_v44, %v1361_v30 }
  0xd9   : > { %1467 = vst.msk [vmem:[%s2545_s14 + $0x8] sm:$0xf] %vm213_vm4, %v1463_v0 }
  0xda   : > { %v1419_v19 = vadd.f32 %v1411_v63, %v1382_v24 }
  0xdc   : > { %v1456_v23 = vadd.f32 %v1448_v14, %v1419_v19 }
  0xde   : > { %v1464_v20 = vadd.f32 %v2529_v3, %v1456_v23 }
  0xe0   : > { %1468 = vst.msk [vmem:[%s2545_s14 + $0xc] sm:$0xf] %vm213_vm4, %v1464_v20 }
  0xe1 PF: > { %s14_s12 = sadd.s32 1, %s1613_s12  }
  0xe2   : > { %p11_p7 = scmp.ge.s32.totalorder %s14_s12, 4  }
  0xe4   :  { %13 = sbr.rel (!%p11_p7) target bundleno = 1 (0x1), region = 73 }
  0xe9   :  { %1490 = vsyncpa [#allocation4], 1 }
  0xea   :  { %1492 = vsyncpa [#allocation4 + $0x1], 1 }

</bundles_post_ra>
